<compile_context>
chip_gen: v6e
topology: v6e:2x2x1
jax: 0.10.0
libtpu: 0.0.40
codegen_flags: <defaults>
</compile_context>

<pallas_src>
import functools

import jax
import jax.numpy as jnp
from jax.experimental import pallas as pl
from jax.experimental.pallas import tpu as pltpu

_BN_EPS = 1e-4
_VMEM_LIMIT = 48 * 1024 * 1024           # fits v7x (64 MiB) as well as v5e/v6e


# ----------------------------------------------------------------------------
# Fused conv3x3 kernel:
#   input transform (folded BN+ReLU of previous layer)  ->  halo assembly
#   ->  im2col  ->  single big-K MXU matmul  ->  optional bias / ReLU
#   ->  per-tile BatchNorm partial moments  ->  store.
# ----------------------------------------------------------------------------
def _conv3x3_kernel(xm_ref, xa_ref, xb_ref, w_ref, sc_ref, sh_ref, b_ref,
                    o_ref, st_ref, xbuf, pbuf,
                    *, apply_in_act, out_relu, add_bias):
    i = pl.program_id(1)
    n_tiles = pl.num_programs(1)
    _, th, w, cin = xm_ref.shape
    cout = o_ref.shape[3]
    m = th * w

    if apply_in_act:
        in_scale = sc_ref[0].astype(jnp.float32)        # (cin,)
        in_shift = sh_ref[0].astype(jnp.float32)        # (cin,)

    def act(v):
        # Folded BN + ReLU of the previous layer, applied in f32, stored bf16.
        v = v.astype(jnp.float32)
        if apply_in_act:
            v = jnp.maximum(v * in_scale + in_shift, 0.0)
        return v.astype(jnp.bfloat16)

    # --- assemble zero-padded (th+2, w+2, cin) window in VMEM scratch -------
    xbuf[...] = jnp.zeros(xbuf.shape, xbuf.dtype)
    xbuf[1:th + 1, 1:w + 1, :] = act(xm_ref[0])

    @pl.when(i > 0)                                      # halo row above
    def _():
        xbuf[0:1, 1:w + 1, :] = act(xa_ref[0])

    @pl.when(i < n_tiles - 1)                            # halo row below
    def _():
        xbuf[th + 1:th + 2, 1:w + 1, :] = act(xb_ref[0])

    # --- im2col: one (m, 9*cin) bf16 patch matrix -> single MXU matmul ------
    for tap in range(9):
        dy, dx = tap // 3, tap % 3
        pbuf[:, tap * cin:(tap + 1) * cin] = (
            xbuf[dy:dy + th, dx:dx + w, :].reshape(m, cin))
    acc = jnp.dot(pbuf[...], w_ref[...],
                  preferred_element_type=jnp.float32)    # (m, cout) f32

    if add_bias:
        acc = acc + b_ref[0].astype(jnp.float32)
    if out_relu:
        acc = jnp.maximum(acc, 0.0)

    # --- per-tile BatchNorm partial moments (sum, sum of squares), f32 ------
    st_ref[:, :, 0:1, :] = jnp.sum(acc, axis=0, keepdims=True).reshape(
        1, 1, 1, cout)
    st_ref[:, :, 1:2, :] = jnp.sum(acc * acc, axis=0, keepdims=True).reshape(
        1, 1, 1, cout)

    o_ref[...] = acc.reshape(1, th, w, cout).astype(o_ref.dtype)


def _conv3x3_call(x, w2d, scale, shift, bias, *, apply_in_act, out_relu,
                  add_bias, out_dtype, tile_h):
    n, h, w, cin = x.shape
    kdim, cout = w2d.shape
    assert kdim == 9 * cin
    assert h % tile_h == 0, "tile_h must divide H"
    nt = h // tile_h
    grid = (n, nt)

    kernel = functools.partial(_conv3x3_kernel, apply_in_act=apply_in_act,
                               out_relu=out_relu, add_bias=add_bias)

    in_specs = [
        # main row tile
        pl.BlockSpec((1, tile_h, w, cin), lambda b, i: (b, i, 0, 0)),
        # halo row above (clamped; masked inside the kernel when i == 0)
        pl.BlockSpec((1, 1, w, cin),
                     lambda b, i: (b, jnp.maximum(i * tile_h - 1, 0), 0, 0)),
        # halo row below (clamped; masked inside the kernel when i == last)
        pl.BlockSpec((1, 1, w, cin),
                     lambda b, i: (b, jnp.minimum(i * tile_h + tile_h, h - 1),
                                   0, 0)),
        # weights / per-channel input affine / bias (constant across the grid)
        pl.BlockSpec((kdim, cout), lambda b, i: (0, 0)),
        pl.BlockSpec((1, cin), lambda b, i: (0, 0)),
        pl.BlockSpec((1, cin), lambda b, i: (0, 0)),
        pl.BlockSpec((1, cout), lambda b, i: (0, 0)),
    ]
    out_shape = (
        jax.ShapeDtypeStruct((n, h, w, cout), out_dtype),
        jax.ShapeDtypeStruct((n, nt, 2, cout), jnp.float32),
    )
    out_specs = (
        pl.BlockSpec((1, tile_h, w, cout), lambda b, i: (b, i, 0, 0)),
        pl.BlockSpec((1, 1, 2, cout), lambda b, i: (b, i, 0, 0)),
    )
    scratch = [
        pltpu.VMEM((tile_h + 2, w + 2, cin), jnp.bfloat16),   # padded window
        pltpu.VMEM((tile_h * w, kdim), jnp.bfloat16),         # im2col patches
    ]
    return pl.pallas_call(
        kernel,
        grid=grid,
        in_specs=in_specs,
        out_specs=out_specs,
        out_shape=out_shape,
        scratch_shapes=scratch,
        compiler_params=pltpu.CompilerParams(
            dimension_semantics=("parallel", "parallel"),
            vmem_limit_bytes=_VMEM_LIMIT),
    )(x, x, x, w2d, scale, shift, bias)


# ----------------------------------------------------------------------------
# BatchNorm fold: cross-tile reduce of partial moments -> (scale, shift).
# ----------------------------------------------------------------------------
def _bn_fold(stats, count, gamma, beta, eps):
    s = jnp.sum(stats[:, :, 0, :], axis=(0, 1))          # (C,)
    ss = jnp.sum(stats[:, :, 1, :], axis=(0, 1))         # (C,)
    mean = s / count
    var = jnp.maximum(ss / count - mean * mean, 0.0)     # biased (training mode)
    inv = jax.lax.rsqrt(var + eps)
    scale = gamma * inv
    shift = beta - mean * scale
    return (scale.reshape(1, -1).astype(jnp.float32),
            shift.reshape(1, -1).astype(jnp.float32))


# ----------------------------------------------------------------------------
# Parameter init (orthogonal conv weights / zero bias / BN gamma=1, beta=0,
# matching DnCNN._initialize_weights).
# ----------------------------------------------------------------------------
def _orthogonal(key, rows, cols):
    big, small = max(rows, cols), min(rows, cols)
    a = jax.random.normal(key, (big, small), jnp.float32)
    q, r = jnp.linalg.qr(a)
    d = jnp.diagonal(r)
    q = q * jnp.where(d >= 0, 1.0, -1.0)
    if rows < cols:
        q = q.T
    return q                                              # (rows, cols)


def _conv_weight(key, cin, cout, cout_pad=None):
    # PyTorch layout (cout, cin, 3, 3) -> kernel layout (9*cin, cout[_pad]) bf16.
    w = _orthogonal(key, cout, cin * 9).reshape(cout, cin, 3, 3)
    wk = jnp.transpose(w, (2, 3, 1, 0)).reshape(9 * cin, cout)
    if cout_pad is not None and cout_pad > cout:
        wk = jnp.pad(wk, ((0, 0), (0, cout_pad - cout)))  # lane-dense last layer
    return wk.astype(jnp.bfloat16)


def init_dncnn_params(key, depth=22, n_channels=64, image_channels=3,
                      lane_pad=128):
    keys = jax.random.split(key, depth)
    layers = [dict(w=_conv_weight(keys[0], image_channels, n_channels),
                   b=jnp.zeros((1, n_channels), jnp.float32))]
    for d in range(1, depth - 1):
        layers.append(dict(w=_conv_weight(keys[d], n_channels, n_channels),
                           gamma=jnp.ones((n_channels,), jnp.float32),
                           beta=jnp.zeros((n_channels,), jnp.float32)))
    layers.append(dict(w=_conv_weight(keys[depth - 1], n_channels,
                                      image_channels, cout_pad=lane_pad)))
    return dict(layers=layers)


# ----------------------------------------------------------------------------
# DnCNN forward
# ----------------------------------------------------------------------------
def _pick_tile_h(h, w):
    budget = max(8, 4096 // max(w, 1))
    for d in range(min(h, budget), 0, -1):
        if h % d == 0:
            return d
    return h


def dncnn_forward(x_nchw, params, find_noise=True, tile_h=None, bn_eps=_BN_EPS):
    layers = params['layers']
    x = jnp.transpose(x_nchw, (0, 2, 3, 1)).astype(jnp.float32)   # NCHW -> NHWC
    n, h, w, cimg = x.shape
    if tile_h is None:
        tile_h = _pick_tile_h(h, w)
    count = float(n * h * w)

    nch = layers[0]['w'].shape[1]
    ones_c = jnp.ones((1, nch), jnp.float32)
    zeros_c = jnp.zeros((1, nch), jnp.float32)

    # L1: conv(+bias) + ReLU (no input transform).
    a, _ = _conv3x3_call(
        x, layers[0]['w'],
        scale=jnp.ones((1, cimg), jnp.float32),
        shift=jnp.zeros((1, cimg), jnp.float32),
        bias=layers[0]['b'],
        apply_in_act=False, out_relu=True, add_bias=True,
        out_dtype=jnp.bfloat16, tile_h=tile_h)

    # L2..L_{depth-1}: conv; BN+ReLU of the previous conv is folded into this
    # kernel's input transform (identity for L2 since L1 is already activated).
    z = a
    scale, shift = ones_c, zeros_c
    for li in range(1, len(layers) - 1):
        z, stats = _conv3x3_call(
            z, layers[li]['w'], scale=scale, shift=shift, bias=zeros_c,
            apply_in_act=True, out_relu=False, add_bias=False,
            out_dtype=jnp.bfloat16, tile_h=tile_h)
        scale, shift = _bn_fold(stats, count, layers[li]['gamma'],
                                layers[li]['beta'], bn_eps)

    # Final conv: last BN+ReLU folded in; output channels padded to 128 lanes.
    cout_pad = layers[-1]['w'].shape[1]
    out_pad, _ = _conv3x3_call(
        z, layers[-1]['w'], scale=scale, shift=shift,
        bias=jnp.zeros((1, cout_pad), jnp.float32),
        apply_in_act=True, out_relu=False, add_bias=False,
        out_dtype=jnp.float32, tile_h=tile_h)
    out = out_pad[..., :cimg]

    if find_noise:
        out = x - out
    return jnp.transpose(out, (0, 3, 1, 2))               # NHWC -> NCHW


if __name__ == "__main__":
    key = jax.random.PRNGKey(0)
    kx, kp = jax.random.split(key)
    image_channels, n_channels, depth = 3, 64, 22
    x = jax.random.normal(kx, (2, image_channels, 16, 16), jnp.float32)
    params = init_dncnn_params(kp, depth=depth, n_channels=n_channels,
                               image_channels=image_channels)

    fwd = jax.jit(functools.partial(dncnn_forward, find_noise=True, tile_h=8))
    out = jax.block_until_ready(fwd(x, params))

    assert out.shape == (2, image_channels, 16, 16)
    assert bool(jnp.all(jnp.isfinite(out)))
    print("KERNEL_OK")
</pallas_src>

<mosaic_0001>
module attributes {stable_mosaic.version = 11 : i64} {
  func.func @_conv3x3_kernel(%arg0: i32, %arg1: i32, %arg2: memref<1x8x16x3xf32, #tpu.memory_space<vmem>>, %arg3: memref<1x1x16x3xf32, #tpu.memory_space<vmem>>, %arg4: memref<1x1x16x3xf32, #tpu.memory_space<vmem>>, %arg5: memref<27x64xbf16, #tpu.memory_space<vmem>>, %arg6: memref<1x3xf32, #tpu.memory_space<vmem>>, %arg7: memref<1x3xf32, #tpu.memory_space<vmem>>, %arg8: memref<1x64xf32, #tpu.memory_space<vmem>>, %arg9: memref<1x8x16x64xbf16, #tpu.memory_space<vmem>>, %arg10: memref<1x1x2x64xf32, #tpu.memory_space<vmem>>, %arg11: memref<10x18x3xbf16, #tpu.memory_space<vmem>>, %arg12: memref<128x27xbf16, #tpu.memory_space<vmem>>) attributes {dimension_semantics = [#tpu.dimension_semantics<parallel>, #tpu.dimension_semantics<parallel>], iteration_bounds = array<i64: 2, 2>, scalar_prefetch = 0 : i64, scratch_operands = 2 : i64, tpu.core_type = #tpu.core_type<tc>, window_params = [{transform_indices = @transform_0, window_bounds = array<i64: 1, 8, 16, 3>}, {transform_indices = @transform_1, window_bounds = array<i64: 1, 1, 16, 3>}, {transform_indices = @transform_2, window_bounds = array<i64: 1, 1, 16, 3>}, {pipeline_mode = #tpu.pipeline_mode<synchronous>, transform_indices = @transform_3, window_bounds = array<i64: 27, 64>}, {pipeline_mode = #tpu.pipeline_mode<synchronous>, transform_indices = @transform_4, window_bounds = array<i64: 1, 3>}, {pipeline_mode = #tpu.pipeline_mode<synchronous>, transform_indices = @transform_5, window_bounds = array<i64: 1, 3>}, {pipeline_mode = #tpu.pipeline_mode<synchronous>, transform_indices = @transform_6, window_bounds = array<i64: 1, 64>}, {transform_indices = @transform_7, window_bounds = array<i64: 1, 8, 16, 64>}, {transform_indices = @transform_8, window_bounds = array<i64: 1, 1, 2, 64>}]} {
    %cst = arith.constant 0.000000e+00 : bf16
    %0 = vector.broadcast %cst : bf16 to vector<10x18x3xbf16>
    %c0 = arith.constant 0 : index
    %c0_0 = arith.constant 0 : index
    %c0_1 = arith.constant 0 : index
    %1 = vector.load %arg11[%c0, %c0_0, %c0_1] : memref<10x18x3xbf16, #tpu.memory_space<vmem>>, vector<10x18x3xbf16>
    tpu.vector_store %arg11[%c0, %c0_0, %c0_1], %0 {strides = array<i32>} : memref<10x18x3xbf16, #tpu.memory_space<vmem>>, vector<10x18x3xbf16>,
    %c0_2 = arith.constant 0 : index
    %c0_3 = arith.constant 0 : index
    %c0_4 = arith.constant 0 : index
    %c0_5 = arith.constant 0 : index
    %2 = vector.load %arg2[%c0_2, %c0_3, %c0_4, %c0_5] : memref<1x8x16x3xf32, #tpu.memory_space<vmem>>, vector<1x8x16x3xf32>
    %3 = vector.shape_cast %2 : vector<1x8x16x3xf32> to vector<8x16x3xf32>
    %4 = arith.truncf %3 : vector<8x16x3xf32> to vector<8x16x3xbf16>
    %c1 = arith.constant 1 : index
    %c1_6 = arith.constant 1 : index
    %c0_7 = arith.constant 0 : index
    %5 = vector.load %arg11[%c1, %c1_6, %c0_7] : memref<10x18x3xbf16, #tpu.memory_space<vmem>>, vector<8x16x3xbf16>
    tpu.vector_store %arg11[%c1, %c1_6, %c0_7], %4 {strides = array<i32>} : memref<10x18x3xbf16, #tpu.memory_space<vmem>>, vector<8x16x3xbf16>,
    %c0_i32 = arith.constant 0 : i32
    %6 = arith.cmpi sgt, %arg1, %c0_i32 : i32
    %7 = arith.extui %6 : i1 to i32
    %c0_i32_8 = arith.constant 0 : i32
    %8 = arith.cmpi ne, %7, %c0_i32_8 : i32
    scf.if %8 {
      %c0_68 = arith.constant 0 : index
      %c0_69 = arith.constant 0 : index
      %c0_70 = arith.constant 0 : index
      %c0_71 = arith.constant 0 : index
      %61 = vector.load %arg3[%c0_68, %c0_69, %c0_70, %c0_71] : memref<1x1x16x3xf32, #tpu.memory_space<vmem>>, vector<1x1x16x3xf32>
      %62 = vector.shape_cast %61 : vector<1x1x16x3xf32> to vector<1x16x3xf32>
      %63 = arith.truncf %62 : vector<1x16x3xf32> to vector<1x16x3xbf16>
      %c0_72 = arith.constant 0 : index
      %c1_73 = arith.constant 1 : index
      %c0_74 = arith.constant 0 : index
      %64 = vector.load %arg11[%c0_72, %c1_73, %c0_74] : memref<10x18x3xbf16, #tpu.memory_space<vmem>>, vector<1x16x3xbf16>
      tpu.vector_store %arg11[%c0_72, %c1_73, %c0_74], %63 {strides = array<i32>} : memref<10x18x3xbf16, #tpu.memory_space<vmem>>, vector<1x16x3xbf16>,
    } else {
    }
    %c1_i32 = arith.constant 1 : i32
    %9 = arith.cmpi slt, %arg1, %c1_i32 : i32
    %10 = arith.extui %9 : i1 to i32
    %c0_i32_9 = arith.constant 0 : i32
    %11 = arith.cmpi ne, %10, %c0_i32_9 : i32
    scf.if %11 {
      %c0_68 = arith.constant 0 : index
      %c0_69 = arith.constant 0 : index
      %c0_70 = arith.constant 0 : index
      %c0_71 = arith.constant 0 : index
      %61 = vector.load %arg4[%c0_68, %c0_69, %c0_70, %c0_71] : memref<1x1x16x3xf32, #tpu.memory_space<vmem>>, vector<1x1x16x3xf32>
      %62 = vector.shape_cast %61 : vector<1x1x16x3xf32> to vector<1x16x3xf32>
      %63 = arith.truncf %62 : vector<1x16x3xf32> to vector<1x16x3xbf16>
      %c9_72 = arith.constant 9 : index
      %c1_73 = arith.constant 1 : index
      %c0_74 = arith.constant 0 : index
      %64 = vector.load %arg11[%c9_72, %c1_73, %c0_74] : memref<10x18x3xbf16, #tpu.memory_space<vmem>>, vector<1x16x3xbf16>
      tpu.vector_store %arg11[%c9_72, %c1_73, %c0_74], %63 {strides = array<i32>} : memref<10x18x3xbf16, #tpu.memory_space<vmem>>, vector<1x16x3xbf16>,
    } else {
    }
    %c0_10 = arith.constant 0 : index
    %c0_11 = arith.constant 0 : index
    %c0_12 = arith.constant 0 : index
    %12 = vector.load %arg11[%c0_10, %c0_11, %c0_12] : memref<10x18x3xbf16, #tpu.memory_space<vmem>>, vector<8x16x3xbf16>
    %13 = vector.shape_cast %12 : vector<8x16x3xbf16> to vector<128x3xbf16>
    %c0_13 = arith.constant 0 : index
    %c0_14 = arith.constant 0 : index
    %14 = vector.load %arg12[%c0_13, %c0_14] : memref<128x27xbf16, #tpu.memory_space<vmem>>, vector<128x3xbf16>
    tpu.vector_store %arg12[%c0_13, %c0_14], %13 {strides = array<i32>} : memref<128x27xbf16, #tpu.memory_space<vmem>>, vector<128x3xbf16>,
    %c0_15 = arith.constant 0 : index
    %c1_16 = arith.constant 1 : index
    %c0_17 = arith.constant 0 : index
    %15 = vector.load %arg11[%c0_15, %c1_16, %c0_17] : memref<10x18x3xbf16, #tpu.memory_space<vmem>>, vector<8x16x3xbf16>
    %16 = vector.shape_cast %15 : vector<8x16x3xbf16> to vector<128x3xbf16>
    %c0_18 = arith.constant 0 : index
    %c3 = arith.constant 3 : index
    %17 = vector.load %arg12[%c0_18, %c3] : memref<128x27xbf16, #tpu.memory_space<vmem>>, vector<128x3xbf16>
    tpu.vector_store %arg12[%c0_18, %c3], %16 {strides = array<i32>} : memref<128x27xbf16, #tpu.memory_space<vmem>>, vector<128x3xbf16>,
    %c0_19 = arith.constant 0 : index
    %c2 = arith.constant 2 : index
    %c0_20 = arith.constant 0 : index
    %18 = vector.load %arg11[%c0_19, %c2, %c0_20] : memref<10x18x3xbf16, #tpu.memory_space<vmem>>, vector<8x16x3xbf16>
    %19 = vector.shape_cast %18 : vector<8x16x3xbf16> to vector<128x3xbf16>
    %c0_21 = arith.constant 0 : index
    %c6 = arith.constant 6 : index
    %20 = vector.load %arg12[%c0_21, %c6] : memref<128x27xbf16, #tpu.memory_space<vmem>>, vector<128x3xbf16>
    tpu.vector_store %arg12[%c0_21, %c6], %19 {strides = array<i32>} : memref<128x27xbf16, #tpu.memory_space<vmem>>, vector<128x3xbf16>,
    %c1_22 = arith.constant 1 : index
    %c0_23 = arith.constant 0 : index
    %c0_24 = arith.constant 0 : index
    %21 = vector.load %arg11[%c1_22, %c0_23, %c0_24] : memref<10x18x3xbf16, #tpu.memory_space<vmem>>, vector<8x16x3xbf16>
    %22 = vector.shape_cast %21 : vector<8x16x3xbf16> to vector<128x3xbf16>
    %c0_25 = arith.constant 0 : index
    %c9 = arith.constant 9 : index
    %23 = vector.load %arg12[%c0_25, %c9] : memref<128x27xbf16, #tpu.memory_space<vmem>>, vector<128x3xbf16>
    tpu.vector_store %arg12[%c0_25, %c9], %22 {strides = array<i32>} : memref<128x27xbf16, #tpu.memory_space<vmem>>, vector<128x3xbf16>,
    %c1_26 = arith.constant 1 : index
    %c1_27 = arith.constant 1 : index
    %c0_28 = arith.constant 0 : index
    %24 = vector.load %arg11[%c1_26, %c1_27, %c0_28] : memref<10x18x3xbf16, #tpu.memory_space<vmem>>, vector<8x16x3xbf16>
    %25 = vector.shape_cast %24 : vector<8x16x3xbf16> to vector<128x3xbf16>
    %c0_29 = arith.constant 0 : index
    %c12 = arith.constant 12 : index
    %26 = vector.load %arg12[%c0_29, %c12] : memref<128x27xbf16, #tpu.memory_space<vmem>>, vector<128x3xbf16>
    tpu.vector_store %arg12[%c0_29, %c12], %25 {strides = array<i32>} : memref<128x27xbf16, #tpu.memory_space<vmem>>, vector<128x3xbf16>,
    %c1_30 = arith.constant 1 : index
    %c2_31 = arith.constant 2 : index
    %c0_32 = arith.constant 0 : index
    %27 = vector.load %arg11[%c1_30, %c2_31, %c0_32] : memref<10x18x3xbf16, #tpu.memory_space<vmem>>, vector<8x16x3xbf16>
    %28 = vector.shape_cast %27 : vector<8x16x3xbf16> to vector<128x3xbf16>
    %c0_33 = arith.constant 0 : index
    %c15 = arith.constant 15 : index
    %29 = vector.load %arg12[%c0_33, %c15] : memref<128x27xbf16, #tpu.memory_space<vmem>>, vector<128x3xbf16>
    tpu.vector_store %arg12[%c0_33, %c15], %28 {strides = array<i32>} : memref<128x27xbf16, #tpu.memory_space<vmem>>, vector<128x3xbf16>,
    %c2_34 = arith.constant 2 : index
    %c0_35 = arith.constant 0 : index
    %c0_36 = arith.constant 0 : index
    %30 = vector.load %arg11[%c2_34, %c0_35, %c0_36] : memref<10x18x3xbf16, #tpu.memory_space<vmem>>, vector<8x16x3xbf16>
    %31 = vector.shape_cast %30 : vector<8x16x3xbf16> to vector<128x3xbf16>
    %c0_37 = arith.constant 0 : index
    %c18 = arith.constant 18 : index
    %32 = vector.load %arg12[%c0_37, %c18] : memref<128x27xbf16, #tpu.memory_space<vmem>>, vector<128x3xbf16>
    tpu.vector_store %arg12[%c0_37, %c18], %31 {strides = array<i32>} : memref<128x27xbf16, #tpu.memory_space<vmem>>, vector<128x3xbf16>,
    %c2_38 = arith.constant 2 : index
    %c1_39 = arith.constant 1 : index
    %c0_40 = arith.constant 0 : index
    %33 = vector.load %arg11[%c2_38, %c1_39, %c0_40] : memref<10x18x3xbf16, #tpu.memory_space<vmem>>, vector<8x16x3xbf16>
    %34 = vector.shape_cast %33 : vector<8x16x3xbf16> to vector<128x3xbf16>
    %c0_41 = arith.constant 0 : index
    %c21 = arith.constant 21 : index
    %35 = vector.load %arg12[%c0_41, %c21] : memref<128x27xbf16, #tpu.memory_space<vmem>>, vector<128x3xbf16>
    tpu.vector_store %arg12[%c0_41, %c21], %34 {strides = array<i32>} : memref<128x27xbf16, #tpu.memory_space<vmem>>, vector<128x3xbf16>,
    %c2_42 = arith.constant 2 : index
    %c2_43 = arith.constant 2 : index
    %c0_44 = arith.constant 0 : index
    %36 = vector.load %arg11[%c2_42, %c2_43, %c0_44] : memref<10x18x3xbf16, #tpu.memory_space<vmem>>, vector<8x16x3xbf16>
    %37 = vector.shape_cast %36 : vector<8x16x3xbf16> to vector<128x3xbf16>
    %c0_45 = arith.constant 0 : index
    %c24 = arith.constant 24 : index
    %38 = vector.load %arg12[%c0_45, %c24] : memref<128x27xbf16, #tpu.memory_space<vmem>>, vector<128x3xbf16>
    tpu.vector_store %arg12[%c0_45, %c24], %37 {strides = array<i32>} : memref<128x27xbf16, #tpu.memory_space<vmem>>, vector<128x3xbf16>,
    %c0_46 = arith.constant 0 : index
    %c0_47 = arith.constant 0 : index
    %39 = vector.load %arg12[%c0_46, %c0_47] : memref<128x27xbf16, #tpu.memory_space<vmem>>, vector<128x27xbf16>
    %c0_48 = arith.constant 0 : index
    %c0_49 = arith.constant 0 : index
    %40 = vector.load %arg5[%c0_48, %c0_49] : memref<27x64xbf16, #tpu.memory_space<vmem>>, vector<27x64xbf16>
    %cst_50 = arith.constant dense<0.000000e+00> : vector<128x64xf32>
    %41 = tpu.matmul %39, %40, %cst_50 {dimension_numbers = #tpu.dot_dimension_numbers<[1], [0], [0], [1], [0, 0, 1, 1], [], []>} : vector<128x27xbf16>, vector<27x64xbf16>, vector<128x64xf32> -> vector<128x64xf32>
    %c0_51 = arith.constant 0 : index
    %c0_52 = arith.constant 0 : index
    %42 = vector.load %arg8[%c0_51, %c0_52] : memref<1x64xf32, #tpu.memory_space<vmem>>, vector<1x64xf32>
    %43 = vector.shape_cast %42 : vector<1x64xf32> to vector<64xf32>
    %44 = vector.shape_cast %43 : vector<64xf32> to vector<1x64xf32>
    %45 = vector.broadcast %44 : vector<1x64xf32> to vector<128x64xf32>
    %46 = arith.addf %41, %45 : vector<128x64xf32>
    %cst_53 = arith.constant 0.000000e+00 : f32
    %47 = vector.broadcast %cst_53 : f32 to vector<128x64xf32>
    %48 = arith.maximumf %46, %47 : vector<128x64xf32>
    %cst_54 = arith.constant dense<0.000000e+00> : vector<64xf32>
    %49 = vector.multi_reduction <add>, %48, %cst_54 [0] : vector<128x64xf32> to vector<64xf32>
    %50 = vector.shape_cast %49 : vector<64xf32> to vector<1x64xf32>
    %51 = vector.shape_cast %50 : vector<1x64xf32> to vector<1x1x1x64xf32>
    %c0_55 = arith.constant 0 : index
    %c0_56 = arith.constant 0 : index
    %c0_57 = arith.constant 0 : index
    %c0_58 = arith.constant 0 : index
    %52 = vector.load %arg10[%c0_55, %c0_56, %c0_57, %c0_58] : memref<1x1x2x64xf32, #tpu.memory_space<vmem>>, vector<1x1x1x64xf32>
    tpu.vector_store %arg10[%c0_55, %c0_56, %c0_57, %c0_58], %51 {strides = array<i32>} : memref<1x1x2x64xf32, #tpu.memory_space<vmem>>, vector<1x1x1x64xf32>,
    %53 = arith.mulf %48, %48 : vector<128x64xf32>
    %cst_59 = arith.constant dense<0.000000e+00> : vector<64xf32>
    %54 = vector.multi_reduction <add>, %53, %cst_59 [0] : vector<128x64xf32> to vector<64xf32>
    %55 = vector.shape_cast %54 : vector<64xf32> to vector<1x64xf32>
    %56 = vector.shape_cast %55 : vector<1x64xf32> to vector<1x1x1x64xf32>
    %c0_60 = arith.constant 0 : index
    %c0_61 = arith.constant 0 : index
    %c1_62 = arith.constant 1 : index
    %c0_63 = arith.constant 0 : index
    %57 = vector.load %arg10[%c0_60, %c0_61, %c1_62, %c0_63] : memref<1x1x2x64xf32, #tpu.memory_space<vmem>>, vector<1x1x1x64xf32>
    tpu.vector_store %arg10[%c0_60, %c0_61, %c1_62, %c0_63], %56 {strides = array<i32>} : memref<1x1x2x64xf32, #tpu.memory_space<vmem>>, vector<1x1x1x64xf32>,
    %58 = vector.shape_cast %48 : vector<128x64xf32> to vector<1x8x16x64xf32>
    %59 = arith.truncf %58 : vector<1x8x16x64xf32> to vector<1x8x16x64xbf16>
    %c0_64 = arith.constant 0 : index
    %c0_65 = arith.constant 0 : index
    %c0_66 = arith.constant 0 : index
    %c0_67 = arith.constant 0 : index
    %60 = vector.load %arg9[%c0_64, %c0_65, %c0_66, %c0_67] : memref<1x8x16x64xbf16, #tpu.memory_space<vmem>>, vector<1x8x16x64xbf16>
    tpu.vector_store %arg9[%c0_64, %c0_65, %c0_66, %c0_67], %59 {strides = array<i32>} : memref<1x8x16x64xbf16, #tpu.memory_space<vmem>>, vector<1x8x16x64xbf16>,
    return
  }
  func.func @transform_0(%arg0: i32, %arg1: i32) -> (i32, i32, i32, i32) {
    %c0_i32 = arith.constant 0 : i32
    %c0_i32_0 = arith.constant 0 : i32
    %c0_i32_1 = arith.constant 0 : i32
    return %arg0, %arg1, %c0_i32, %c0_i32_0 : i32, i32, i32, i32
  }
  func.func @transform_1(%arg0: i32, %arg1: i32) -> (i32, i32, i32, i32) {
    %c8_i32 = arith.constant 8 : i32
    %0 = arith.muli %arg1, %c8_i32 : i32
    %c1_i32 = arith.constant 1 : i32
    %1 = arith.subi %0, %c1_i32 : i32
    %c0_i32 = arith.constant 0 : i32
    %2 = arith.maxsi %1, %c0_i32 : i32
    %c0_i32_0 = arith.constant 0 : i32
    %c0_i32_1 = arith.constant 0 : i32
    %c0_i32_2 = arith.constant 0 : i32
    return %arg0, %2, %c0_i32_0, %c0_i32_1 : i32, i32, i32, i32
  }
  func.func @transform_2(%arg0: i32, %arg1: i32) -> (i32, i32, i32, i32) {
    %c8_i32 = arith.constant 8 : i32
    %0 = arith.muli %arg1, %c8_i32 : i32
    %c8_i32_0 = arith.constant 8 : i32
    %1 = arith.addi %0, %c8_i32_0 : i32
    %c15_i32 = arith.constant 15 : i32
    %2 = arith.minsi %1, %c15_i32 : i32
    %c0_i32 = arith.constant 0 : i32
    %c0_i32_1 = arith.constant 0 : i32
    %c0_i32_2 = arith.constant 0 : i32
    return %arg0, %2, %c0_i32, %c0_i32_1 : i32, i32, i32, i32
  }
  func.func @transform_3(%arg0: i32, %arg1: i32) -> (i32, i32) {
    %c0_i32 = arith.constant 0 : i32
    %c0_i32_0 = arith.constant 0 : i32
    %c0_i32_1 = arith.constant 0 : i32
    return %c0_i32, %c0_i32_0 : i32, i32
  }
  func.func @transform_4(%arg0: i32, %arg1: i32) -> (i32, i32) {
    %c0_i32 = arith.constant 0 : i32
    %c0_i32_0 = arith.constant 0 : i32
    %c0_i32_1 = arith.constant 0 : i32
    return %c0_i32, %c0_i32_0 : i32, i32
  }
  func.func @transform_5(%arg0: i32, %arg1: i32) -> (i32, i32) {
    %c0_i32 = arith.constant 0 : i32
    %c0_i32_0 = arith.constant 0 : i32
    %c0_i32_1 = arith.constant 0 : i32
    return %c0_i32, %c0_i32_0 : i32, i32
  }
  func.func @transform_6(%arg0: i32, %arg1: i32) -> (i32, i32) {
    %c0_i32 = arith.constant 0 : i32
    %c0_i32_0 = arith.constant 0 : i32
    %c0_i32_1 = arith.constant 0 : i32
    return %c0_i32, %c0_i32_0 : i32, i32
  }
  func.func @transform_7(%arg0: i32, %arg1: i32) -> (i32, i32, i32, i32) {
    %c0_i32 = arith.constant 0 : i32
    %c0_i32_0 = arith.constant 0 : i32
    %c0_i32_1 = arith.constant 0 : i32
    return %arg0, %arg1, %c0_i32, %c0_i32_0 : i32, i32, i32, i32
  }
  func.func @transform_8(%arg0: i32, %arg1: i32) -> (i32, i32, i32, i32) {
    %c0_i32 = arith.constant 0 : i32
    %c0_i32_0 = arith.constant 0 : i32
    %c0_i32_1 = arith.constant 0 : i32
    return %arg0, %arg1, %c0_i32, %c0_i32_0 : i32, i32, i32, i32
  }
}

module attributes {stable_mosaic.version = 11 : i64} {
  func.func @_conv3x3_kernel(%arg0: i32, %arg1: i32, %arg2: memref<1x8x16x64xbf16, #tpu.memory_space<vmem>>, %arg3: memref<1x1x16x64xbf16, #tpu.memory_space<vmem>>, %arg4: memref<1x1x16x64xbf16, #tpu.memory_space<vmem>>, %arg5: memref<576x64xbf16, #tpu.memory_space<vmem>>, %arg6: memref<1x64xf32, #tpu.memory_space<vmem>>, %arg7: memref<1x64xf32, #tpu.memory_space<vmem>>, %arg8: memref<1x64xf32, #tpu.memory_space<vmem>>, %arg9: memref<1x8x16x64xbf16, #tpu.memory_space<vmem>>, %arg10: memref<1x1x2x64xf32, #tpu.memory_space<vmem>>, %arg11: memref<10x18x64xbf16, #tpu.memory_space<vmem>>, %arg12: memref<128x576xbf16, #tpu.memory_space<vmem>>) attributes {dimension_semantics = [#tpu.dimension_semantics<parallel>, #tpu.dimension_semantics<parallel>], iteration_bounds = array<i64: 2, 2>, scalar_prefetch = 0 : i64, scratch_operands = 2 : i64, tpu.core_type = #tpu.core_type<tc>, window_params = [{transform_indices = @transform_0, window_bounds = array<i64: 1, 8, 16, 64>}, {transform_indices = @transform_1, window_bounds = array<i64: 1, 1, 16, 64>}, {transform_indices = @transform_2, window_bounds = array<i64: 1, 1, 16, 64>}, {pipeline_mode = #tpu.pipeline_mode<synchronous>, transform_indices = @transform_3, window_bounds = array<i64: 576, 64>}, {pipeline_mode = #tpu.pipeline_mode<synchronous>, transform_indices = @transform_4, window_bounds = array<i64: 1, 64>}, {pipeline_mode = #tpu.pipeline_mode<synchronous>, transform_indices = @transform_5, window_bounds = array<i64: 1, 64>}, {pipeline_mode = #tpu.pipeline_mode<synchronous>, transform_indices = @transform_6, window_bounds = array<i64: 1, 64>}, {transform_indices = @transform_7, window_bounds = array<i64: 1, 8, 16, 64>}, {transform_indices = @transform_8, window_bounds = array<i64: 1, 1, 2, 64>}]} {
    %c0 = arith.constant 0 : index
    %c0_0 = arith.constant 0 : index
    %0 = vector.load %arg6[%c0, %c0_0] : memref<1x64xf32, #tpu.memory_space<vmem>>, vector<1x64xf32>
    %1 = vector.shape_cast %0 : vector<1x64xf32> to vector<64xf32>
    %c0_1 = arith.constant 0 : index
    %c0_2 = arith.constant 0 : index
    %2 = vector.load %arg7[%c0_1, %c0_2] : memref<1x64xf32, #tpu.memory_space<vmem>>, vector<1x64xf32>
    %3 = vector.shape_cast %2 : vector<1x64xf32> to vector<64xf32>
    %cst = arith.constant 0.000000e+00 : bf16
    %4 = vector.broadcast %cst : bf16 to vector<10x18x64xbf16>
    %c0_3 = arith.constant 0 : index
    %c0_4 = arith.constant 0 : index
    %c0_5 = arith.constant 0 : index
    %5 = vector.load %arg11[%c0_3, %c0_4, %c0_5] : memref<10x18x64xbf16, #tpu.memory_space<vmem>>, vector<10x18x64xbf16>
    tpu.vector_store %arg11[%c0_3, %c0_4, %c0_5], %4 {strides = array<i32>} : memref<10x18x64xbf16, #tpu.memory_space<vmem>>, vector<10x18x64xbf16>,
    %c0_6 = arith.constant 0 : index
    %c0_7 = arith.constant 0 : index
    %c0_8 = arith.constant 0 : index
    %c0_9 = arith.constant 0 : index
    %6 = vector.load %arg2[%c0_6, %c0_7, %c0_8, %c0_9] : memref<1x8x16x64xbf16, #tpu.memory_space<vmem>>, vector<1x8x16x64xbf16>
    %7 = vector.shape_cast %6 : vector<1x8x16x64xbf16> to vector<8x16x64xbf16>
    %8 = arith.extf %7 : vector<8x16x64xbf16> to vector<8x16x64xf32>
    %9 = vector.shape_cast %1 : vector<64xf32> to vector<1x1x64xf32>
    %10 = vector.broadcast %9 : vector<1x1x64xf32> to vector<8x16x64xf32>
    %11 = arith.mulf %8, %10 : vector<8x16x64xf32>
    %12 = vector.shape_cast %3 : vector<64xf32> to vector<1x1x64xf32>
    %13 = vector.broadcast %12 : vector<1x1x64xf32> to vector<8x16x64xf32>
    %14 = arith.addf %11, %13 : vector<8x16x64xf32>
    %cst_10 = arith.constant 0.000000e+00 : f32
    %15 = vector.broadcast %cst_10 : f32 to vector<8x16x64xf32>
    %16 = arith.maximumf %14, %15 : vector<8x16x64xf32>
    %17 = arith.truncf %16 : vector<8x16x64xf32> to vector<8x16x64xbf16>
    %c1 = arith.constant 1 : index
    %c1_11 = arith.constant 1 : index
    %c0_12 = arith.constant 0 : index
    %18 = vector.load %arg11[%c1, %c1_11, %c0_12] : memref<10x18x64xbf16, #tpu.memory_space<vmem>>, vector<8x16x64xbf16>
    tpu.vector_store %arg11[%c1, %c1_11, %c0_12], %17 {strides = array<i32>} : memref<10x18x64xbf16, #tpu.memory_space<vmem>>, vector<8x16x64xbf16>,
    %c0_i32 = arith.constant 0 : i32
    %19 = arith.cmpi sgt, %arg1, %c0_i32 : i32
    %20 = arith.extui %19 : i1 to i32
    %c0_i32_13 = arith.constant 0 : i32
    %21 = arith.cmpi ne, %20, %c0_i32_13 : i32
    scf.if %21 {
      %c0_70 = arith.constant 0 : index
      %c0_71 = arith.constant 0 : index
      %c0_72 = arith.constant 0 : index
      %c0_73 = arith.constant 0 : index
      %67 = vector.load %arg3[%c0_70, %c0_71, %c0_72, %c0_73] : memref<1x1x16x64xbf16, #tpu.memory_space<vmem>>, vector<1x1x16x64xbf16>
      %68 = vector.shape_cast %67 : vector<1x1x16x64xbf16> to vector<1x16x64xbf16>
      %69 = arith.extf %68 : vector<1x16x64xbf16> to vector<1x16x64xf32>
      %70 = vector.shape_cast %1 : vector<64xf32> to vector<1x1x64xf32>
      %71 = vector.broadcast %70 : vector<1x1x64xf32> to vector<1x16x64xf32>
      %72 = arith.mulf %69, %71 : vector<1x16x64xf32>
      %73 = vector.shape_cast %3 : vector<64xf32> to vector<1x1x64xf32>
      %74 = vector.broadcast %73 : vector<1x1x64xf32> to vector<1x16x64xf32>
      %75 = arith.addf %72, %74 : vector<1x16x64xf32>
      %cst_74 = arith.constant 0.000000e+00 : f32
      %76 = vector.broadcast %cst_74 : f32 to vector<1x16x64xf32>
      %77 = arith.maximumf %75, %76 : vector<1x16x64xf32>
      %78 = arith.truncf %77 : vector<1x16x64xf32> to vector<1x16x64xbf16>
      %c0_75 = arith.constant 0 : index
      %c1_76 = arith.constant 1 : index
      %c0_77 = arith.constant 0 : index
      %79 = vector.load %arg11[%c0_75, %c1_76, %c0_77] : memref<10x18x64xbf16, #tpu.memory_space<vmem>>, vector<1x16x64xbf16>
      tpu.vector_store %arg11[%c0_75, %c1_76, %c0_77], %78 {strides = array<i32>} : memref<10x18x64xbf16, #tpu.memory_space<vmem>>, vector<1x16x64xbf16>,
    } else {
    }
    %c1_i32 = arith.constant 1 : i32
    %22 = arith.cmpi slt, %arg1, %c1_i32 : i32
    %23 = arith.extui %22 : i1 to i32
    %c0_i32_14 = arith.constant 0 : i32
    %24 = arith.cmpi ne, %23, %c0_i32_14 : i32
    scf.if %24 {
      %c0_70 = arith.constant 0 : index
      %c0_71 = arith.constant 0 : index
      %c0_72 = arith.constant 0 : index
      %c0_73 = arith.constant 0 : index
      %67 = vector.load %arg4[%c0_70, %c0_71, %c0_72, %c0_73] : memref<1x1x16x64xbf16, #tpu.memory_space<vmem>>, vector<1x1x16x64xbf16>
      %68 = vector.shape_cast %67 : vector<1x1x16x64xbf16> to vector<1x16x64xbf16>
      %69 = arith.extf %68 : vector<1x16x64xbf16> to vector<1x16x64xf32>
      %70 = vector.shape_cast %1 : vector<64xf32> to vector<1x1x64xf32>
      %71 = vector.broadcast %70 : vector<1x1x64xf32> to vector<1x16x64xf32>
      %72 = arith.mulf %69, %71 : vector<1x16x64xf32>
      %73 = vector.shape_cast %3 : vector<64xf32> to vector<1x1x64xf32>
      %74 = vector.broadcast %73 : vector<1x1x64xf32> to vector<1x16x64xf32>
      %75 = arith.addf %72, %74 : vector<1x16x64xf32>
      %cst_74 = arith.constant 0.000000e+00 : f32
      %76 = vector.broadcast %cst_74 : f32 to vector<1x16x64xf32>
      %77 = arith.maximumf %75, %76 : vector<1x16x64xf32>
      %78 = arith.truncf %77 : vector<1x16x64xf32> to vector<1x16x64xbf16>
      %c9 = arith.constant 9 : index
      %c1_75 = arith.constant 1 : index
      %c0_76 = arith.constant 0 : index
      %79 = vector.load %arg11[%c9, %c1_75, %c0_76] : memref<10x18x64xbf16, #tpu.memory_space<vmem>>, vector<1x16x64xbf16>
      tpu.vector_store %arg11[%c9, %c1_75, %c0_76], %78 {strides = array<i32>} : memref<10x18x64xbf16, #tpu.memory_space<vmem>>, vector<1x16x64xbf16>,
    } else {
    }
    %c0_15 = arith.constant 0 : index
    %c0_16 = arith.constant 0 : index
    %c0_17 = arith.constant 0 : index
    %25 = vector.load %arg11[%c0_15, %c0_16, %c0_17] : memref<10x18x64xbf16, #tpu.memory_space<vmem>>, vector<8x16x64xbf16>
    %26 = vector.shape_cast %25 : vector<8x16x64xbf16> to vector<128x64xbf16>
    %c0_18 = arith.constant 0 : index
    %c0_19 = arith.constant 0 : index
    %27 = vector.load %arg12[%c0_18, %c0_19] : memref<128x576xbf16, #tpu.memory_space<vmem>>, vector<128x64xbf16>
    tpu.vector_store %arg12[%c0_18, %c0_19], %26 {strides = array<i32>} : memref<128x576xbf16, #tpu.memory_space<vmem>>, vector<128x64xbf16>,
    %c0_20 = arith.constant 0 : index
    %c1_21 = arith.constant 1 : index
    %c0_22 = arith.constant 0 : index
    %28 = vector.load %arg11[%c0_20, %c1_21, %c0_22] : memref<10x18x64xbf16, #tpu.memory_space<vmem>>, vector<8x16x64xbf16>
    %29 = vector.shape_cast %28 : vector<8x16x64xbf16> to vector<128x64xbf16>
    %c0_23 = arith.constant 0 : index
    %c64 = arith.constant 64 : index
    %30 = vector.load %arg12[%c0_23, %c64] : memref<128x576xbf16, #tpu.memory_space<vmem>>, vector<128x64xbf16>
    tpu.vector_store %arg12[%c0_23, %c64], %29 {strides = array<i32>} : memref<128x576xbf16, #tpu.memory_space<vmem>>, vector<128x64xbf16>,
    %c0_24 = arith.constant 0 : index
    %c2 = arith.constant 2 : index
    %c0_25 = arith.constant 0 : index
    %31 = vector.load %arg11[%c0_24, %c2, %c0_25] : memref<10x18x64xbf16, #tpu.memory_space<vmem>>, vector<8x16x64xbf16>
    %32 = vector.shape_cast %31 : vector<8x16x64xbf16> to vector<128x64xbf16>
    %c0_26 = arith.constant 0 : index
    %c128 = arith.constant 128 : index
    %33 = vector.load %arg12[%c0_26, %c128] : memref<128x576xbf16, #tpu.memory_space<vmem>>, vector<128x64xbf16>
    tpu.vector_store %arg12[%c0_26, %c128], %32 {strides = array<i32>} : memref<128x576xbf16, #tpu.memory_space<vmem>>, vector<128x64xbf16>,
    %c1_27 = arith.constant 1 : index
    %c0_28 = arith.constant 0 : index
    %c0_29 = arith.constant 0 : index
    %34 = vector.load %arg11[%c1_27, %c0_28, %c0_29] : memref<10x18x64xbf16, #tpu.memory_space<vmem>>, vector<8x16x64xbf16>
    %35 = vector.shape_cast %34 : vector<8x16x64xbf16> to vector<128x64xbf16>
    %c0_30 = arith.constant 0 : index
    %c192 = arith.constant 192 : index
    %36 = vector.load %arg12[%c0_30, %c192] : memref<128x576xbf16, #tpu.memory_space<vmem>>, vector<128x64xbf16>
    tpu.vector_store %arg12[%c0_30, %c192], %35 {strides = array<i32>} : memref<128x576xbf16, #tpu.memory_space<vmem>>, vector<128x64xbf16>,
    %c1_31 = arith.constant 1 : index
    %c1_32 = arith.constant 1 : index
    %c0_33 = arith.constant 0 : index
    %37 = vector.load %arg11[%c1_31, %c1_32, %c0_33] : memref<10x18x64xbf16, #tpu.memory_space<vmem>>, vector<8x16x64xbf16>
    %38 = vector.shape_cast %37 : vector<8x16x64xbf16> to vector<128x64xbf16>
    %c0_34 = arith.constant 0 : index
    %c256 = arith.constant 256 : index
    %39 = vector.load %arg12[%c0_34, %c256] : memref<128x576xbf16, #tpu.memory_space<vmem>>, vector<128x64xbf16>
    tpu.vector_store %arg12[%c0_34, %c256], %38 {strides = array<i32>} : memref<128x576xbf16, #tpu.memory_space<vmem>>, vector<128x64xbf16>,
    %c1_35 = arith.constant 1 : index
    %c2_36 = arith.constant 2 : index
    %c0_37 = arith.constant 0 : index
    %40 = vector.load %arg11[%c1_35, %c2_36, %c0_37] : memref<10x18x64xbf16, #tpu.memory_space<vmem>>, vector<8x16x64xbf16>
    %41 = vector.shape_cast %40 : vector<8x16x64xbf16> to vector<128x64xbf16>
    %c0_38 = arith.constant 0 : index
    %c320 = arith.constant 320 : index
    %42 = vector.load %arg12[%c0_38, %c320] : memref<128x576xbf16, #tpu.memory_space<vmem>>, vector<128x64xbf16>
    tpu.vector_store %arg12[%c0_38, %c320], %41 {strides = array<i32>} : memref<128x576xbf16, #tpu.memory_space<vmem>>, vector<128x64xbf16>,
    %c2_39 = arith.constant 2 : index
    %c0_40 = arith.constant 0 : index
    %c0_41 = arith.constant 0 : index
    %43 = vector.load %arg11[%c2_39, %c0_40, %c0_41] : memref<10x18x64xbf16, #tpu.memory_space<vmem>>, vector<8x16x64xbf16>
    %44 = vector.shape_cast %43 : vector<8x16x64xbf16> to vector<128x64xbf16>
    %c0_42 = arith.constant 0 : index
    %c384 = arith.constant 384 : index
    %45 = vector.load %arg12[%c0_42, %c384] : memref<128x576xbf16, #tpu.memory_space<vmem>>, vector<128x64xbf16>
    tpu.vector_store %arg12[%c0_42, %c384], %44 {strides = array<i32>} : memref<128x576xbf16, #tpu.memory_space<vmem>>, vector<128x64xbf16>,
    %c2_43 = arith.constant 2 : index
    %c1_44 = arith.constant 1 : index
    %c0_45 = arith.constant 0 : index
    %46 = vector.load %arg11[%c2_43, %c1_44, %c0_45] : memref<10x18x64xbf16, #tpu.memory_space<vmem>>, vector<8x16x64xbf16>
    %47 = vector.shape_cast %46 : vector<8x16x64xbf16> to vector<128x64xbf16>
    %c0_46 = arith.constant 0 : index
    %c448 = arith.constant 448 : index
    %48 = vector.load %arg12[%c0_46, %c448] : memref<128x576xbf16, #tpu.memory_space<vmem>>, vector<128x64xbf16>
    tpu.vector_store %arg12[%c0_46, %c448], %47 {strides = array<i32>} : memref<128x576xbf16, #tpu.memory_space<vmem>>, vector<128x64xbf16>,
    %c2_47 = arith.constant 2 : index
    %c2_48 = arith.constant 2 : index
    %c0_49 = arith.constant 0 : index
    %49 = vector.load %arg11[%c2_47, %c2_48, %c0_49] : memref<10x18x64xbf16, #tpu.memory_space<vmem>>, vector<8x16x64xbf16>
    %50 = vector.shape_cast %49 : vector<8x16x64xbf16> to vector<128x64xbf16>
    %c0_50 = arith.constant 0 : index
    %c512 = arith.constant 512 : index
    %51 = vector.load %arg12[%c0_50, %c512] : memref<128x576xbf16, #tpu.memory_space<vmem>>, vector<128x64xbf16>
    tpu.vector_store %arg12[%c0_50, %c512], %50 {strides = array<i32>} : memref<128x576xbf16, #tpu.memory_space<vmem>>, vector<128x64xbf16>,
    %c0_51 = arith.constant 0 : index
    %c0_52 = arith.constant 0 : index
    %52 = vector.load %arg12[%c0_51, %c0_52] : memref<128x576xbf16, #tpu.memory_space<vmem>>, vector<128x576xbf16>
    %c0_53 = arith.constant 0 : index
    %c0_54 = arith.constant 0 : index
    %53 = vector.load %arg5[%c0_53, %c0_54] : memref<576x64xbf16, #tpu.memory_space<vmem>>, vector<576x64xbf16>
    %cst_55 = arith.constant dense<0.000000e+00> : vector<128x64xf32>
    %54 = tpu.matmul %52, %53, %cst_55 {dimension_numbers = #tpu.dot_dimension_numbers<[1], [0], [0], [1], [0, 0, 1, 1], [], []>} : vector<128x576xbf16>, vector<576x64xbf16>, vector<128x64xf32> -> vector<128x64xf32>
    %cst_56 = arith.constant dense<0.000000e+00> : vector<64xf32>
    %55 = vector.multi_reduction <add>, %54, %cst_56 [0] : vector<128x64xf32> to vector<64xf32>
    %56 = vector.shape_cast %55 : vector<64xf32> to vector<1x64xf32>
    %57 = vector.shape_cast %56 : vector<1x64xf32> to vector<1x1x1x64xf32>
    %c0_57 = arith.constant 0 : index
    %c0_58 = arith.constant 0 : index
    %c0_59 = arith.constant 0 : index
    %c0_60 = arith.constant 0 : index
    %58 = vector.load %arg10[%c0_57, %c0_58, %c0_59, %c0_60] : memref<1x1x2x64xf32, #tpu.memory_space<vmem>>, vector<1x1x1x64xf32>
    tpu.vector_store %arg10[%c0_57, %c0_58, %c0_59, %c0_60], %57 {strides = array<i32>} : memref<1x1x2x64xf32, #tpu.memory_space<vmem>>, vector<1x1x1x64xf32>,
    %59 = arith.mulf %54, %54 : vector<128x64xf32>
    %cst_61 = arith.constant dense<0.000000e+00> : vector<64xf32>
    %60 = vector.multi_reduction <add>, %59, %cst_61 [0] : vector<128x64xf32> to vector<64xf32>
    %61 = vector.shape_cast %60 : vector<64xf32> to vector<1x64xf32>
    %62 = vector.shape_cast %61 : vector<1x64xf32> to vector<1x1x1x64xf32>
    %c0_62 = arith.constant 0 : index
    %c0_63 = arith.constant 0 : index
    %c1_64 = arith.constant 1 : index
    %c0_65 = arith.constant 0 : index
    %63 = vector.load %arg10[%c0_62, %c0_63, %c1_64, %c0_65] : memref<1x1x2x64xf32, #tpu.memory_space<vmem>>, vector<1x1x1x64xf32>
    tpu.vector_store %arg10[%c0_62, %c0_63, %c1_64, %c0_65], %62 {strides = array<i32>} : memref<1x1x2x64xf32, #tpu.memory_space<vmem>>, vector<1x1x1x64xf32>,
    %64 = vector.shape_cast %54 : vector<128x64xf32> to vector<1x8x16x64xf32>
    %65 = arith.truncf %64 : vector<1x8x16x64xf32> to vector<1x8x16x64xbf16>
    %c0_66 = arith.constant 0 : index
    %c0_67 = arith.constant 0 : index
    %c0_68 = arith.constant 0 : index
    %c0_69 = arith.constant 0 : index
    %66 = vector.load %arg9[%c0_66, %c0_67, %c0_68, %c0_69] : memref<1x8x16x64xbf16, #tpu.memory_space<vmem>>, vector<1x8x16x64xbf16>
    tpu.vector_store %arg9[%c0_66, %c0_67, %c0_68, %c0_69], %65 {strides = array<i32>} : memref<1x8x16x64xbf16, #tpu.memory_space<vmem>>, vector<1x8x16x64xbf16>,
    return
  }
  func.func @transform_0(%arg0: i32, %arg1: i32) -> (i32, i32, i32, i32) {
    %c0_i32 = arith.constant 0 : i32
    %c0_i32_0 = arith.constant 0 : i32
    %c0_i32_1 = arith.constant 0 : i32
    return %arg0, %arg1, %c0_i32, %c0_i32_0 : i32, i32, i32, i32
  }
  func.func @transform_1(%arg0: i32, %arg1: i32) -> (i32, i32, i32, i32) {
    %c8_i32 = arith.constant 8 : i32
    %0 = arith.muli %arg1, %c8_i32 : i32
    %c1_i32 = arith.constant 1 : i32
    %1 = arith.subi %0, %c1_i32 : i32
    %c0_i32 = arith.constant 0 : i32
    %2 = arith.maxsi %1, %c0_i32 : i32
    %c0_i32_0 = arith.constant 0 : i32
    %c0_i32_1 = arith.constant 0 : i32
    %c0_i32_2 = arith.constant 0 : i32
    return %arg0, %2, %c0_i32_0, %c0_i32_1 : i32, i32, i32, i32
  }
  func.func @transform_2(%arg0: i32, %arg1: i32) -> (i32, i32, i32, i32) {
    %c8_i32 = arith.constant 8 : i32
    %0 = arith.muli %arg1, %c8_i32 : i32
    %c8_i32_0 = arith.constant 8 : i32
    %1 = arith.addi %0, %c8_i32_0 : i32
    %c15_i32 = arith.constant 15 : i32
    %2 = arith.minsi %1, %c15_i32 : i32
    %c0_i32 = arith.constant 0 : i32
    %c0_i32_1 = arith.constant 0 : i32
    %c0_i32_2 = arith.constant 0 : i32
    return %arg0, %2, %c0_i32, %c0_i32_1 : i32, i32, i32, i32
  }
  func.func @transform_3(%arg0: i32, %arg1: i32) -> (i32, i32) {
    %c0_i32 = arith.constant 0 : i32
    %c0_i32_0 = arith.constant 0 : i32
    %c0_i32_1 = arith.constant 0 : i32
    return %c0_i32, %c0_i32_0 : i32, i32
  }
  func.func @transform_4(%arg0: i32, %arg1: i32) -> (i32, i32) {
    %c0_i32 = arith.constant 0 : i32
    %c0_i32_0 = arith.constant 0 : i32
    %c0_i32_1 = arith.constant 0 : i32
    return %c0_i32, %c0_i32_0 : i32, i32
  }
  func.func @transform_5(%arg0: i32, %arg1: i32) -> (i32, i32) {
    %c0_i32 = arith.constant 0 : i32
    %c0_i32_0 = arith.constant 0 : i32
    %c0_i32_1 = arith.constant 0 : i32
    return %c0_i32, %c0_i32_0 : i32, i32
  }
  func.func @transform_6(%arg0: i32, %arg1: i32) -> (i32, i32) {
    %c0_i32 = arith.constant 0 : i32
    %c0_i32_0 = arith.constant 0 : i32
    %c0_i32_1 = arith.constant 0 : i32
    return %c0_i32, %c0_i32_0 : i32, i32
  }
  func.func @transform_7(%arg0: i32, %arg1: i32) -> (i32, i32, i32, i32) {
    %c0_i32 = arith.constant 0 : i32
    %c0_i32_0 = arith.constant 0 : i32
    %c0_i32_1 = arith.constant 0 : i32
    return %arg0, %arg1, %c0_i32, %c0_i32_0 : i32, i32, i32, i32
  }
  func.func @transform_8(%arg0: i32, %arg1: i32) -> (i32, i32, i32, i32) {
    %c0_i32 = arith.constant 0 : i32
    %c0_i32_0 = arith.constant 0 : i32
    %c0_i32_1 = arith.constant 0 : i32
    return %arg0, %arg1, %c0_i32, %c0_i32_0 : i32, i32, i32, i32
  }
}

module attributes {stable_mosaic.version = 11 : i64} {
  func.func @_conv3x3_kernel(%arg0: i32, %arg1: i32, %arg2: memref<1x8x16x64xbf16, #tpu.memory_space<vmem>>, %arg3: memref<1x1x16x64xbf16, #tpu.memory_space<vmem>>, %arg4: memref<1x1x16x64xbf16, #tpu.memory_space<vmem>>, %arg5: memref<576x128xbf16, #tpu.memory_space<vmem>>, %arg6: memref<1x64xf32, #tpu.memory_space<vmem>>, %arg7: memref<1x64xf32, #tpu.memory_space<vmem>>, %arg8: memref<1x128xf32, #tpu.memory_space<vmem>>, %arg9: memref<1x8x16x128xf32, #tpu.memory_space<vmem>>, %arg10: memref<1x1x2x128xf32, #tpu.memory_space<vmem>>, %arg11: memref<10x18x64xbf16, #tpu.memory_space<vmem>>, %arg12: memref<128x576xbf16, #tpu.memory_space<vmem>>) attributes {dimension_semantics = [#tpu.dimension_semantics<parallel>, #tpu.dimension_semantics<parallel>], iteration_bounds = array<i64: 2, 2>, scalar_prefetch = 0 : i64, scratch_operands = 2 : i64, tpu.core_type = #tpu.core_type<tc>, window_params = [{transform_indices = @transform_0, window_bounds = array<i64: 1, 8, 16, 64>}, {transform_indices = @transform_1, window_bounds = array<i64: 1, 1, 16, 64>}, {transform_indices = @transform_2, window_bounds = array<i64: 1, 1, 16, 64>}, {pipeline_mode = #tpu.pipeline_mode<synchronous>, transform_indices = @transform_3, window_bounds = array<i64: 576, 128>}, {pipeline_mode = #tpu.pipeline_mode<synchronous>, transform_indices = @transform_4, window_bounds = array<i64: 1, 64>}, {pipeline_mode = #tpu.pipeline_mode<synchronous>, transform_indices = @transform_5, window_bounds = array<i64: 1, 64>}, {pipeline_mode = #tpu.pipeline_mode<synchronous>, transform_indices = @transform_6, window_bounds = array<i64: 1, 128>}, {transform_indices = @transform_7, window_bounds = array<i64: 1, 8, 16, 128>}, {transform_indices = @transform_8, window_bounds = array<i64: 1, 1, 2, 128>}]} {
    %c0 = arith.constant 0 : index
    %c0_0 = arith.constant 0 : index
    %0 = vector.load %arg6[%c0, %c0_0] : memref<1x64xf32, #tpu.memory_space<vmem>>, vector<1x64xf32>
    %1 = vector.shape_cast %0 : vector<1x64xf32> to vector<64xf32>
    %c0_1 = arith.constant 0 : index
    %c0_2 = arith.constant 0 : index
    %2 = vector.load %arg7[%c0_1, %c0_2] : memref<1x64xf32, #tpu.memory_space<vmem>>, vector<1x64xf32>
    %3 = vector.shape_cast %2 : vector<1x64xf32> to vector<64xf32>
    %cst = arith.constant 0.000000e+00 : bf16
    %4 = vector.broadcast %cst : bf16 to vector<10x18x64xbf16>
    %c0_3 = arith.constant 0 : index
    %c0_4 = arith.constant 0 : index
    %c0_5 = arith.constant 0 : index
    %5 = vector.load %arg11[%c0_3, %c0_4, %c0_5] : memref<10x18x64xbf16, #tpu.memory_space<vmem>>, vector<10x18x64xbf16>
    tpu.vector_store %arg11[%c0_3, %c0_4, %c0_5], %4 {strides = array<i32>} : memref<10x18x64xbf16, #tpu.memory_space<vmem>>, vector<10x18x64xbf16>,
    %c0_6 = arith.constant 0 : index
    %c0_7 = arith.constant 0 : index
    %c0_8 = arith.constant 0 : index
    %c0_9 = arith.constant 0 : index
    %6 = vector.load %arg2[%c0_6, %c0_7, %c0_8, %c0_9] : memref<1x8x16x64xbf16, #tpu.memory_space<vmem>>, vector<1x8x16x64xbf16>
    %7 = vector.shape_cast %6 : vector<1x8x16x64xbf16> to vector<8x16x64xbf16>
    %8 = arith.extf %7 : vector<8x16x64xbf16> to vector<8x16x64xf32>
    %9 = vector.shape_cast %1 : vector<64xf32> to vector<1x1x64xf32>
    %10 = vector.broadcast %9 : vector<1x1x64xf32> to vector<8x16x64xf32>
    %11 = arith.mulf %8, %10 : vector<8x16x64xf32>
    %12 = vector.shape_cast %3 : vector<64xf32> to vector<1x1x64xf32>
    %13 = vector.broadcast %12 : vector<1x1x64xf32> to vector<8x16x64xf32>
    %14 = arith.addf %11, %13 : vector<8x16x64xf32>
    %cst_10 = arith.constant 0.000000e+00 : f32
    %15 = vector.broadcast %cst_10 : f32 to vector<8x16x64xf32>
    %16 = arith.maximumf %14, %15 : vector<8x16x64xf32>
    %17 = arith.truncf %16 : vector<8x16x64xf32> to vector<8x16x64xbf16>
    %c1 = arith.constant 1 : index
    %c1_11 = arith.constant 1 : index
    %c0_12 = arith.constant 0 : index
    %18 = vector.load %arg11[%c1, %c1_11, %c0_12] : memref<10x18x64xbf16, #tpu.memory_space<vmem>>, vector<8x16x64xbf16>
    tpu.vector_store %arg11[%c1, %c1_11, %c0_12], %17 {strides = array<i32>} : memref<10x18x64xbf16, #tpu.memory_space<vmem>>, vector<8x16x64xbf16>,
    %c0_i32 = arith.constant 0 : i32
    %19 = arith.cmpi sgt, %arg1, %c0_i32 : i32
    %20 = arith.extui %19 : i1 to i32
    %c0_i32_13 = arith.constant 0 : i32
    %21 = arith.cmpi ne, %20, %c0_i32_13 : i32
    scf.if %21 {
      %c0_70 = arith.constant 0 : index
      %c0_71 = arith.constant 0 : index
      %c0_72 = arith.constant 0 : index
      %c0_73 = arith.constant 0 : index
      %66 = vector.load %arg3[%c0_70, %c0_71, %c0_72, %c0_73] : memref<1x1x16x64xbf16, #tpu.memory_space<vmem>>, vector<1x1x16x64xbf16>
      %67 = vector.shape_cast %66 : vector<1x1x16x64xbf16> to vector<1x16x64xbf16>
      %68 = arith.extf %67 : vector<1x16x64xbf16> to vector<1x16x64xf32>
      %69 = vector.shape_cast %1 : vector<64xf32> to vector<1x1x64xf32>
      %70 = vector.broadcast %69 : vector<1x1x64xf32> to vector<1x16x64xf32>
      %71 = arith.mulf %68, %70 : vector<1x16x64xf32>
      %72 = vector.shape_cast %3 : vector<64xf32> to vector<1x1x64xf32>
      %73 = vector.broadcast %72 : vector<1x1x64xf32> to vector<1x16x64xf32>
      %74 = arith.addf %71, %73 : vector<1x16x64xf32>
      %cst_74 = arith.constant 0.000000e+00 : f32
      %75 = vector.broadcast %cst_74 : f32 to vector<1x16x64xf32>
      %76 = arith.maximumf %74, %75 : vector<1x16x64xf32>
      %77 = arith.truncf %76 : vector<1x16x64xf32> to vector<1x16x64xbf16>
      %c0_75 = arith.constant 0 : index
      %c1_76 = arith.constant 1 : index
      %c0_77 = arith.constant 0 : index
      %78 = vector.load %arg11[%c0_75, %c1_76, %c0_77] : memref<10x18x64xbf16, #tpu.memory_space<vmem>>, vector<1x16x64xbf16>
      tpu.vector_store %arg11[%c0_75, %c1_76, %c0_77], %77 {strides = array<i32>} : memref<10x18x64xbf16, #tpu.memory_space<vmem>>, vector<1x16x64xbf16>,
    } else {
    }
    %c1_i32 = arith.constant 1 : i32
    %22 = arith.cmpi slt, %arg1, %c1_i32 : i32
    %23 = arith.extui %22 : i1 to i32
    %c0_i32_14 = arith.constant 0 : i32
    %24 = arith.cmpi ne, %23, %c0_i32_14 : i32
    scf.if %24 {
      %c0_70 = arith.constant 0 : index
      %c0_71 = arith.constant 0 : index
      %c0_72 = arith.constant 0 : index
      %c0_73 = arith.constant 0 : index
      %66 = vector.load %arg4[%c0_70, %c0_71, %c0_72, %c0_73] : memref<1x1x16x64xbf16, #tpu.memory_space<vmem>>, vector<1x1x16x64xbf16>
      %67 = vector.shape_cast %66 : vector<1x1x16x64xbf16> to vector<1x16x64xbf16>
      %68 = arith.extf %67 : vector<1x16x64xbf16> to vector<1x16x64xf32>
      %69 = vector.shape_cast %1 : vector<64xf32> to vector<1x1x64xf32>
      %70 = vector.broadcast %69 : vector<1x1x64xf32> to vector<1x16x64xf32>
      %71 = arith.mulf %68, %70 : vector<1x16x64xf32>
      %72 = vector.shape_cast %3 : vector<64xf32> to vector<1x1x64xf32>
      %73 = vector.broadcast %72 : vector<1x1x64xf32> to vector<1x16x64xf32>
      %74 = arith.addf %71, %73 : vector<1x16x64xf32>
      %cst_74 = arith.constant 0.000000e+00 : f32
      %75 = vector.broadcast %cst_74 : f32 to vector<1x16x64xf32>
      %76 = arith.maximumf %74, %75 : vector<1x16x64xf32>
      %77 = arith.truncf %76 : vector<1x16x64xf32> to vector<1x16x64xbf16>
      %c9 = arith.constant 9 : index
      %c1_75 = arith.constant 1 : index
      %c0_76 = arith.constant 0 : index
      %78 = vector.load %arg11[%c9, %c1_75, %c0_76] : memref<10x18x64xbf16, #tpu.memory_space<vmem>>, vector<1x16x64xbf16>
      tpu.vector_store %arg11[%c9, %c1_75, %c0_76], %77 {strides = array<i32>} : memref<10x18x64xbf16, #tpu.memory_space<vmem>>, vector<1x16x64xbf16>,
    } else {
    }
    %c0_15 = arith.constant 0 : index
    %c0_16 = arith.constant 0 : index
    %c0_17 = arith.constant 0 : index
    %25 = vector.load %arg11[%c0_15, %c0_16, %c0_17] : memref<10x18x64xbf16, #tpu.memory_space<vmem>>, vector<8x16x64xbf16>
    %26 = vector.shape_cast %25 : vector<8x16x64xbf16> to vector<128x64xbf16>
    %c0_18 = arith.constant 0 : index
    %c0_19 = arith.constant 0 : index
    %27 = vector.load %arg12[%c0_18, %c0_19] : memref<128x576xbf16, #tpu.memory_space<vmem>>, vector<128x64xbf16>
    tpu.vector_store %arg12[%c0_18, %c0_19], %26 {strides = array<i32>} : memref<128x576xbf16, #tpu.memory_space<vmem>>, vector<128x64xbf16>,
    %c0_20 = arith.constant 0 : index
    %c1_21 = arith.constant 1 : index
    %c0_22 = arith.constant 0 : index
    %28 = vector.load %arg11[%c0_20, %c1_21, %c0_22] : memref<10x18x64xbf16, #tpu.memory_space<vmem>>, vector<8x16x64xbf16>
    %29 = vector.shape_cast %28 : vector<8x16x64xbf16> to vector<128x64xbf16>
    %c0_23 = arith.constant 0 : index
    %c64 = arith.constant 64 : index
    %30 = vector.load %arg12[%c0_23, %c64] : memref<128x576xbf16, #tpu.memory_space<vmem>>, vector<128x64xbf16>
    tpu.vector_store %arg12[%c0_23, %c64], %29 {strides = array<i32>} : memref<128x576xbf16, #tpu.memory_space<vmem>>, vector<128x64xbf16>,
    %c0_24 = arith.constant 0 : index
    %c2 = arith.constant 2 : index
    %c0_25 = arith.constant 0 : index
    %31 = vector.load %arg11[%c0_24, %c2, %c0_25] : memref<10x18x64xbf16, #tpu.memory_space<vmem>>, vector<8x16x64xbf16>
    %32 = vector.shape_cast %31 : vector<8x16x64xbf16> to vector<128x64xbf16>
    %c0_26 = arith.constant 0 : index
    %c128 = arith.constant 128 : index
    %33 = vector.load %arg12[%c0_26, %c128] : memref<128x576xbf16, #tpu.memory_space<vmem>>, vector<128x64xbf16>
    tpu.vector_store %arg12[%c0_26, %c128], %32 {strides = array<i32>} : memref<128x576xbf16, #tpu.memory_space<vmem>>, vector<128x64xbf16>,
    %c1_27 = arith.constant 1 : index
    %c0_28 = arith.constant 0 : index
    %c0_29 = arith.constant 0 : index
    %34 = vector.load %arg11[%c1_27, %c0_28, %c0_29] : memref<10x18x64xbf16, #tpu.memory_space<vmem>>, vector<8x16x64xbf16>
    %35 = vector.shape_cast %34 : vector<8x16x64xbf16> to vector<128x64xbf16>
    %c0_30 = arith.constant 0 : index
    %c192 = arith.constant 192 : index
    %36 = vector.load %arg12[%c0_30, %c192] : memref<128x576xbf16, #tpu.memory_space<vmem>>, vector<128x64xbf16>
    tpu.vector_store %arg12[%c0_30, %c192], %35 {strides = array<i32>} : memref<128x576xbf16, #tpu.memory_space<vmem>>, vector<128x64xbf16>,
    %c1_31 = arith.constant 1 : index
    %c1_32 = arith.constant 1 : index
    %c0_33 = arith.constant 0 : index
    %37 = vector.load %arg11[%c1_31, %c1_32, %c0_33] : memref<10x18x64xbf16, #tpu.memory_space<vmem>>, vector<8x16x64xbf16>
    %38 = vector.shape_cast %37 : vector<8x16x64xbf16> to vector<128x64xbf16>
    %c0_34 = arith.constant 0 : index
    %c256 = arith.constant 256 : index
    %39 = vector.load %arg12[%c0_34, %c256] : memref<128x576xbf16, #tpu.memory_space<vmem>>, vector<128x64xbf16>
    tpu.vector_store %arg12[%c0_34, %c256], %38 {strides = array<i32>} : memref<128x576xbf16, #tpu.memory_space<vmem>>, vector<128x64xbf16>,
    %c1_35 = arith.constant 1 : index
    %c2_36 = arith.constant 2 : index
    %c0_37 = arith.constant 0 : index
    %40 = vector.load %arg11[%c1_35, %c2_36, %c0_37] : memref<10x18x64xbf16, #tpu.memory_space<vmem>>, vector<8x16x64xbf16>
    %41 = vector.shape_cast %40 : vector<8x16x64xbf16> to vector<128x64xbf16>
    %c0_38 = arith.constant 0 : index
    %c320 = arith.constant 320 : index
    %42 = vector.load %arg12[%c0_38, %c320] : memref<128x576xbf16, #tpu.memory_space<vmem>>, vector<128x64xbf16>
    tpu.vector_store %arg12[%c0_38, %c320], %41 {strides = array<i32>} : memref<128x576xbf16, #tpu.memory_space<vmem>>, vector<128x64xbf16>,
    %c2_39 = arith.constant 2 : index
    %c0_40 = arith.constant 0 : index
    %c0_41 = arith.constant 0 : index
    %43 = vector.load %arg11[%c2_39, %c0_40, %c0_41] : memref<10x18x64xbf16, #tpu.memory_space<vmem>>, vector<8x16x64xbf16>
    %44 = vector.shape_cast %43 : vector<8x16x64xbf16> to vector<128x64xbf16>
    %c0_42 = arith.constant 0 : index
    %c384 = arith.constant 384 : index
    %45 = vector.load %arg12[%c0_42, %c384] : memref<128x576xbf16, #tpu.memory_space<vmem>>, vector<128x64xbf16>
    tpu.vector_store %arg12[%c0_42, %c384], %44 {strides = array<i32>} : memref<128x576xbf16, #tpu.memory_space<vmem>>, vector<128x64xbf16>,
    %c2_43 = arith.constant 2 : index
    %c1_44 = arith.constant 1 : index
    %c0_45 = arith.constant 0 : index
    %46 = vector.load %arg11[%c2_43, %c1_44, %c0_45] : memref<10x18x64xbf16, #tpu.memory_space<vmem>>, vector<8x16x64xbf16>
    %47 = vector.shape_cast %46 : vector<8x16x64xbf16> to vector<128x64xbf16>
    %c0_46 = arith.constant 0 : index
    %c448 = arith.constant 448 : index
    %48 = vector.load %arg12[%c0_46, %c448] : memref<128x576xbf16, #tpu.memory_space<vmem>>, vector<128x64xbf16>
    tpu.vector_store %arg12[%c0_46, %c448], %47 {strides = array<i32>} : memref<128x576xbf16, #tpu.memory_space<vmem>>, vector<128x64xbf16>,
    %c2_47 = arith.constant 2 : index
    %c2_48 = arith.constant 2 : index
    %c0_49 = arith.constant 0 : index
    %49 = vector.load %arg11[%c2_47, %c2_48, %c0_49] : memref<10x18x64xbf16, #tpu.memory_space<vmem>>, vector<8x16x64xbf16>
    %50 = vector.shape_cast %49 : vector<8x16x64xbf16> to vector<128x64xbf16>
    %c0_50 = arith.constant 0 : index
    %c512 = arith.constant 512 : index
    %51 = vector.load %arg12[%c0_50, %c512] : memref<128x576xbf16, #tpu.memory_space<vmem>>, vector<128x64xbf16>
    tpu.vector_store %arg12[%c0_50, %c512], %50 {strides = array<i32>} : memref<128x576xbf16, #tpu.memory_space<vmem>>, vector<128x64xbf16>,
    %c0_51 = arith.constant 0 : index
    %c0_52 = arith.constant 0 : index
    %52 = vector.load %arg12[%c0_51, %c0_52] : memref<128x576xbf16, #tpu.memory_space<vmem>>, vector<128x576xbf16>
    %c0_53 = arith.constant 0 : index
    %c0_54 = arith.constant 0 : index
    %53 = vector.load %arg5[%c0_53, %c0_54] : memref<576x128xbf16, #tpu.memory_space<vmem>>, vector<576x128xbf16>
    %cst_55 = arith.constant dense<0.000000e+00> : vector<128x128xf32>
    %54 = tpu.matmul %52, %53, %cst_55 {dimension_numbers = #tpu.dot_dimension_numbers<[1], [0], [0], [1], [0, 0, 1, 1], [], []>} : vector<128x576xbf16>, vector<576x128xbf16>, vector<128x128xf32> -> vector<128x128xf32>
    %cst_56 = arith.constant dense<0.000000e+00> : vector<128xf32>
    %55 = vector.multi_reduction <add>, %54, %cst_56 [0] : vector<128x128xf32> to vector<128xf32>
    %56 = vector.shape_cast %55 : vector<128xf32> to vector<1x128xf32>
    %57 = vector.shape_cast %56 : vector<1x128xf32> to vector<1x1x1x128xf32>
    %c0_57 = arith.constant 0 : index
    %c0_58 = arith.constant 0 : index
    %c0_59 = arith.constant 0 : index
    %c0_60 = arith.constant 0 : index
    %58 = vector.load %arg10[%c0_57, %c0_58, %c0_59, %c0_60] : memref<1x1x2x128xf32, #tpu.memory_space<vmem>>, vector<1x1x1x128xf32>
    tpu.vector_store %arg10[%c0_57, %c0_58, %c0_59, %c0_60], %57 {strides = array<i32>} : memref<1x1x2x128xf32, #tpu.memory_space<vmem>>, vector<1x1x1x128xf32>,
    %59 = arith.mulf %54, %54 : vector<128x128xf32>
    %cst_61 = arith.constant dense<0.000000e+00> : vector<128xf32>
    %60 = vector.multi_reduction <add>, %59, %cst_61 [0] : vector<128x128xf32> to vector<128xf32>
    %61 = vector.shape_cast %60 : vector<128xf32> to vector<1x128xf32>
    %62 = vector.shape_cast %61 : vector<1x128xf32> to vector<1x1x1x128xf32>
    %c0_62 = arith.constant 0 : index
    %c0_63 = arith.constant 0 : index
    %c1_64 = arith.constant 1 : index
    %c0_65 = arith.constant 0 : index
    %63 = vector.load %arg10[%c0_62, %c0_63, %c1_64, %c0_65] : memref<1x1x2x128xf32, #tpu.memory_space<vmem>>, vector<1x1x1x128xf32>
    tpu.vector_store %arg10[%c0_62, %c0_63, %c1_64, %c0_65], %62 {strides = array<i32>} : memref<1x1x2x128xf32, #tpu.memory_space<vmem>>, vector<1x1x1x128xf32>,
    %64 = vector.shape_cast %54 : vector<128x128xf32> to vector<1x8x16x128xf32>
    %c0_66 = arith.constant 0 : index
    %c0_67 = arith.constant 0 : index
    %c0_68 = arith.constant 0 : index
    %c0_69 = arith.constant 0 : index
    %65 = vector.load %arg9[%c0_66, %c0_67, %c0_68, %c0_69] : memref<1x8x16x128xf32, #tpu.memory_space<vmem>>, vector<1x8x16x128xf32>
    tpu.vector_store %arg9[%c0_66, %c0_67, %c0_68, %c0_69], %64 {strides = array<i32>} : memref<1x8x16x128xf32, #tpu.memory_space<vmem>>, vector<1x8x16x128xf32>,
    return
  }
  func.func @transform_0(%arg0: i32, %arg1: i32) -> (i32, i32, i32, i32) {
    %c0_i32 = arith.constant 0 : i32
    %c0_i32_0 = arith.constant 0 : i32
    %c0_i32_1 = arith.constant 0 : i32
    return %arg0, %arg1, %c0_i32, %c0_i32_0 : i32, i32, i32, i32
  }
  func.func @transform_1(%arg0: i32, %arg1: i32) -> (i32, i32, i32, i32) {
    %c8_i32 = arith.constant 8 : i32
    %0 = arith.muli %arg1, %c8_i32 : i32
    %c1_i32 = arith.constant 1 : i32
    %1 = arith.subi %0, %c1_i32 : i32
    %c0_i32 = arith.constant 0 : i32
    %2 = arith.maxsi %1, %c0_i32 : i32
    %c0_i32_0 = arith.constant 0 : i32
    %c0_i32_1 = arith.constant 0 : i32
    %c0_i32_2 = arith.constant 0 : i32
    return %arg0, %2, %c0_i32_0, %c0_i32_1 : i32, i32, i32, i32
  }
  func.func @transform_2(%arg0: i32, %arg1: i32) -> (i32, i32, i32, i32) {
    %c8_i32 = arith.constant 8 : i32
    %0 = arith.muli %arg1, %c8_i32 : i32
    %c8_i32_0 = arith.constant 8 : i32
    %1 = arith.addi %0, %c8_i32_0 : i32
    %c15_i32 = arith.constant 15 : i32
    %2 = arith.minsi %1, %c15_i32 : i32
    %c0_i32 = arith.constant 0 : i32
    %c0_i32_1 = arith.constant 0 : i32
    %c0_i32_2 = arith.constant 0 : i32
    return %arg0, %2, %c0_i32, %c0_i32_1 : i32, i32, i32, i32
  }
  func.func @transform_3(%arg0: i32, %arg1: i32) -> (i32, i32) {
    %c0_i32 = arith.constant 0 : i32
    %c0_i32_0 = arith.constant 0 : i32
    %c0_i32_1 = arith.constant 0 : i32
    return %c0_i32, %c0_i32_0 : i32, i32
  }
  func.func @transform_4(%arg0: i32, %arg1: i32) -> (i32, i32) {
    %c0_i32 = arith.constant 0 : i32
    %c0_i32_0 = arith.constant 0 : i32
    %c0_i32_1 = arith.constant 0 : i32
    return %c0_i32, %c0_i32_0 : i32, i32
  }
  func.func @transform_5(%arg0: i32, %arg1: i32) -> (i32, i32) {
    %c0_i32 = arith.constant 0 : i32
    %c0_i32_0 = arith.constant 0 : i32
    %c0_i32_1 = arith.constant 0 : i32
    return %c0_i32, %c0_i32_0 : i32, i32
  }
  func.func @transform_6(%arg0: i32, %arg1: i32) -> (i32, i32) {
    %c0_i32 = arith.constant 0 : i32
    %c0_i32_0 = arith.constant 0 : i32
    %c0_i32_1 = arith.constant 0 : i32
    return %c0_i32, %c0_i32_0 : i32, i32
  }
  func.func @transform_7(%arg0: i32, %arg1: i32) -> (i32, i32, i32, i32) {
    %c0_i32 = arith.constant 0 : i32
    %c0_i32_0 = arith.constant 0 : i32
    %c0_i32_1 = arith.constant 0 : i32
    return %arg0, %arg1, %c0_i32, %c0_i32_0 : i32, i32, i32, i32
  }
  func.func @transform_8(%arg0: i32, %arg1: i32) -> (i32, i32, i32, i32) {
    %c0_i32 = arith.constant 0 : i32
    %c0_i32_0 = arith.constant 0 : i32
    %c0_i32_1 = arith.constant 0 : i32
    return %arg0, %arg1, %c0_i32, %c0_i32_0 : i32, i32, i32, i32
  }
}

</mosaic_0001>

<bundles_post_ra>
// kernel: dncnn_forward.22
= control target key start
LH: loop header
LB: loop body
LE: loop exit
PB: predicated region body
PF: predicated region fallthrough
CT: control target
= control target key end

     0   :  { %s4444_s0 = inlined_call_operand.vmem [shape: f32[2,16,16,3], index: 0, kind: input, shape index: {}, may-alias: {0,1,2}]   ;;  %s4445_s1 = inlined_call_operand.vmem [shape: f32[2,16,16,3], index: 1, kind: input, shape index: {}, may-alias: {0,1,2}]   ;;  %s4446_s2 = inlined_call_operand.vmem [shape: f32[2,16,16,3], index: 2, kind: input, shape index: {}, may-alias: {0,1,2}]   ;;  %s4447_s3 = inlined_call_operand.vmem [shape: bf16[27,64], index: 3, kind: input, shape index: {}]   ;;  %s4448_s4 = inlined_call_operand.vmem [shape: f32[1,3], index: 4, kind: input, shape index: {}]   ;;  %s4449_s5 = inlined_call_operand.vmem [shape: f32[1,3], index: 5, kind: input, shape index: {}]   ;;  %s4450_s6 = inlined_call_operand.vmem [shape: f32[1,64], index: 6, kind: input, shape index: {}]   ;;  %s4451_s7 = inlined_call_operand.vmem [shape: bf16[2,16,16,64], index: 7, kind: output, shape index: {0}]   ;;  %s4452_s8 = inlined_call_operand.hbm [shape: f32[2,2,2,64], index: 8, kind: output, shape index: {1}]  }
   0x1   :  { %4457 = sst [smem:[#allocation10_spill]] %s4444_s0 }
   0x2   :  { %14 = vsyncpa [#allocation5], 0 }
   0x3   :  { %16 = vsyncpa [#allocation5 + $0x1], 0  ;;  %s3500_s27 = smov 0   ;;  %s3502_s28 = smov 0  }
   0x4   :  { %s3504_s29 = smov 0   ;;  %s3506_s4 = smov 0  }
   0x5   :  { %s3508_s5 = smov 0   ;;  %s3510_s30 = smov 0  }
   0x6   :  { %s3512_s9 = smov 0   ;;  %s3514_s10 = smov 0  }
   0x7 LB: > { %4458 = sst [smem:[#allocation7_spill]] %s3438_s9  ;;  %s3064_s11 = sadd.s32 4294967295, %s3442_s10   ;;  %s3442_s10 = sphi %s3514_s10, %s22_s10   ;;  %s3438_s9 = sphi %s3512_s9, %s4478_s9   ;;  %s3434_s30 = sphi %s3510_s30, %s4483_s30   ;;  %s3430_s5 = sphi %s3508_s5, %s4476_s5   ;;  %s3426_s4 = sphi %s3506_s4, %s4482_s4   ;;  %s3422_s29 = sphi %s3504_s29, %s4481_s29   ;;  %s3418_s28 = sphi %s3502_s28, %s4480_s28   ;;  %s3414_s27 = sphi %s3500_s27, %s4479_s27  }
   0x8   : > { %s3065_s12 = sadd.s32 4294967294, %s3442_s10   ;;  %s31_s13 = sadd.s32 1, %s3434_s30 }
   0x9   : > { %p32_p0 = scmp.ge.s32.totalorder %s31_s13, 2  ;;  %s34_s14 = sadd.s32 1, %s3438_s9 }
   0xa   : > { %p265_p1 = scmp.ne.s32.totalorder %s3422_s29, %s3418_s28  ;;  %p266_p2 = scmp.eq.s32.totalorder %s3064_s11, 3 }
   0xb   : > { %s4485_s13 = smov (%p32_p0, %s31_s13), 0  ;;  %s4487_s14 = smov (!%p32_p0, %s34_s14), %s3438_s9 }
   0xc   : > { %4459 = sst [smem:[#allocation8_spill]] %s4485_s13  ;;  %s251_s15 = ssub.s32 %s3434_s30, %s4485_s13 }
   0xd   : > { %p3551_p3 = por %p266_p2, %p265_p1  ;;  %p36_p4 = scmp.ge.s32.totalorder %s4487_s14, 2 }
   0xe   : > { %p271_p5 = scmp.ne.s32.totalorder %s3418_s28, %s3414_s27  ;;  %p272_p6 = scmp.eq.s32.totalorder %s3065_s12, 3 }
   0xf   : > { %p3074_p7 = scmp.ge.s32.totalorder %s3442_s10, 1  ;;  %s4489_s14 = smov (%p36_p4, %s4487_s14), 0 }
  0x10   : > { %4461 = sst [smem:[#allocation9_spill]] %s4489_s14  ;;  %p3560_p8 = por %p272_p6, %p271_p5 }
  0x11   : > { %p356_p9 = scmp.lt.s32.totalorder %s3442_s10, 5  ;;  %s250_s18 = ssub.s32 %s3438_s9, %s4489_s14 }
  0x12   : > { %s255_s19 = sadd.s32 1, %s3422_s29  ;;  %s252_s20 = sor.u32 %s251_s15, %s250_s18 }
  0x13   : > { %p357_p10 = pnand %p3074_p7, %p356_p9  ;;  %p253_p11 = scmp.eq.s32.totalorder %s252_s20, 0 }
  0x14   : > { %s4455_s22 = sand.u32 (!%p357_p10), 1, %s3418_s28   ;;  %s3573_s23 = sshll.u32 (!%p357_p10), %s3426_s4, 3 }
  0x15   : > { %s3569_s21 = scalar_select %p253_p11, %s3422_s29, %s255_s19  }
  0x16   : > { %360 = sbr.rel (%p357_p10) target bundleno = 726 (0x2d6), region = 48  ;;  %s3607_s24 = sshll.u32 (!%p357_p10), %s4455_s22, 1 }
  0x17   : > { %p432_p12 = scmp.lt.s32.totalorder (!%p357_p10), %s3430_s5, 1  ;;  %p434_p13 = scmp.lt.s32.totalorder (!%p357_p10), %s3573_s23, 15 }
  0x18   : > { %s3081_s12 = sadd.s32 (!%p357_p10), 4294967295, %s3573_s23  ;;  %s460_s20 = sadd.s32 (!%p357_p10), 8, %s3573_s23 }
  0x19   : > { %p444_p0 = scmp.gt.s32.totalorder (!%p357_p10), %s3081_s12, 0  ;;  %p3082_p1 = scmp.lt.s32.totalorder (!%p357_p10), %s3081_s12, 15 }
  0x1a   : > { %s4463_s0 = sld [smem:[#allocation10_spill]] (!%p357_p10)  ;;  %p3626_p2 = scmp.lt.s32.totalorder (!%p357_p10), %s460_s20, 15 }
  0x1b   : > { %vm488_vm0 = vcmask 19456   ;;  %vm491_vm1 = vcmask 16384   ;;  %v3444_v0 = vmov 0   ;;  %s433_s25 = scalar_select %p432_p12, %s3430_s5, 1  ;;  %vm749_vm2 = vsmask.f32 7938 }
  0x1c   : > { %493 = vst.msk [vmem:[#allocation2 + $0xc] sm:$0xf] %vm488_vm0, %v3444_v0  ;;  %489 = vst.msk [vmem:[#allocation2] sm:$0xf] %vm488_vm0, %v3444_v0  ;;  %s435_s26 = scalar_select %p434_p13, %s3573_s23, 15 }
  0x1d   : > { %490 = vst.msk [vmem:[#allocation2 + $0x4] sm:$0xf] %vm488_vm0, %v3444_v0  ;;  %494 = vst.msk [vmem:[#allocation2 + $0x10] sm:$0xf] %vm488_vm0, %v3444_v0  ;;  %s3613_s11 = sshll.u32 %s433_s25, 5  ;;  %s4491_s20 = smov (!%p3626_p2, %s460_s20), 15 }
  0x1e   : > { %496 = vst.msk [vmem:[#allocation2 + $0x18] sm:$0xf] %vm488_vm0, %v3444_v0  ;;  %497 = vst.msk [vmem:[#allocation2 + $0x1c] sm:$0xf] %vm488_vm0, %v3444_v0  ;;  %s3077_s15 = sshll.u32 %s435_s26, 1  ;;  %s4495_s20 = smov (!%p3626_p2, %s4491_s20), 15 }
  0x1f   : > { %499 = vst.msk [vmem:[#allocation2 + $0x24] sm:$0xf] %vm488_vm0, %v3444_v0  ;;  %500 = vst.msk [vmem:[#allocation2 + $0x28] sm:$0xf] %vm488_vm0, %v3444_v0  ;;  %s3617_s18 = sadd.s32 %s3613_s11, %s3077_s15  ;;  %vm584_vm3 = vsmask.f32 256 }
  0x20   : > { %502 = vst.msk [vmem:[#allocation2 + $0x30] sm:$0xf] %vm488_vm0, %v3444_v0  ;;  %503 = vst.msk [vmem:[#allocation2 + $0x34] sm:$0xf] %vm488_vm0, %v3444_v0  ;;  %s3079_s19 = sshll.u32 %s3617_s18, 3  ;;  %s3100_s14 = sshll.u32 %s3617_s18, 2 }
  0x21   : > { %505 = vst.msk [vmem:[#allocation2 + $0x3c] sm:$0xf] %vm488_vm0, %v3444_v0  ;;  %506 = vst.msk [vmem:[#allocation2 + $0x40] sm:$0xf] %vm488_vm0, %v3444_v0  ;;  %s3624_s22 = scalar_lea.vmem %s4463_s0, %s3079_s19  ;;  %vm585_vm4 = vsmask.f32 4368 }
  0x22   : > { %508 = vst.msk [vmem:[#allocation2 + $0x48] sm:$0xf] %vm488_vm0, %v3444_v0  ;;  %509 = vst.msk [vmem:[#allocation2 + $0x4c] sm:$0xf] %vm488_vm0, %v3444_v0  ;;  %s445_s26 = scalar_select %p444_p0, %s3081_s12, 0  ;;  %v520_v1 = vld [vmem:[%s3624_s22] sm:$0xff] }
  0x23   : > { %511 = vst.msk [vmem:[#allocation2 + $0x54] sm:$0xf] %vm488_vm0, %v3444_v0  ;;  %512 = vst.msk [vmem:[#allocation2 + $0x58] sm:$0xf] %vm488_vm0, %v3444_v0  ;;  %v521_v2 = vld [vmem:[%s3624_s22 + $0x8] sm:$0xff]  ;;  %v522_v3 = vld [vmem:[%s3624_s22 + $0x10] sm:$0xff]  ;;  %v3189_v4 = vpack.c.bf16 %v520_v1, %v520_v1 }
  0x24   : > { %514 = vst.msk [vmem:[#allocation2 + $0x60] sm:$0xf] %vm488_vm0, %v3444_v0  ;;  %515 = vst.msk [vmem:[#allocation2 + $0x64] sm:$0xf] %vm488_vm0, %v3444_v0  ;;  %v3190_v5 = vpack.c.bf16 %v521_v2, %v521_v2  ;;  %v3191_v6 = vpack.c.bf16 %v522_v3, %v522_v3  ;;  %v523_v7 = vld [vmem:[%s3624_s22 + $0x18] sm:$0xff]  ;;  %v524_v8 = vld [vmem:[%s3624_s22 + $0x20] sm:$0xff] }
  0x25   : > { %517 = vst.msk [vmem:[#allocation2 + $0x6c] sm:$0xf] %vm488_vm0, %v3444_v0  ;;  %518 = vst.msk [vmem:[#allocation2 + $0x70] sm:$0xf] %vm488_vm0, %v3444_v0  ;;  %s4493_s26 = smov (!%p3082_p1, %s445_s26), 15  ;;  %v3192_v9 = vpack.c.bf16 %v523_v7, %v523_v7  ;;  %v3640_v10 = vpack.c.bf16 %v524_v8, %v524_v8  ;;  %v525_v11 = vld [vmem:[%s3624_s22 + $0x28] sm:$0xff] }
  0x26   : > { %495 = vst.msk [vmem:[#allocation2 + $0x14] sm:$0x1] %vm491_vm1, %v3444_v0  ;;  %492 = vst.msk [vmem:[#allocation2 + $0x8] sm:$0x1] %vm491_vm1, %v3444_v0  ;;  %v588_v12 = vshrl.u32 %v3189_v4, 16  ;;  %v591_v13 = vshll.u32 %v3189_v4, 16  ;;  %v3194_v33 = vpack.c.bf16 %v525_v11, %v525_v11 }
  0x27   : > { %498 = vst.msk [vmem:[#allocation2 + $0x20] sm:$0x1] %vm491_vm1, %v3444_v0  ;;  %501 = vst.msk [vmem:[#allocation2 + $0x2c] sm:$0x1] %vm491_vm1, %v3444_v0  ;;  %v596_v14 = vshrl.u32 %v3190_v5, 16  ;;  %v599_v15 = vshll.u32 %v3190_v5, 16 }
  0x28   : > { %504 = vst.msk [vmem:[#allocation2 + $0x38] sm:$0x1] %vm491_vm1, %v3444_v0  ;;  %507 = vst.msk [vmem:[#allocation2 + $0x44] sm:$0x1] %vm491_vm1, %v3444_v0  ;;  %v526_v16 = vld [vmem:[%s3624_s22 + $0x30] sm:$0xff]  ;;  %s3087_s13 = sshll.u32 %s4493_s26, 1 }
  0x29   : > { %510 = vst.msk [vmem:[#allocation2 + $0x50] sm:$0x1] %vm491_vm1, %v3444_v0  ;;  %513 = vst.msk [vmem:[#allocation2 + $0x5c] sm:$0x1] %vm491_vm1, %v3444_v0  ;;  %v751_v18 = vld [vmem:[#allocation2 + $0xc] sm:$0xf]  ;;  %s452_s23 = sadd.s32 %s3087_s13, %s3613_s11  ;;  %v3195_v34 = vpack.c.bf16 %v526_v16, %v526_v16 }
  0x2a   : > { %516 = vst.msk [vmem:[#allocation2 + $0x68] sm:$0x1] %vm491_vm1, %v3444_v0  ;;  %519 = vst.msk [vmem:[#allocation2 + $0x74] sm:$0x1] %vm491_vm1, %v3444_v0  ;;  %v605_v20 = vshrl.u32 %v3191_v6, 16  ;;  %v608_v21 = vshll.u32 %v3191_v6, 16 }
  0x2b   : > { %vm3650_vm5 = vmand %vm488_vm0, %vm749_vm2  ;;  %v613_v22 = vshrl.u32 %v3192_v9, 16  ;;  %v616_v23 = vshll.u32 %v3192_v9, 16  ;;  %s3094_s12 = sshll.u32 %s4495_s20, 1  ;;  %v590_v24 = vrot.slane %v588_v12, 7  ;;  %v598_v26 = vrot.slane %v596_v14, 7  ;;  %s3089_s15 = sshll.u32 %s452_s23, 3 }
  0x2c   : > { %vm3657_vm6 = vmor %vm584_vm3, %vm585_vm4  ;;  %v622_v27 = vshrl.u32 %v3640_v10, 16  ;;  %v625_v28 = vshll.u32 %v3640_v10, 16  ;;  %s469_s19 = sadd.s32 %s3094_s12, %s3613_s11  ;;  %v607_v30 = vrot.slane %v605_v20, 7  ;;  %v760_v31 = vld [vmem:[#allocation2 + $0x18] sm:$0xf]  ;;  %s3673_s26 = scalar_lea.vmem %s4445_s1, %s3089_s15  ;;  %v528_v49 = vld [vmem:[%s3624_s22 + $0x40] sm:$0xff] }
  0x2d   : > { %v757_v19 = vld [vmem:[#allocation2 + $0x14] sm:$0x1]  ;;  %vm3666_vm7 = vmand %vm491_vm1, %vm584_vm3  ;;  %v615_v32 = vrot.slane %v613_v22, 7  ;;  %s3096_s13 = sshll.u32 %s469_s19, 3  ;;  %v593_v35 = vor.u32 %v591_v13, %v590_v24  ;;  %v594_v36 = vrot.slane %v590_v24, 4  ;;  %v601_v37 = vor.u32 %v599_v15, %v598_v26  ;;  %s3685_s20 = scalar_lea.vmem %s4451_s7, %s3100_s14  ;;  %v527_v48 = vld [vmem:[%s3624_s22 + $0x38] sm:$0xff] }
  0x2e   : > { %v603_v38 = vrot.slane %v598_v26, 4  ;;  %v764_v39 = vld [vmem:[#allocation2 + $0x20] sm:$0x1]  ;;  %s3678_s12 = scalar_lea.vmem %s4446_s2, %s3096_s13  ;;  %v610_v40 = vor.u32 %v608_v21, %v607_v30  ;;  %v611_v41 = vrot.slane %v607_v30, 4  ;;  %v624_v47 = vrot.slane %v622_v27, 7  ;;  %v529_v55 = vld [vmem:[%s3624_s22 + $0x48] sm:$0xff] }
  0x2f   : > { %v618_v42 = vor.u32 %v616_v23, %v615_v32  ;;  %v620_v43 = vrot.slane %v615_v32, 4  ;;  %v752_v44 = vsel %vm3650_vm5, %v593_v35, %v751_v18  ;;  %v602_v45 = vsel %vm3657_vm6, %v594_v36, %v601_v37  ;;  %v767_v53 = vld [vmem:[#allocation2 + $0x24] sm:$0xf]  ;;  %v530_v56 = vld [vmem:[%s3624_s22 + $0x50] sm:$0xff]  ;;  %v771_v2 = vld [vmem:[#allocation2 + $0x2c] sm:$0x1] }
  0x30   : > { %v758_v46 = vsel %vm3666_vm7, %v603_v38, %v757_v19  ;;  %753 = vst [vmem:[#allocation2 + $0xc] sm:$0xf] %v752_v44  ;;  %754 = vst.msk [vmem:[#allocation2 + $0x10] sm:$0xf] %vm488_vm0, %v602_v45  ;;  %v761_v50 = vsel %vm3650_vm5, %v610_v40, %v760_v31  ;;  %v630_v54 = vshrl.u32 %v3194_v33, 16  ;;  %v627_v57 = vor.u32 %v625_v28, %v624_v47  ;;  %v531_v20 = vld [vmem:[%s3624_s22 + $0x58] sm:$0xff] }
  0x31   : > { %759 = vst [vmem:[#allocation2 + $0x14] sm:$0x1] %v758_v46  ;;  %v619_v51 = vsel %vm3657_vm6, %v611_v41, %v618_v42  ;;  %v765_v52 = vsel %vm3666_vm7, %v620_v43, %v764_v39  ;;  %762 = vst [vmem:[#allocation2 + $0x18] sm:$0xf] %v761_v50  ;;  %v628_v58 = vrot.slane %v624_v47, 4  ;;  %v633_v59 = vshll.u32 %v3194_v33, 16 }
  0x32   : > { %763 = vst.msk [vmem:[#allocation2 + $0x1c] sm:$0xf] %vm488_vm0, %v619_v51  ;;  %766 = vst [vmem:[#allocation2 + $0x20] sm:$0x1] %v765_v52  ;;  %v639_v60 = vshrl.u32 %v3195_v34, 16  ;;  %v632_v61 = vrot.slane %v630_v54, 7  ;;  %v3196_v63 = vpack.c.bf16 %v527_v48, %v527_v48  ;;  %v3197_v0 = vpack.c.bf16 %v528_v49, %v528_v49 }
  0x33   : > { %v642_v62 = vshll.u32 %v3195_v34, 16  ;;  %v768_v1 = vsel %vm3650_vm5, %v627_v57, %v767_v53  ;;  %v3198_v4 = vpack.c.bf16 %v529_v55, %v529_v55  ;;  %v3199_v5 = vpack.c.bf16 %v530_v56, %v530_v56  ;;  %v774_v8 = vld [vmem:[#allocation2 + $0x30] sm:$0xf]  ;;  %v778_v22 = vld [vmem:[#allocation2 + $0x38] sm:$0x1]  ;;  %v532_v38 = vld [vmem:[%s3624_s22 + $0x60] sm:$0xff] }
  0x34   : > { %v641_v3 = vrot.slane %v639_v60, 7  ;;  %769 = vst [vmem:[#allocation2 + $0x24] sm:$0xf] %v768_v1  ;;  %v635_v6 = vor.u32 %v633_v59, %v632_v61  ;;  %v637_v7 = vrot.slane %v632_v61, 4  ;;  %v647_v9 = vshrl.u32 %v3196_v63, 16  ;;  %v533_v44 = vld [vmem:[%s3624_s22 + $0x68] sm:$0xff] }
  0x35   : > { %v650_v10 = vshll.u32 %v3196_v63, 16  ;;  %v656_v13 = vshrl.u32 %v3197_v0, 16  ;;  %v659_v14 = vshll.u32 %v3197_v0, 16  ;;  %v664_v19 = vshrl.u32 %v3198_v4, 16  ;;  %v781_v30 = vld [vmem:[#allocation2 + $0x3c] sm:$0xf] }
  0x36   : > { %v644_v11 = vor.u32 %v642_v62, %v641_v3  ;;  %v645_v12 = vrot.slane %v641_v3, 4  ;;  %v636_v15 = vsel %vm3657_vm6, %v628_v58, %v635_v6  ;;  %v772_v16 = vsel %vm3666_vm7, %v637_v7, %v771_v2  ;;  %v785_v35 = vld [vmem:[#allocation2 + $0x44] sm:$0x1]  ;;  %v788_v43 = vld [vmem:[#allocation2 + $0x48] sm:$0xf]  ;;  %v534_v45 = vld [vmem:[%s3624_s22 + $0x70] sm:$0xff] }
  0x37   : > { %v649_v18 = vrot.slane %v647_v9, 7  ;;  %770 = vst.msk [vmem:[#allocation2 + $0x28] sm:$0xf] %vm488_vm0, %v636_v15  ;;  %773 = vst [vmem:[#allocation2 + $0x2c] sm:$0x1] %v772_v16  ;;  %v658_v23 = vrot.slane %v656_v13, 7  ;;  %v3200_v37 = vpack.c.bf16 %v531_v20, %v531_v20  ;;  %v3201_v54 = vpack.c.bf16 %v532_v38, %v532_v38 }
  0x38   : > { %v775_v21 = vsel %vm3650_vm5, %v644_v11, %v774_v8  ;;  %v667_v24 = vshll.u32 %v3198_v4, 16  ;;  %v673_v26 = vshrl.u32 %v3199_v5, 16  ;;  %v666_v31 = vrot.slane %v664_v19, 7  ;;  %v535_v50 = vld [vmem:[%s3624_s22 + $0x78] sm:$0xff]  ;;  %v792_v59 = vld [vmem:[#allocation2 + $0x50] sm:$0x1] }
  0x39   : > { %776 = vst [vmem:[#allocation2 + $0x30] sm:$0xf] %v775_v21  ;;  %v652_v27 = vor.u32 %v650_v10, %v649_v18  ;;  %v654_v28 = vrot.slane %v649_v18, 4  ;;  %v676_v32 = vshll.u32 %v3199_v5, 16  ;;  %v661_v33 = vor.u32 %v659_v14, %v658_v23  ;;  %v795_v9 = vld [vmem:[#allocation2 + $0x54] sm:$0xf] }
  0x3a   : > { %v662_v34 = vrot.slane %v658_v23, 4  ;;  %v675_v36 = vrot.slane %v673_v26, 7  ;;  %v669_v41 = vor.u32 %v667_v24, %v666_v31  ;;  %v671_v42 = vrot.slane %v666_v31, 4  ;;  %v799_v14 = vld [vmem:[#allocation2 + $0x5c] sm:$0x1]  ;;  %s3753_s0 = scalar_lea.vmem [#allocation4], %s3607_s24 }
  0x3b   : > { %v653_v39 = vsel %vm3657_vm6, %v645_v12, %v652_v27  ;;  %v779_v40 = vsel %vm3666_vm7, %v654_v28, %v778_v22  ;;  %v782_v46 = vsel %vm3650_vm5, %v661_v33, %v781_v30  ;;  %v681_v49 = vshrl.u32 %v3200_v37, 16  ;;  %v802_v20 = vld [vmem:[#allocation2 + $0x60] sm:$0xf]  ;;  %v806_v26 = vld [vmem:[#allocation2 + $0x68] sm:$0x1]  ;;  %p3117_p4 = scmp.le.s32.totalorder %s3426_s4, 0 }
  0x3c   : > { %777 = vst.msk [vmem:[#allocation2 + $0x34] sm:$0xf] %vm488_vm0, %v653_v39  ;;  %780 = vst [vmem:[#allocation2 + $0x38] sm:$0x1] %v779_v40  ;;  %v678_v47 = vor.u32 %v676_v32, %v675_v36  ;;  %v679_v48 = vrot.slane %v675_v36, 4  ;;  %v670_v51 = vsel %vm3657_vm6, %v662_v34, %v669_v41  ;;  %v786_v52 = vsel %vm3666_vm7, %v671_v42, %v785_v35 }
  0x3d   : > { %783 = vst [vmem:[#allocation2 + $0x3c] sm:$0xf] %v782_v46  ;;  %v684_v53 = vshll.u32 %v3200_v37, 16  ;;  %784 = vst.msk [vmem:[#allocation2 + $0x40] sm:$0xf] %vm488_vm0, %v670_v51  ;;  %v683_v56 = vrot.slane %v681_v49, 7  ;;  %v3202_v57 = vpack.c.bf16 %v533_v44, %v533_v44  ;;  %v3203_v58 = vpack.c.bf16 %v534_v45, %v534_v45 }
  0x3e   : > { %787 = vst [vmem:[#allocation2 + $0x44] sm:$0x1] %v786_v52  ;;  %v789_v55 = vsel %vm3650_vm5, %v678_v47, %v788_v43  ;;  %v690_v60 = vshrl.u32 %v3201_v54, 16  ;;  %v693_v61 = vshll.u32 %v3201_v54, 16  ;;  %v3204_v62 = vpack.c.bf16 %v535_v50, %v535_v50 }
  0x3f   : > { %790 = vst [vmem:[#allocation2 + $0x48] sm:$0xf] %v789_v55  ;;  %v686_v63 = vor.u32 %v684_v53, %v683_v56  ;;  %v688_v0 = vrot.slane %v683_v56, 4  ;;  %v698_v1 = vshrl.u32 %v3202_v57, 16  ;;  %v701_v2 = vshll.u32 %v3202_v57, 16 }
  0x40   : > { %v692_v3 = vrot.slane %v690_v60, 7  ;;  %v707_v4 = vshrl.u32 %v3203_v58, 16  ;;  %v710_v5 = vshll.u32 %v3203_v58, 16  ;;  %v715_v6 = vshrl.u32 %v3204_v62, 16 }
  0x41   : > { %v687_v7 = vsel %vm3657_vm6, %v679_v48, %v686_v63  ;;  %v793_v8 = vsel %vm3666_vm7, %v688_v0, %v792_v59  ;;  %v700_v10 = vrot.slane %v698_v1, 7  ;;  %v718_v11 = vshll.u32 %v3204_v62, 16 }
  0x42   : > { %791 = vst.msk [vmem:[#allocation2 + $0x4c] sm:$0xf] %vm488_vm0, %v687_v7  ;;  %794 = vst [vmem:[#allocation2 + $0x50] sm:$0x1] %v793_v8  ;;  %v695_v12 = vor.u32 %v693_v61, %v692_v3  ;;  %v696_v13 = vrot.slane %v692_v3, 4  ;;  %v709_v15 = vrot.slane %v707_v4, 7 }
  0x43   : > { %v717_v16 = vrot.slane %v715_v6, 7  ;;  %v703_v18 = vor.u32 %v701_v2, %v700_v10  ;;  %v705_v19 = vrot.slane %v700_v10, 4 }
  0x44   : > { %v796_v21 = vsel %vm3650_vm5, %v695_v12, %v795_v9  ;;  %v712_v22 = vor.u32 %v710_v5, %v709_v15  ;;  %v713_v23 = vrot.slane %v709_v15, 4  ;;  %812 = sbr.rel (%p3117_p4) target bundleno = 85 (0x55), region = 52 }
  0x45   : > { %v720_v24 = vor.u32 %v718_v11, %v717_v16  ;;  %797 = vst [vmem:[#allocation2 + $0x54] sm:$0xf] %v796_v21  ;;  %v704_v27 = vsel %vm3657_vm6, %v696_v13, %v703_v18  ;;  %v800_v28 = vsel %vm3666_vm7, %v705_v19, %v799_v14  ;;  %v722_v30 = vrot.slane %v717_v16, 4 }
  0x46   : > { %798 = vst.msk [vmem:[#allocation2 + $0x58] sm:$0xf] %vm488_vm0, %v704_v27  ;;  %801 = vst [vmem:[#allocation2 + $0x5c] sm:$0x1] %v800_v28  ;;  %v803_v31 = vsel %vm3650_vm5, %v712_v22, %v802_v20 }
  0x47   : > { %v721_v32 = vsel %vm3657_vm6, %v713_v23, %v720_v24  ;;  %804 = vst [vmem:[#allocation2 + $0x60] sm:$0xf] %v803_v31  ;;  %v807_v33 = vsel %vm3666_vm7, %v722_v30, %v806_v26 }
  0x48   : > { %805 = vst.msk [vmem:[#allocation2 + $0x64] sm:$0xf] %vm488_vm0, %v721_v32  ;;  %808 = vst [vmem:[#allocation2 + $0x68] sm:$0x1] %v807_v33 }
  0x49   : > { %v813_v34 = vld [vmem:[%s3673_s26] sm:$0xff]  ;;  %v814_v35 = vld [vmem:[%s3673_s26 + $0x8] sm:$0xff] }
  0x4a   : > { %v3205_v36 = vpack.c.bf16 %v813_v34, %v813_v34  ;;  %v3206_v37 = vpack.c.bf16 %v814_v35, %v814_v35  ;;  %v841_v44 = vld [vmem:[#allocation2] sm:$0xf]  ;;  %v845_v45 = vld [vmem:[#allocation2 + $0x8] sm:$0x1] }
  0x4c   : > { %v822_v38 = vshrl.u32 %v3205_v36, 16  ;;  %v825_v39 = vshll.u32 %v3205_v36, 16  ;;  %v830_v40 = vshrl.u32 %v3206_v37, 16  ;;  %v833_v41 = vshll.u32 %v3206_v37, 16 }
  0x4e   : > { %v824_v42 = vrot.slane %v822_v38, 7  ;;  %v832_v43 = vrot.slane %v830_v40, 7 }
  0x50   : > { %v827_v46 = vor.u32 %v825_v39, %v824_v42  ;;  %v828_v47 = vrot.slane %v824_v42, 4  ;;  %v835_v48 = vor.u32 %v833_v41, %v832_v43  ;;  %v837_v49 = vrot.slane %v832_v43, 4 }
  0x52   : > { %v842_v50 = vsel %vm3650_vm5, %v827_v46, %v841_v44  ;;  %v836_v51 = vsel %vm3657_vm6, %v828_v47, %v835_v48  ;;  %v846_v52 = vsel %vm3666_vm7, %v837_v49, %v845_v45 }
  0x53   : > { %843 = vst [vmem:[#allocation2] sm:$0xf] %v842_v50  ;;  %844 = vst.msk [vmem:[#allocation2 + $0x4] sm:$0xf] %vm488_vm0, %v836_v51 }
  0x54   : > { %847 = vst [vmem:[#allocation2 + $0x8] sm:$0x1] %v846_v52 }
  0x55 PF: > { %p3120_p5 = scmp.ge.s32.totalorder %s3426_s4, 1 }
  0x57   : > { %851 = sbr.rel (%p3120_p5) target bundleno = 104 (0x68), region = 56 }
  0x5c   : > { %v852_v53 = vld [vmem:[%s3678_s12] sm:$0xff]  ;;  %v853_v54 = vld [vmem:[%s3678_s12 + $0x8] sm:$0xff]  ;;  %v885_v0 = vld [vmem:[#allocation2 + $0x74] sm:$0x1] }
  0x5d   : > { %v3207_v55 = vpack.c.bf16 %v852_v53, %v852_v53  ;;  %v3208_v56 = vpack.c.bf16 %v853_v54, %v853_v54  ;;  %v881_v63 = vld [vmem:[#allocation2 + $0x6c] sm:$0xf] }
  0x5f   : > { %v861_v57 = vshrl.u32 %v3207_v55, 16  ;;  %v864_v58 = vshll.u32 %v3207_v55, 16  ;;  %v869_v59 = vshrl.u32 %v3208_v56, 16  ;;  %v872_v60 = vshll.u32 %v3208_v56, 16 }
  0x61   : > { %v863_v61 = vrot.slane %v861_v57, 7  ;;  %v871_v62 = vrot.slane %v869_v59, 7 }
  0x63   : > { %v866_v1 = vor.u32 %v864_v58, %v863_v61  ;;  %v867_v2 = vrot.slane %v863_v61, 4  ;;  %v874_v3 = vor.u32 %v872_v60, %v871_v62  ;;  %v876_v4 = vrot.slane %v871_v62, 4 }
  0x65   : > { %v882_v5 = vsel %vm3650_vm5, %v866_v1, %v881_v63  ;;  %v875_v6 = vsel %vm3657_vm6, %v867_v2, %v874_v3  ;;  %v886_v7 = vsel %vm3666_vm7, %v876_v4, %v885_v0 }
  0x66   : > { %883 = vst [vmem:[#allocation2 + $0x6c] sm:$0xf] %v882_v5  ;;  %884 = vst.msk [vmem:[#allocation2 + $0x70] sm:$0xf] %vm488_vm0, %v875_v6 }
  0x67   : > { %887 = vst [vmem:[#allocation2 + $0x74] sm:$0x1] %v886_v7 }
  0x68 PF: > { %v1205_v8 = vld [vmem:[#allocation2 + $0x4] sm:$0xf]  ;;  %v1206_v9 = vld [vmem:[#allocation2 + $0x8] sm:$0x1]  ;;  %vm1252_vm8 = vcmask 1042432   ;;  %vm1253_vm9 = vcmask 1046532  }
  0x69   : > { %vm3775_vm10 = vmor %vm1252_vm8, %vm1253_vm9  ;;  %v1257_v17 = vrot.slane %v1205_v8, 5  ;;  %v1260_v11 = vrot.slane %v1206_v9, 5  ;;  %v1204_v25 = vld [vmem:[#allocation2] sm:$0xe]  ;;  %v923_v13 = vld [vmem:[#allocation2 + $0xc] sm:$0xf] }
  0x6a   : > { %v3123_v12 = vrot.slane %v1204_v25, 9  ;;  %v924_v29 = vld [vmem:[#allocation2 + $0x10] sm:$0xf]  ;;  %vm944_vm11 = vsmask.f32 3328  ;;  %v972_v15 = vshrl.u32 %v923_v13, 16 }
  0x6b   : > { %v1259_v14 = vrot.slane %v1257_v17, 4  ;;  %vm945_vm12 = vsmask.f32 7440  ;;  %v975_v18 = vshll.u32 %v923_v13, 16  ;;  %v981_v19 = vshll.u32 %v924_v29, 16  ;;  %s3445_s9 = smov 6  }
  0x6c   : > { %v1258_v16 = vsel %vm3775_vm10, %v3123_v12, %v1257_v17  ;;  %v985_v20 = vshrl.u32 %v924_v29, 16  ;;  %v920_v21 = vld [vmem:[#allocation2] sm:$0xf]  ;;  %v974_v23 = vrot.slane %v972_v15, 4  ;;  %v921_v24 = vld [vmem:[#allocation2 + $0x4] sm:$0xf]  ;;  %vm3787_vm13 = vmor %vm944_vm11, %vm945_vm12 }
  0x6d   : > { %v1261_v22 = vsel %vm3775_vm10, %v1259_v14, %v1260_v11  ;;  %1311 = vrot.lane.b32.xlu0 %v1258_v16, %s3445_s9  ;;  %v948_v26 = vshrl.u32 %v920_v21, 16  ;;  %v951_v27 = vshll.u32 %v920_v21, 16  ;;  %v977_v28 = vrot.slane %v975_v18, 5  ;;  %v925_v33 = vld [vmem:[#allocation2 + $0x14] sm:$0x1]  ;;  %s3446_s22 = smov 3  }
  0x6e   : > { %1313 = vrot.lane.b32.xlu1 %v1261_v22, %s3445_s9  ;;  %v983_v30 = vrot.slane %v981_v19, 5  ;;  %v957_v31 = vshll.u32 %v921_v24, 16  ;;  %v961_v32 = vshrl.u32 %v921_v24, 16  ;;  %v987_v36 = vrot.slane %v985_v20, 4  ;;  %v922_v38 = vld [vmem:[#allocation2 + $0x8] sm:$0x1] }
  0x6f   : > { %v950_v34 = vrot.slane %v948_v26, 4  ;;  %v953_v35 = vrot.slane %v951_v27, 5  ;;  %v991_v37 = vshll.u32 %v925_v33, 16  ;;  %v978_v39 = vor.u32 %v977_v28, %v974_v23  ;;  %v1208_v43 = vld [vmem:[#allocation2 + $0x10] sm:$0xf]  ;;  %s3447_s24 = smov 9  }
  0x70   : > { %v959_v40 = vrot.slane %v957_v31, 5  ;;  %v963_v41 = vrot.slane %v961_v32, 4  ;;  %v967_v42 = vshll.u32 %v922_v38, 16  ;;  %v988_v46 = vor.u32 %v987_v36, %v983_v30  ;;  %v1209_v47 = vld [vmem:[#allocation2 + $0x14] sm:$0x1]  ;;  %s3448_s18 = smov 12  }
  0x71   : > { %v954_v45 = vor.u32 %v953_v35, %v950_v34  ;;  %v1264_v48 = vrot.slane %v1208_v43, 5  ;;  %v979_v49 = vrot.slane %v978_v39, 4  ;;  %v993_v50 = vrot.slane %v991_v37, 5  ;;  %v1207_v52 = vld [vmem:[#allocation2 + $0xc] sm:$0xe]  ;;  %s3449_s14 = smov 15  }
  0x72   : > { %v964_v51 = vor.u32 %v963_v41, %v959_v40  ;;  %v989_v54 = vrot.slane %v988_v46, 4  ;;  %v969_v55 = vrot.slane %v967_v42, 5  ;;  %v1267_v58 = vrot.slane %v1209_v47, 5  ;;  %v1474_v62 = vld [vmem:[#allocation2 + $0x10] sm:$0xf]  ;;  %s3450_s15 = smov 18  }
  0x73   : > { %v955_v53 = vrot.slane %v954_v45, 4  ;;  %v984_v56 = vsel %vm3787_vm13, %v979_v49, %v983_v30  ;;  %v1266_v60 = vrot.slane %v1264_v48, 4  ;;  %v3124_v61 = vrot.slane %v1207_v52, 9  ;;  %v1473_v63 = vld [vmem:[#allocation2 + $0xc] sm:$0xf]  ;;  %s3451_s19 = smov 21  }
  0x74   : > { %v965_v57 = vrot.slane %v964_v51, 4  ;;  %1143 = vrot.lane.b32.xlu1 %v984_v56, %s3446_s22  ;;  %v994_v0 = vsel %vm3787_vm13, %v989_v54, %v993_v50  ;;  %v1507_v1 = vshll.u32 %v1474_v62, 16  ;;  %v1511_v2 = vshrl.u32 %v1474_v62, 16  ;;  %v1477_v6 = vld [vmem:[#allocation2 + $0x1c] sm:$0xf]  ;;  %s3452_s25 = smov 24  }
  0x75   : > { %v960_v59 = vsel %vm3787_vm13, %v955_v53, %v959_v40  ;;  %v1498_v4 = vshrl.u32 %v1473_v63, 16  ;;  %v1501_v5 = vshll.u32 %v1473_v63, 16  ;;  %v1476_v7 = vld [vmem:[#allocation2 + $0x18] sm:$0xf]  ;;  %v1268_v8 = vsel %vm3775_vm10, %v1266_v60, %v1267_v58  ;;  %v1475_v13 = vld [vmem:[#allocation2 + $0x14] sm:$0x1] }
  0x76   : > { %1139 = vrot.lane.b32.xlu0 %v960_v59, %s3446_s22  ;;  %v970_v3 = vsel %vm3787_vm13, %v965_v57, %v969_v55  ;;  %v1265_v9 = vsel %vm3775_vm10, %v3124_v61, %v1264_v48  ;;  %v1509_v17 = vrot.slane %v1507_v1, 5  ;;  %v1513_v11 = vrot.slane %v1511_v2, 4  ;;  %v1377_v18 = vld [vmem:[#allocation2 + $0x10] sm:$0xf]  ;;  %v1376_v23 = vld [vmem:[#allocation2 + $0xc] sm:$0xf] }
  0x77   : > { %v1531_v25 = vshll.u32 %v1477_v6, 16  ;;  %v1535_v12 = vshrl.u32 %v1477_v6, 16  ;;  %v1500_v29 = vrot.slane %v1498_v4, 4  ;;  %v1503_v14 = vrot.slane %v1501_v5, 5  ;;  %v1478_v26 = vld [vmem:[#allocation2 + $0x20] sm:$0x1] }
  0x78   : > { %1145 = vrot.lane.b32.xlu1 %v994_v0, %s3446_s22  ;;  %v1522_v15 = vshrl.u32 %v1476_v7, 16  ;;  %v1525_v16 = vshll.u32 %v1476_v7, 16  ;;  %v1514_v19 = vor.u32 %v1513_v11, %v1509_v17  ;;  %v1517_v20 = vshll.u32 %v1475_v13, 16  ;;  %v1379_v30 = vld [vmem:[#allocation2 + $0x1c] sm:$0xf] }
  0x79   : > { %v1533_v21 = vrot.slane %v1531_v25, 5  ;;  %v1537_v22 = vrot.slane %v1535_v12, 4  ;;  %v1504_v24 = vor.u32 %v1503_v14, %v1500_v29  ;;  %v1541_v34 = vshll.u32 %v1478_v26, 16  ;;  %v1378_v35 = vld [vmem:[#allocation2 + $0x18] sm:$0xf] }
  0x7a   : > { %1141 = vrot.lane.b32.xlu0 %v970_v3, %s3446_s22  ;;  %v1524_v27 = vrot.slane %v1522_v15, 4  ;;  %v1527_v28 = vrot.slane %v1525_v16, 5  ;;  %v1515_v31 = vrot.slane %v1514_v19, 4  ;;  %v1519_v32 = vrot.slane %v1517_v20, 5  ;;  %v1755_v38 = vld [vmem:[#allocation2 + $0x10] sm:$0xf] }
  0x7b   : > { %v1538_v33 = vor.u32 %v1537_v22, %v1533_v21  ;;  %v1505_v36 = vrot.slane %v1504_v24, 4  ;;  %v1543_v41 = vrot.slane %v1541_v34, 5  ;;  %v1804_v42 = vrot.slane %v1755_v38, 5  ;;  %v1758_v43 = vld [vmem:[#allocation2 + $0x1c] sm:$0xf] }
  0x7c   : > { %1317 = vrot.lane.b32.xlu1 %v1268_v8, %s3445_s9  ;;  %v1528_v37 = vor.u32 %v1527_v28, %v1524_v27  ;;  %v1520_v39 = vsel %vm3787_vm13, %v1515_v31, %v1519_v32  ;;  %v1756_v47 = vld [vmem:[#allocation2 + $0x14] sm:$0x1]  ;;  %v1754_v48 = vld [vmem:[#allocation2 + $0xc] sm:$0xe]  ;;  %v1811_v49 = vrot.slane %v1758_v43, 5  ;;  %vm2574_vm14 = vcmask 1044480  }
  0x7d   : > { %v1539_v40 = vrot.slane %v1538_v33, 4  ;;  %v1510_v45 = vsel %vm3787_vm13, %v1505_v36, %v1509_v17  ;;  %v1806_v51 = vrot.slane %v1804_v42, 4  ;;  %v1807_v52 = vrot.slane %v1756_v47, 5  ;;  %v1759_v53 = vld [vmem:[#allocation2 + $0x20] sm:$0x1] }
  0x7e   : > { %1315 = vrot.lane.b32.xlu0 %v1265_v9, %s3445_s9  ;;  %v1529_v46 = vrot.slane %v1528_v37, 4  ;;  %v1757_v54 = vld [vmem:[#allocation2 + $0x18] sm:$0xe]  ;;  %v3131_v56 = vrot.slane %v1754_v48, 9  ;;  %v2022_v57 = vld [vmem:[#allocation2 + $0x1c] sm:$0xf] }
  0x7f   : > { %v1544_v50 = vsel %vm3787_vm13, %v1539_v40, %v1543_v41  ;;  %v2021_v58 = vld [vmem:[#allocation2 + $0x18] sm:$0xf]  ;;  %v1813_v59 = vrot.slane %v1811_v49, 4  ;;  %v1814_v60 = vrot.slane %v1759_v53, 5  ;;  %v3132_v61 = vrot.slane %v1757_v54, 9 }
  0x80   : > { %1410 = vrot.lane.b32.xlu1 %v1377_v18, %s3447_s24  ;;  %v1534_v55 = vsel %vm3787_vm13, %v1529_v46, %v1533_v21  ;;  %v1808_v62 = vsel %vm3775_vm10, %v1806_v51, %v1807_v52  ;;  %v2055_v63 = vshll.u32 %v2022_v57, 16  ;;  %v2059_v0 = vshrl.u32 %v2022_v57, 16  ;;  %v2025_v4 = vld [vmem:[#allocation2 + $0x28] sm:$0xf]  ;;  %v2024_v5 = vld [vmem:[#allocation2 + $0x24] sm:$0xf] }
  0x81   : > { %v1805_v1 = vsel %vm3775_vm10, %v3131_v56, %v1804_v42  ;;  %v2046_v2 = vshrl.u32 %v2021_v58, 16  ;;  %v2049_v3 = vshll.u32 %v2021_v58, 16  ;;  %v1815_v6 = vsel %vm3775_vm10, %v1813_v59, %v1814_v60  ;;  %v2023_v8 = vld [vmem:[#allocation2 + $0x20] sm:$0x1]  ;;  %v1925_v16 = vld [vmem:[#allocation2 + $0x1c] sm:$0xf] }
  0x82   : > { %1408 = vrot.lane.b32.xlu0 %v1376_v23, %s3447_s24  ;;  %v1812_v7 = vsel %vm3775_vm10, %v3132_v61, %v1811_v49  ;;  %v2057_v9 = vrot.slane %v2055_v63, 5  ;;  %v2061_v17 = vrot.slane %v2059_v0, 4  ;;  %v2079_v11 = vshll.u32 %v2025_v4, 16  ;;  %v2026_v19 = vld [vmem:[#allocation2 + $0x2c] sm:$0x1] }
  0x83   : > { %v2083_v25 = vshrl.u32 %v2025_v4, 16  ;;  %v2048_v12 = vrot.slane %v2046_v2, 4  ;;  %v2051_v13 = vrot.slane %v2049_v3, 5  ;;  %v2070_v29 = vshrl.u32 %v2024_v5, 16  ;;  %v1924_v22 = vld [vmem:[#allocation2 + $0x18] sm:$0xf] }
  0x84   : > { %1414 = vrot.lane.b32.xlu1 %v1379_v30, %s3447_s24  ;;  %v2073_v14 = vshll.u32 %v2024_v5, 16  ;;  %v2065_v15 = vshll.u32 %v2023_v8, 16  ;;  %v2062_v18 = vor.u32 %v2061_v17, %v2057_v9  ;;  %v2081_v20 = vrot.slane %v2079_v11, 5  ;;  %v927_v27 = vld [vmem:[#allocation2 + $0x1c] sm:$0xf] }
  0x85   : > { %v2085_v21 = vrot.slane %v2083_v25, 4  ;;  %v2052_v23 = vor.u32 %v2051_v13, %v2048_v12  ;;  %v2072_v24 = vrot.slane %v2070_v29, 4  ;;  %v926_v28 = vld [vmem:[#allocation2 + $0x18] sm:$0xf]  ;;  %v1927_v30 = vld [vmem:[#allocation2 + $0x28] sm:$0xf] }
  0x86   : > { %1412 = vrot.lane.b32.xlu0 %v1378_v35, %s3447_s24  ;;  %v2075_v26 = vrot.slane %v2073_v14, 5  ;;  %v2067_v31 = vrot.slane %v2065_v15, 5  ;;  %v2089_v32 = vshll.u32 %v2026_v19, 16  ;;  %v2063_v33 = vrot.slane %v2062_v18, 4  ;;  %v2303_v35 = vld [vmem:[#allocation2 + $0x1c] sm:$0xf] }
  0x87   : > { %v2086_v34 = vor.u32 %v2085_v21, %v2081_v20  ;;  %v1005_v36 = vshll.u32 %v927_v27, 16  ;;  %v1009_v37 = vshrl.u32 %v927_v27, 16  ;;  %v1926_v38 = vld [vmem:[#allocation2 + $0x24] sm:$0xf]  ;;  %v996_v41 = vshrl.u32 %v926_v28, 16 }
  0x88   : > { %1691 = vrot.lane.b32.xlu1 %v1520_v39, %s3448_s18  ;;  %v2053_v39 = vrot.slane %v2052_v23, 4  ;;  %v2076_v40 = vor.u32 %v2075_v26, %v2072_v24  ;;  %v999_v42 = vshll.u32 %v926_v28, 16  ;;  %v2091_v43 = vrot.slane %v2089_v32, 5  ;;  %v2302_v47 = vld [vmem:[#allocation2 + $0x18] sm:$0xe] }
  0x89   : > { %v2352_v46 = vrot.slane %v2303_v35, 5  ;;  %v2068_v48 = vsel %vm3787_vm13, %v2063_v33, %v2067_v31  ;;  %v2087_v49 = vrot.slane %v2086_v34, 4  ;;  %v1007_v51 = vrot.slane %v1005_v36, 5  ;;  %v930_v57 = vld [vmem:[#allocation2 + $0x28] sm:$0xf] }
  0x8a   : > { %1689 = vrot.lane.b32.xlu0 %v1510_v45, %s3448_s18  ;;  %v2304_v45 = vld [vmem:[#allocation2 + $0x20] sm:$0x1]  ;;  %v1011_v52 = vrot.slane %v1009_v37, 4  ;;  %v2058_v53 = vsel %vm3787_vm13, %v2053_v39, %v2057_v9  ;;  %v2077_v54 = vrot.slane %v2076_v40, 4  ;;  %v1001_v56 = vrot.slane %v999_v42, 5 }
  0x8b   : > { %v929_v58 = vld [vmem:[#allocation2 + $0x24] sm:$0xf]  ;;  %v2354_v59 = vrot.slane %v2352_v46, 4  ;;  %v2355_v60 = vrot.slane %v2304_v45, 5  ;;  %v3139_v61 = vrot.slane %v2302_v47, 9  ;;  %v2092_v63 = vsel %vm3787_vm13, %v2087_v49, %v2091_v43 }
  0x8c   : > { %1695 = vrot.lane.b32.xlu1 %v1544_v50, %s3448_s18  ;;  %v928_v50 = vld [vmem:[#allocation2 + $0x20] sm:$0x1]  ;;  %v1012_v0 = vor.u32 %v1011_v52, %v1007_v51  ;;  %v1029_v2 = vshll.u32 %v930_v57, 16  ;;  %v1033_v3 = vshrl.u32 %v930_v57, 16  ;;  %v2082_v4 = vsel %vm3787_vm13, %v2077_v54, %v2081_v20  ;;  %v2307_v9 = vld [vmem:[#allocation2 + $0x2c] sm:$0x1] }
  0x8d   : > { %v2356_v8 = vsel %vm3775_vm10, %v2354_v59, %v2355_v60  ;;  %v890_v11 = vld [vmem:[#allocation2 + $0xc] sm:$0xf]  ;;  %v888_v14 = vld [vmem:[#allocation2] sm:$0xf]  ;;  %v2353_v15 = vsel %vm3775_vm10, %v3139_v61, %v2352_v46  ;;  %v2305_v21 = vld [vmem:[#allocation2 + $0x24] sm:$0xe] }
  0x8e   : > { %1693 = vrot.lane.b32.xlu0 %v1534_v55, %s3448_s18  ;;  %v998_v55 = vrot.slane %v996_v41, 4  ;;  %v1013_v25 = vrot.slane %v1012_v0, 4  ;;  %v1031_v13 = vrot.slane %v1029_v2, 5  ;;  %v1035_v29 = vrot.slane %v1033_v3, 4  ;;  %906 = vst.msk [vmem:[#allocation3 + $0x8] sm:$0xf] %vm488_vm0, %v890_v11 }
  0x8f   : > { %v931_v18 = vld [vmem:[#allocation2 + $0x2c] sm:$0x1]  ;;  %904 = vst.msk [vmem:[#allocation3] sm:$0xf] %vm488_vm0, %v888_v14  ;;  %v891_v28 = vld [vmem:[#allocation2 + $0x10] sm:$0xf] }
  0x90   : > { %1860 = vrot.lane.b32.xlu1 %v1808_v62, %s3449_s14  ;;  %v1015_v62 = vshll.u32 %v928_v50, 16  ;;  %v1002_v5 = vor.u32 %v1001_v56, %v998_v55  ;;  %v1036_v26 = vor.u32 %v1035_v29, %v1031_v13  ;;  %v1039_v27 = vshll.u32 %v931_v18, 16  ;;  %v1211_v34 = vld [vmem:[#allocation2 + $0x1c] sm:$0xf]  ;;  %907 = vst.msk [vmem:[#allocation3 + $0xc] sm:$0xf] %vm488_vm0, %v891_v28 }
  0x91   : > { %v3140_v32 = vrot.slane %v2305_v21, 9  ;;  %v1214_v39 = vld [vmem:[#allocation2 + $0x28] sm:$0xf]  ;;  %v1212_v42 = vld [vmem:[#allocation2 + $0x20] sm:$0x1]  ;;  %vm2575_vm15 = vcmask 1045504  }
  0x92   : > { %1858 = vrot.lane.b32.xlu0 %v1805_v1, %s3449_s14  ;;  %v2306_v1 = vld [vmem:[#allocation2 + $0x28] sm:$0xf]  ;;  %v1017_v12 = vrot.slane %v1015_v62, 5  ;;  %v1037_v36 = vrot.slane %v1036_v26, 4  ;;  %v1041_v37 = vrot.slane %v1039_v27, 5  ;;  %v1278_v45 = vrot.slane %v1214_v39, 5 }
  0x93   : > { %v2359_v17 = vrot.slane %v2306_v1, 5  ;;  %v1210_v43 = vld [vmem:[#allocation2 + $0x18] sm:$0xe]  ;;  %v1215_v49 = vld [vmem:[#allocation2 + $0x2c] sm:$0x1]  ;;  %vm1187_vm1 = vcmask 44056  }
  0x94   : > { %1864 = vrot.lane.b32.xlu1 %v1815_v6, %s3449_s14  ;;  %v1020_v6 = vshrl.u32 %v929_v58, 16  ;;  %v1018_v23 = vsel %vm3787_vm13, %v1013_v25, %v1017_v12  ;;  %v1042_v46 = vsel %vm3787_vm13, %v1037_v36, %v1041_v37  ;;  %v1213_v50 = vld [vmem:[#allocation2 + $0x24] sm:$0xe]  ;;  %v3125_v52 = vrot.slane %v1210_v43, 9  ;;  %v1483_v0 = vld [vmem:[#allocation2 + $0x34] sm:$0xf] }
  0x95   : > { %v2361_v24 = vrot.slane %v2359_v17, 4  ;;  %v2360_v40 = vsel %vm3775_vm10, %v3140_v32, %v2359_v17  ;;  %v1479_v54 = vld [vmem:[#allocation2 + $0x24] sm:$0xf]  ;;  %v1280_v55 = vrot.slane %v1278_v45, 4  ;;  %v1281_v56 = vrot.slane %v1215_v49, 5 }
  0x96   : > { %1862 = vrot.lane.b32.xlu0 %v1812_v7, %s3449_s14  ;;  %v1023_v7 = vshll.u32 %v929_v58, 16  ;;  %v1022_v19 = vrot.slane %v1020_v6, 4  ;;  %v3126_v57 = vrot.slane %v1213_v50, 9  ;;  %v1546_v62 = vshrl.u32 %v1479_v54, 16  ;;  %v1482_v1 = vld [vmem:[#allocation2 + $0x30] sm:$0xf] }
  0x97   : > { %v1282_v2 = vsel %vm3775_vm10, %v1280_v55, %v1281_v56  ;;  %v1579_v6 = vshll.u32 %v1483_v0, 16  ;;  %v1570_v11 = vshrl.u32 %v1482_v1, 16  ;;  %v1573_v25 = vshll.u32 %v1482_v1, 16  ;;  %v1381_v12 = vld [vmem:[#allocation2 + $0x28] sm:$0xf] }
  0x98   : > { %1958 = vrot.lane.b32.xlu1 %v1925_v16, %s3450_s15  ;;  %v1003_v16 = vrot.slane %v1002_v5, 4  ;;  %v1025_v20 = vrot.slane %v1023_v7, 5  ;;  %v1279_v3 = vsel %vm3775_vm10, %v3126_v57, %v1278_v45  ;;  %v1583_v7 = vshrl.u32 %v1483_v0, 16  ;;  %v1761_v28 = vld [vmem:[#allocation2 + $0x28] sm:$0xf] }
  0x99   : > { %v1581_v14 = vrot.slane %v1579_v6, 5  ;;  %v1575_v21 = vrot.slane %v1573_v25, 5  ;;  %v1764_v39 = vld [vmem:[#allocation2 + $0x34] sm:$0xf]  ;;  %v1760_v43 = vld [vmem:[#allocation2 + $0x24] sm:$0xe] }
  0x9a   : > { %1956 = vrot.lane.b32.xlu0 %v1924_v22, %s3450_s15  ;;  %v2362_v22 = vrot.slane %v2307_v9, 5  ;;  %v1008_v31 = vsel %vm3787_vm13, %v1003_v16, %v1007_v51  ;;  %v1026_v33 = vor.u32 %v1025_v20, %v1022_v19  ;;  %v1548_v9 = vrot.slane %v1546_v62, 4  ;;  %v1380_v16 = vld [vmem:[#allocation2 + $0x24] sm:$0xf]  ;;  %v1484_v19 = vld [vmem:[#allocation2 + $0x38] sm:$0x1] }
  0x9b   : > { %v1572_v20 = vrot.slane %v1570_v11, 4  ;;  %v1589_v27 = vshll.u32 %v1484_v19, 16  ;;  %v1763_v50 = vld [vmem:[#allocation2 + $0x30] sm:$0xe]  ;;  %v3340_v55 = vld [vmem:[%s4447_s3 + $0x8] sm:$0x3f]  }
  0x9c   : > { %1962 = vrot.lane.b32.xlu1 %v1927_v30, %s3450_s15  ;;  %v889_v30 = vld [vmem:[#allocation2 + $0x4] sm:$0xf]  ;;  %v2363_v35 = vsel %vm3775_vm10, %v2361_v24, %v2362_v22  ;;  %v1027_v41 = vrot.slane %v1026_v33, 4  ;;  %v1383_v22 = vld [vmem:[#allocation2 + $0x34] sm:$0xf]  ;;  %vm1359_vm2 = vcmask 68656  }
  0x9d   : > { %905 = vst.msk [vmem:[#allocation3 + $0x4] sm:$0xf] %vm488_vm0, %v889_v30  ;;  %v1382_v30 = vld [vmem:[#allocation2 + $0x30] sm:$0xf]  ;;  %v1576_v32 = vor.u32 %v1575_v21, %v1572_v20  ;;  %v1762_v33 = vld [vmem:[#allocation2 + $0x2c] sm:$0x1] }
  0x9e   : > { %1960 = vrot.lane.b32.xlu0 %v1926_v38, %s3450_s15  ;;  %v1271_v38 = vrot.slane %v1211_v34, 5  ;;  %v1032_v51 = vsel %vm3787_vm13, %v1027_v41, %v1031_v13  ;;  %v1818_v34 = vrot.slane %v1761_v28, 5  ;;  %v1821_v45 = vrot.slane %v1762_v33, 5  ;;  %v2031_v6 = vld [vmem:[#allocation2 + $0x40] sm:$0xf] }
  0x9f   : > { %v2029_v25 = vld [vmem:[#allocation2 + $0x38] sm:$0x1]  ;;  %v1929_v21 = vld [vmem:[#allocation2 + $0x34] sm:$0xf]  ;;  %v932_v33 = vld [vmem:[#allocation2 + $0x30] sm:$0xf] }
  0xa0   : > { %2239 = vrot.lane.b32.xlu1 %v2068_v48, %s3451_s19  ;;  %v1273_v47 = vrot.slane %v1271_v38, 4  ;;  %v1274_v48 = vrot.slane %v1212_v42, 5  ;;  %v1272_v61 = vsel %vm3775_vm10, %v3125_v52, %v1271_v38  ;;  %v1591_v38 = vrot.slane %v1589_v27, 5  ;;  %v1928_v27 = vld [vmem:[#allocation2 + $0x30] sm:$0xf] }
  0xa1   : > { %v1577_v42 = vrot.slane %v1576_v32, 4  ;;  %v1820_v49 = vrot.slane %v1818_v34, 4  ;;  %v3133_v52 = vrot.slane %v1760_v43, 9  ;;  %v2113_v20 = vshll.u32 %v2029_v25, 16  ;;  %v933_v32 = vld [vmem:[#allocation2 + $0x34] sm:$0xf] }
  0xa2   : > { %2237 = vrot.lane.b32.xlu0 %v2058_v53, %s3451_s19  ;;  %v1480_v53 = vld [vmem:[#allocation2 + $0x28] sm:$0xf]  ;;  %v1275_v58 = vsel %vm3775_vm10, %v1273_v47, %v1274_v48  ;;  %v1825_v47 = vrot.slane %v1764_v39, 5  ;;  %v2309_v39 = vld [vmem:[#allocation2 + $0x34] sm:$0xf]  ;;  %vm1456_vm3 = vcmask 93256  }
  0xa3   : > { %v1555_v59 = vshll.u32 %v1480_v53, 16  ;;  %v1559_v60 = vshrl.u32 %v1480_v53, 16  ;;  %v2028_v53 = vld [vmem:[#allocation2 + $0x34] sm:$0xf]  ;;  %v1822_v62 = vsel %vm3775_vm10, %v1820_v49, %v1821_v45  ;;  %v2310_v49 = vld [vmem:[#allocation2 + $0x38] sm:$0x1] }
  0xa4   : > { %2243 = vrot.lane.b32.xlu1 %v2092_v63, %s3451_s19  ;;  %v1549_v63 = vshll.u32 %v1479_v54, 16  ;;  %v2027_v54 = vld [vmem:[#allocation2 + $0x30] sm:$0xf]  ;;  %v1827_v56 = vrot.slane %v1825_v47, 4  ;;  %v2107_v0 = vshrl.u32 %v2028_v53, 16  ;;  %vm1737_vm4 = vcmask 117856  }
  0xa5   : > { %v1561_v5 = vrot.slane %v1559_v60, 4  ;;  %vm1906_vm5 = vcmask 142456   ;;  %vm2004_vm6 = vcmask 167056   ;;  %vm2285_vm7 = vcmask 191656  }
  0xa6   : > { %2241 = vrot.lane.b32.xlu0 %v2082_v4, %s3451_s19  ;;  %v1557_v4 = vrot.slane %v1555_v59, 5  ;;  %v1551_v17 = vrot.slane %v1549_v63, 5  ;;  %v3453_v59 = vmov 65535   ;;  %v2103_v63 = vshll.u32 %v2028_v53, 16 }
  0xa7   : > { %v2576_v60 = vsel %vm2574_vm14, 4294967295, %v3453_v59  ;;  %vm2454_vm8 = vcmask 216256   ;;  %vm2549_vm9 = vcmask 220160   ;;  %vm2732_vm11 = vcmask 516096  }
  0xa8   : > { %2408 = vrot.lane.b32.xlu1 %v2356_v8, %s3452_s25  ;;  %v1481_v8 = vld [vmem:[#allocation2 + $0x2c] sm:$0x1]  ;;  %v1562_v13 = vor.u32 %v1561_v5, %v1557_v4  ;;  %v1552_v18 = vor.u32 %v1551_v17, %v1548_v9  ;;  %v2577_v1 = vsel %vm2575_vm15, %v2576_v60, 0  ;;  %v2097_v5 = vshll.u32 %v2027_v54, 16  ;;  %v2030_v9 = vld [vmem:[#allocation2 + $0x3c] sm:$0xf] }
  0xa9   : > { %v1565_v29 = vshll.u32 %v1481_v8, 16  ;;  %v3342_v8 = vld [vmem:[%s4447_s3] sm:$0xff]   ;;  %v2121_v19 = vshll.u32 %v2030_v9, 16 }
  0xaa   : > { %2406 = vrot.lane.b32.xlu0 %v2353_v15, %s3452_s25  ;;  %v1585_v15 = vrot.slane %v1583_v7, 4  ;;  %v2579_v7 = vand.u32 %v3340_v55, %v2577_v1  ;;  %v2369_v1 = vrot.slane %v2310_v49, 5 }
  0xab   : > { %v1567_v24 = vrot.slane %v1565_v29, 5  ;;  %v2127_v29 = vshll.u32 %v2031_v6, 16 }
  0xac   : > { %1149 = vrot.lane.b32.xlu1 %v1018_v23, %s3446_s22  ;;  %v1563_v23 = vrot.slane %v1562_v13, 4  ;;  %v1586_v26 = vor.u32 %v1585_v15, %v1581_v14  ;;  %3235 = vmatprep.subr.bf16.mxu0 %v2579_v7  ;;  %v2109_v13 = vrot.slane %v2107_v0, 4 }
  0xad   : > { %3236 = vmatpush3.bf16.msra.mxu0 %v2579_v7  ;;  %3255 = vmatprep.subr.bf16.mxu1 %v2579_v7 }
  0xae   : > { %1147 = vrot.lane.b32.xlu0 %v1008_v31, %s3446_s22  ;;  %v1553_v31 = vrot.slane %v1552_v18, 4  ;;  %v1568_v36 = vsel %vm3787_vm13, %v1563_v23, %v1567_v24  ;;  %v1587_v37 = vrot.slane %v1586_v26, 4  ;;  %v2118_v18 = vshrl.u32 %v2030_v9, 16  ;;  %3237 = vmatprep.subr.bf16.mxu0 %v3342_v8  ;;  %v2032_v23 = vld [vmem:[#allocation2 + $0x44] sm:$0x1] }
  0xaf   : > { %3257 = vmatpush3.bf16.msra.mxu1 %v2579_v7  ;;  %v3934_v24 = vrot.slane %v2127_v29, 5 }
  0xb0   : > { %2412 = vrot.lane.b32.xlu1 %v2363_v35, %s3452_s25  ;;  %v893_v35 = vld [vmem:[#allocation2 + $0x1c] sm:$0xf]  ;;  %v1558_v41 = vsel %vm3787_vm13, %v1553_v31, %v1557_v4  ;;  %v1592_v48 = vsel %vm3787_vm13, %v1587_v37, %v1591_v38  ;;  %v2094_v4 = vshrl.u32 %v2027_v54, 16  ;;  %3256 = vmatprep.subr.bf16.mxu1 %v3342_v8  ;;  %v2123_v31 = vrot.slane %v2121_v19, 5  ;;  %v934_v54 = vld [vmem:[#allocation2 + $0x38] sm:$0x1] }
  0xb1   : > { %909 = vst.msk [vmem:[#allocation3 + $0x14] sm:$0xf] %vm488_vm0, %v893_v35  ;;  %3238 = vmatpush3.bf16.msra.mxu0 %v3342_v8  ;;  %v2115_v35 = vrot.slane %v2113_v20, 5 }
  0xb2   : > { %2410 = vrot.lane.b32.xlu0 %v2360_v40, %s3452_s25  ;;  %v892_v40 = vld [vmem:[#allocation2 + $0x18] sm:$0xf]  ;;  %v2096_v15 = vrot.slane %v2094_v4, 4 }
  0xb3   : > { %908 = vst.msk [vmem:[#allocation3 + $0x10] sm:$0xf] %vm488_vm0, %v892_v40  ;;  %3258 = vmatpush3.bf16.msra.mxu1 %v3342_v8  ;;  %v1053_v40 = vshll.u32 %v933_v32, 16 }
  0xb4   : > { %1153 = vrot.lane.b32.xlu1 %v1042_v46, %s3446_s22  ;;  %v1765_v46 = vld [vmem:[#allocation2 + $0x38] sm:$0x1] }
  0xb5   : > { %v1828_v57 = vrot.slane %v1765_v46, 5  ;;  %v1044_v46 = vshrl.u32 %v932_v33, 16  ;;  %v3943_v55 = vrot.slane %v1053_v40, 5  ;;  %v897_v40 = vld [vmem:[#allocation2 + $0x34] sm:$0xf] }
  0xb6   : > { %1151 = vrot.lane.b32.xlu0 %v1032_v51, %s3446_s22  ;;  %v1582_v51 = vsel %vm3787_vm13, %v1577_v42, %v1581_v14  ;;  %v2131_v14 = vshrl.u32 %v2031_v6, 16  ;;  %v1930_v42 = vld [vmem:[#allocation2 + $0x3c] sm:$0xf]  ;;  %913 = vst.msk [vmem:[#allocation3 + $0x24] sm:$0xf] %vm488_vm0, %v897_v40 }
  0xb7   : > { %v1829_v17 = vsel %vm3775_vm10, %v1827_v56, %v1828_v57  ;;  %v1046_v59 = vrot.slane %v1044_v46, 4  ;;  %v1490_v40 = vld [vmem:[#allocation2 + $0x50] sm:$0x1] }
  0xb8   : > { %1321 = vrot.lane.b32.xlu1 %v1275_v58, %s3445_s9  ;;  %v3134_v58 = vrot.slane %v1763_v50, 9  ;;  %v2133_v26 = vrot.slane %v2131_v14, 4  ;;  %v2366_v50 = vrot.slane %v2309_v39, 5  ;;  %v1217_v39 = vld [vmem:[#allocation2 + $0x34] sm:$0xf] }
  0xba   : > { %1319 = vrot.lane.b32.xlu0 %v1272_v61, %s3445_s9  ;;  %v895_v61 = vld [vmem:[#allocation2 + $0x28] sm:$0xf]  ;;  %v1826_v11 = vsel %vm3775_vm10, %v3134_v58, %v1825_v47  ;;  %v2134_v38 = vor.u32 %v2133_v26, %v3934_v24  ;;  %v1047_v47 = vshll.u32 %v932_v33, 16  ;;  %v2368_v0 = vrot.slane %v2366_v50, 4 }
  0xbb   : > { %911 = vst.msk [vmem:[#allocation3 + $0x1c] sm:$0xf] %vm488_vm0, %v895_v61  ;;  %v936_v61 = vld [vmem:[#allocation2 + $0x40] sm:$0xf] }
  0xbc   : > { %1325 = vrot.lane.b32.xlu1 %v1282_v2, %s3445_s9  ;;  %v894_v2 = vld [vmem:[#allocation2 + $0x24] sm:$0xf]  ;;  %v2135_v53 = vrot.slane %v2134_v38, 4  ;;  %v1049_v60 = vrot.slane %v1047_v47, 5  ;;  %v1077_v7 = vshll.u32 %v936_v61, 16  ;;  %v1081_v8 = vshrl.u32 %v936_v61, 16 }
  0xbd   : > { %910 = vst.msk [vmem:[#allocation3 + $0x18] sm:$0xf] %vm488_vm0, %v894_v2  ;;  %v1285_v47 = vrot.slane %v1217_v39, 5  ;;  %v1221_v61 = vld [vmem:[#allocation2 + $0x44] sm:$0x1] }
  0xbe   : > { %1323 = vrot.lane.b32.xlu0 %v1279_v3, %s3445_s9  ;;  %v1819_v3 = vsel %vm3775_vm10, %v3133_v52, %v1818_v34  ;;  %v1931_v34 = vld [vmem:[#allocation2 + $0x40] sm:$0xf]  ;;  %v1083_v19 = vrot.slane %v1081_v8, 4 }
  0xc0   : > { %1418 = vrot.lane.b32.xlu1 %v1381_v12, %s3447_s24  ;;  %v3929_v12 = vrot.slane %v2103_v63, 5 }
  0xc2   : > { %1416 = vrot.lane.b32.xlu0 %v1380_v16, %s3447_s24  ;;  %v2099_v16 = vrot.slane %v2097_v5, 5 }
  0xc4   : > { %1422 = vrot.lane.b32.xlu1 %v1383_v22, %s3447_s24  ;;  %v2110_v22 = vor.u32 %v2109_v13, %v3929_v12  ;;  %v2100_v28 = vor.u32 %v2099_v16, %v2096_v15  ;;  %v2370_v13 = vsel %vm3775_vm10, %v2368_v0, %v2369_v1  ;;  %v2313_v15 = vld [vmem:[#allocation2 + $0x44] sm:$0x1] }
  0xc6   : > { %1420 = vrot.lane.b32.xlu0 %v1382_v30, %s3447_s24  ;;  %v2120_v30 = vrot.slane %v2118_v18, 4  ;;  %v2111_v37 = vrot.slane %v2110_v22, 4  ;;  %v2101_v43 = vrot.slane %v2100_v28, 4  ;;  %v3960_v18 = vrot.slane %v1077_v7, 5  ;;  %v2311_v28 = vld [vmem:[#allocation2 + $0x3c] sm:$0xe] }
  0xc8   : > { %1699 = vrot.lane.b32.xlu1 %v1568_v36, %s3448_s18  ;;  %v2137_v36 = vshll.u32 %v2032_v23, 16  ;;  %v2124_v45 = vor.u32 %v2123_v31, %v2120_v30  ;;  %v2116_v52 = vsel %vm3787_vm13, %v2111_v37, %v2115_v35  ;;  %v2106_v57 = vsel %vm3787_vm13, %v2101_v43, %v3929_v12  ;;  %v937_v23 = vld [vmem:[#allocation2 + $0x44] sm:$0x1] }
  0xc9   : > { %v2376_v30 = vrot.slane %v2313_v15, 5  ;;  %v1084_v33 = vor.u32 %v1083_v19, %v3960_v18  ;;  %v3142_v37 = vrot.slane %v2311_v28, 9  ;;  %v1488_v15 = vld [vmem:[#allocation2 + $0x48] sm:$0xf] }
  0xca   : > { %1697 = vrot.lane.b32.xlu0 %v1558_v41, %s3448_s18  ;;  %v1057_v41 = vshrl.u32 %v933_v32, 16  ;;  %v2125_v58 = vrot.slane %v2124_v45, 4  ;;  %v1618_v28 = vshrl.u32 %v1488_v15, 16 }
  0xcb   : > { %v1085_v45 = vrot.slane %v1084_v33, 4 }
  0xcc   : > { %1703 = vrot.lane.b32.xlu1 %v1592_v48, %s3448_s18  ;;  %v2139_v48 = vrot.slane %v2137_v36, 5  ;;  %v1059_v56 = vrot.slane %v1057_v41, 4  ;;  %v2130_v9 = vsel %vm3787_vm13, %v2125_v58, %v3934_v24 }
  0xce   : > { %1701 = vrot.lane.b32.xlu0 %v1582_v51, %s3448_s18  ;;  %v2308_v51 = vld [vmem:[#allocation2 + $0x30] sm:$0xe]  ;;  %v2140_v5 = vsel %vm3787_vm13, %v2135_v53, %v2139_v48  ;;  %v1060_v6 = vor.u32 %v1059_v56, %v3943_v55  ;;  %v1220_v48 = vld [vmem:[#allocation2 + $0x40] sm:$0xf] }
  0xcf   : > { %v3141_v2 = vrot.slane %v2308_v51, 9  ;;  %v1292_v56 = vrot.slane %v1220_v48, 5 }
  0xd0   : > { %1868 = vrot.lane.b32.xlu1 %v1822_v62, %s3449_s14  ;;  %v935_v62 = vld [vmem:[#allocation2 + $0x3c] sm:$0xf]  ;;  %v1061_v14 = vrot.slane %v1060_v6, 4  ;;  %v1295_v6 = vrot.slane %v1221_v61, 5 }
  0xd1   : > { %v1068_v25 = vshrl.u32 %v935_v62, 16  ;;  %v1071_v12 = vshll.u32 %v935_v62, 16  ;;  %v1219_v62 = vld [vmem:[#allocation2 + $0x3c] sm:$0xe] }
  0xd2   : > { %1866 = vrot.lane.b32.xlu0 %v1819_v3, %s3449_s14  ;;  %v1063_v3 = vshll.u32 %v934_v54, 16  ;;  %v1216_v54 = vld [vmem:[#allocation2 + $0x30] sm:$0xe]  ;;  %v3128_v7 = vrot.slane %v1219_v62, 9 }
  0xd3   : > { %v1070_v24 = vrot.slane %v1068_v25, 4  ;;  %v1073_v26 = vrot.slane %v1071_v12, 5  ;;  %v3127_v1 = vrot.slane %v1216_v54, 9  ;;  %v1767_v54 = vld [vmem:[#allocation2 + $0x40] sm:$0xf] }
  0xd4   : > { %1872 = vrot.lane.b32.xlu1 %v1829_v17, %s3449_s14  ;;  %v1050_v17 = vor.u32 %v1049_v60, %v1046_v59  ;;  %v1065_v29 = vrot.slane %v1063_v3, 5  ;;  %v1287_v59 = vrot.slane %v1285_v47, 4 }
  0xd5   : > { %v1074_v38 = vor.u32 %v1073_v26, %v1070_v24  ;;  %v1286_v25 = vsel %vm3775_vm10, %v3127_v1, %v1285_v47  ;;  %v1487_v24 = vld [vmem:[#allocation2 + $0x44] sm:$0x1] }
  0xd6   : > { %1870 = vrot.lane.b32.xlu0 %v1826_v11, %s3449_s14  ;;  %v2312_v11 = vld [vmem:[#allocation2 + $0x40] sm:$0xf]  ;;  %v1051_v22 = vrot.slane %v1050_v17, 4  ;;  %v1066_v31 = vsel %vm3787_vm13, %v1061_v14, %v1065_v29  ;;  %v1489_v29 = vld [vmem:[#allocation2 + $0x4c] sm:$0xf] }
  0xd7   : > { %v2373_v16 = vrot.slane %v2312_v11, 5  ;;  %v1075_v51 = vrot.slane %v1074_v38, 4  ;;  %v1384_v38 = vld [vmem:[#allocation2 + $0x3c] sm:$0xf] }
  0xd8   : > { %1966 = vrot.lane.b32.xlu1 %v1929_v21, %s3450_s15  ;;  %v2367_v21 = vsel %vm3775_vm10, %v3141_v2, %v2366_v50  ;;  %v1056_v36 = vsel %vm3787_vm13, %v1051_v22, %v3943_v55  ;;  %v899_v55 = vld [vmem:[#allocation2 + $0x40] sm:$0xf]  ;;  %v1631_v22 = vshrl.u32 %v1489_v29, 16 }
  0xd9   : > { %v2375_v32 = vrot.slane %v2373_v16, 4  ;;  %v2374_v50 = vsel %vm3775_vm10, %v3142_v37, %v2373_v16  ;;  %915 = vst.msk [vmem:[#allocation3 + $0x2c] sm:$0xf] %vm488_vm0, %v899_v55  ;;  %v1080_v0 = vsel %vm3787_vm13, %v1075_v51, %v3960_v18  ;;  %v1486_v2 = vld [vmem:[#allocation2 + $0x40] sm:$0xf]  ;;  %v1293_v18 = vsel %vm3775_vm10, %v3128_v7, %v1292_v56 }
  0xda   : > { %1964 = vrot.lane.b32.xlu0 %v1928_v27, %s3450_s15  ;;  %v1607_v17 = vshrl.u32 %v1486_v2, 16  ;;  %v1386_v51 = vld [vmem:[#allocation2 + $0x48] sm:$0xf] }
  0xdb   : > { %v2377_v43 = vsel %vm3775_vm10, %v2375_v32, %v2376_v30  ;;  %v1621_v30 = vshll.u32 %v1488_v15, 16  ;;  %v1385_v32 = vld [vmem:[#allocation2 + $0x40] sm:$0xf]  ;;  %v2037_v15 = vld [vmem:[#allocation2 + $0x58] sm:$0xf] }
  0xdc   : > { %1970 = vrot.lane.b32.xlu1 %v1931_v34, %s3450_s15  ;;  %v1087_v34 = vshll.u32 %v937_v23, 16 }
  0xde   : > { %1968 = vrot.lane.b32.xlu0 %v1930_v42, %s3450_s15  ;;  %v896_v42 = vld [vmem:[#allocation2 + $0x30] sm:$0xf]  ;;  %v1089_v46 = vrot.slane %v1087_v34, 5  ;;  %v1613_v34 = vshll.u32 %v1487_v24, 16 }
  0xdf   : > { %v1312_v4 = vpop.permute.xlu0 %1311  ;;  %912 = vst.msk [vmem:[#allocation3 + $0x20] sm:$0xf] %vm488_vm0, %v896_v42  ;;  %v1623_v42 = vrot.slane %v1621_v30, 5  ;;  %v2175_v30 = vshll.u32 %v2037_v15, 16 }
  0xe0   : > { %2247 = vrot.lane.b32.xlu1 %v2116_v52, %s3451_s19  ;;  %v1314_v63 = vpop.permute.xlu1 %1313  ;;  %v1218_v52 = vld [vmem:[#allocation2 + $0x38] sm:$0x1]  ;;  %v1090_v58 = vsel %vm3787_vm13, %v1085_v45, %v1089_v46  ;;  %v1387_v45 = vld [vmem:[#allocation2 + $0x4c] sm:$0xf]  ;;  %v1615_v47 = vrot.slane %v1613_v34, 5 }
  0xe1   : > { %v1288_v60 = vrot.slane %v1218_v52, 5 }
  0xe2   : > { %2245 = vrot.lane.b32.xlu0 %v2106_v57, %s3451_s19  ;;  %v898_v57 = vld [vmem:[#allocation2 + $0x3c] sm:$0xf] }
  0xe3   : > { %914 = vst.msk [vmem:[#allocation3 + $0x28] sm:$0xf] %vm488_vm0, %v898_v57  ;;  %v1289_v8 = vsel %vm3775_vm10, %v1287_v59, %v1288_v60  ;;  %v1832_v59 = vrot.slane %v1767_v54, 5  ;;  %v939_v54 = vld [vmem:[#allocation2 + $0x4c] sm:$0xf] }
  0xe4   : > { %2251 = vrot.lane.b32.xlu1 %v2140_v5, %s3451_s19  ;;  %v1294_v5 = vrot.slane %v1292_v56, 4 }
  0xe6   : > { %2249 = vrot.lane.b32.xlu0 %v2130_v9, %s3451_s19  ;;  %v1144_v20 = vpop.permute.xlu1 %1143  ;;  %v1603_v9 = vshll.u32 %v1486_v2, 16  ;;  %v1296_v16 = vsel %vm3775_vm10, %v1294_v5, %v1295_v6  ;;  %v1766_v2 = vld [vmem:[#allocation2 + $0x3c] sm:$0xe]  ;;  %v1834_v5 = vrot.slane %v1832_v59, 4 }
  0xe7   : > { %1190 = vst.msk [vmem:[#allocation3 + $0x8] sm:$0xf] %vm1187_vm1, %v1144_v20  ;;  %v1609_v20 = vrot.slane %v1607_v17, 4  ;;  %v3135_v17 = vrot.slane %v1766_v2, 9 }
  0xe8   : > { %v1140_v27 = vpop.permute.xlu0 %1139  ;;  %2416 = vrot.lane.b32.xlu1 %v2370_v13, %s3452_s25  ;;  %v4013_v19 = vrot.slane %v1603_v9, 5 }
  0xe9   : > { %1188 = vst.msk [vmem:[#allocation3] sm:$0xf] %vm1187_vm1, %v1140_v27 }
  0xea   : > { %2414 = vrot.lane.b32.xlu0 %v2367_v21, %s3452_s25  ;;  %1360 = vst.msk [vmem:[#allocation3] sm:$0xf] %vm1359_vm2, %v1312_v4  ;;  %v1146_v35 = vpop.permute.xlu1 %1145  ;;  %v1485_v4 = vld [vmem:[#allocation2 + $0x3c] sm:$0xf]  ;;  %v1627_v21 = vshll.u32 %v1489_v29, 16  ;;  %v1610_v33 = vor.u32 %v1609_v20, %v4013_v19 }
  0xeb   : > { %1191 = vst.msk [vmem:[#allocation3 + $0xc] sm:$0xf] %vm1187_vm1, %v1146_v35  ;;  %v1594_v12 = vshrl.u32 %v1485_v4, 16  ;;  %v1597_v13 = vshll.u32 %v1485_v4, 16  ;;  %v2033_v29 = vld [vmem:[#allocation2 + $0x48] sm:$0xf] }
  0xec   : > { %v1142_v41 = vpop.permute.xlu0 %1141  ;;  %1157 = vrot.lane.b32.xlu1 %v1066_v31, %s3446_s22  ;;  %v4020_v35 = vrot.slane %v1627_v21, 5  ;;  %v1611_v46 = vrot.slane %v1610_v33, 4  ;;  %v2036_v20 = vld [vmem:[#allocation2 + $0x54] sm:$0xf]  ;;  %v2142_v24 = vshrl.u32 %v2033_v29, 16  ;;  %v2179_v33 = vshrl.u32 %v2037_v15, 16 }
  0xed   : > { %1189 = vst.msk [vmem:[#allocation3 + $0x4] sm:$0xf] %vm1187_vm1, %v1142_v41  ;;  %v1596_v26 = vrot.slane %v1594_v12, 4  ;;  %v1599_v27 = vrot.slane %v1597_v13, 5  ;;  %v1620_v41 = vrot.slane %v1618_v28, 4  ;;  %v2166_v34 = vshrl.u32 %v2036_v20, 16 }
  0xee   : > { %1155 = vrot.lane.b32.xlu0 %v1056_v36, %s3446_s22  ;;  %1361 = vst.msk [vmem:[#allocation3 + $0x4] sm:$0xf] %vm1359_vm2, %v1314_v63  ;;  %v1318_v49 = vpop.permute.xlu1 %1317  ;;  %v1633_v36 = vrot.slane %v1631_v22, 4  ;;  %v1616_v56 = vsel %vm3787_vm13, %v1611_v46, %v1615_v47  ;;  %v1769_v12 = vld [vmem:[#allocation2 + $0x48] sm:$0xe]  ;;  %v1833_v22 = vsel %vm3775_vm10, %v3135_v17, %v1832_v59  ;;  %v2181_v47 = vrot.slane %v2179_v33, 4 }
  0xef   : > { %1363 = vst.msk [vmem:[#allocation3 + $0xc] sm:$0xf] %vm1359_vm2, %v1318_v49  ;;  %v1600_v39 = vor.u32 %v1599_v27, %v1596_v26  ;;  %v1637_v49 = vshll.u32 %v1490_v40, 16  ;;  %v2145_v26 = vshll.u32 %v2033_v29, 16  ;;  %v2038_v46 = vld [vmem:[#allocation2 + $0x5c] sm:$0x1] }
  0xf0   : > { %v1316_v53 = vpop.permute.xlu0 %1315  ;;  %2420 = vrot.lane.b32.xlu1 %v2377_v43, %s3452_s25  ;;  %v1634_v48 = vor.u32 %v1633_v36, %v4020_v35 }
  0xf1   : > { %1362 = vst.msk [vmem:[#allocation3 + $0x8] sm:$0xf] %vm1359_vm2, %v1316_v53  ;;  %v1601_v52 = vrot.slane %v1600_v39, 4  ;;  %v1624_v53 = vor.u32 %v1623_v42, %v1620_v41  ;;  %v2144_v39 = vrot.slane %v2142_v24, 4  ;;  %v2147_v40 = vrot.slane %v2145_v26, 5 }
  0xf2   : > { %2418 = vrot.lane.b32.xlu0 %v2374_v50, %s3452_s25  ;;  %v1411_v63 = vpop.permute.xlu1 %1410  ;;  %v1635_v57 = vrot.slane %v1634_v48, 4  ;;  %v2168_v48 = vrot.slane %v2166_v34, 4  ;;  %v2314_v24 = vld [vmem:[#allocation2 + $0x48] sm:$0xe]  ;;  %v941_v26 = vld [vmem:[#allocation2 + $0x54] sm:$0xf] }
  0xf3   : > { %1458 = vst.msk [vmem:[#allocation3 + $0x4] sm:$0xf] %vm1456_vm3, %v1411_v63  ;;  %v1606_v61 = vsel %vm3787_vm13, %v1601_v52, %v4013_v19  ;;  %v1625_v62 = vrot.slane %v1624_v53, 4  ;;  %v1768_v63 = vld [vmem:[#allocation2 + $0x44] sm:$0x1]  ;;  %v2148_v53 = vor.u32 %v2147_v40, %v2144_v39  ;;  %v3143_v39 = vrot.slane %v2314_v24, 9 }
  0xf4   : > { %v1409_v3 = vpop.permute.xlu0 %1408  ;;  %1161 = vrot.lane.b32.xlu1 %v1090_v58, %s3446_s22  ;;  %v1639_v58 = vrot.slane %v1637_v49, 5  ;;  %v1835_v6 = vrot.slane %v1768_v63, 5  ;;  %v1932_v52 = vld [vmem:[#allocation2 + $0x48] sm:$0xf]  ;;  %v4075_v63 = vld [vmem:[#allocation2 + $0x4c] sm:$0xf] }
  0xf5   : > { %1457 = vst.msk [vmem:[#allocation3] sm:$0xf] %vm1456_vm3, %v1409_v3  ;;  %v2034_v3 = vld [vmem:[#allocation2 + $0x4c] sm:$0xf]  ;;  %v1630_v9 = vsel %vm3787_vm13, %v1625_v62, %v4020_v35  ;;  %v2169_v35 = vshll.u32 %v2036_v20, 16  ;;  %v1116_v40 = vshrl.u32 %v941_v26, 16 }
  0xf6   : > { %1159 = vrot.lane.b32.xlu0 %v1080_v0, %s3446_s22  ;;  %v1415_v11 = vpop.permute.xlu1 %1414  ;;  %v1770_v0 = vld [vmem:[#allocation2 + $0x4c] sm:$0xf]  ;;  %v1640_v4 = vsel %vm3787_vm13, %v1635_v57, %v1639_v58  ;;  %v2151_v13 = vshll.u32 %v2034_v3, 16  ;;  %v2185_v57 = vshll.u32 %v2038_v46, 16  ;;  %v1935_v58 = vld [vmem:[#allocation2 + $0x58] sm:$0xf] }
  0xf7   : > { %1460 = vst.msk [vmem:[#allocation3 + $0xc] sm:$0xf] %vm1456_vm3, %v1415_v11  ;;  %v1839_v7 = vrot.slane %v1770_v0, 5  ;;  %v1771_v11 = vld [vmem:[#allocation2 + $0x50] sm:$0x1]  ;;  %v2171_v49 = vrot.slane %v2169_v35, 5 }
  0xf8   : > { %v1413_v14 = vpop.permute.xlu0 %1412  ;;  %1329 = vrot.lane.b32.xlu1 %v1289_v8, %s3445_s9  ;;  %v1842_v19 = vrot.slane %v1771_v11, 5  ;;  %v4054_v28 = vrot.slane %v2151_v13, 5  ;;  %v1101_v0 = vshll.u32 %v939_v54, 16  ;;  %v940_v13 = vld [vmem:[#allocation2 + $0x50] sm:$0x1] }
  0xf9   : > { %1459 = vst.msk [vmem:[#allocation3 + $0x8] sm:$0xf] %vm1456_vm3, %v1413_v14  ;;  %v2155_v14 = vshrl.u32 %v2034_v3, 16  ;;  %v2172_v62 = vor.u32 %v2171_v49, %v2168_v48  ;;  %v942_v20 = vld [vmem:[#allocation2 + $0x58] sm:$0xf] }
  0xfa   : > { %1327 = vrot.lane.b32.xlu0 %v1286_v25, %s3445_s9  ;;  %v1692_v23 = vpop.permute.xlu1 %1691  ;;  %v4084_v29 = vrot.slane %v1101_v0, 5  ;;  %v4098_v34 = vld [vmem:[#allocation2 + $0x58] sm:$0xf]  ;;  %v1125_v35 = vshll.u32 %v942_v20, 16  ;;  %v2319_v48 = vld [vmem:[#allocation2 + $0x5c] sm:$0x1] }
  0xfb   : > { %1739 = vst.msk [vmem:[#allocation3 + $0x4] sm:$0xf] %vm1737_vm4, %v1692_v23  ;;  %v3136_v23 = vrot.slane %v1769_v12, 9  ;;  %v2173_v11 = vrot.slane %v2172_v62, 4  ;;  %v2380_v12 = vrot.slane %v4075_v63, 5  ;;  %v2387_v49 = vrot.slane %v4098_v34, 5 }
  0xfc   : > { %v1690_v31 = vpop.permute.xlu0 %1689  ;;  %1333 = vrot.lane.b32.xlu1 %v1296_v16, %s3445_s9  ;;  %v1836_v16 = vsel %vm3775_vm10, %v1834_v5, %v1835_v6  ;;  %v1934_v5 = vld [vmem:[#allocation2 + $0x54] sm:$0xf]  ;;  %v2149_v6 = vrot.slane %v2148_v53, 4  ;;  %v2390_v62 = vrot.slane %v2319_v48, 5  ;;  %v1227_v24 = vld [vmem:[#allocation2 + $0x5c] sm:$0x1] }
  0xfd   : > { %1738 = vst.msk [vmem:[#allocation3] sm:$0xf] %vm1737_vm4, %v1690_v31  ;;  %v2035_v31 = vld [vmem:[#allocation2 + $0x50] sm:$0x1]  ;;  %v2389_v0 = vrot.slane %v2387_v49, 4 }
  0xfe   : > { %1331 = vrot.lane.b32.xlu0 %v1293_v18, %s3445_s9  ;;  %v1696_v37 = vpop.permute.xlu1 %1695  ;;  %v1841_v18 = vrot.slane %v1839_v7, 4  ;;  %v2161_v42 = vshll.u32 %v2035_v31, 16  ;;  %v1111_v31 = vshll.u32 %v940_v13, 16  ;;  %v1226_v13 = vld [vmem:[#allocation2 + $0x58] sm:$0xf] }
  0xff   : > { %1741 = vst.msk [vmem:[#allocation3 + $0xc] sm:$0xf] %vm1737_vm4, %v1696_v37  ;;  %v1494_v48 = vld [vmem:[#allocation2 + $0x60] sm:$0xf] }
 0x100   : > { %v1694_v43 = vpop.permute.xlu0 %1693  ;;  %1426 = vrot.lane.b32.xlu1 %v1385_v32, %s3447_s24  ;;  %v2157_v32 = vrot.slane %v2155_v14, 4  ;;  %v1843_v36 = vsel %vm3775_vm10, %v1841_v18, %v1842_v19  ;;  %v2154_v19 = vsel %vm3787_vm13, %v2149_v6, %v4054_v28 }
 0x101   : > { %1740 = vst.msk [vmem:[#allocation3 + $0x8] sm:$0xf] %vm1737_vm4, %v1694_v43  ;;  %v4064_v43 = vrot.slane %v2175_v30, 5 }
 0x102   : > { %1424 = vrot.lane.b32.xlu0 %v1384_v38, %s3447_s24  ;;  %v1861_v50 = vpop.permute.xlu1 %1860  ;;  %v1840_v38 = vsel %vm3775_vm10, %v3136_v23, %v1839_v7 }
 0x103   : > { %1908 = vst.msk [vmem:[#allocation3 + $0x4] sm:$0xf] %vm1906_vm5, %v1861_v50  ;;  %v1933_v50 = vld [vmem:[#allocation2 + $0x4c] sm:$0xf] }
 0x104   : > { %v1859_v55 = vpop.permute.xlu0 %1858  ;;  %1430 = vrot.lane.b32.xlu1 %v1387_v45, %s3447_s24  ;;  %v2158_v45 = vor.u32 %v2157_v32, %v4054_v28  ;;  %v2382_v28 = vrot.slane %v2380_v12, 4 }
 0x105   : > { %1907 = vst.msk [vmem:[#allocation3] sm:$0xf] %vm1906_vm5, %v1859_v55  ;;  %v938_v55 = vld [vmem:[#allocation2 + $0x48] sm:$0xf] }
 0x106   : > { %1428 = vrot.lane.b32.xlu0 %v1386_v51, %s3447_s24  ;;  %v1865_v60 = vpop.permute.xlu1 %1864  ;;  %v2159_v59 = vrot.slane %v2158_v45, 4  ;;  %v1092_v2 = vshrl.u32 %v938_v55, 16  ;;  %v1095_v3 = vshll.u32 %v938_v55, 16  ;;  %v2381_v55 = vsel %vm3775_vm10, %v3143_v39, %v2380_v12 }
 0x107   : > { %1910 = vst.msk [vmem:[#allocation3 + $0xc] sm:$0xf] %vm1906_vm5, %v1865_v60  ;;  %v2163_v60 = vrot.slane %v2161_v42, 5 }
 0x108   : > { %v1863_v1 = vpop.permute.xlu0 %1862  ;;  %1707 = vrot.lane.b32.xlu1 %v1616_v56, %s3448_s18  ;;  %v1094_v15 = vrot.slane %v1092_v2, 4 }
 0x109   : > { %1909 = vst.msk [vmem:[#allocation3 + $0x8] sm:$0xf] %vm1906_vm5, %v1863_v1  ;;  %v1105_v1 = vshrl.u32 %v939_v54, 16 }
 0x10a   : > { %1705 = vrot.lane.b32.xlu0 %v1606_v61, %s3448_s18  ;;  %v1959_v8 = vpop.permute.xlu1 %1958  ;;  %v2182_v61 = vor.u32 %v2181_v47, %v4064_v43  ;;  %v1113_v47 = vrot.slane %v1111_v31, 5  ;;  %v1492_v31 = vld [vmem:[#allocation2 + $0x58] sm:$0xf] }
 0x10b   : > { %2006 = vst.msk [vmem:[#allocation3 + $0x4] sm:$0xf] %vm2004_vm6, %v1959_v8  ;;  %v2187_v8 = vrot.slane %v2185_v57, 5  ;;  %v1107_v14 = vrot.slane %v1105_v1, 4  ;;  %v1655_v39 = vshrl.u32 %v1492_v31, 16 }
 0x10c   : > { %v1957_v25 = vpop.permute.xlu0 %1956  ;;  %1711 = vrot.lane.b32.xlu1 %v1640_v4, %s3448_s18  ;;  %v2183_v17 = vrot.slane %v2182_v61, 4  ;;  %v2317_v61 = vld [vmem:[#allocation2 + $0x54] sm:$0xe] }
 0x10d   : > { %2005 = vst.msk [vmem:[#allocation3] sm:$0xf] %vm2004_vm6, %v1957_v25  ;;  %v2316_v25 = vld [vmem:[#allocation2 + $0x50] sm:$0x1]  ;;  %v1108_v32 = vor.u32 %v1107_v14, %v4084_v29 }
 0x10e   : > { %1709 = vrot.lane.b32.xlu0 %v1630_v9, %s3448_s18  ;;  %v1963_v21 = vpop.permute.xlu1 %1962  ;;  %v2164_v9 = vsel %vm3787_vm13, %v2159_v59, %v2163_v60  ;;  %v2383_v30 = vrot.slane %v2316_v25, 5  ;;  %v902_v59 = vld [vmem:[#allocation2 + $0x54] sm:$0xf] }
 0x10f   : > { %2008 = vst.msk [vmem:[#allocation3 + $0xc] sm:$0xf] %vm2004_vm6, %v1963_v21  ;;  %v901_v21 = vld [vmem:[#allocation2 + $0x4c] sm:$0xf] }
 0x110   : > { %v1961_v27 = vpop.permute.xlu0 %1960  ;;  %1876 = vrot.lane.b32.xlu1 %v1836_v16, %s3449_s14  ;;  %v1097_v16 = vrot.slane %v1095_v3, 5  ;;  %917 = vst.msk [vmem:[#allocation3 + $0x34] sm:$0xf] %vm488_vm0, %v901_v21  ;;  %v2384_v46 = vsel %vm3775_vm10, %v2382_v28, %v2383_v30  ;;  %918 = vst.msk [vmem:[#allocation3 + $0x38] sm:$0xf] %vm488_vm0, %v902_v59  ;;  %v1669_v59 = vshll.u32 %v1494_v48, 16 }
 0x111   : > { %2007 = vst.msk [vmem:[#allocation3 + $0x8] sm:$0xf] %vm2004_vm6, %v1961_v27  ;;  %v2188_v27 = vsel %vm3787_vm13, %v2183_v17, %v2187_v8  ;;  %v2391_v17 = vsel %vm3775_vm10, %v2389_v0, %v2390_v62 }
 0x112   : > { %1874 = vrot.lane.b32.xlu0 %v1833_v22, %s3449_s14  ;;  %v2240_v37 = vpop.permute.xlu1 %2239  ;;  %v900_v22 = vld [vmem:[#allocation2 + $0x48] sm:$0xf]  ;;  %v1098_v33 = vor.u32 %v1097_v16, %v1094_v15  ;;  %v1224_v16 = vld [vmem:[#allocation2 + $0x50] sm:$0x1] }
 0x113   : > { %2287 = vst.msk [vmem:[#allocation3 + $0x4] sm:$0xf] %vm2285_vm7, %v2240_v37 }
 0x114   : > { %v2238_v41 = vpop.permute.xlu0 %2237  ;;  %1880 = vrot.lane.b32.xlu1 %v1843_v36, %s3449_s14  ;;  %916 = vst.msk [vmem:[#allocation3 + $0x30] sm:$0xf] %vm488_vm0, %v900_v22  ;;  %v1129_v36 = vshrl.u32 %v942_v20, 16  ;;  %v1306_v20 = vrot.slane %v1226_v13, 5 }
 0x115   : > { %2286 = vst.msk [vmem:[#allocation3] sm:$0xf] %vm2285_vm7, %v2238_v41  ;;  %v1119_v41 = vshll.u32 %v941_v26, 16  ;;  %v1225_v26 = vld [vmem:[#allocation2 + $0x54] sm:$0xe] }
 0x116   : > { %1878 = vrot.lane.b32.xlu0 %v1840_v38, %s3449_s14  ;;  %v2244_v51 = vpop.permute.xlu1 %2243  ;;  %v2178_v38 = vsel %vm3787_vm13, %v2173_v11, %v4064_v43  ;;  %v1109_v43 = vrot.slane %v1108_v32, 4  ;;  %v1131_v53 = vrot.slane %v1129_v36, 4  ;;  %v1308_v34 = vrot.slane %v1306_v20, 4 }
 0x117   : > { %2289 = vst.msk [vmem:[#allocation3 + $0xc] sm:$0xf] %vm2285_vm7, %v2244_v51  ;;  %v943_v51 = vld [vmem:[#allocation2 + $0x5c] sm:$0x1]  ;;  %v1121_v57 = vrot.slane %v1119_v41, 5  ;;  %v3130_v36 = vrot.slane %v1225_v26, 9 }
 0x118   : > { %v2242_v56 = vpop.permute.xlu0 %2241  ;;  %1974 = vrot.lane.b32.xlu1 %v1933_v50, %s3450_s15  ;;  %v1099_v50 = vrot.slane %v1098_v33, 4  ;;  %v1114_v63 = vsel %vm3787_vm13, %v1109_v43, %v1113_v47  ;;  %v1135_v2 = vshll.u32 %v943_v51, 16  ;;  %v1491_v33 = vld [vmem:[#allocation2 + $0x54] sm:$0xf]  ;;  %v1657_v51 = vrot.slane %v1655_v39, 4 }
 0x119   : > { %2288 = vst.msk [vmem:[#allocation3 + $0x8] sm:$0xf] %vm2285_vm7, %v2242_v56  ;;  %v1118_v56 = vrot.slane %v1116_v40, 4  ;;  %v1307_v43 = vsel %vm3775_vm10, %v3130_v36, %v1306_v20  ;;  %v1777_v36 = vld [vmem:[#allocation2 + $0x68] sm:$0x1] }
 0x11a   : > { %1972 = vrot.lane.b32.xlu0 %v1932_v52, %s3450_s15  ;;  %v2409_v4 = vpop.permute.xlu1 %2408  ;;  %v4111_v52 = vrot.slane %v1125_v35, 5  ;;  %v1137_v25 = vrot.slane %v1135_v2, 5  ;;  %v1309_v35 = vrot.slane %v1227_v24, 5 }
 0x11b   : > { %2456 = vst.msk [vmem:[#allocation3 + $0x4] sm:$0xf] %vm2454_vm8, %v2409_v4  ;;  %v1104_v4 = vsel %vm3787_vm13, %v1099_v50, %v4084_v29  ;;  %v1122_v6 = vor.u32 %v1121_v57, %v1118_v56 }
 0x11c   : > { %v2407_v7 = vpop.permute.xlu0 %2406  ;;  %1978 = vrot.lane.b32.xlu1 %v1935_v58, %s3450_s15  ;;  %v903_v58 = vld [vmem:[#allocation2 + $0x58] sm:$0xf]  ;;  %v1132_v1 = vor.u32 %v1131_v53, %v4111_v52 }
 0x11d   : > { %2455 = vst.msk [vmem:[#allocation3] sm:$0xf] %vm2454_vm8, %v2407_v7  ;;  %v1223_v7 = vld [vmem:[#allocation2 + $0x4c] sm:$0xf]  ;;  %v1123_v15 = vrot.slane %v1122_v6, 4 }
 0x11e   : > { %1976 = vrot.lane.b32.xlu0 %v1934_v5, %s3450_s15  ;;  %v1150_v18 = vpop.permute.xlu1 %1149  ;;  %919 = vst.msk [vmem:[#allocation3 + $0x3c] sm:$0xf] %vm488_vm0, %v903_v58  ;;  %v3144_v5 = vrot.slane %v2317_v61, 9  ;;  %v1133_v11 = vrot.slane %v1132_v1, 4  ;;  %v1299_v12 = vrot.slane %v1223_v7, 5  ;;  %v1666_v58 = vshrl.u32 %v1494_v48, 16 }
 0x11f   : > { %1193 = vst.msk [vmem:[#allocation3 + $0x14] sm:$0xf] %vm1187_vm1, %v1150_v18  ;;  %v1128_v28 = vsel %vm3787_vm13, %v1123_v15, %v4111_v52  ;;  %v1389_v61 = vld [vmem:[#allocation2 + $0x58] sm:$0xf]  ;;  %v1671_v7 = vrot.slane %v1669_v59, 5  ;;  %vm2852_vm0 = vcmask 519168  }
 0x120   : > { %v1148_v23 = vpop.permute.xlu0 %1147  ;;  %2255 = vrot.lane.b32.xlu1 %v2164_v9, %s3451_s19  ;;  %v2388_v14 = vsel %vm3775_vm10, %v3144_v5, %v2387_v49  ;;  %v1138_v21 = vsel %vm3787_vm13, %v1133_v11, %v1137_v25  ;;  %v1301_v22 = vrot.slane %v1299_v12, 4  ;;  %v1310_v49 = vsel %vm3775_vm10, %v1308_v34, %v1309_v35  ;;  %v1496_v5 = vld [vmem:[#allocation2 + $0x68] sm:$0x1] }
 0x121   : > { %1192 = vst.msk [vmem:[#allocation3 + $0x10] sm:$0xf] %vm1187_vm1, %v1148_v23  ;;  %v1302_v23 = vrot.slane %v1224_v16, 5  ;;  %v1668_v6 = vrot.slane %v1666_v58, 4  ;;  %v1773_v16 = vld [vmem:[#allocation2 + $0x58] sm:$0xf] }
 0x122   : > { %2253 = vrot.lane.b32.xlu0 %v2154_v19, %s3451_s19  ;;  %v2413_v37 = vpop.permute.xlu1 %2412  ;;  %v1222_v19 = vld [vmem:[#allocation2 + $0x48] sm:$0xe] }
 0x123   : > { %2458 = vst.msk [vmem:[#allocation3 + $0xc] sm:$0xf] %vm2454_vm8, %v2413_v37  ;;  %v3129_v30 = vrot.slane %v1222_v19, 9  ;;  %v1303_v37 = vsel %vm3775_vm10, %v1301_v22, %v1302_v23  ;;  %v1672_v15 = vor.u32 %v1671_v7, %v1668_v6  ;;  %v1846_v22 = vrot.slane %v1773_v16, 5  ;;  %v1776_v23 = vld [vmem:[#allocation2 + $0x64] sm:$0xf] }
 0x124   : > { %v2411_v42 = vpop.permute.xlu0 %2410  ;;  %v3341_v45 = vld [vmem:[#allocation3] sm:$0xff]   ;;  %2259 = vrot.lane.b32.xlu1 %v2188_v27, %s3451_s19  ;;  %v1937_v7 = vld [vmem:[#allocation2 + $0x64] sm:$0xf] }
 0x125   : > { %2457 = vst.msk [vmem:[#allocation3 + $0x8] sm:$0xf] %vm2454_vm8, %v2411_v42  ;;  %3239 = vmatprep.mubr.msk.bf16.mxu0 %vm2549_vm9, %v3341_v45  ;;  %v1300_v41 = vsel %vm3775_vm10, %v3129_v30, %v1299_v12  ;;  %v1642_v42 = vshrl.u32 %v1491_v33, 16  ;;  %v1645_v45 = vshll.u32 %v1491_v33, 16  ;;  %v1685_v12 = vshll.u32 %v1496_v5, 16 }
 0x126   : > { %2257 = vrot.lane.b32.xlu0 %v2178_v38, %s3451_s19  ;;  %v1154_v54 = vpop.permute.xlu1 %1153  ;;  %v1651_v38 = vshll.u32 %v1492_v31, 16  ;;  %v1772_v31 = vld [vmem:[#allocation2 + $0x54] sm:$0xe]  ;;  %v1848_v34 = vrot.slane %v1846_v22, 4 }
 0x127   : > { %1195 = vst.msk [vmem:[#allocation3 + $0x1c] sm:$0xf] %vm1187_vm1, %v1154_v54  ;;  %v1644_v56 = vrot.slane %v1642_v42, 4  ;;  %v1647_v57 = vrot.slane %v1645_v45, 5  ;;  %v2039_v45 = vld [vmem:[#allocation2 + $0x60] sm:$0xf] }
 0x128   : > { %v1152_v60 = vpop.permute.xlu0 %1151  ;;  %2424 = vrot.lane.b32.xlu1 %v2384_v46, %s3452_s25  ;;  %v1495_v46 = vld [vmem:[#allocation2 + $0x64] sm:$0xf]  ;;  %v1653_v50 = vrot.slane %v1651_v38, 5 }
 0x129   : > { %1194 = vst.msk [vmem:[#allocation3 + $0x18] sm:$0xf] %vm1187_vm1, %v1152_v60  ;;  %v1675_v52 = vshll.u32 %v1495_v46, 16  ;;  %v1679_v53 = vshrl.u32 %v1495_v46, 16 }
 0x12a   : > { %2422 = vrot.lane.b32.xlu0 %v2381_v55, %s3452_s25  ;;  %v1322_v3 = vpop.permute.xlu1 %1321  ;;  %v1493_v55 = vld [vmem:[#allocation2 + $0x5c] sm:$0x1]  ;;  %v1658_v62 = vor.u32 %v1657_v51, %v1653_v50 }
 0x12b   : > { %1365 = vst.msk [vmem:[#allocation3 + $0x14] sm:$0xf] %vm1359_vm2, %v1322_v3  ;;  %v1677_v0 = vrot.slane %v1675_v52, 5  ;;  %v1681_v1 = vrot.slane %v1679_v53, 4  ;;  %v1388_v3 = vld [vmem:[#allocation2 + $0x54] sm:$0xf] }
 0x12c   : > { %v1320_v8 = vpop.permute.xlu0 %1319  ;;  %v3343_v9 = vld [vmem:[#allocation3 + $0x8] sm:$0xff]   ;;  %1165 = vrot.lane.b32.xlu1 %v1114_v63, %s3446_s22  ;;  %v1661_v63 = vshll.u32 %v1493_v55, 16  ;;  %v2190_v53 = vshrl.u32 %v2039_v45, 16  ;;  %v2043_v55 = vld [vmem:[#allocation2 + $0x70] sm:$0xf] }
 0x12d   : > { %1364 = vst.msk [vmem:[#allocation3 + $0x10] sm:$0xf] %vm1359_vm2, %v1320_v8  ;;  %3240 = vmatmul.mubr.msk.bf16.vlgmr.msra.gmra.mxu0 %vm2549_vm9, %v3343_v9  ;;  %v1391_v9 = vld [vmem:[#allocation2 + $0x64] sm:$0xf]  ;;  %v1682_v25 = vor.u32 %v1681_v1, %v1677_v0  ;;  %v2041_v1 = vld [vmem:[#allocation2 + $0x68] sm:$0x1] }
 0x12e   : > { %1163 = vrot.lane.b32.xlu0 %v1104_v4, %s3446_s22  ;;  %v1326_v29 = vpop.permute.xlu1 %1325  ;;  %v1648_v4 = vor.u32 %v1647_v57, %v1644_v56  ;;  %v1663_v11 = vrot.slane %v1661_v63, 5  ;;  %v2042_v57 = vld [vmem:[#allocation2 + $0x6c] sm:$0xf]  ;;  %v2227_v63 = vshrl.u32 %v2043_v55, 16 }
 0x12f   : > { %1367 = vst.msk [vmem:[#allocation3 + $0x1c] sm:$0xf] %vm1359_vm2, %v1326_v29  ;;  %v1390_v29 = vld [vmem:[#allocation2 + $0x60] sm:$0xf]  ;;  %v1683_v20 = vrot.slane %v1682_v25, 4  ;;  %v2217_v5 = vshll.u32 %v2042_v57, 16 }
 0x130   : > { %v1324_v18 = vpop.permute.xlu0 %1323  ;;  %2428 = vrot.lane.b32.xlu1 %v2391_v17, %s3452_s25  ;;  %v1659_v17 = vrot.slane %v1658_v62, 4  ;;  %v2223_v62 = vshll.u32 %v2043_v55, 16 }
 0x131   : > { %1366 = vst.msk [vmem:[#allocation3 + $0x18] sm:$0xf] %vm1359_vm2, %v1324_v18 }
 0x132   : > { %2426 = vrot.lane.b32.xlu0 %v2388_v14, %s3452_s25  ;;  %v1419_v27 = vpop.permute.xlu1 %1418  ;;  %v1649_v14 = vrot.slane %v1648_v4, 4  ;;  %v1664_v19 = vsel %vm3787_vm13, %v1659_v17, %v1663_v11  ;;  %v2214_v4 = vshrl.u32 %v2042_v57, 16  ;;  %v2225_v17 = vrot.slane %v2223_v62, 5 }
 0x133   : > { %1462 = vst.msk [vmem:[#allocation3 + $0x14] sm:$0xf] %vm1456_vm3, %v1419_v27  ;;  %v1673_v27 = vrot.slane %v1672_v15, 4  ;;  %v2229_v11 = vrot.slane %v2227_v63, 4  ;;  %v2219_v15 = vrot.slane %v2217_v5, 5 }
 0x134   : > { %v1417_v32 = vpop.permute.xlu0 %1416  ;;  %1169 = vrot.lane.b32.xlu1 %v1138_v21, %s3446_s22  ;;  %v1687_v21 = vrot.slane %v1685_v12, 5  ;;  %v1654_v26 = vsel %vm3787_vm13, %v1649_v14, %v1653_v50  ;;  %v1936_v12 = vld [vmem:[#allocation2 + $0x60] sm:$0xf]  ;;  %v2216_v14 = vrot.slane %v2214_v4, 4 }
 0x135   : > { %1461 = vst.msk [vmem:[#allocation3 + $0x10] sm:$0xf] %vm1456_vm3, %v1417_v32  ;;  %v1853_v32 = vrot.slane %v1776_v23, 5  ;;  %v1678_v39 = vsel %vm3787_vm13, %v1673_v27, %v1677_v0 }
 0x136   : > { %1167 = vrot.lane.b32.xlu0 %v1128_v28, %s3446_s22  ;;  %v1423_v40 = vpop.permute.xlu1 %1422  ;;  %v1774_v28 = vld [vmem:[#allocation2 + $0x5c] sm:$0x1]  ;;  %v1688_v33 = vsel %vm3787_vm13, %v1683_v20, %v1687_v21  ;;  %v2230_v21 = vor.u32 %v2229_v11, %v2225_v17  ;;  %v2220_v27 = vor.u32 %v2219_v15, %v2216_v14  ;;  %s3183_s22 = sshll.u32 %s3430_s5, 1 }
 0x137   : > { %1464 = vst.msk [vmem:[#allocation3 + $0x1c] sm:$0xf] %vm1456_vm3, %v1423_v40  ;;  %v1849_v35 = vrot.slane %v1774_v28, 5  ;;  %v3137_v40 = vrot.slane %v1772_v31, 9  ;;  %v1855_v46 = vrot.slane %v1853_v32, 4 }
 0x138   : > { %v1421_v47 = vpop.permute.xlu0 %1420  ;;  %1337 = vrot.lane.b32.xlu1 %v1303_v37, %s3445_s9  ;;  %v1775_v37 = vld [vmem:[#allocation2 + $0x60] sm:$0xe]  ;;  %v2321_v28 = vld [vmem:[#allocation2 + $0x64] sm:$0xf] }
 0x139   : > { %1463 = vst.msk [vmem:[#allocation3 + $0x18] sm:$0xf] %vm1456_vm3, %v1421_v47  ;;  %v1856_v47 = vrot.slane %v1777_v36, 5  ;;  %v3138_v48 = vrot.slane %v1775_v37, 9  ;;  %v1847_v52 = vsel %vm3775_vm10, %v3137_v40, %v1846_v22  ;;  %v2221_v37 = vrot.slane %v2220_v27, 4 }
 0x13a   : > { %1335 = vrot.lane.b32.xlu0 %v1300_v41, %s3445_s9  ;;  %v1700_v54 = vpop.permute.xlu1 %1699  ;;  %v2040_v41 = vld [vmem:[#allocation2 + $0x64] sm:$0xf] }
 0x13b   : > { %1743 = vst.msk [vmem:[#allocation3 + $0x14] sm:$0xf] %vm1737_vm4, %v1700_v54  ;;  %v2203_v50 = vshrl.u32 %v2040_v41, 16  ;;  %v2193_v54 = vshll.u32 %v2039_v45, 16  ;;  %v1857_v58 = vsel %vm3775_vm10, %v1855_v46, %v1856_v47  ;;  %v1854_v59 = vsel %vm3775_vm10, %v3138_v48, %v1853_v32 }
 0x13c   : > { %v1698_v60 = vpop.permute.xlu0 %1697  ;;  %1341 = vrot.lane.b32.xlu1 %v1310_v49, %s3445_s9  ;;  %v1850_v49 = vsel %vm3775_vm10, %v1848_v34, %v1849_v35  ;;  %v2231_v32 = vrot.slane %v2230_v21, 4  ;;  %v2394_v34 = vrot.slane %v2321_v28, 5 }
 0x13d   : > { %1742 = vst.msk [vmem:[#allocation3 + $0x10] sm:$0xf] %vm1737_vm4, %v1698_v60 }
 0x13e   : > { %1339 = vrot.lane.b32.xlu0 %v1307_v43, %s3445_s9  ;;  %v1704_v2 = vpop.permute.xlu1 %1703  ;;  %v2199_v43 = vshll.u32 %v2040_v41, 16  ;;  %v2320_v41 = vld [vmem:[#allocation2 + $0x60] sm:$0xe]  ;;  %v2396_v45 = vrot.slane %v2394_v34, 4 }
 0x13f   : > { %1745 = vst.msk [vmem:[#allocation3 + $0x1c] sm:$0xf] %vm1737_vm4, %v1704_v2  ;;  %v2192_v2 = vrot.slane %v2190_v53, 4  ;;  %v2323_v53 = vld [vmem:[#allocation2 + $0x6c] sm:$0xe] }
 0x140   : > { %v1702_v8 = vpop.permute.xlu0 %1701  ;;  %1434 = vrot.lane.b32.xlu1 %v1389_v61, %s3447_s24  ;;  %v2201_v60 = vrot.slane %v2199_v43, 5  ;;  %v2205_v61 = vrot.slane %v2203_v50, 4  ;;  %v3145_v43 = vrot.slane %v2320_v41, 9  ;;  %v2325_v50 = vld [vmem:[#allocation2 + $0x74] sm:$0x1] }
 0x141   : > { %1744 = vst.msk [vmem:[#allocation3 + $0x18] sm:$0xf] %vm1737_vm4, %v1702_v8  ;;  %v2404_v55 = vrot.slane %v2325_v50, 5 }
 0x142   : > { %1432 = vrot.lane.b32.xlu0 %v1388_v3, %s3447_s24  ;;  %v1869_v13 = vpop.permute.xlu1 %1868  ;;  %v2195_v3 = vrot.slane %v2193_v54, 5  ;;  %v2206_v8 = vor.u32 %v2205_v61, %v2201_v60  ;;  %v2395_v57 = vsel %vm3775_vm10, %v3145_v43, %v2394_v34 }
 0x143   : > { %1912 = vst.msk [vmem:[#allocation3 + $0x14] sm:$0xf] %vm1906_vm5, %v1869_v13 }
 0x144   : > { %v1867_v18 = vpop.permute.xlu0 %1866  ;;  %1438 = vrot.lane.b32.xlu1 %v1391_v9, %s3447_s24  ;;  %v2209_v9 = vshll.u32 %v2041_v1, 16  ;;  %v2196_v13 = vor.u32 %v2195_v3, %v2192_v2 }
 0x145   : > { %1911 = vst.msk [vmem:[#allocation3 + $0x10] sm:$0xf] %vm1906_vm5, %v1867_v18  ;;  %v1939_v18 = vld [vmem:[#allocation2 + $0x70] sm:$0xf] }
 0x146   : > { %1436 = vrot.lane.b32.xlu0 %v1390_v29, %s3447_s24  ;;  %v1873_v24 = vpop.permute.xlu1 %1872  ;;  %v2044_v29 = vld [vmem:[#allocation2 + $0x74] sm:$0x1]  ;;  %v2211_v20 = vrot.slane %v2209_v9, 5 }
 0x147   : > { %1914 = vst.msk [vmem:[#allocation3 + $0x1c] sm:$0xf] %vm1906_vm5, %v1873_v24  ;;  %v2233_v22 = vshll.u32 %v2044_v29, 16  ;;  %v1938_v24 = vld [vmem:[#allocation2 + $0x6c] sm:$0xf] }
 0x148   : > { %v1871_v30 = vpop.permute.xlu0 %1870  ;;  %1715 = vrot.lane.b32.xlu1 %v1664_v19, %s3448_s18  ;;  %v2207_v19 = vrot.slane %v2206_v8, 4 }
 0x149   : > { %1913 = vst.msk [vmem:[#allocation3 + $0x18] sm:$0xf] %vm1906_vm5, %v1871_v30 }
 0x14a   : > { %1713 = vrot.lane.b32.xlu0 %v1654_v26, %s3448_s18  ;;  %v1967_v38 = vpop.permute.xlu1 %1966  ;;  %v2197_v26 = vrot.slane %v2196_v13, 4  ;;  %v2212_v31 = vsel %vm3787_vm13, %v2207_v19, %v2211_v20 }
 0x14b   : > { %2010 = vst.msk [vmem:[#allocation3 + $0x14] sm:$0xf] %vm2004_vm6, %v1967_v38  ;;  %v2322_v38 = vld [vmem:[#allocation2 + $0x68] sm:$0x1] }
 0x14c   : > { %v1965_v42 = vpop.permute.xlu0 %1964  ;;  %1719 = vrot.lane.b32.xlu1 %v1688_v33, %s3448_s18  ;;  %v2235_v33 = vrot.slane %v2233_v22, 5  ;;  %v2202_v36 = vsel %vm3787_vm13, %v2197_v26, %v2201_v60  ;;  %v2397_v46 = vrot.slane %v2322_v38, 5 }
 0x14d   : > { %2009 = vst.msk [vmem:[#allocation3 + $0x10] sm:$0xf] %vm2004_vm6, %v1965_v42 }
 0x14e   : > { %1717 = vrot.lane.b32.xlu0 %v1678_v39, %s3448_s18  ;;  %v1971_v51 = vpop.permute.xlu1 %1970  ;;  %v2324_v39 = vld [vmem:[#allocation2 + $0x70] sm:$0xf]  ;;  %v2236_v42 = vsel %vm3787_vm13, %v2231_v32, %v2235_v33  ;;  %v2398_v54 = vsel %vm3775_vm10, %v2396_v45, %v2397_v46  ;;  %s2899_s18 = sshll.u32 %s3753_s0, 4  ;;  %s2900_s18 = int_to_ptr.vmem [resolvable:$true] %s2899_s18 }
 0x14f   : > { %2012 = vst.msk [vmem:[#allocation3 + $0x1c] sm:$0xf] %vm2004_vm6, %v1971_v51  ;;  %v2401_v47 = vrot.slane %v2324_v39, 5  ;;  %s3350_s26 = scalar_lea.vmem %s2900_s18, 32 }
 0x150   : > { %v1969_v56 = vpop.permute.xlu0 %1968  ;;  %1884 = vrot.lane.b32.xlu1 %v1850_v49, %s3449_s14  ;;  %v2226_v49 = vsel %vm3787_vm13, %v2221_v37, %v2225_v17  ;;  %p3351_p6 = scmp.ne.s32.totalorder %s2900_s18, %s3350_s26 }
 0x151   : > { %2011 = vst.msk [vmem:[#allocation3 + $0x18] sm:$0xf] %vm2004_vm6, %v1969_v56  ;;  %v2403_v44 = vrot.slane %v2401_v47, 4 }
 0x152   : > { %1882 = vrot.lane.b32.xlu0 %v1847_v52, %s3449_s14  ;;  %v2248_v0 = vpop.permute.xlu1 %2247  ;;  %p3352_p7 = pnand %p3351_p6, %p3551_p3 }
 0x153   : > { %2291 = vst.msk [vmem:[#allocation3 + $0x14] sm:$0xf] %vm2285_vm7, %v2248_v0  ;;  %v2405_v60 = vsel %vm3775_vm10, %v2403_v44, %v2404_v55 }
 0x154   : > { %v2246_v6 = vpop.permute.xlu0 %2245  ;;  %1888 = vrot.lane.b32.xlu1 %v1857_v58, %s3449_s14  ;;  %v3146_v58 = vrot.slane %v2323_v53, 9  ;;  %p3353_p9 = pneg %p3352_p7 }
 0x155   : > { %2290 = vst.msk [vmem:[#allocation3 + $0x10] sm:$0xf] %vm2285_vm7, %v2246_v6 }
 0x156   : > { %1886 = vrot.lane.b32.xlu0 %v1854_v59, %s3449_s14  ;;  %v2252_v25 = vpop.permute.xlu1 %2251  ;;  %v2402_v62 = vsel %vm3775_vm10, %v3146_v58, %v2401_v47  ;;  %vm2694_vm10 = vcmask 523264  }
 0x157   : > { %2293 = vst.msk [vmem:[#allocation3 + $0x1c] sm:$0xf] %vm2285_vm7, %v2252_v25 }
 0x158   : > { %v2250_v16 = vpop.permute.xlu0 %2249  ;;  %1982 = vrot.lane.b32.xlu1 %v1937_v7, %s3450_s15 }
 0x159   : > { %2292 = vst.msk [vmem:[#allocation3 + $0x18] sm:$0xf] %vm2285_vm7, %v2250_v16 }
 0x15a   : > { %1980 = vrot.lane.b32.xlu0 %v1936_v12, %s3450_s15  ;;  %v2417_v23 = vpop.permute.xlu1 %2416 }
 0x15b   : > { %2460 = vst.msk [vmem:[#allocation3 + $0x14] sm:$0xf] %vm2454_vm8, %v2417_v23 }
 0x15c   : > { %v2415_v30 = vpop.permute.xlu0 %2414  ;;  %1986 = vrot.lane.b32.xlu1 %v1939_v18, %s3450_s15 }
 0x15d   : > { %2459 = vst.msk [vmem:[#allocation3 + $0x10] sm:$0xf] %vm2454_vm8, %v2415_v30 }
 0x15e   : > { %1984 = vrot.lane.b32.xlu0 %v1938_v24, %s3450_s15  ;;  %v1158_v35 = vpop.permute.xlu1 %1157 }
 0x15f   : > { %1197 = vst.msk [vmem:[#allocation3 + $0x24] sm:$0xf] %vm1187_vm1, %v1158_v35 }
 0x160   : > { %v1156_v40 = vpop.permute.xlu0 %1155  ;;  %2263 = vrot.lane.b32.xlu1 %v2212_v31, %s3451_s19 }
 0x161   : > { %1196 = vst.msk [vmem:[#allocation3 + $0x20] sm:$0xf] %vm1187_vm1, %v1156_v40 }
 0x162   : > { %2261 = vrot.lane.b32.xlu0 %v2202_v36, %s3451_s19  ;;  %v2421_v48 = vpop.permute.xlu1 %2420 }
 0x163   : > { %2462 = vst.msk [vmem:[#allocation3 + $0x1c] sm:$0xf] %vm2454_vm8, %v2421_v48 }
 0x164   : > { %v2419_v51 = vpop.permute.xlu0 %2418  ;;  %v3344_v52 = vld [vmem:[#allocation3 + $0x10] sm:$0xff]   ;;  %2267 = vrot.lane.b32.xlu1 %v2236_v42, %s3451_s19 }
 0x165   : > { %2461 = vst.msk [vmem:[#allocation3 + $0x18] sm:$0xf] %vm2454_vm8, %v2419_v51  ;;  %3243 = vmatprep.mubr.msk.bf16.mxu0 %vm2549_vm9, %v3344_v52 }
 0x166   : > { %2265 = vrot.lane.b32.xlu0 %v2226_v49, %s3451_s19  ;;  %v1162_v56 = vpop.permute.xlu1 %1161  ;;  %s4475_s19 = sand.u32 1, %s3418_s28  }
 0x167   : > { %1199 = vst.msk [vmem:[#allocation3 + $0x2c] sm:$0xf] %vm1187_vm1, %v1162_v56 }
 0x168   : > { %v1160_v59 = vpop.permute.xlu0 %1159  ;;  %2432 = vrot.lane.b32.xlu1 %v2398_v54, %s3452_s25 }
 0x169   : > { %1198 = vst.msk [vmem:[#allocation3 + $0x28] sm:$0xf] %vm1187_vm1, %v1160_v59 }
 0x16a   : > { %2430 = vrot.lane.b32.xlu0 %v2395_v57, %s3452_s25  ;;  %v1330_v61 = vpop.permute.xlu1 %1329 }
 0x16b   : > { %1369 = vst.msk [vmem:[#allocation3 + $0x24] sm:$0xf] %vm1359_vm2, %v1330_v61 }
 0x16c   : > { %v1328_v63 = vpop.permute.xlu0 %1327  ;;  %v3345_v0 = vld [vmem:[#allocation3 + $0x18] sm:$0xff]   ;;  %2436 = vrot.lane.b32.xlu1 %v2405_v60, %s3452_s25 }
 0x16d   : > { %1368 = vst.msk [vmem:[#allocation3 + $0x20] sm:$0xf] %vm1359_vm2, %v1328_v63  ;;  %3244 = vmatmul.mubr.msk.bf16.gmra.mxu0 %vm2549_vm9, %v3345_v0  ;;  %v4312_v63 = vld [vmem:[%s4450_s6] ss:$0 sm:$0xff] }
 0x16e   : > { %2434 = vrot.lane.b32.xlu0 %v2402_v62, %s3452_s25  ;;  %v1334_v1 = vpop.permute.xlu1 %1333  ;;  %s2880_s25 = scalar_lea.sflag [#allocation5], %s4475_s19 }
 0x16f   : > { %1371 = vst.msk [vmem:[#allocation3 + $0x2c] sm:$0xf] %vm1359_vm2, %v1334_v1 }
 0x170   : > { %v1332_v2 = vpop.permute.xlu0 %1331 }
 0x171   : > { %1370 = vst.msk [vmem:[#allocation3 + $0x28] sm:$0xf] %vm1359_vm2, %v1332_v2 }
 0x172   : > { %v1427_v10 = vpop.permute.xlu1 %1426 }
 0x173   : > { %1466 = vst.msk [vmem:[#allocation3 + $0x24] sm:$0xf] %vm1456_vm3, %v1427_v10 }
 0x174   : > { %v1425_v3 = vpop.permute.xlu0 %1424 }
 0x175   : > { %1465 = vst.msk [vmem:[#allocation3 + $0x20] sm:$0xf] %vm1456_vm3, %v1425_v3 }
 0x176   : > { %v1431_v4 = vpop.permute.xlu1 %1430 }
 0x177   : > { %1468 = vst.msk [vmem:[#allocation3 + $0x2c] sm:$0xf] %vm1456_vm3, %v1431_v4 }
 0x178   : > { %v1429_v5 = vpop.permute.xlu0 %1428 }
 0x179   : > { %1467 = vst.msk [vmem:[#allocation3 + $0x28] sm:$0xf] %vm1456_vm3, %v1429_v5 }
 0x17a   : > { %v1708_v6 = vpop.permute.xlu1 %1707 }
 0x17b   : > { %1747 = vst.msk [vmem:[#allocation3 + $0x24] sm:$0xf] %vm1737_vm4, %v1708_v6 }
 0x17c   : > { %v1706_v7 = vpop.permute.xlu0 %1705 }
 0x17d   : > { %1746 = vst.msk [vmem:[#allocation3 + $0x20] sm:$0xf] %vm1737_vm4, %v1706_v7 }
 0x17e   : > { %v1712_v8 = vpop.permute.xlu1 %1711 }
 0x17f   : > { %1749 = vst.msk [vmem:[#allocation3 + $0x2c] sm:$0xf] %vm1737_vm4, %v1712_v8 }
 0x180   : > { %v1710_v9 = vpop.permute.xlu0 %1709 }
 0x181   : > { %1748 = vst.msk [vmem:[#allocation3 + $0x28] sm:$0xf] %vm1737_vm4, %v1710_v9 }
 0x182   : > { %v1877_v17 = vpop.permute.xlu1 %1876 }
 0x183   : > { %1916 = vst.msk [vmem:[#allocation3 + $0x24] sm:$0xf] %vm1906_vm5, %v1877_v17 }
 0x184   : > { %v1875_v11 = vpop.permute.xlu0 %1874 }
 0x185   : > { %1915 = vst.msk [vmem:[#allocation3 + $0x20] sm:$0xf] %vm1906_vm5, %v1875_v11 }
 0x186   : > { %v1881_v25 = vpop.permute.xlu1 %1880 }
 0x187   : > { %1918 = vst.msk [vmem:[#allocation3 + $0x2c] sm:$0xf] %vm1906_vm5, %v1881_v25 }
 0x188   : > { %v1879_v12 = vpop.permute.xlu0 %1878 }
 0x189   : > { %1917 = vst.msk [vmem:[#allocation3 + $0x28] sm:$0xf] %vm1906_vm5, %v1879_v12 }
 0x18a   : > { %v1975_v13 = vpop.permute.xlu1 %1974 }
 0x18b   : > { %2014 = vst.msk [vmem:[#allocation3 + $0x24] sm:$0xf] %vm2004_vm6, %v1975_v13 }
 0x18c   : > { %v1973_v29 = vpop.permute.xlu0 %1972 }
 0x18d   : > { %2013 = vst.msk [vmem:[#allocation3 + $0x20] sm:$0xf] %vm2004_vm6, %v1973_v29 }
 0x18e   : > { %v1979_v14 = vpop.permute.xlu1 %1978 }
 0x18f   : > { %2016 = vst.msk [vmem:[#allocation3 + $0x2c] sm:$0xf] %vm2004_vm6, %v1979_v14 }
 0x190   : > { %v1977_v15 = vpop.permute.xlu0 %1976 }
 0x191   : > { %2015 = vst.msk [vmem:[#allocation3 + $0x28] sm:$0xf] %vm2004_vm6, %v1977_v15 }
 0x192   : > { %v2256_v16 = vpop.permute.xlu1 %2255 }
 0x193   : > { %2295 = vst.msk [vmem:[#allocation3 + $0x24] sm:$0xf] %vm2285_vm7, %v2256_v16 }
 0x194   : > { %v2254_v18 = vpop.permute.xlu0 %2253 }
 0x195   : > { %2294 = vst.msk [vmem:[#allocation3 + $0x20] sm:$0xf] %vm2285_vm7, %v2254_v18 }
 0x196   : > { %v2260_v19 = vpop.permute.xlu1 %2259 }
 0x197   : > { %2297 = vst.msk [vmem:[#allocation3 + $0x2c] sm:$0xf] %vm2285_vm7, %v2260_v19 }
 0x198   : > { %v2258_v20 = vpop.permute.xlu0 %2257 }
 0x199   : > { %2296 = vst.msk [vmem:[#allocation3 + $0x28] sm:$0xf] %vm2285_vm7, %v2258_v20 }
 0x19a   : > { %v2425_v21 = vpop.permute.xlu1 %2424 }
 0x19b   : > { %2464 = vst.msk [vmem:[#allocation3 + $0x24] sm:$0xf] %vm2454_vm8, %v2425_v21 }
 0x19c   : > { %v2423_v22 = vpop.permute.xlu0 %2422 }
 0x19d   : > { %2463 = vst.msk [vmem:[#allocation3 + $0x20] sm:$0xf] %vm2454_vm8, %v2423_v22 }
 0x19e   : > { %v1166_v23 = vpop.permute.xlu1 %1165 }
 0x19f   : > { %1201 = vst.msk [vmem:[#allocation3 + $0x34] sm:$0xf] %vm1187_vm1, %v1166_v23 }
 0x1a0   : > { %v1164_v24 = vpop.permute.xlu0 %1163 }
 0x1a1   : > { %1200 = vst.msk [vmem:[#allocation3 + $0x30] sm:$0xf] %vm1187_vm1, %v1164_v24 }
 0x1a2   : > { %v2429_v26 = vpop.permute.xlu1 %2428 }
 0x1a3   : > { %2466 = vst.msk [vmem:[#allocation3 + $0x2c] sm:$0xf] %vm2454_vm8, %v2429_v26 }
 0x1a4   : > { %v2427_v27 = vpop.permute.xlu0 %2426  ;;  %v3346_v28 = vld [vmem:[#allocation3 + $0x20] sm:$0xff]  }
 0x1a5   : > { %2465 = vst.msk [vmem:[#allocation3 + $0x28] sm:$0xf] %vm2454_vm8, %v2427_v27  ;;  %3247 = vmatprep.mubr.msk.bf16.mxu1 %vm2549_vm9, %v3346_v28 }
 0x1a6   : > { %v1170_v30 = vpop.permute.xlu1 %1169 }
 0x1a7   : > { %1203 = vst.msk [vmem:[#allocation3 + $0x3c] sm:$0xf] %vm1187_vm1, %v1170_v30 }
 0x1a8   : > { %v1168_v31 = vpop.permute.xlu0 %1167 }
 0x1a9   : > { %1202 = vst.msk [vmem:[#allocation3 + $0x38] sm:$0xf] %vm1187_vm1, %v1168_v31 }
 0x1aa   : > { %v1338_v32 = vpop.permute.xlu1 %1337 }
 0x1ab   : > { %1373 = vst.msk [vmem:[#allocation3 + $0x34] sm:$0xf] %vm1359_vm2, %v1338_v32 }
 0x1ac   : > { %v1336_v33 = vpop.permute.xlu0 %1335  ;;  %v3347_v34 = vld [vmem:[#allocation3 + $0x28] sm:$0xff]  }
 0x1ad   : > { %1372 = vst.msk [vmem:[#allocation3 + $0x30] sm:$0xf] %vm1359_vm2, %v1336_v33  ;;  %3248 = vmatmul.mubr.msk.bf16.vlgmr.msra.gmra.mxu1 %vm2549_vm9, %v3347_v34 }
 0x1ae   : > { %v1342_v35 = vpop.permute.xlu1 %1341 }
 0x1af   : > { %1375 = vst.msk [vmem:[#allocation3 + $0x3c] sm:$0xf] %vm1359_vm2, %v1342_v35 }
 0x1b0   : > { %v1340_v36 = vpop.permute.xlu0 %1339 }
 0x1b1   : > { %1374 = vst.msk [vmem:[#allocation3 + $0x38] sm:$0xf] %vm1359_vm2, %v1340_v36 }
 0x1b2   : > { %v1435_v37 = vpop.permute.xlu1 %1434 }
 0x1b3   : > { %1470 = vst.msk [vmem:[#allocation3 + $0x34] sm:$0xf] %vm1456_vm3, %v1435_v37 }
 0x1b4   : > { %v1433_v38 = vpop.permute.xlu0 %1432 }
 0x1b5   : > { %1469 = vst.msk [vmem:[#allocation3 + $0x30] sm:$0xf] %vm1456_vm3, %v1433_v38 }
 0x1b6   : > { %v1439_v39 = vpop.permute.xlu1 %1438 }
 0x1b7   : > { %1472 = vst.msk [vmem:[#allocation3 + $0x3c] sm:$0xf] %vm1456_vm3, %v1439_v39 }
 0x1b8   : > { %v1437_v40 = vpop.permute.xlu0 %1436 }
 0x1b9   : > { %1471 = vst.msk [vmem:[#allocation3 + $0x38] sm:$0xf] %vm1456_vm3, %v1437_v40 }
 0x1ba   : > { %v1716_v41 = vpop.permute.xlu1 %1715 }
 0x1bb   : > { %1751 = vst.msk [vmem:[#allocation3 + $0x34] sm:$0xf] %vm1737_vm4, %v1716_v41 }
 0x1bc   : > { %v1714_v42 = vpop.permute.xlu0 %1713 }
 0x1bd   : > { %1750 = vst.msk [vmem:[#allocation3 + $0x30] sm:$0xf] %vm1737_vm4, %v1714_v42 }
 0x1be   : > { %v1720_v45 = vpop.permute.xlu1 %1719 }
 0x1bf   : > { %1753 = vst.msk [vmem:[#allocation3 + $0x3c] sm:$0xf] %vm1737_vm4, %v1720_v45 }
 0x1c0   : > { %v1718_v46 = vpop.permute.xlu0 %1717 }
 0x1c1   : > { %1752 = vst.msk [vmem:[#allocation3 + $0x38] sm:$0xf] %vm1737_vm4, %v1718_v46 }
 0x1c2   : > { %v1885_v47 = vpop.permute.xlu1 %1884 }
 0x1c3   : > { %1920 = vst.msk [vmem:[#allocation3 + $0x34] sm:$0xf] %vm1906_vm5, %v1885_v47 }
 0x1c4   : > { %v1883_v48 = vpop.permute.xlu0 %1882 }
 0x1c5   : > { %1919 = vst.msk [vmem:[#allocation3 + $0x30] sm:$0xf] %vm1906_vm5, %v1883_v48 }
 0x1c6   : > { %v1889_v49 = vpop.permute.xlu1 %1888 }
 0x1c7   : > { %1922 = vst.msk [vmem:[#allocation3 + $0x3c] sm:$0xf] %vm1906_vm5, %v1889_v49 }
 0x1c8   : > { %v1887_v43 = vpop.permute.xlu0 %1886 }
 0x1c9   : > { %1921 = vst.msk [vmem:[#allocation3 + $0x38] sm:$0xf] %vm1906_vm5, %v1887_v43 }
 0x1ca   : > { %v1983_v50 = vpop.permute.xlu1 %1982 }
 0x1cb   : > { %2018 = vst.msk [vmem:[#allocation3 + $0x34] sm:$0xf] %vm2004_vm6, %v1983_v50 }
 0x1cc   : > { %v1981_v51 = vpop.permute.xlu0 %1980 }
 0x1cd   : > { %2017 = vst.msk [vmem:[#allocation3 + $0x30] sm:$0xf] %vm2004_vm6, %v1981_v51 }
 0x1ce   : > { %v1987_v52 = vpop.permute.xlu1 %1986 }
 0x1cf   : > { %2020 = vst.msk [vmem:[#allocation3 + $0x3c] sm:$0xf] %vm2004_vm6, %v1987_v52 }
 0x1d0   : > { %v1985_v53 = vpop.permute.xlu0 %1984 }
 0x1d1   : > { %2019 = vst.msk [vmem:[#allocation3 + $0x38] sm:$0xf] %vm2004_vm6, %v1985_v53 }
 0x1d2   : > { %v2264_v54 = vpop.permute.xlu1 %2263 }
 0x1d3   : > { %2299 = vst.msk [vmem:[#allocation3 + $0x34] sm:$0xf] %vm2285_vm7, %v2264_v54 }
 0x1d4   : > { %v2262_v44 = vpop.permute.xlu0 %2261 }
 0x1d5   : > { %2298 = vst.msk [vmem:[#allocation3 + $0x30] sm:$0xf] %vm2285_vm7, %v2262_v44 }
 0x1d6   : > { %v2268_v55 = vpop.permute.xlu1 %2267 }
 0x1d7   : > { %2301 = vst.msk [vmem:[#allocation3 + $0x3c] sm:$0xf] %vm2285_vm7, %v2268_v55 }
 0x1d8   : > { %v2266_v56 = vpop.permute.xlu0 %2265 }
 0x1d9   : > { %2300 = vst.msk [vmem:[#allocation3 + $0x38] sm:$0xf] %vm2285_vm7, %v2266_v56 }
 0x1da   : > { %v2433_v57 = vpop.permute.xlu1 %2432 }
 0x1db   : > { %2468 = vst.msk [vmem:[#allocation3 + $0x34] sm:$0xf] %vm2454_vm8, %v2433_v57 }
 0x1dc   : > { %v2431_v58 = vpop.permute.xlu0 %2430 }
 0x1dd   : > { %2467 = vst.msk [vmem:[#allocation3 + $0x30] sm:$0xf] %vm2454_vm8, %v2431_v58 }
 0x1de   : > { %v2437_v59 = vpop.permute.xlu1 %2436 }
 0x1df   : > { %2470 = vst.msk [vmem:[#allocation3 + $0x3c] sm:$0xf] %vm2454_vm8, %v2437_v59 }
 0x1e0   : > { %v2435_v60 = vpop.permute.xlu0 %2434 }
 0x1e1   : > { %2469 = vst.msk [vmem:[#allocation3 + $0x38] sm:$0xf] %vm2454_vm8, %v2435_v60 }
 0x1e4   : > { %v3348_v61 = vld [vmem:[#allocation3 + $0x30] sm:$0xff]  }
 0x1e5   : > { %3251 = vmatprep.mubr.msk.bf16.mxu1 %vm2549_vm9, %v3348_v61 }
 0x1e8   : > { %v3349_v62 = vld [vmem:[#allocation3 + $0x38] sm:$0xff]  }
 0x1e9   : > { %3252 = vmatmul.mubr.msk.bf16.gmra.mxu1 %vm2549_vm9, %v3349_v62 }
 0x1ed   : > { %v3241_v0 = vpop.f32.mrf.mxu0 }
 0x1ee   : > { %v2624_v1 = vadd.f32 %v3241_v0, %v4312_v63 }
 0x1ef   : > { %v2615_v2 = vpop.f32.mrf.mxu0 }
 0x1f0   : > { %v2680_v10 = vmax.f32 %v2624_v1, 0.0  ;;  %v2616_v3 = vadd.f32 %v4312_v63, %v2615_v2 }
 0x1f1   : > { %v3242_v4 = vpop.f32.mrf.mxu0 }
 0x1f2   : > { %v3211_v5 = vpack.c.bf16 %v2680_v10, %v2680_v10  ;;  %v2678_v6 = vmax.f32 %v2616_v3, 0.0  ;;  %v2627_v7 = vadd.f32 %v3242_v4, %v4312_v63  ;;  %v2736_v29 = vmul.f32 %v2680_v10, %v2680_v10 }
 0x1f3   : > { %v2618_v8 = vpop.f32.mrf.mxu0  ;;  %v2698_v20 = vsel %vm2694_vm10, %v2680_v10, 0.0 }
 0x1f4   : > { %2855 = vst.msk [vmem:[%s3685_s20 + $0x8] sm:$0xf] %vm2852_vm0, %v3211_v5  ;;  %v3209_v9 = vpack.c.bf16 %v2678_v6, %v2678_v6  ;;  %v2681_v17 = vmax.f32 %v2627_v7, 0.0  ;;  %v2619_v11 = vadd.f32 %v4312_v63, %v2618_v8  ;;  %v2734_v25 = vmul.f32 %v2678_v6, %v2678_v6 }
 0x1f5   : > { %v2695_v14 = vsel %vm2694_vm10, %v2678_v6, 0.0  ;;  %v2753_v27 = vsel %vm2694_vm10, %v2736_v29, 0.0 }
 0x1f6   : > { %2853 = vst.msk [vmem:[%s3685_s20] sm:$0xf] %vm2852_vm0, %v3209_v9  ;;  %v3212_v12 = vpack.c.bf16 %v2681_v17, %v2681_v17  ;;  %v2679_v13 = vmax.f32 %v2619_v11, 0.0  ;;  %v2750_v21 = vsel %vm2694_vm10, %v2734_v25, 0.0  ;;  %v2737_v22 = vmul.f32 %v2681_v17, %v2681_v17 }
 0x1f7   : > { %v2700_v28 = vsel %vm2694_vm10, %v2681_v17, 0.0 }
 0x1f8   : > { %2856 = vst.msk [vmem:[%s3685_s20 + $0xc] sm:$0xf] %vm2852_vm0, %v3212_v12  ;;  %v2696_v15 = vsel %vm2694_vm10, %v2679_v13, 0.0  ;;  %v2735_v16 = vmul.f32 %v2679_v13, %v2679_v13  ;;  %v3210_v18 = vpack.c.bf16 %v2679_v13, %v2679_v13  ;;  %v2755_v32 = vsel %vm2694_vm10, %v2737_v22, 0.0 }
 0x1f9   : > { %v2697_v19 = vadd.f32 %v2696_v15, %v2695_v14 }
 0x1fa   : > { %v2751_v23 = vsel %vm2694_vm10, %v2735_v16, 0.0  ;;  %2854 = vst.msk [vmem:[%s3685_s20 + $0x4] sm:$0xf] %vm2852_vm0, %v3210_v18 }
 0x1fb   : > { %v2699_v24 = vadd.f32 %v2698_v20, %v2697_v19  ;;  %v2752_v26 = vadd.f32 %v2751_v23, %v2750_v21 }
 0x1fd   : > { %v2754_v30 = vadd.f32 %v2753_v27, %v2752_v26  ;;  %v2701_v31 = vadd.f32 %v2700_v28, %v2699_v24 }
 0x1ff   : > { %v2756_v33 = vadd.f32 %v2755_v32, %v2754_v30 }
 0x22d   : > { %v3245_v34 = vpop.f32.mrf.mxu0 }
 0x22e   : > { %v2640_v35 = vadd.f32 %v3245_v34, %v4312_v63 }
 0x22f   : > { %v2631_v36 = vpop.f32.mrf.mxu0 }
 0x230   : > { %v2684_v37 = vmax.f32 %v2640_v35, 0.0  ;;  %v2632_v38 = vadd.f32 %v4312_v63, %v2631_v36 }
 0x231   : > { %v3246_v39 = vpop.f32.mrf.mxu0 }
 0x232   : > { %v3215_v40 = vpack.c.bf16 %v2684_v37, %v2684_v37  ;;  %v2682_v41 = vmax.f32 %v2632_v38, 0.0  ;;  %v2643_v42 = vadd.f32 %v3246_v39, %v4312_v63  ;;  %v2740_v44 = vmul.f32 %v2684_v37, %v2684_v37 }
 0x233   : > { %v2634_v45 = vpop.f32.mrf.mxu0  ;;  %v2706_v59 = vsel %vm2694_vm10, %v2684_v37, 0.0 }
 0x234   : > { %2859 = vst.msk [vmem:[%s3685_s20 + $0x18] sm:$0xf] %vm2852_vm0, %v3215_v40  ;;  %v2702_v46 = vsel %vm2694_vm10, %v2682_v41, 0.0  ;;  %v2738_v47 = vmul.f32 %v2682_v41, %v2682_v41  ;;  %v3213_v48 = vpack.c.bf16 %v2682_v41, %v2682_v41  ;;  %v2685_v43 = vmax.f32 %v2643_v42, 0.0 }
 0x235   : > { %v2703_v49 = vadd.f32 %v2702_v46, %v2701_v31  ;;  %v2635_v50 = vadd.f32 %v4312_v63, %v2634_v45  ;;  %v2761_v1 = vsel %vm2694_vm10, %v2740_v44, 0.0 }
 0x236   : > { %v2757_v51 = vsel %vm2694_vm10, %v2738_v47, 0.0  ;;  %2857 = vst.msk [vmem:[%s3685_s20 + $0x10] sm:$0xf] %vm2852_vm0, %v3213_v48  ;;  %v3216_v53 = vpack.c.bf16 %v2685_v43, %v2685_v43  ;;  %v2741_v60 = vmul.f32 %v2685_v43, %v2685_v43  ;;  %v2708_v2 = vsel %vm2694_vm10, %v2685_v43, 0.0 }
 0x237   : > { %v2758_v52 = vadd.f32 %v2757_v51, %v2756_v33  ;;  %v2683_v54 = vmax.f32 %v2635_v50, 0.0 }
 0x238   : > { %2860 = vst.msk [vmem:[%s3685_s20 + $0x1c] sm:$0xf] %vm2852_vm0, %v3216_v53  ;;  %v2763_v4 = vsel %vm2694_vm10, %v2741_v60, 0.0 }
 0x239   : > { %v2704_v55 = vsel %vm2694_vm10, %v2683_v54, 0.0  ;;  %v2739_v56 = vmul.f32 %v2683_v54, %v2683_v54  ;;  %v3214_v57 = vpack.c.bf16 %v2683_v54, %v2683_v54 }
 0x23a   : > { %v2705_v58 = vadd.f32 %v2704_v55, %v2703_v49 }
 0x23b   : > { %v2759_v61 = vsel %vm2694_vm10, %v2739_v56, 0.0  ;;  %2858 = vst.msk [vmem:[%s3685_s20 + $0x14] sm:$0xf] %vm2852_vm0, %v3214_v57 }
 0x23c   : > { %v2707_v62 = vadd.f32 %v2706_v59, %v2705_v58  ;;  %v2760_v0 = vadd.f32 %v2759_v61, %v2758_v52 }
 0x23e   : > { %v2762_v10 = vadd.f32 %v2761_v1, %v2760_v0  ;;  %v2709_v3 = vadd.f32 %v2708_v2, %v2707_v62 }
 0x240   : > { %v2764_v5 = vadd.f32 %v2763_v4, %v2762_v10 }
 0x26d   : > { %v3249_v6 = vpop.f32.mrf.mxu1 }
 0x26e   : > { %v2656_v7 = vadd.f32 %v3249_v6, %v4312_v63 }
 0x26f   : > { %v2647_v8 = vpop.f32.mrf.mxu1 }
 0x270   : > { %v2688_v9 = vmax.f32 %v2656_v7, 0.0  ;;  %v2648_v17 = vadd.f32 %v4312_v63, %v2647_v8 }
 0x271   : > { %v3250_v11 = vpop.f32.mrf.mxu1 }
 0x272   : > { %v3219_v25 = vpack.c.bf16 %v2688_v9, %v2688_v9  ;;  %v2686_v12 = vmax.f32 %v2648_v17, 0.0  ;;  %v2659_v13 = vadd.f32 %v3250_v11, %v4312_v63  ;;  %v2744_v35 = vmul.f32 %v2688_v9, %v2688_v9 }
 0x273   : > { %v2650_v29 = vpop.f32.mrf.mxu1  ;;  %v2714_v40 = vsel %vm2694_vm10, %v2688_v9, 0.0 }
 0x274   : > { %2863 = vst.msk [vmem:[%s3685_s20 + $0x28] sm:$0xf] %vm2852_vm0, %v3219_v25  ;;  %v3217_v14 = vpack.c.bf16 %v2686_v12, %v2686_v12  ;;  %v2689_v15 = vmax.f32 %v2659_v13, 0.0  ;;  %v2651_v16 = vadd.f32 %v4312_v63, %v2650_v29  ;;  %v2742_v21 = vmul.f32 %v2686_v12, %v2686_v12 }
 0x275   : > { %v2710_v22 = vsel %vm2694_vm10, %v2686_v12, 0.0  ;;  %v2769_v48 = vsel %vm2694_vm10, %v2744_v35, 0.0 }
 0x276   : > { %2861 = vst.msk [vmem:[%s3685_s20 + $0x20] sm:$0xf] %vm2852_vm0, %v3217_v14  ;;  %v3220_v18 = vpack.c.bf16 %v2689_v15, %v2689_v15  ;;  %v2687_v19 = vmax.f32 %v2651_v16, 0.0  ;;  %v2765_v24 = vsel %vm2694_vm10, %v2742_v21, 0.0  ;;  %v2711_v27 = vadd.f32 %v2710_v22, %v2709_v3 }
 0x277   : > { %v2766_v32 = vadd.f32 %v2765_v24, %v2764_v5  ;;  %v2745_v49 = vmul.f32 %v2689_v15, %v2689_v15  ;;  %v2716_v54 = vsel %vm2694_vm10, %v2689_v15, 0.0 }
 0x278   : > { %2864 = vst.msk [vmem:[%s3685_s20 + $0x2c] sm:$0xf] %vm2852_vm0, %v3220_v18  ;;  %v3218_v20 = vpack.c.bf16 %v2687_v19, %v2687_v19  ;;  %v2743_v23 = vmul.f32 %v2687_v19, %v2687_v19  ;;  %v2712_v26 = vsel %vm2694_vm10, %v2687_v19, 0.0 }
 0x279   : > { %v2713_v33 = vadd.f32 %v2712_v26, %v2711_v27  ;;  %v2771_v57 = vsel %vm2694_vm10, %v2745_v49, 0.0 }
 0x27a   : > { %2862 = vst.msk [vmem:[%s3685_s20 + $0x24] sm:$0xf] %vm2852_vm0, %v3218_v20  ;;  %v2767_v30 = vsel %vm2694_vm10, %v2743_v23, 0.0 }
 0x27b   : > { %v2768_v38 = vadd.f32 %v2767_v30, %v2766_v32  ;;  %v2715_v45 = vadd.f32 %v2714_v40, %v2713_v33 }
 0x27d   : > { %v2770_v51 = vadd.f32 %v2769_v48, %v2768_v38  ;;  %v2717_v55 = vadd.f32 %v2716_v54, %v2715_v45 }
 0x27f   : > { %v2772_v61 = vadd.f32 %v2771_v57, %v2770_v51 }
 0x2a9   : > { %v3253_v28 = vpop.f32.mrf.mxu1 }
 0x2aa   : > { %v2672_v31 = vadd.f32 %v3253_v28, %v4312_v63 }
 0x2ab   : > { %v2663_v34 = vpop.f32.mrf.mxu1 }
 0x2ac   : > { %v2692_v36 = vmax.f32 %v2672_v31, 0.0  ;;  %v2664_v37 = vadd.f32 %v4312_v63, %v2663_v34 }
 0x2ad   : > { %v3254_v39 = vpop.f32.mrf.mxu1 }
 0x2ae   : > { %v3223_v41 = vpack.c.bf16 %v2692_v36, %v2692_v36  ;;  %v2690_v42 = vmax.f32 %v2664_v37, 0.0  ;;  %v2675_v46 = vadd.f32 %v3254_v39, %v4312_v63  ;;  %v2748_v62 = vmul.f32 %v2692_v36, %v2692_v36 }
 0x2af   : > { %v2666_v47 = vpop.f32.mrf.mxu1  ;;  %v2722_v3 = vsel %vm2694_vm10, %v2692_v36, 0.0 }
 0x2b0   : > { %2867 = vst.msk [vmem:[%s3685_s20 + $0x38] sm:$0xf] %vm2852_vm0, %v3223_v41  ;;  %v2746_v43 = vmul.f32 %v2690_v42, %v2690_v42  ;;  %v3221_v50 = vpack.c.bf16 %v2690_v42, %v2690_v42  ;;  %v2693_v52 = vmax.f32 %v2675_v46, 0.0  ;;  %v2667_v53 = vadd.f32 %v4312_v63, %v2666_v47 }
 0x2b1   : > { %v2718_v44 = vsel %vm2694_vm10, %v2690_v42, 0.0  ;;  %v2777_v8 = vsel %vm2694_vm10, %v2748_v62, 0.0 }
 0x2b2   : > { %2865 = vst.msk [vmem:[%s3685_s20 + $0x30] sm:$0xf] %vm2852_vm0, %v3221_v50  ;;  %v3224_v56 = vpack.c.bf16 %v2693_v52, %v2693_v52  ;;  %v2773_v58 = vsel %vm2694_vm10, %v2746_v43, 0.0  ;;  %v2691_v59 = vmax.f32 %v2667_v53, 0.0  ;;  %v2719_v60 = vadd.f32 %v2718_v44, %v2717_v55 }
 0x2b3   : > { %v2774_v2 = vadd.f32 %v2773_v58, %v2772_v61  ;;  %v2749_v4 = vmul.f32 %v2693_v52, %v2693_v52  ;;  %v2724_v9 = vsel %vm2694_vm10, %v2693_v52, 0.0 }
 0x2b4   : > { %2868 = vst.msk [vmem:[%s3685_s20 + $0x3c] sm:$0xf] %vm2852_vm0, %v3224_v56  ;;  %v2720_v63 = vsel %vm2694_vm10, %v2691_v59, 0.0  ;;  %v2747_v0 = vmul.f32 %v2691_v59, %v2691_v59  ;;  %v3222_v1 = vpack.c.bf16 %v2691_v59, %v2691_v59 }
 0x2b5   : > { %v2721_v10 = vadd.f32 %v2720_v63, %v2719_v60  ;;  %v2779_v25 = vsel %vm2694_vm10, %v2749_v4, 0.0 }
 0x2b6   : > { %v2775_v5 = vsel %vm2694_vm10, %v2747_v0, 0.0  ;;  %2866 = vst.msk [vmem:[%s3685_s20 + $0x34] sm:$0xf] %vm2852_vm0, %v3222_v1  ;;  %s2895_s20 = sadd.s32 %s3426_s4, %s3183_s22  ;;  %s3454_s4 = smov [#allocation4]  }
 0x2b7   : > { %v2723_v6 = vadd.f32 %v2722_v3, %v2721_v10  ;;  %v2776_v7 = vadd.f32 %v2775_v5, %v2774_v2  ;;  %s3184_s24 = sshll.u32 %s2895_s20, 5  ;;  %s3354_s13 = sshll.u32 %s3454_s4, 4  ;;  %s3355_s13 = int_to_ptr.vmem [resolvable:$false] %s3354_s13 }
 0x2b8   : > { %s2897_s5 = scalar_lea.hbm %s4452_s8, %s3184_s24  ;;  %s3356_s11 = scalar_lea.vmem %s3355_s13, 64 }
 0x2b9   : > { %v2725_v17 = vadd.f32 %v2724_v9, %v2723_v6  ;;  %v2778_v11 = vadd.f32 %v2777_v8, %v2776_v7  ;;  %p3357_p10 = scmp.lt.s32.totalorder %s2900_s18, %s3355_s13  ;;  %p3358_p11 = scmp.lt.s32.totalorder %s3356_s11, %s3350_s26 }
 0x2bb   : > { %v2726_v12 = vrot.slane %v2725_v17, 4  ;;  %v2780_v13 = vadd.f32 %v2779_v25, %v2778_v11  ;;  %p3359_p12 = por %p3358_p11, %p3357_p10 }
 0x2bd   : > { %v2727_v29 = vadd.f32 %v2726_v12, %v2725_v17  ;;  %v2781_v14 = vrot.slane %v2780_v13, 4  ;;  %p3360_p13 = pnand %p3359_p12, %p3353_p9 }
 0x2bf   : > { %v2728_v15 = vrot.slane %v2727_v29, 2  ;;  %v2782_v16 = vadd.f32 %v2781_v14, %v2780_v13 }
 0x2c1   : > { %v2729_v18 = vadd.f32 %v2728_v15, %v2727_v29  ;;  %v2783_v19 = vrot.slane %v2782_v16, 2 }
 0x2c3   : > { %v2730_v20 = vrot.slane %v2729_v18, 1  ;;  %v2784_v21 = vadd.f32 %v2783_v19, %v2782_v16 }
 0x2c5   : > { %v2731_v22 = vadd.f32 %v2730_v20, %v2729_v18  ;;  %v2785_v23 = vrot.slane %v2784_v21, 1 }
 0x2c7   : > { %2733 = vst.msk [vmem:[%s3753_s0] sm:$0x1] %vm2732_vm11, %v2731_v22  ;;  %v2786_v24 = vadd.f32 %v2785_v23, %v2784_v21 }
 0x2c9   : > { %2787 = vst.msk [vmem:[%s3753_s0 + $0x1] sm:$0x1] %vm2732_vm11, %v2786_v24 }
 0x2ca   : > { %3363 = shalt.err (!%p3360_p13)
}
 0x2cb   : > { %s3364_s23 = scalar_lea.hbm %s2897_s5, 32  ;;  %s3368_s9 = scalar_lea.hbm %s4452_s8, 128 }
 0x2cc   : > { %p3365_p0 = scmp.ne.s32.totalorder %s2897_s5, %s3364_s23  ;;  %p3369_p4 = scmp.lt.s32.totalorder %s2897_s5, %s4452_s8 }
 0x2cd   : > { %p3370_p5 = scmp.lt.s32.totalorder %s3368_s9, %s3364_s23 }
 0x2ce   : > { %p3366_p1 = pnand %p3365_p0, %p3551_p3 }
 0x2cf   : > { %p3371_p6 = por %p3370_p5, %p3369_p4 }
 0x2d0   : > { %p3367_p2 = pneg %p3366_p1 }
 0x2d2   : > { %p3372_p7 = pnand %p3371_p6, %p3367_p2 }
 0x2d4   : > { %3375 = shalt.err (!%p3372_p7)
}
 0x2d5   : > { %3259 = dma.vmem_to_hbm [thread:$0]  (%p3551_p3), %s2900_s18, 32, %s2897_s5, %s2880_s25  }
 0x2d6 PF: > { %p3265_p9 = scmp.ge.s32.totalorder %s3442_s10, 2  ;;  %s2924_s24 = sand.u32 1, %s3414_s27  }
 0x2d7   : > { %s2925_s14 = scalar_lea.sflag [#allocation5], %s2924_s24 }
 0x2d8   : > { %p3262_p10 = pnand %p3265_p9, %p3560_p8 }
 0x2da   : > { %p3263_p11 = pneg %p3262_p10 }
 0x2dc   : > { %3409 = dma.done.wait (%p3263_p11), %s2925_s14, 32  }
 0x2dd   : > { %3411 = vsyncadd (%p3263_p11), %s2925_s14, 4294967264  ;;  %s22_s10 = sadd.s32 1, %s3442_s10   ;;  %s4476_s5 = sld [smem:[#allocation7_spill]] }
 0x2de   : > { %p19_p12 = scmp.ge.s32.totalorder %s22_s10, 6   ;;  %s4477_s16 = sld [smem:[#allocation8_spill]] }
 0x2df   : > { %s4478_s9 = sld [smem:[#allocation9_spill]]  ;;  %s4479_s27 = smov %s3418_s28 }
 0x2e0   : > { %s4480_s28 = smov %s3422_s29  ;;  %s4481_s29 = smov %s3569_s21 }
 0x2e1   : > { %s4482_s4 = smov %s3434_s30  ;;  %21 = sbr.rel (!%p19_p12) target bundleno = 7 (0x7), region = 112 }
 0x2e4   : > { %s4483_s30 = smov %s4477_s16 }
 0x2e6   :  { %2930 = vsyncpa [#allocation5], 1 }
 0x2e7   :  { %2932 = vsyncpa [#allocation5 + $0x1], 1 }

// kernel: dncnn_forward.23
= control target key start
LH: loop header
LB: loop body
LE: loop exit
PB: predicated region body
PF: predicated region fallthrough
CT: control target
= control target key end

     0   :  { %s4272_s27 = smov 0   ;;  %s4274_s28 = smov 0   ;;  %s5653_s0 = inlined_call_operand.vmem [shape: bf16[2,16,16,64], index: 0, kind: input, shape index: {}, may-alias: {0,1,2}]   ;;  %s5654_s1 = inlined_call_operand.vmem [shape: bf16[2,16,16,64], index: 1, kind: input, shape index: {}, may-alias: {0,1,2}]   ;;  %s5655_s2 = inlined_call_operand.vmem [shape: bf16[2,16,16,64], index: 2, kind: input, shape index: {}, may-alias: {0,1,2}]   ;;  %s5656_s3 = inlined_call_operand.vmem [shape: bf16[576,64], index: 3, kind: input, shape index: {}]   ;;  %s5657_s4 = inlined_call_operand.vmem [shape: f32[1,64], index: 4, kind: input, shape index: {}]   ;;  %s5658_s5 = inlined_call_operand.vmem [shape: f32[1,64], index: 5, kind: input, shape index: {}, may-alias: {5,6}]   ;;  %s5659_s6 = inlined_call_operand.vmem [shape: f32[1,64], index: 6, kind: input, shape index: {}, may-alias: {5,6}]   ;;  %s5660_s7 = inlined_call_operand.vmem [shape: bf16[2,16,16,64], index: 7, kind: output, shape index: {0}]   ;;  %s5661_s8 = inlined_call_operand.vmem [shape: f32[2,2,2,64], index: 8, kind: output, shape index: {1}]  }
   0x1   :  { %s4276_s29 = smov 0   ;;  %s4278_s30 = smov 0  }
   0x2   :  { %s4280_s9 = smov 0  }
   0x3 LB: > { %s28_s6 = sadd.s32 1, %s4215_s29  ;;  %s31_s10 = sadd.s32 1, %s4219_s30  ;;  %s4223_s9 = sphi %s4280_s9, %s19_s9   ;;  %s4219_s30 = sphi %s4278_s30, %s5676_s30   ;;  %s4215_s29 = sphi %s4276_s29, %s5675_s29   ;;  %s4211_s28 = sphi %s4274_s28, %s5674_s28   ;;  %s4207_s27 = sphi %s4272_s27, %s5673_s27  }
   0x4   : > { %p29_p0 = scmp.ge.s32.totalorder %s28_s6, 2  ;;  %p3628_p1 = scmp.ge.s32.totalorder %s4223_s9, 1 }
   0x5   : > { %p353_p2 = scmp.lt.s32.totalorder %s4223_s9, 5 }
   0x6   : > { %s5678_s6 = smov (%p29_p0, %s28_s6), 0  ;;  %s5680_s10 = smov (!%p29_p0, %s31_s10), %s4219_s30 }
   0x7   : > { %p354_p3 = pnand %p3628_p1, %p353_p2  ;;  %p33_p4 = scmp.ge.s32.totalorder %s5680_s10, 2 }
   0x8   : > { %s4307_s11 = sshll.u32 (!%p354_p3), %s4207_s27, 3  ;;  %p432_p5 = scmp.lt.s32.totalorder (!%p354_p3), %s4211_s28, 1 }
   0x9   : > { %s5682_s10 = smov (%p33_p4, %s5680_s10), 0  ;;  %357 = sbr.rel (%p354_p3) target bundleno = 626 (0x272), region = 48 }
   0xa   : > { %p434_p6 = scmp.lt.s32.totalorder (!%p354_p3), %s4307_s11, 15  ;;  %s3634_s12 = sadd.s32 (!%p354_p3), 4294967295, %s4307_s11 }
   0xb   : > { %p444_p7 = scmp.gt.s32.totalorder (!%p354_p3), %s3634_s12, 0  ;;  %p3635_p8 = scmp.lt.s32.totalorder (!%p354_p3), %s3634_s12, 15 }
   0xc   : > { %s460_s17 = sadd.s32 (!%p354_p3), 8, %s4307_s11  ;;  %p489_p10 = scmp.lt.s32.totalorder (!%p354_p3), %s4207_s27, 1 }
   0xd   : > { %p4353_p9 = scmp.lt.s32.totalorder (!%p354_p3), %s460_s17, 15  ;;  %p3674_p11 = scmp.le.s32.totalorder (!%p354_p3), %s4207_s27, 0 }
   0xe   : > { %vm498_vm0 = vcmask 519168   ;;  %vm501_vm1 = vcmask 516096   ;;  %v4225_v0 = vmov 0   ;;  %s5684_s28 = smov (!%p432_p5, %s4211_s28), 1  ;;  %v4370_v1 = vld [vmem:[%s5657_s4] ss:$0 sm:$0xff] }
   0xf   : > { %503 = vst.msk [vmem:[#allocation2 + $0xc] sm:$0xf] %vm498_vm0, %v4225_v0  ;;  %499 = vst.msk [vmem:[#allocation2] sm:$0xf] %vm498_vm0, %v4225_v0  ;;  %s435_s13 = scalar_select %p434_p6, %s4307_s11, 15 }
  0x10   : > { %500 = vst.msk [vmem:[#allocation2 + $0x4] sm:$0xf] %vm498_vm0, %v4225_v0  ;;  %504 = vst.msk [vmem:[#allocation2 + $0x10] sm:$0xf] %vm498_vm0, %v4225_v0  ;;  %s4349_s14 = sshll.u32 %s5684_s28, 5  ;;  %s5686_s17 = smov (!%p4353_p9, %s460_s17), 15 }
  0x11   : > { %506 = vst.msk [vmem:[#allocation2 + $0x18] sm:$0xf] %vm498_vm0, %v4225_v0  ;;  %507 = vst.msk [vmem:[#allocation2 + $0x1c] sm:$0xf] %vm498_vm0, %v4225_v0  ;;  %s3630_s15 = sshll.u32 %s435_s13, 1  ;;  %s5690_s17 = smov (!%p4353_p9, %s5686_s17), 15 }
  0x12   : > { %509 = vst.msk [vmem:[#allocation2 + $0x24] sm:$0xf] %vm498_vm0, %v4225_v0  ;;  %510 = vst.msk [vmem:[#allocation2 + $0x28] sm:$0xf] %vm498_vm0, %v4225_v0  ;;  %s438_s16 = sadd.s32 %s4349_s14, %s3630_s15  ;;  %v4379_v4 = vld [vmem:[%s5658_s5] ss:$0 sm:$0xff] }
  0x13   : > { %512 = vst.msk [vmem:[#allocation2 + $0x30] sm:$0xf] %vm498_vm0, %v4225_v0  ;;  %513 = vst.msk [vmem:[#allocation2 + $0x34] sm:$0xf] %vm498_vm0, %v4225_v0  ;;  %s3632_s18 = sshll.u32 %s438_s16, 2  ;;  %s3647_s19 = sshll.u32 %s5690_s17, 1 }
  0x14   : > { %515 = vst.msk [vmem:[#allocation2 + $0x3c] sm:$0xf] %vm498_vm0, %v4225_v0  ;;  %516 = vst.msk [vmem:[#allocation2 + $0x40] sm:$0xf] %vm498_vm0, %v4225_v0  ;;  %s4360_s22 = scalar_lea.vmem %s5653_s0, %s3632_s18  ;;  %s4365_s25 = scalar_lea.vmem %s5660_s7, %s3632_s18  ;;  %vm835_vm2 = vsmask.f32 7938 }
  0x15   : > { %518 = vst.msk [vmem:[#allocation2 + $0x48] sm:$0xf] %vm498_vm0, %v4225_v0  ;;  %519 = vst.msk [vmem:[#allocation2 + $0x4c] sm:$0xf] %vm498_vm0, %v4225_v0  ;;  %s445_s26 = scalar_select %p444_p7, %s3634_s12, 0  ;;  %v3845_v2 = vld [vmem:[%s4360_s22] sm:$0xff]  }
  0x16   : > { %521 = vst.msk [vmem:[#allocation2 + $0x54] sm:$0xf] %vm498_vm0, %v4225_v0  ;;  %522 = vst.msk [vmem:[#allocation2 + $0x58] sm:$0xf] %vm498_vm0, %v4225_v0  ;;  %v3884_v3 = vld [vmem:[%s4360_s22 + $0x8] sm:$0xff]   ;;  %v3846_v5 = vunpack.c.l.bf16 %v3845_v2  ;;  %v3847_v6 = vunpack.c.h.bf16 %v3845_v2  ;;  %v3885_v9 = vld [vmem:[%s4360_s22 + $0x10] sm:$0xff]   ;;  %s469_s21 = sadd.s32 %s3647_s19, %s4349_s14 }
  0x17   : > { %524 = vst.msk [vmem:[#allocation2 + $0x60] sm:$0xf] %vm498_vm0, %v4225_v0  ;;  %525 = vst.msk [vmem:[#allocation2 + $0x64] sm:$0xf] %vm498_vm0, %v4225_v0  ;;  %v3850_v7 = vunpack.c.l.bf16 %v3884_v3  ;;  %v3851_v8 = vunpack.c.h.bf16 %v3884_v3  ;;  %s5688_s26 = smov (!%p3635_p8, %s445_s26), 15  ;;  %v3854_v10 = vunpack.c.l.bf16 %v3885_v9  ;;  %v3855_v11 = vunpack.c.h.bf16 %v3885_v9  ;;  %v3886_v12 = vld [vmem:[%s4360_s22 + $0x18] sm:$0xff]  }
  0x18   : > { %527 = vst.msk [vmem:[#allocation2 + $0x6c] sm:$0xf] %vm498_vm0, %v4225_v0  ;;  %528 = vst.msk [vmem:[#allocation2 + $0x70] sm:$0xf] %vm498_vm0, %v4225_v0  ;;  %vm670_vm3 = vsmask.f32 256  ;;  %v568_v13 = vmul.f32 %v3846_v5, %v4370_v1  ;;  %v569_v14 = vmul.f32 %v3847_v6, %v4370_v1  ;;  %v3858_v19 = vunpack.c.l.bf16 %v3886_v12 }
  0x19   : > { %505 = vst.msk [vmem:[#allocation2 + $0x14] sm:$0x1] %vm501_vm1, %v4225_v0  ;;  %502 = vst.msk [vmem:[#allocation2 + $0x8] sm:$0x1] %vm501_vm1, %v4225_v0  ;;  %vm671_vm4 = vsmask.f32 4368  ;;  %v570_v15 = vmul.f32 %v3850_v7, %v4370_v1  ;;  %v571_v16 = vmul.f32 %v3851_v8, %v4370_v1  ;;  %v572_v17 = vmul.f32 %v3854_v10, %v4370_v1 }
  0x1a   : > { %508 = vst.msk [vmem:[#allocation2 + $0x20] sm:$0x1] %vm501_vm1, %v4225_v0  ;;  %511 = vst.msk [vmem:[#allocation2 + $0x2c] sm:$0x1] %vm501_vm1, %v4225_v0  ;;  %s3640_s18 = sshll.u32 %s5688_s26, 1  ;;  %v573_v18 = vmul.f32 %v3855_v11, %v4370_v1  ;;  %v3859_v20 = vunpack.c.h.bf16 %v3886_v12  ;;  %v590_v21 = vadd.f32 %v4379_v4, %v568_v13  ;;  %v591_v22 = vadd.f32 %v4379_v4, %v569_v14  ;;  %s4408_s26 = sshll.u32 %s469_s21, 2 }
  0x1b   : > { %514 = vst.msk [vmem:[#allocation2 + $0x38] sm:$0x1] %vm501_vm1, %v4225_v0  ;;  %517 = vst.msk [vmem:[#allocation2 + $0x44] sm:$0x1] %vm501_vm1, %v4225_v0  ;;  %s452_s12 = sadd.s32 %s3640_s18, %s4349_s14  ;;  %v592_v23 = vadd.f32 %v4379_v4, %v570_v15  ;;  %v593_v24 = vadd.f32 %v4379_v4, %v571_v16  ;;  %v594_v25 = vadd.f32 %v4379_v4, %v572_v17  ;;  %s471_s13 = scalar_lea.vmem %s5655_s2, %s4408_s26  ;;  %v837_v55 = vld [vmem:[#allocation2 + $0xc] sm:$0xf] }
  0x1c   : > { %520 = vst.msk [vmem:[#allocation2 + $0x50] sm:$0x1] %vm501_vm1, %v4225_v0  ;;  %523 = vst.msk [vmem:[#allocation2 + $0x5c] sm:$0x1] %vm501_vm1, %v4225_v0  ;;  %s3642_s20 = sshll.u32 %s452_s12, 2  ;;  %v595_v26 = vadd.f32 %v4379_v4, %v573_v18  ;;  %v574_v27 = vmul.f32 %v3858_v19, %v4370_v1  ;;  %v575_v28 = vmul.f32 %v3859_v20, %v4370_v1  ;;  %v606_v29 = vmax.f32 %v590_v21, 0.0 }
  0x1d   : > { %526 = vst.msk [vmem:[#allocation2 + $0x68] sm:$0x1] %vm501_vm1, %v4225_v0  ;;  %529 = vst.msk [vmem:[#allocation2 + $0x74] sm:$0x1] %vm501_vm1, %v4225_v0  ;;  %s4406_s24 = scalar_lea.vmem %s5654_s1, %s3642_s20  ;;  %v607_v30 = vmax.f32 %v591_v22, 0.0  ;;  %v608_v31 = vmax.f32 %v592_v23, 0.0 }
  0x1e   : > { %v609_v32 = vmax.f32 %v593_v24, 0.0  ;;  %s3654_s15 = sshll.u32 %s5684_s28, 1  ;;  %v610_v33 = vmax.f32 %v594_v25, 0.0  ;;  %v611_v34 = vmax.f32 %v595_v26, 0.0  ;;  %v4416_v35 = vadd.f32 %v4379_v4, %v574_v27  ;;  %vm4428_vm5 = vmand %vm498_vm0, %vm835_vm2  ;;  %v846_v8 = vld [vmem:[#allocation2 + $0x18] sm:$0xf] }
  0x1f   : > { %v4419_v36 = vadd.f32 %v4379_v4, %v575_v28  ;;  %s490_s16 = scalar_select %p489_p10, %s4207_s27, 1  ;;  %v3808_v37 = vpack.c.bf16 %v606_v29, %v606_v29  ;;  %v3809_v38 = vpack.c.bf16 %v607_v30, %v607_v30  ;;  %v3810_v39 = vpack.c.bf16 %v608_v31, %v608_v31  ;;  %vm4439_vm6 = vmor %vm670_vm3, %vm671_vm4  ;;  %v3887_v18 = vld [vmem:[%s4360_s22 + $0x20] sm:$0xff]  }
  0x20   : > { %v3811_v40 = vpack.c.bf16 %v609_v32, %v609_v32  ;;  %v3812_v41 = vpack.c.bf16 %v610_v33, %v610_v33  ;;  %v3813_v42 = vpack.c.bf16 %v611_v34, %v611_v34  ;;  %v612_v43 = vmax.f32 %v4416_v35, 0.0  ;;  %vm4445_vm7 = vmand %vm501_vm1, %vm670_vm3  ;;  %v843_v61 = vld [vmem:[#allocation2 + $0x14] sm:$0x1]  ;;  %v853_v22 = vld [vmem:[#allocation2 + $0x24] sm:$0xf] }
  0x21   : > { %v613_v44 = vmax.f32 %v4419_v36, 0.0  ;;  %s492_s28 = sadd.s32 %s3654_s15, %s490_s16  ;;  %v674_v45 = vshrl.u32 %v3808_v37, 16  ;;  %v677_v46 = vshll.u32 %v3808_v37, 16  ;;  %v682_v47 = vshrl.u32 %v3809_v38, 16  ;;  %v850_v9 = vld [vmem:[#allocation2 + $0x20] sm:$0x1] }
  0x22   : > { %v685_v48 = vshll.u32 %v3809_v38, 16  ;;  %s3655_s18 = sshll.u32 %s492_s28, 1  ;;  %v691_v50 = vshrl.u32 %v3810_v39, 16  ;;  %v694_v51 = vshll.u32 %v3810_v39, 16  ;;  %v699_v52 = vshrl.u32 %v3811_v40, 16  ;;  %v3888_v33 = vld [vmem:[%s4360_s22 + $0x28] sm:$0xff]  }
  0x23   : > { %v702_v53 = vshll.u32 %v3811_v40, 16  ;;  %s4435_s20 = scalar_lea.vmem %s5661_s8, %s3655_s18  ;;  %v676_v54 = vrot.slane %v674_v45, 7  ;;  %v684_v57 = vrot.slane %v682_v47, 7  ;;  %v708_v58 = vshrl.u32 %v3812_v41, 16  ;;  %v857_v26 = vld [vmem:[#allocation2 + $0x2c] sm:$0x1] }
  0x24   : > { %v711_v59 = vshll.u32 %v3812_v41, 16  ;;  %v693_v62 = vrot.slane %v691_v50, 7  ;;  %v701_v63 = vrot.slane %v699_v52, 7  ;;  %v716_v0 = vshrl.u32 %v3813_v42, 16  ;;  %v3889_v38 = vld [vmem:[%s4360_s22 + $0x30] sm:$0xff]  }
  0x25   : > { %v719_v2 = vshll.u32 %v3813_v42, 16  ;;  %v679_v3 = vor.u32 %v677_v46, %v676_v54  ;;  %v680_v5 = vrot.slane %v676_v54, 4  ;;  %v687_v6 = vor.u32 %v685_v48, %v684_v57  ;;  %v860_v47 = vld [vmem:[#allocation2 + $0x30] sm:$0xf]  ;;  %v864_v48 = vld [vmem:[#allocation2 + $0x38] sm:$0x1] }
  0x26   : > { %v689_v7 = vrot.slane %v684_v57, 4  ;;  %v696_v10 = vor.u32 %v694_v51, %v693_v62  ;;  %v697_v11 = vrot.slane %v693_v62, 4  ;;  %v704_v12 = vor.u32 %v702_v53, %v701_v63 }
  0x27   : > { %v706_v13 = vrot.slane %v701_v63, 4  ;;  %v838_v14 = vsel %vm4428_vm5, %v679_v3, %v837_v55  ;;  %v688_v15 = vsel %vm4439_vm6, %v680_v5, %v687_v6  ;;  %v710_v17 = vrot.slane %v708_v58, 7 }
  0x28   : > { %v844_v16 = vsel %vm4445_vm7, %v689_v7, %v843_v61  ;;  %839 = vst [vmem:[#allocation2 + $0xc] sm:$0xf] %v838_v14  ;;  %840 = vst.msk [vmem:[#allocation2 + $0x10] sm:$0xf] %vm498_vm0, %v688_v15  ;;  %v847_v19 = vsel %vm4428_vm5, %v696_v10, %v846_v8  ;;  %v705_v20 = vsel %vm4439_vm6, %v697_v11, %v704_v12  ;;  %v718_v23 = vrot.slane %v716_v0, 7  ;;  %v4480_v0 = vld [vmem:[%s4360_s22 + $0x38] sm:$0xff]  }
  0x29   : > { %845 = vst [vmem:[#allocation2 + $0x14] sm:$0x1] %v844_v16  ;;  %v851_v21 = vsel %vm4445_vm7, %v706_v13, %v850_v9  ;;  %848 = vst [vmem:[#allocation2 + $0x18] sm:$0xf] %v847_v19  ;;  %v713_v24 = vor.u32 %v711_v59, %v710_v17  ;;  %v714_v25 = vrot.slane %v710_v17, 4  ;;  %v3814_v27 = vpack.c.bf16 %v612_v43, %v612_v43 }
  0x2a   : > { %849 = vst.msk [vmem:[#allocation2 + $0x1c] sm:$0xf] %vm498_vm0, %v705_v20  ;;  %852 = vst [vmem:[#allocation2 + $0x20] sm:$0x1] %v851_v21  ;;  %v3815_v28 = vpack.c.bf16 %v613_v44, %v613_v44  ;;  %v721_v29 = vor.u32 %v719_v2, %v718_v23  ;;  %v723_v30 = vrot.slane %v718_v23, 4  ;;  %v3862_v31 = vunpack.c.l.bf16 %v3887_v18 }
  0x2b   : > { %v3863_v32 = vunpack.c.h.bf16 %v3887_v18  ;;  %v854_v34 = vsel %vm4428_vm5, %v713_v24, %v853_v22  ;;  %v725_v35 = vshrl.u32 %v3814_v27, 16  ;;  %v728_v36 = vshll.u32 %v3814_v27, 16  ;;  %v867_v27 = vld [vmem:[#allocation2 + $0x3c] sm:$0xf] }
  0x2c   : > { %v733_v37 = vshrl.u32 %v3815_v28, 16  ;;  %855 = vst [vmem:[#allocation2 + $0x24] sm:$0xf] %v854_v34  ;;  %v722_v39 = vsel %vm4439_vm6, %v714_v25, %v721_v29  ;;  %v858_v40 = vsel %vm4445_vm7, %v723_v30, %v857_v26  ;;  %v736_v41 = vshll.u32 %v3815_v28, 16 }
  0x2d   : > { %v576_v42 = vmul.f32 %v3862_v31, %v4370_v1  ;;  %856 = vst.msk [vmem:[#allocation2 + $0x28] sm:$0xf] %vm498_vm0, %v722_v39  ;;  %859 = vst [vmem:[#allocation2 + $0x2c] sm:$0x1] %v858_v40  ;;  %v727_v43 = vrot.slane %v725_v35, 7  ;;  %v577_v45 = vmul.f32 %v3863_v32, %v4370_v1  ;;  %v3866_v46 = vunpack.c.l.bf16 %v3888_v33 }
  0x2e   : > { %v735_v44 = vrot.slane %v733_v37, 7  ;;  %v3867_v51 = vunpack.c.h.bf16 %v3888_v33  ;;  %v3870_v52 = vunpack.c.l.bf16 %v3889_v38  ;;  %v3871_v53 = vunpack.c.h.bf16 %v3889_v38 }
  0x2f   : > { %v598_v50 = vadd.f32 %v4379_v4, %v576_v42  ;;  %v730_v54 = vor.u32 %v728_v36, %v727_v43  ;;  %v731_v55 = vrot.slane %v727_v43, 4  ;;  %v599_v61 = vadd.f32 %v4379_v4, %v577_v45  ;;  %v871_v36 = vld [vmem:[#allocation2 + $0x44] sm:$0x1]  ;;  %v874_v45 = vld [vmem:[#allocation2 + $0x48] sm:$0xf] }
  0x30   : > { %v738_v57 = vor.u32 %v736_v41, %v735_v44  ;;  %v740_v58 = vrot.slane %v735_v44, 4  ;;  %v578_v62 = vmul.f32 %v3866_v46, %v4370_v1  ;;  %v579_v63 = vmul.f32 %v3867_v51, %v4370_v1 }
  0x31   : > { %v614_v59 = vmax.f32 %v598_v50, 0.0  ;;  %v861_v2 = vsel %vm4428_vm5, %v730_v54, %v860_v47  ;;  %v580_v6 = vmul.f32 %v3870_v52, %v4370_v1  ;;  %v615_v8 = vmax.f32 %v599_v61, 0.0 }
  0x32   : > { %v739_v3 = vsel %vm4439_vm6, %v731_v55, %v738_v57  ;;  %v865_v5 = vsel %vm4445_vm7, %v740_v58, %v864_v48  ;;  %862 = vst [vmem:[#allocation2 + $0x30] sm:$0xf] %v861_v2  ;;  %v600_v9 = vadd.f32 %v4379_v4, %v578_v62  ;;  %v601_v10 = vadd.f32 %v4379_v4, %v579_v63  ;;  %v878_v55 = vld [vmem:[#allocation2 + $0x50] sm:$0x1]  ;;  %v881_v57 = vld [vmem:[#allocation2 + $0x54] sm:$0xf] }
  0x33   : > { %863 = vst.msk [vmem:[#allocation2 + $0x34] sm:$0xf] %vm498_vm0, %v739_v3  ;;  %866 = vst [vmem:[#allocation2 + $0x38] sm:$0x1] %v865_v5  ;;  %v3816_v7 = vpack.c.bf16 %v614_v59, %v614_v59  ;;  %v602_v11 = vadd.f32 %v4379_v4, %v580_v6  ;;  %v581_v12 = vmul.f32 %v3871_v53, %v4370_v1  ;;  %v3874_v13 = vunpack.c.l.bf16 %v4480_v0 }
  0x34   : > { %v3875_v14 = vunpack.c.h.bf16 %v4480_v0  ;;  %v3817_v17 = vpack.c.bf16 %v615_v8, %v615_v8  ;;  %v616_v18 = vmax.f32 %v600_v9, 0.0  ;;  %v617_v19 = vmax.f32 %v601_v10, 0.0 }
  0x35   : > { %v742_v15 = vshrl.u32 %v3816_v7, 16  ;;  %v745_v16 = vshll.u32 %v3816_v7, 16  ;;  %v618_v20 = vmax.f32 %v602_v11, 0.0  ;;  %v603_v21 = vadd.f32 %v4379_v4, %v581_v12  ;;  %v885_v11 = vld [vmem:[#allocation2 + $0x5c] sm:$0x1] }
  0x36   : > { %v582_v22 = vmul.f32 %v3874_v13, %v4370_v1  ;;  %v750_v24 = vshrl.u32 %v3817_v17, 16  ;;  %v753_v25 = vshll.u32 %v3817_v17, 16  ;;  %v3818_v26 = vpack.c.bf16 %v616_v18, %v616_v18 }
  0x37   : > { %v744_v23 = vrot.slane %v742_v15, 7  ;;  %v3819_v28 = vpack.c.bf16 %v617_v19, %v617_v19  ;;  %v3820_v29 = vpack.c.bf16 %v618_v20, %v618_v20  ;;  %v619_v30 = vmax.f32 %v603_v21, 0.0  ;;  %v888_v21 = vld [vmem:[#allocation2 + $0x60] sm:$0xf] }
  0x38   : > { %v604_v31 = vadd.f32 %v4379_v4, %v582_v22  ;;  %v752_v34 = vrot.slane %v750_v24, 7  ;;  %v759_v35 = vshrl.u32 %v3818_v26, 16  ;;  %v762_v37 = vshll.u32 %v3818_v26, 16 }
  0x39   : > { %v747_v32 = vor.u32 %v745_v16, %v744_v23  ;;  %v748_v33 = vrot.slane %v744_v23, 4  ;;  %v767_v38 = vshrl.u32 %v3819_v28, 16  ;;  %v770_v39 = vshll.u32 %v3819_v28, 16 }
  0x3a   : > { %v776_v40 = vshrl.u32 %v3820_v29, 16  ;;  %v755_v42 = vor.u32 %v753_v25, %v752_v34  ;;  %v757_v43 = vrot.slane %v752_v34, 4  ;;  %v761_v44 = vrot.slane %v759_v35, 7 }
  0x3b   : > { %v868_v41 = vsel %vm4428_vm5, %v747_v32, %v867_v27  ;;  %v769_v46 = vrot.slane %v767_v38, 7  ;;  %v779_v48 = vshll.u32 %v3820_v29, 16  ;;  %v3821_v50 = vpack.c.bf16 %v619_v30, %v619_v30  ;;  %v892_v29 = vld [vmem:[#allocation2 + $0x68] sm:$0x1] }
  0x3c   : > { %869 = vst [vmem:[#allocation2 + $0x3c] sm:$0xf] %v868_v41  ;;  %v778_v47 = vrot.slane %v776_v40, 7  ;;  %v756_v51 = vsel %vm4439_vm6, %v748_v33, %v755_v42  ;;  %v872_v52 = vsel %vm4445_vm7, %v757_v43, %v871_v36  ;;  %v764_v53 = vor.u32 %v762_v37, %v761_v44 }
  0x3d   : > { %v765_v54 = vrot.slane %v761_v44, 4  ;;  %870 = vst.msk [vmem:[#allocation2 + $0x40] sm:$0xf] %vm498_vm0, %v756_v51  ;;  %873 = vst [vmem:[#allocation2 + $0x44] sm:$0x1] %v872_v52  ;;  %v772_v58 = vor.u32 %v770_v39, %v769_v46  ;;  %v774_v59 = vrot.slane %v769_v46, 4  ;;  %v583_v7 = vmul.f32 %v3875_v14, %v4370_v1 }
  0x3e   : > { %v781_v61 = vor.u32 %v779_v48, %v778_v47  ;;  %v875_v62 = vsel %vm4428_vm5, %v764_v53, %v874_v45  ;;  %v784_v63 = vshrl.u32 %v3821_v50, 16  ;;  %v787_v0 = vshll.u32 %v3821_v50, 16 }
  0x3f   : > { %v620_v2 = vmax.f32 %v604_v31, 0.0  ;;  %876 = vst [vmem:[#allocation2 + $0x48] sm:$0xf] %v875_v62  ;;  %v773_v3 = vsel %vm4439_vm6, %v765_v54, %v772_v58  ;;  %v879_v5 = vsel %vm4445_vm7, %v774_v59, %v878_v55  ;;  %v782_v8 = vrot.slane %v778_v47, 4 }
  0x40   : > { %v882_v6 = vsel %vm4428_vm5, %v781_v61, %v881_v57  ;;  %877 = vst.msk [vmem:[#allocation2 + $0x4c] sm:$0xf] %vm498_vm0, %v773_v3  ;;  %880 = vst [vmem:[#allocation2 + $0x50] sm:$0x1] %v879_v5  ;;  %v786_v9 = vrot.slane %v784_v63, 7  ;;  %v605_v12 = vadd.f32 %v4379_v4, %v583_v7 }
  0x41   : > { %883 = vst [vmem:[#allocation2 + $0x54] sm:$0xf] %v882_v6  ;;  %v3822_v10 = vpack.c.bf16 %v620_v2, %v620_v2 }
  0x42   : > { %v789_v13 = vor.u32 %v787_v0, %v786_v9  ;;  %v791_v15 = vrot.slane %v786_v9, 4  ;;  %v621_v18 = vmax.f32 %v605_v12, 0.0 }
  0x43   : > { %v793_v16 = vshrl.u32 %v3822_v10, 16  ;;  %v796_v17 = vshll.u32 %v3822_v10, 16 }
  0x44   : > { %v790_v19 = vsel %vm4439_vm6, %v782_v8, %v789_v13  ;;  %v886_v14 = vsel %vm4445_vm7, %v791_v15, %v885_v11  ;;  %v3823_v22 = vpack.c.bf16 %v621_v18, %v621_v18 }
  0x45   : > { %v795_v20 = vrot.slane %v793_v16, 7  ;;  %884 = vst.msk [vmem:[#allocation2 + $0x58] sm:$0xf] %vm498_vm0, %v790_v19  ;;  %887 = vst [vmem:[#allocation2 + $0x5c] sm:$0x1] %v886_v14 }
  0x46   : > { %v801_v24 = vshrl.u32 %v3823_v22, 16  ;;  %v804_v25 = vshll.u32 %v3823_v22, 16 }
  0x47   : > { %v798_v23 = vor.u32 %v796_v17, %v795_v20  ;;  %v799_v27 = vrot.slane %v795_v20, 4 }
  0x48   : > { %v803_v28 = vrot.slane %v801_v24, 7 }
  0x49   : > { %v889_v26 = vsel %vm4428_vm5, %v798_v23, %v888_v21  ;;  %898 = sbr.rel (%p3674_p11) target bundleno = 98 (0x62), region = 52 }
  0x4a   : > { %890 = vst [vmem:[#allocation2 + $0x60] sm:$0xf] %v889_v26  ;;  %v806_v30 = vor.u32 %v804_v25, %v803_v28  ;;  %v808_v31 = vrot.slane %v803_v28, 4 }
  0x4c   : > { %v807_v32 = vsel %vm4439_vm6, %v799_v27, %v806_v30  ;;  %v893_v33 = vsel %vm4445_vm7, %v808_v31, %v892_v29 }
  0x4d   : > { %891 = vst.msk [vmem:[#allocation2 + $0x64] sm:$0xf] %vm498_vm0, %v807_v32  ;;  %894 = vst [vmem:[#allocation2 + $0x68] sm:$0x1] %v893_v33 }
  0x4e   : > { %v3877_v34 = vld [vmem:[%s4406_s24] sm:$0xff]   ;;  %v939_v53 = vld [vmem:[#allocation2 + $0x8] sm:$0x1] }
  0x4f   : > { %v3878_v35 = vunpack.c.l.bf16 %v3877_v34  ;;  %v3879_v36 = vunpack.c.h.bf16 %v3877_v34  ;;  %v935_v52 = vld [vmem:[#allocation2] sm:$0xf] }
  0x51   : > { %v903_v37 = vmul.f32 %v3878_v35, %v4370_v1  ;;  %v904_v38 = vmul.f32 %v3879_v36, %v4370_v1 }
  0x53   : > { %v905_v39 = vadd.f32 %v4379_v4, %v903_v37  ;;  %v906_v40 = vadd.f32 %v4379_v4, %v904_v38 }
  0x55   : > { %v907_v41 = vmax.f32 %v905_v39, 0.0  ;;  %v908_v42 = vmax.f32 %v906_v40, 0.0 }
  0x57   : > { %v3824_v43 = vpack.c.bf16 %v907_v41, %v907_v41  ;;  %v3825_v44 = vpack.c.bf16 %v908_v42, %v908_v42 }
  0x59   : > { %v916_v45 = vshrl.u32 %v3824_v43, 16  ;;  %v919_v46 = vshll.u32 %v3824_v43, 16  ;;  %v924_v47 = vshrl.u32 %v3825_v44, 16  ;;  %v927_v48 = vshll.u32 %v3825_v44, 16 }
  0x5b   : > { %v918_v50 = vrot.slane %v916_v45, 7  ;;  %v926_v51 = vrot.slane %v924_v47, 7 }
  0x5d   : > { %v921_v54 = vor.u32 %v919_v46, %v918_v50  ;;  %v922_v55 = vrot.slane %v918_v50, 4  ;;  %v929_v57 = vor.u32 %v927_v48, %v926_v51  ;;  %v931_v58 = vrot.slane %v926_v51, 4 }
  0x5f   : > { %v936_v59 = vsel %vm4428_vm5, %v921_v54, %v935_v52  ;;  %v930_v61 = vsel %vm4439_vm6, %v922_v55, %v929_v57  ;;  %v940_v62 = vsel %vm4445_vm7, %v931_v58, %v939_v53 }
  0x60   : > { %937 = vst [vmem:[#allocation2] sm:$0xf] %v936_v59  ;;  %938 = vst.msk [vmem:[#allocation2 + $0x4] sm:$0xf] %vm498_vm0, %v930_v61 }
  0x61   : > { %941 = vst [vmem:[#allocation2 + $0x8] sm:$0x1] %v940_v62 }
  0x62 PF: > { %p3677_p12 = scmp.ge.s32.totalorder %s4207_s27, 1 }
  0x64   : > { %945 = sbr.rel (%p3677_p12) target bundleno = 125 (0x7d), region = 56 }
  0x69   : > { %v3881_v63 = vld [vmem:[%s471_s13] sm:$0xff]   ;;  %v983_v19 = vld [vmem:[#allocation2 + $0x6c] sm:$0xf]  ;;  %v987_v14 = vld [vmem:[#allocation2 + $0x74] sm:$0x1] }
  0x6a   : > { %v3882_v0 = vunpack.c.l.bf16 %v3881_v63  ;;  %v3883_v2 = vunpack.c.h.bf16 %v3881_v63 }
  0x6c   : > { %v950_v3 = vmul.f32 %v3882_v0, %v4370_v1  ;;  %v951_v5 = vmul.f32 %v3883_v2, %v4370_v1 }
  0x6e   : > { %v952_v6 = vadd.f32 %v4379_v4, %v950_v3  ;;  %v953_v7 = vadd.f32 %v4379_v4, %v951_v5 }
  0x70   : > { %v954_v8 = vmax.f32 %v952_v6, 0.0  ;;  %v955_v9 = vmax.f32 %v953_v7, 0.0 }
  0x72   : > { %v3826_v10 = vpack.c.bf16 %v954_v8, %v954_v8  ;;  %v3827_v11 = vpack.c.bf16 %v955_v9, %v955_v9 }
  0x74   : > { %v963_v12 = vshrl.u32 %v3826_v10, 16  ;;  %v966_v13 = vshll.u32 %v3826_v10, 16  ;;  %v971_v15 = vshrl.u32 %v3827_v11, 16  ;;  %v974_v16 = vshll.u32 %v3827_v11, 16 }
  0x76   : > { %v965_v17 = vrot.slane %v963_v12, 7  ;;  %v973_v18 = vrot.slane %v971_v15, 7 }
  0x78   : > { %v968_v20 = vor.u32 %v966_v13, %v965_v17  ;;  %v969_v21 = vrot.slane %v965_v17, 4  ;;  %v976_v22 = vor.u32 %v974_v16, %v973_v18  ;;  %v978_v1 = vrot.slane %v973_v18, 4 }
  0x7a   : > { %v984_v23 = vsel %vm4428_vm5, %v968_v20, %v983_v19  ;;  %v977_v4 = vsel %vm4439_vm6, %v969_v21, %v976_v22  ;;  %v988_v24 = vsel %vm4445_vm7, %v978_v1, %v987_v14 }
  0x7b   : > { %985 = vst [vmem:[#allocation2 + $0x6c] sm:$0xf] %v984_v23  ;;  %986 = vst.msk [vmem:[#allocation2 + $0x70] sm:$0xf] %vm498_vm0, %v977_v4 }
  0x7c   : > { %989 = vst [vmem:[#allocation2 + $0x74] sm:$0x1] %v988_v24 }
  0x7d PF: > { %v1445_v25 = vld [vmem:[#allocation2 + $0xc] sm:$0xf]  ;;  %v1446_v26 = vld [vmem:[#allocation2 + $0x10] sm:$0xf]  ;;  %s4226_s27 = smov 64   ;;  %v4105_v60 = vld [vmem:[%s5656_s3 + $0x78] sm:$0xff]  }
  0x7e   : > { %1477 = vrot.lane.b32.xlu1 %v1445_v25, %s4226_s27  ;;  %v1022_v27 = vld [vmem:[#allocation2] sm:$0xf]  ;;  %v1023_v28 = vld [vmem:[#allocation2 + $0x4] sm:$0xf]  ;;  %vm1046_vm8 = vsmask.f32 3328  ;;  %3891 = vmatprep.subr.bf16.mxu0 %v4105_v60 }
  0x7f   : > { %vm1047_vm9 = vsmask.f32 7440  ;;  %v1050_v49 = vshrl.u32 %v1022_v27, 16  ;;  %v1053_v56 = vshll.u32 %v1022_v27, 16  ;;  %v1059_v29 = vshll.u32 %v1023_v28, 16  ;;  %v4106_v46 = vld [vmem:[%s5656_s3 + $0x38] sm:$0xff]  }
  0x80   : > { %v1063_v30 = vshrl.u32 %v1023_v28, 16  ;;  %v1026_v31 = vld [vmem:[#allocation2 + $0x10] sm:$0xf]  ;;  %v1027_v32 = vld [vmem:[#allocation2 + $0x14] sm:$0x1]  ;;  %vm4571_vm10 = vmor %vm1046_vm8, %vm1047_vm9  ;;  %3892 = vmatpush3.bf16.msra.mxu0 %v4106_v46  ;;  %vm1354_vm11 = vcmask 1042432  }
  0x81   : > { %v1052_v33 = vrot.slane %v1050_v49, 4  ;;  %v1055_v34 = vrot.slane %v1053_v56, 5  ;;  %v1061_v35 = vrot.slane %v1059_v29, 5  ;;  %v1083_v36 = vshll.u32 %v1026_v31, 16  ;;  %v1024_v37 = vld [vmem:[#allocation2 + $0x8] sm:$0x1] }
  0x82   : > { %1479 = vrot.lane.b32.xlu1 %v1446_v26, %s4226_s27  ;;  %v1065_v38 = vrot.slane %v1063_v30, 4  ;;  %v1087_v39 = vshrl.u32 %v1026_v31, 16  ;;  %v1093_v40 = vshll.u32 %v1027_v32, 16  ;;  %v1069_v41 = vshll.u32 %v1024_v37, 16  ;;  %v1025_v44 = vld [vmem:[#allocation2 + $0xc] sm:$0xf] }
  0x83   : > { %v1056_v42 = vor.u32 %v1055_v34, %v1052_v33  ;;  %v4564_v43 = vrot.slane %v1083_v36, 5  ;;  %v1029_v45 = vld [vmem:[#allocation2 + $0x1c] sm:$0xf]  ;;  %v4107_v52 = vld [vmem:[%s5656_s3 + $0x70] sm:$0xff]   ;;  %v1074_v54 = vshrl.u32 %v1025_v44, 16  ;;  %v1077_v55 = vshll.u32 %v1025_v44, 16 }
  0x84   : > { %v1089_v48 = vrot.slane %v1087_v39, 4  ;;  %v1066_v50 = vor.u32 %v1065_v38, %v1061_v35  ;;  %v1071_v51 = vrot.slane %v1069_v41, 5  ;;  %v1030_v57 = vld [vmem:[#allocation2 + $0x20] sm:$0x1]  ;;  %v1107_v58 = vshll.u32 %v1029_v45, 16  ;;  %3893 = vmatprep.subr.bf16.mxu0 %v4107_v52  ;;  %v4108_v0 = vld [vmem:[%s5656_s3 + $0x30] sm:$0xff]  }
  0x85   : > { %v1057_v53 = vrot.slane %v1056_v42, 4  ;;  %v1095_v61 = vrot.slane %v1093_v40, 5  ;;  %v1111_v63 = vshrl.u32 %v1029_v45, 16  ;;  %v1076_v3 = vrot.slane %v1074_v54, 4  ;;  %v1028_v7 = vld [vmem:[#allocation2 + $0x18] sm:$0xf]  ;;  %3894 = vmatpush3.bf16.msra.mxu0 %v4108_v0 }
  0x86   : > { %v1090_v59 = vor.u32 %v1089_v48, %v4564_v43  ;;  %v1067_v62 = vrot.slane %v1066_v50, 4  ;;  %v1079_v5 = vrot.slane %v1077_v55, 5  ;;  %v4584_v6 = vrot.slane %v1107_v58, 5  ;;  %v4109_v8 = vld [vmem:[%s5656_s3 + $0x68] sm:$0xff]   ;;  %v1991_v14 = vld [vmem:[#allocation2 + $0x1c] sm:$0xf] }
  0x87   : > { %v1062_v2 = vsel %vm4571_vm10, %v1057_v53, %v1061_v35  ;;  %v1113_v10 = vrot.slane %v1111_v63, 4  ;;  %v1117_v11 = vshll.u32 %v1030_v57, 16  ;;  %v1098_v15 = vshrl.u32 %v1028_v7, 16  ;;  %v4110_v17 = vld [vmem:[%s5656_s3 + $0x28] sm:$0xff]   ;;  %3895 = vmatprep.subr.bf16.mxu0 %v4109_v8  ;;  %v4111_v20 = vld [vmem:[%s5656_s3 + $0x60] sm:$0xff]   ;;  %v4113_v30 = vld [vmem:[%s5656_s3 + $0x58] sm:$0xff]  }
  0x88   : > { %1241 = vrot.lane.b32.xlu0 %v1062_v2, %s4226_s27  ;;  %v1091_v9 = vrot.slane %v1090_v59, 4  ;;  %v1072_v12 = vsel %vm4571_vm10, %v1067_v62, %v1071_v51  ;;  %v1080_v13 = vor.u32 %v1079_v5, %v1076_v3  ;;  %v1101_v16 = vshll.u32 %v1028_v7, 16  ;;  %v1448_v23 = vld [vmem:[#allocation2 + $0x1c] sm:$0xf]  ;;  %v4606_v49 = vld [vmem:[#allocation2 + $0x10] sm:$0xf] }
  0x89   : > { %v1114_v19 = vor.u32 %v1113_v10, %v4584_v6  ;;  %v1100_v22 = vrot.slane %v1098_v15, 4  ;;  %v1119_v24 = vrot.slane %v1117_v11, 5  ;;  %v2024_v25 = vshll.u32 %v1991_v14, 16  ;;  %v1032_v56 = vld [vmem:[#allocation2 + $0x28] sm:$0xf]  ;;  %3896 = vmatpush3.bf16.msra.mxu0 %v4110_v17  ;;  %v4112_v29 = vld [vmem:[%s5656_s3 + $0x20] sm:$0xff]  }
  0x8a   : > { %v1096_v18 = vsel %vm4571_vm10, %v1091_v9, %v1095_v61  ;;  %v1081_v21 = vrot.slane %v1080_v13, 4  ;;  %v1103_v1 = vrot.slane %v1101_v16, 5  ;;  %v2028_v26 = vshrl.u32 %v1991_v14, 16  ;;  %v1990_v60 = vld [vmem:[#allocation2 + $0x18] sm:$0xf]  ;;  %3897 = vmatprep.subr.bf16.mxu0 %v4111_v20  ;;  %v4115_v48 = vld [vmem:[%s5656_s3 + $0x50] sm:$0xff]  }
  0x8b   : > { %1247 = vrot.lane.b32.xlu1 %v1096_v18, %s4226_s27  ;;  %v1115_v4 = vrot.slane %v1114_v19, 4  ;;  %v1447_v31 = vld [vmem:[#allocation2 + $0x18] sm:$0xf]  ;;  %v1791_v32 = vld [vmem:[#allocation2 + $0x14] sm:$0x1]  ;;  %v1131_v33 = vshll.u32 %v1032_v56, 16 }
  0x8c   : > { %1243 = vrot.lane.b32.xlu0 %v1072_v12, %s4226_s27  ;;  %v1086_v27 = vsel %vm4571_vm10, %v1081_v21, %v4564_v43  ;;  %v1104_v28 = vor.u32 %v1103_v1, %v1100_v22  ;;  %v1135_v34 = vshrl.u32 %v1032_v56, 16  ;;  %v1839_v36 = vrot.slane %v4606_v49, 5  ;;  %v1031_v39 = vld [vmem:[#allocation2 + $0x24] sm:$0xf]  ;;  %v1992_v41 = vld [vmem:[#allocation2 + $0x20] sm:$0x1] }
  0x8d   : > { %v1120_v35 = vsel %vm4571_vm10, %v1115_v4, %v1119_v24  ;;  %v4619_v37 = vrot.slane %v2024_v25, 5  ;;  %v2030_v38 = vrot.slane %v2028_v26, 4  ;;  %v2015_v42 = vshrl.u32 %v1990_v60, 16  ;;  %3898 = vmatpush3.bf16.msra.mxu0 %v4112_v29  ;;  %v4114_v44 = vld [vmem:[%s5656_s3 + $0x18] sm:$0xff]   ;;  %v1450_v45 = vld [vmem:[#allocation2 + $0x28] sm:$0xf] }
  0x8e   : > { %v1105_v40 = vrot.slane %v1104_v28, 4  ;;  %v2018_v43 = vshll.u32 %v1990_v60, 16  ;;  %vm1355_vm12 = vcmask 1046532   ;;  %v1122_v46 = vshrl.u32 %v1031_v39, 16  ;;  %3899 = vmatprep.subr.bf16.mxu0 %v4113_v30  ;;  %v1033_v50 = vld [vmem:[#allocation2 + $0x2c] sm:$0x1] }
  0x8f   : > { %1483 = vrot.lane.b32.xlu1 %v1448_v23, %s4226_s27  ;;  %v4628_v51 = vrot.slane %v1131_v33, 5  ;;  %v1137_v52 = vrot.slane %v1135_v34, 4  ;;  %v1125_v53 = vshll.u32 %v1031_v39, 16  ;;  %v1841_v54 = vrot.slane %v1839_v36, 4  ;;  %v1994_v59 = vld [vmem:[#allocation2 + $0x28] sm:$0xf]  ;;  %vm4642_vm13 = vmor %vm1354_vm11, %vm1355_vm12 }
  0x90   : > { %1245 = vrot.lane.b32.xlu0 %v1086_v27, %s4226_s27  ;;  %v1842_v55 = vrot.slane %v1791_v32, 5  ;;  %v2031_v57 = vor.u32 %v2030_v38, %v4619_v37  ;;  %v2034_v58 = vshll.u32 %v1992_v41, 16  ;;  %v4118_v61 = vld [vmem:[%s5656_s3 + $0xf8] sm:$0xff]   ;;  %v1110_v62 = vsel %vm4571_vm10, %v1105_v40, %v4584_v6  ;;  %v4116_v3 = vld [vmem:[%s5656_s3 + $0x10] sm:$0xff]   ;;  %v1789_v5 = vld [vmem:[#allocation2 + $0xc] sm:$0xe] }
  0x91   : > { %v2017_v0 = vrot.slane %v2015_v42, 4  ;;  %v2020_v2 = vrot.slane %v2018_v43, 5  ;;  %3900 = vmatpush3.bf16.msra.mxu0 %v4114_v44  ;;  %v1141_v7 = vshll.u32 %v1033_v50, 16  ;;  %v1124_v8 = vrot.slane %v1122_v46, 4  ;;  %v4117_v6 = vld [vmem:[%s5656_s3 + $0x48] sm:$0xff]   ;;  %3955 = vmatprep.subr.bf16.mxu1 %v4118_v61  ;;  %v4120_v28 = vld [vmem:[%s5656_s3 + $0xb8] sm:$0xff]  }
  0x92   : > { %v1127_v9 = vrot.slane %v1125_v53, 5  ;;  %3901 = vmatprep.subr.bf16.mxu0 %v4115_v48  ;;  %v1138_v10 = vor.u32 %v1137_v52, %v4628_v51  ;;  %v2048_v11 = vshll.u32 %v1994_v59, 16  ;;  %v2052_v12 = vshrl.u32 %v1994_v59, 16  ;;  %v1035_v13 = vld [vmem:[#allocation2 + $0x34] sm:$0xf]  ;;  %v4119_v23 = vld [vmem:[%s5656_s3 + $0x8] sm:$0xff]   ;;  %3956 = vmatpush3.bf16.msra.mxu1 %v4120_v28 }
  0x93   : > { %1251 = vrot.lane.b32.xlu1 %v1120_v35, %s4226_s27  ;;  %v1843_v15 = vsel %vm4642_vm13, %v1841_v54, %v1842_v55  ;;  %v1449_v16 = vld [vmem:[#allocation2 + $0x24] sm:$0xf]  ;;  %v2032_v17 = vrot.slane %v2031_v57, 4  ;;  %v2036_v18 = vrot.slane %v2034_v58, 5  ;;  %v4657_v19 = vld [vmem:[#allocation2 + $0x1c] sm:$0xf]  ;;  %v2021_v20 = vor.u32 %v2020_v2, %v2017_v0 }
  0x94   : > { %1481 = vrot.lane.b32.xlu0 %v1447_v31, %s4226_s27  ;;  %v3688_v14 = vrot.slane %v1789_v5, 9  ;;  %v4659_v21 = vld [vmem:[#allocation2 + $0x20] sm:$0x1]  ;;  %v1995_v22 = vld [vmem:[#allocation2 + $0x2c] sm:$0x1]  ;;  %v1143_v4 = vrot.slane %v1141_v7, 5  ;;  %v1128_v24 = vor.u32 %v1127_v9, %v1124_v8 }
  0x95   : > { %v1993_v1 = vld [vmem:[#allocation2 + $0x24] sm:$0xf]  ;;  %3902 = vmatpush3.bf16.msra.mxu0 %v4116_v3  ;;  %v1036_v25 = vld [vmem:[#allocation2 + $0x38] sm:$0x1]  ;;  %v1155_v26 = vshll.u32 %v1035_v13, 16  ;;  %v1159_v27 = vshrl.u32 %v1035_v13, 16  ;;  %v2037_v32 = vsel %vm4571_vm10, %v2032_v17, %v2036_v18 }
  0x96   : > { %3903 = vmatprep.subr.bf16.mxu0 %v4117_v6  ;;  %v1139_v56 = vrot.slane %v1138_v10, 4  ;;  %v1846_v29 = vrot.slane %v4657_v19, 5  ;;  %v4669_v60 = vrot.slane %v2048_v11, 5  ;;  %v2054_v30 = vrot.slane %v2052_v12, 4  ;;  %v4121_v31 = vld [vmem:[%s5656_s3 + $0x40] sm:$0xff]   ;;  %v4122_v43 = vld [vmem:[%s5656_s3 + $0xf0] sm:$0xff]  }
  0x97   : > { %1487 = vrot.lane.b32.xlu1 %v1450_v45, %s4226_s27  ;;  %v4677_v33 = vld [vmem:[#allocation2 + $0x18] sm:$0xe]  ;;  %v2039_v34 = vshrl.u32 %v1993_v1, 16  ;;  %v2042_v35 = vshll.u32 %v1993_v1, 16  ;;  %v1034_v38 = vld [vmem:[#allocation2 + $0x30] sm:$0xf]  ;;  %v1840_v39 = vsel %vm4642_vm13, %v3688_v14, %v1839_v36  ;;  %3957 = vmatprep.subr.bf16.mxu1 %v4122_v43 }
  0x98   : > { %1249 = vrot.lane.b32.xlu0 %v1110_v62, %s4226_s27  ;;  %v2022_v40 = vrot.slane %v2021_v20, 4  ;;  %v2058_v41 = vshll.u32 %v1995_v22, 16  ;;  %v1165_v42 = vshll.u32 %v1036_v25, 16  ;;  %v1129_v44 = vrot.slane %v1128_v24, 4  ;;  %v4694_v53 = vld [vmem:[#allocation2 + $0x28] sm:$0xf] }
  0x99   : > { %3904 = vmatpush3.bf16.msra.mxu0 %v4119_v23  ;;  %v1849_v45 = vrot.slane %v4659_v21, 5  ;;  %v4687_v46 = vrot.slane %v1155_v26, 5  ;;  %v1161_v48 = vrot.slane %v1159_v27, 4  ;;  %v1848_v49 = vrot.slane %v1846_v29, 4  ;;  %v4699_v58 = vld [vmem:[#allocation2 + $0x2c] sm:$0x1] }
  0x9a   : > { %3905 = vmatprep.subr.bf16.mxu0 %v4121_v31  ;;  %v2055_v36 = vor.u32 %v2054_v30, %v4669_v60  ;;  %v3689_v50 = vrot.slane %v4677_v33, 9  ;;  %v1146_v52 = vshrl.u32 %v1034_v38, 16  ;;  %v1144_v54 = vsel %vm4571_vm10, %v1139_v56, %v1143_v4  ;;  %v1997_v59 = vld [vmem:[#allocation2 + $0x34] sm:$0xf]  ;;  %v1038_v3 = vld [vmem:[#allocation2 + $0x40] sm:$0xf] }
  0x9b   : > { %1895 = vrot.lane.b32.xlu1 %v1843_v15, %s4226_s27  ;;  %v2041_v55 = vrot.slane %v2039_v34, 4  ;;  %v2044_v57 = vrot.slane %v2042_v35, 5  ;;  %v2027_v61 = vsel %vm4571_vm10, %v2022_v40, %v4619_v37  ;;  %v4704_v62 = vrot.slane %v2058_v41, 5  ;;  %v4123_v5 = vld [vmem:[%s5656_s3] sm:$0xff]   ;;  %v1996_v6 = vld [vmem:[#allocation2 + $0x30] sm:$0xf] }
  0x9c   : > { %1485 = vrot.lane.b32.xlu0 %v1449_v16, %s4226_s27  ;;  %v4706_v0 = vrot.slane %v1165_v42, 5  ;;  %v1149_v2 = vshll.u32 %v1034_v38, 16  ;;  %v1134_v7 = vsel %vm4571_vm10, %v1129_v44, %v4628_v51  ;;  %v1162_v8 = vor.u32 %v1161_v48, %v4687_v46  ;;  %v1037_v37 = vld [vmem:[#allocation2 + $0x3c] sm:$0xf]  ;;  %v4124_v10 = vld [vmem:[%s5656_s3 + $0xb0] sm:$0xff]   ;;  %v4128_v24 = vld [vmem:[%s5656_s3 + $0xe8] sm:$0xff]  }
  0x9d   : > { %v1853_v9 = vrot.slane %v4694_v53, 5  ;;  %v1452_v11 = vld [vmem:[#allocation2 + $0x34] sm:$0xf]  ;;  %v4720_v12 = vrot.slane %v2055_v36, 4  ;;  %v4722_v13 = vrot.slane %v1146_v52, 4  ;;  %v2072_v15 = vshll.u32 %v1997_v59, 16  ;;  %3906 = vmatpush3.bf16.msra.mxu0 %v4123_v5  ;;  %3958 = vmatpush3.bf16.msra.mxu1 %v4124_v10 }
  0x9e   : > { %v2076_v16 = vshrl.u32 %v1997_v59, 16  ;;  %v2045_v51 = vor.u32 %v2044_v57, %v2041_v55  ;;  %v1856_v17 = vrot.slane %v4699_v58, 5  ;;  %v1998_v18 = vld [vmem:[#allocation2 + $0x38] sm:$0x1]  ;;  %v1179_v14 = vshll.u32 %v1038_v3, 16  ;;  %v4129_v56 = vld [vmem:[%s5656_s3 + $0xa8] sm:$0xff]   ;;  %3959 = vmatprep.subr.bf16.mxu1 %v4128_v24 }
  0x9f   : > { %2208 = vrot.lane.b32.xlu1 %v2037_v32, %s4226_s27  ;;  %v1183_v20 = vshrl.u32 %v1038_v3, 16  ;;  %v1151_v22 = vrot.slane %v1149_v2, 5  ;;  %v2063_v1 = vshrl.u32 %v1996_v6, 16  ;;  %v2066_v23 = vshll.u32 %v1996_v6, 16  ;;  %v4735_v27 = vld [vmem:[#allocation2 + $0x24] sm:$0xe] }
  0xa0   : > { %1893 = vrot.lane.b32.xlu0 %v1840_v39, %s4226_s27  ;;  %v1170_v4 = vshrl.u32 %v1037_v37, 16  ;;  %v4729_v25 = vrot.slane %v1162_v8, 4  ;;  %v4733_v26 = vrot.slane %v1853_v9, 4  ;;  %v1173_v28 = vshll.u32 %v1037_v37, 16  ;;  %v1451_v30 = vld [vmem:[#allocation2 + $0x30] sm:$0xf] }
  0xa1   : > { %v4741_v31 = vrot.slane %v2072_v15, 5  ;;  %v2078_v32 = vrot.slane %v2076_v16, 4  ;;  %v2082_v34 = vshll.u32 %v1998_v18, 16  ;;  %v2000_v35 = vld [vmem:[#allocation2 + $0x40] sm:$0xf]  ;;  %v1850_v39 = vsel %vm4642_vm13, %v1848_v49, %v1849_v45  ;;  %3960 = vmatpush3.bf16.msra.mxu1 %v4129_v56  ;;  %v4135_v10 = vld [vmem:[%s5656_s3 + $0x98] sm:$0xff]  }
  0xa2   : > { %v4130_v38 = vld [vmem:[%s5656_s3 + $0xe0] sm:$0xff]   ;;  %v4751_v40 = vrot.slane %v2045_v51, 4  ;;  %v4753_v42 = vrot.slane %v1179_v14, 5  ;;  %v1185_v43 = vrot.slane %v1183_v20, 4  ;;  %v1152_v48 = vor.u32 %v1151_v22, %v4722_v13  ;;  %v4759_v21 = vld [vmem:[#allocation2 + $0x34] sm:$0xf] }
  0xa3   : > { %1255 = vrot.lane.b32.xlu1 %v1144_v54, %s4226_s27  ;;  %v1039_v41 = vld [vmem:[#allocation2 + $0x44] sm:$0x1]  ;;  %v2065_v36 = vrot.slane %v2063_v1, 4  ;;  %v2068_v52 = vrot.slane %v2066_v23, 5  ;;  %v1172_v54 = vrot.slane %v1170_v4, 4  ;;  %3961 = vmatprep.subr.bf16.mxu1 %v4130_v38  ;;  %v1847_v45 = vsel %vm4642_vm13, %v3689_v50, %v1846_v29  ;;  %v4136_v14 = vld [vmem:[%s5656_s3 + $0xd0] sm:$0xff]  }
  0xa4   : > { %2206 = vrot.lane.b32.xlu0 %v2027_v61, %s4226_s27  ;;  %v4131_v44 = vld [vmem:[%s5656_s3 + $0xa0] sm:$0xff]   ;;  %v1175_v49 = vrot.slane %v1173_v28, 5  ;;  %v2096_v55 = vshll.u32 %v2000_v35, 16  ;;  %v2100_v57 = vshrl.u32 %v2000_v35, 16  ;;  %v1041_v59 = vld [vmem:[#allocation2 + $0x4c] sm:$0xf]  ;;  %v2079_v2 = vor.u32 %v2078_v32, %v4741_v31 }
  0xa5   : > { %v4134_v61 = vld [vmem:[%s5656_s3 + $0xd8] sm:$0xff]   ;;  %v4772_v3 = vrot.slane %v2082_v34, 5  ;;  %v3690_v19 = vrot.slane %v4735_v27, 9  ;;  %v1189_v33 = vshll.u32 %v1039_v41, 16  ;;  %v2001_v5 = vld [vmem:[#allocation2 + $0x44] sm:$0x1]  ;;  %v2061_v29 = vsel %vm4571_vm10, %v4720_v12, %v4704_v62  ;;  %3962 = vmatpush3.bf16.msra.mxu1 %v4131_v44 }
  0xa6   : > { %v1168_v50 = vsel %vm4571_vm10, %v4729_v25, %v4706_v0  ;;  %v4785_v8 = vld [vmem:[#allocation2 + $0x38] sm:$0x1]  ;;  %v1860_v6 = vrot.slane %v4759_v21, 5  ;;  %v1999_v37 = vld [vmem:[#allocation2 + $0x3c] sm:$0xf]  ;;  %v2069_v62 = vor.u32 %v2068_v52, %v2065_v36  ;;  %v1203_v13 = vshll.u32 %v1041_v59, 16  ;;  %3963 = vmatprep.subr.bf16.mxu1 %v4134_v61 }
  0xa7   : > { %1491 = vrot.lane.b32.xlu1 %v1452_v11, %s4226_s27  ;;  %v4791_v11 = vrot.slane %v1152_v48, 4  ;;  %v4793_v12 = vld [vmem:[#allocation2 + $0x30] sm:$0xe]  ;;  %v1207_v15 = vshrl.u32 %v1041_v59, 16  ;;  %v1176_v0 = vor.u32 %v1175_v49, %v1172_v54  ;;  %v4795_v16 = vrot.slane %v2096_v55, 5  ;;  %v4140_v55 = vld [vmem:[%s5656_s3 + $0xc8] sm:$0xff]  }
  0xa8   : > { %1253 = vrot.lane.b32.xlu0 %v1134_v7, %s4226_s27  ;;  %v1186_v7 = vor.u32 %v1185_v43, %v4753_v42  ;;  %v2102_v51 = vrot.slane %v2100_v57, 4  ;;  %v2106_v18 = vshll.u32 %v2001_v5, 16  ;;  %v4801_v20 = vrot.slane %v2079_v2, 4  ;;  %v1042_v1 = vld [vmem:[#allocation2 + $0x50] sm:$0x1]  ;;  %v4184_v47 = vld [vmem:[%s5656_s3 + $0x118] sm:$0xff]  }
  0xa9   : > { %v4803_v22 = vrot.slane %v1189_v33, 5  ;;  %v2087_v23 = vshrl.u32 %v1999_v37, 16  ;;  %v2090_v4 = vshll.u32 %v1999_v37, 16  ;;  %v4810_v25 = vrot.slane %v1860_v6, 4  ;;  %3964 = vmatpush3.bf16.msra.mxu1 %v4135_v10  ;;  %v4137_v41 = vld [vmem:[%s5656_s3 + $0x90] sm:$0xff]   ;;  %v4141_v37 = vld [vmem:[%s5656_s3 + $0x88] sm:$0xff]  }
  0xaa   : > { %v4806_v24 = vrot.slane %v1186_v7, 4  ;;  %v1863_v28 = vrot.slane %v4785_v8, 5  ;;  %v3691_v56 = vrot.slane %v4793_v12, 9  ;;  %v2051_v32 = vsel %vm4571_vm10, %v4751_v40, %v4669_v60  ;;  %3965 = vmatprep.subr.bf16.mxu1 %v4136_v14  ;;  %v1454_v43 = vld [vmem:[#allocation2 + $0x40] sm:$0xf] }
  0xab   : > { %1899 = vrot.lane.b32.xlu1 %v1850_v39, %s4226_s27  ;;  %v4818_v34 = vrot.slane %v2069_v62, 4  ;;  %v4820_v35 = vrot.slane %v1203_v13, 5  ;;  %v1209_v38 = vrot.slane %v1207_v15, 4  ;;  %v2003_v39 = vld [vmem:[#allocation2 + $0x4c] sm:$0xf]  ;;  %v4825_v44 = vrot.slane %v1176_v0, 4 }
  0xac   : > { %1489 = vrot.lane.b32.xlu0 %v1451_v30, %s4226_s27  ;;  %v1040_v30 = vld [vmem:[#allocation2 + $0x48] sm:$0xf]  ;;  %v2103_v48 = vor.u32 %v2102_v51, %v4795_v16  ;;  %v4828_v36 = vrot.slane %v2106_v18, 5  ;;  %v1213_v52 = vshll.u32 %v1042_v1, 16  ;;  %v4830_v60 = vld [vmem:[#allocation2 + $0x40] sm:$0xf]  ;;  %v1158_v61 = vsel %vm4571_vm10, %v4791_v11, %v4687_v46 }
  0xad   : > { %v2089_v40 = vrot.slane %v2087_v23, 4  ;;  %v2092_v54 = vrot.slane %v2090_v4, 5  ;;  %v1197_v49 = vshll.u32 %v1040_v30, 16  ;;  %v2120_v57 = vshll.u32 %v2003_v39, 16  ;;  %3966 = vmatpush3.bf16.msra.mxu1 %v4137_v41  ;;  %v4842_v33 = vld [vmem:[#allocation2 + $0x44] sm:$0x1] }
  0xae   : > { %v2124_v59 = vshrl.u32 %v2003_v39, 16  ;;  %v1210_v2 = vor.u32 %v1209_v38, %v4820_v35  ;;  %3967 = vmatprep.subr.bf16.mxu1 %v4140_v55  ;;  %v1857_v5 = vsel %vm4642_vm13, %v4733_v26, %v1856_v17  ;;  %v1044_v7 = vld [vmem:[#allocation2 + $0x58] sm:$0xf]  ;;  %v1453_v46 = vld [vmem:[#allocation2 + $0x3c] sm:$0xf]  ;;  %v1867_v58 = vrot.slane %v4830_v60, 5 }
  0xaf   : > { %2212 = vrot.lane.b32.xlu1 %v2061_v29, %s4226_s27  ;;  %v4849_v29 = vrot.slane %v2103_v48, 4  ;;  %v2093_v10 = vor.u32 %v2092_v54, %v2089_v40  ;;  %v1199_v62 = vrot.slane %v1197_v49, 5  ;;  %v4856_v13 = vld [vmem:[#allocation2 + $0x3c] sm:$0xe]  ;;  %v1045_v15 = vld [vmem:[#allocation2 + $0x5c] sm:$0x1]  ;;  %v1192_v53 = vsel %vm4571_vm10, %v4806_v24, %v4803_v22 }
  0xb0   : > { %1897 = vrot.lane.b32.xlu0 %v1847_v45, %s4226_s27  ;;  %v1194_v45 = vshrl.u32 %v1040_v30, 16  ;;  %v4142_v17 = vld [vmem:[%s5656_s3 + $0xc0] sm:$0xff]   ;;  %v4862_v26 = vrot.slane %v1213_v52, 5  ;;  %v1870_v0 = vrot.slane %v4842_v33, 5  ;;  %v4865_v51 = vrot.slane %v2120_v57, 5  ;;  %v4889_v54 = vld [vmem:[%s5656_s3 + $0x118] sm:$0xff]  }
  0xb1   : > { %v2126_v18 = vrot.slane %v2124_v59, 4  ;;  %v2002_v14 = vld [vmem:[#allocation2 + $0x48] sm:$0xf]  ;;  %3968 = vmatpush3.bf16.msra.mxu1 %v4141_v37  ;;  %v4867_v1 = vrot.slane %v1210_v2, 4  ;;  %v1227_v23 = vshll.u32 %v1044_v7, 16  ;;  %v2085_v30 = vsel %vm4571_vm10, %v4801_v20, %v4772_v3  ;;  %v4143_v38 = vld [vmem:[%s5656_s3 + $0x80] sm:$0xff]   ;;  %4031 = vmatprep.subr.bf16.mxu0 %v4889_v54 }
  0xb2   : > { %v1196_v11 = vrot.slane %v1194_v45, 4  ;;  %v1043_v4 = vld [vmem:[#allocation2 + $0x54] sm:$0xf]  ;;  %3969 = vmatprep.subr.bf16.mxu1 %v4142_v17  ;;  %v4877_v39 = vrot.slane %v2093_v10, 4  ;;  %v3692_v3 = vrot.slane %v4856_v13, 9  ;;  %v1237_v20 = vshll.u32 %v1045_v15, 16 }
  0xb3   : > { %1259 = vrot.lane.b32.xlu1 %v1168_v50, %s4226_s27  ;;  %v2004_v50 = vld [vmem:[#allocation2 + $0x50] sm:$0x1]  ;;  %v2127_v52 = vor.u32 %v2126_v18, %v4865_v51  ;;  %v2111_v40 = vshrl.u32 %v2002_v14, 16  ;;  %v1854_v45 = vsel %vm4642_vm13, %v3690_v19, %v1853_v9  ;;  %v2114_v49 = vshll.u32 %v2002_v14, 16  ;;  %v4897_v57 = vld [vmem:[#allocation2 + $0x4c] sm:$0xf] }
  0xb4   : > { %2210 = vrot.lane.b32.xlu0 %v2051_v32, %s4226_s27  ;;  %v1231_v32 = vshrl.u32 %v1044_v7, 16  ;;  %v1200_v41 = vor.u32 %v1199_v62, %v1196_v11  ;;  %v2130_v48 = vshll.u32 %v2004_v50, 16  ;;  %v1218_v55 = vshrl.u32 %v1043_v4, 16  ;;  %v2006_v2 = vld [vmem:[#allocation2 + $0x58] sm:$0xf] }
  0xb5   : > { %3970 = vmatpush3.bf16.msra.mxu1 %v4143_v38  ;;  %v4899_v59 = vrot.slane %v1227_v23, 5  ;;  %v2075_v9 = vsel %vm4571_vm10, %v4818_v34, %v4741_v31  ;;  %v1221_v19 = vshll.u32 %v1043_v4, 16  ;;  %v4917_v50 = vrot.slane %v2127_v52, 4  ;;  %v4921_v37 = vld [vmem:[#allocation2 + $0x50] sm:$0x1] }
  0xb6   : > { %4055 = vmatprep.subr.bf16.mxu1 %v4889_v54  ;;  %v4912_v27 = vrot.slane %v2130_v48, 5  ;;  %v4919_v7 = vrot.slane %v1237_v20, 5  ;;  %v1874_v22 = vrot.slane %v4897_v57, 5  ;;  %v2113_v24 = vrot.slane %v2111_v40, 4  ;;  %v1456_v31 = vld [vmem:[#allocation2 + $0x4c] sm:$0xf] }
  0xb7   : > { %1495 = vrot.lane.b32.xlu1 %v1454_v43, %s4226_s27  ;;  %v4881_v43 = vrot.slane %v1867_v58, 4  ;;  %v1220_v10 = vrot.slane %v1218_v55, 4  ;;  %v2144_v11 = vshll.u32 %v2006_v2, 16  ;;  %v2005_v62 = vld [vmem:[#allocation2 + $0x54] sm:$0xf]  ;;  %v1223_v17 = vrot.slane %v1221_v19, 5 }
  0xb8   : > { %1257 = vrot.lane.b32.xlu0 %v1158_v61, %s4226_s27  ;;  %v1233_v61 = vrot.slane %v1231_v32, 4  ;;  %v1306_v15 = vld [vmem:[#allocation2] sm:$0xe]  ;;  %v1877_v18 = vrot.slane %v4921_v37, 5  ;;  %v2148_v14 = vshrl.u32 %v2006_v2, 16  ;;  %v1182_v38 = vsel %vm4571_vm10, %v4825_v44, %v4753_v42 }
  0xb9   : > { %v1307_v23 = vld [vmem:[#allocation2 + $0x4] sm:$0xf]  ;;  %v3680_v4 = vrot.slane %v1306_v15, 9  ;;  %v4936_v48 = vld [vmem:[#allocation2 + $0x48] sm:$0xe]  ;;  %v2135_v52 = vshrl.u32 %v2005_v62, 16  ;;  %v1224_v19 = vor.u32 %v1223_v17, %v1220_v10 }
  0xba   : > { %v1234_v34 = vor.u32 %v1233_v61, %v4899_v59  ;;  %v1359_v32 = vrot.slane %v1307_v23, 5  ;;  %v2138_v20 = vshll.u32 %v2005_v62, 16  ;;  %v1455_v61 = vld [vmem:[#allocation2 + $0x48] sm:$0xf]  ;;  %v2150_v2 = vrot.slane %v2148_v14, 4 }
  0xbb   : > { %1903 = vrot.lane.b32.xlu1 %v1857_v5, %s4226_s27  ;;  %v4915_v5 = vrot.slane %v1200_v41, 4  ;;  %v2007_v41 = vld [vmem:[#allocation2 + $0x5c] sm:$0x1]  ;;  %v1308_v42 = vld [vmem:[#allocation2 + $0x8] sm:$0x1]  ;;  %v3693_v14 = vrot.slane %v4936_v48, 9 }
  0xbc   : > { %1493 = vrot.lane.b32.xlu0 %v1453_v46, %s4226_s27  ;;  %v2116_v46 = vrot.slane %v2114_v49, 5  ;;  %v4938_v40 = vrot.slane %v1234_v34, 4  ;;  %v4940_v49 = vrot.slane %v2144_v11, 5  ;;  %v1360_v55 = vsel %vm4642_vm13, %v3680_v4, %v1359_v32  ;;  %v4958_v23 = vld [vmem:[#allocation2 + $0x5c] sm:$0x1] }
  0xbd   : > { %1429 = vst.msk [vmem:[#allocation3 + $0x4] sm:$0xf] %vm498_vm0, %v1360_v55  ;;  %v1361_v44 = vrot.slane %v1359_v32, 4  ;;  %v1362_v11 = vrot.slane %v1308_v42, 5  ;;  %v2137_v34 = vrot.slane %v2135_v52, 4  ;;  %v2140_v62 = vrot.slane %v2138_v20, 5 }
  0xbe   : > { %v2010_v8 = vld [vmem:[#allocation2 + $0x68] sm:$0x1]  ;;  %v2008_v17 = vld [vmem:[#allocation2 + $0x60] sm:$0xf]  ;;  %v2109_v32 = vsel %vm4571_vm10, %v4849_v29, %v4828_v36  ;;  %v993_v52 = vld [vmem:[#allocation2 + $0x10] sm:$0xf]  ;;  %v1861_v20 = vsel %vm4642_vm13, %v3691_v56, %v1860_v6 }
  0xbf   : > { %2216 = vrot.lane.b32.xlu1 %v2085_v30, %s4226_s27  ;;  %v4930_v30 = vrot.slane %v1874_v22, 4  ;;  %v1363_v4 = vsel %vm4642_vm13, %v1361_v44, %v1362_v11  ;;  %v2141_v55 = vor.u32 %v2140_v62, %v2137_v34  ;;  %1009 = vst.msk [vmem:[#allocation3 + $0x3c] sm:$0xf] %vm498_vm0, %v993_v52  ;;  %v991_v36 = vld [vmem:[#allocation2 + $0x4] sm:$0xf]  ;;  %v1884_v29 = vrot.slane %v4958_v23, 5 }
  0xc0   : > { %1901 = vrot.lane.b32.xlu0 %v1854_v45, %s4226_s27  ;;  %v2117_v45 = vor.u32 %v2116_v46, %v2113_v24  ;;  %v2154_v24 = vshll.u32 %v2007_v41, 16  ;;  %v2009_v46 = vld [vmem:[#allocation2 + $0x64] sm:$0xf]  ;;  %1430 = vst.msk [vmem:[#allocation3 + $0x18] sm:$0xf] %vm498_vm0, %v1363_v4  ;;  %v2159_v42 = vshrl.u32 %v2008_v17, 16  ;;  %v1206_v52 = vsel %vm4571_vm10, %v4915_v5, %v4820_v35 }
  0xc1   : > { %v2172_v10 = vshrl.u32 %v2009_v46, 16  ;;  %1007 = vst.msk [vmem:[#allocation3 + $0x14] sm:$0xf] %vm498_vm0, %v991_v36  ;;  %v4991_v56 = vld [vmem:[#allocation2 + $0x64] sm:$0xf]  ;;  %v2162_v44 = vshll.u32 %v2008_v17, 16  ;;  %v1871_v35 = vsel %vm4642_vm13, %v4881_v43, %v1870_v0  ;;  %v2133_v0 = vsel %vm4571_vm10, %v4917_v50, %v4912_v27 }
  0xc2   : > { %v4955_v15 = vrot.slane %v2117_v45, 4  ;;  %v4979_v45 = vrot.slane %v2154_v24, 5  ;;  %v5007_v11 = vrot.slane %v2141_v55, 4  ;;  %v2012_v34 = vld [vmem:[#allocation2 + $0x70] sm:$0xf]  ;;  %vm1289_vm14 = vcmask 1043968  }
  0xc3   : > { %1263 = vrot.lane.b32.xlu1 %v1192_v53, %s4226_s27  ;;  %v4945_v53 = vld [vmem:[#allocation2 + $0x58] sm:$0xf]  ;;  %v2174_v6 = vrot.slane %v2172_v10, 4  ;;  %v1310_v4 = vld [vmem:[#allocation2 + $0x10] sm:$0xf]  ;;  %vm2942_vm15 = vcmask 523264  }
  0xc4   : > { %2214 = vrot.lane.b32.xlu0 %v2075_v9, %s4226_s27  ;;  %v1864_v9 = vsel %vm4642_vm13, %v4810_v25, %v1863_v28  ;;  %v2151_v25 = vor.u32 %v2150_v2, %v4940_v49  ;;  %v2168_v28 = vshll.u32 %v2009_v46, 16  ;;  %v1881_v41 = vrot.slane %v4945_v53, 5  ;;  %v4981_v2 = vld [vmem:[#allocation2 + $0x54] sm:$0xe]  ;;  %v1458_v62 = vld [vmem:[#allocation2 + $0x58] sm:$0xf] }
  0xc5   : > { %v3694_v24 = vrot.slane %v4981_v2, 9  ;;  %v2099_v46 = vsel %vm4571_vm10, %v4877_v39, %v4795_v16  ;;  %v1311_v10 = vld [vmem:[#allocation2 + $0x14] sm:$0x1]  ;;  %v1366_v17 = vrot.slane %v1310_v4, 5  ;;  %v992_v16 = vld [vmem:[#allocation2 + $0xc] sm:$0xf] }
  0xc6   : > { %v4987_v21 = vrot.slane %v2151_v25, 4  ;;  %v4989_v12 = vrot.slane %v2168_v28, 5  ;;  %v2164_v28 = vrot.slane %v2162_v44, 5  ;;  %v2192_v39 = vshll.u32 %v2012_v34, 16  ;;  %1008 = vst.msk [vmem:[#allocation3 + $0x28] sm:$0xf] %vm498_vm0, %v992_v16 }
  0xc7   : > { %1499 = vrot.lane.b32.xlu1 %v1456_v31, %s4226_s27  ;;  %v990_v31 = vld [vmem:[#allocation2] sm:$0xf]  ;;  %v1368_v55 = vrot.slane %v1366_v17, 4  ;;  %v1457_v36 = vld [vmem:[#allocation2 + $0x54] sm:$0xf] }
  0xc8   : > { %1261 = vrot.lane.b32.xlu0 %v1182_v38, %s4226_s27  ;;  %1006 = vst.msk [vmem:[#allocation3] sm:$0xf] %vm498_vm0, %v990_v31  ;;  %v4970_v38 = vrot.slane %v1224_v19, 4  ;;  %v5000_v19 = vrot.slane %v1881_v41, 4  ;;  %v2175_v25 = vor.u32 %v2174_v6, %v4989_v12  ;;  %v1314_v16 = vld [vmem:[#allocation2 + $0x20] sm:$0x1] }
  0xc9   : > { %v1543_v60 = vld [vmem:[#allocation2 + $0x14] sm:$0x1] }
  0xcb   : > { %1907 = vrot.lane.b32.xlu1 %v1864_v9, %s4226_s27  ;;  %v1216_v9 = vsel %vm4571_vm10, %v4867_v1, %v4862_v26  ;;  %v1888_v26 = vrot.slane %v4991_v56, 5  ;;  %v2161_v1 = vrot.slane %v2159_v42, 4  ;;  %v5023_v42 = vrot.slane %v2175_v25, 4 }
  0xcc   : > { %1497 = vrot.lane.b32.xlu0 %v1455_v61, %s4226_s27  ;;  %v2178_v61 = vshll.u32 %v2010_v8, 16  ;;  %v5011_v8 = vld [vmem:[#allocation2 + $0x68] sm:$0x1] }
  0xcd   : > { %v1891_v6 = vrot.slane %v5011_v8, 5  ;;  %v2165_v5 = vor.u32 %v2164_v28, %v2161_v1  ;;  %v1376_v1 = vrot.slane %v1314_v16, 5  ;;  %v994_v28 = vld [vmem:[#allocation2 + $0x18] sm:$0xf]  ;;  %v1230_v16 = vsel %vm4571_vm10, %v4970_v38, %v4899_v59  ;;  %v1316_v59 = vld [vmem:[#allocation2 + $0x28] sm:$0xf] }
  0xce   : > { %v5009_v31 = vrot.slane %v2178_v61, 5  ;;  %v2013_v61 = vld [vmem:[#allocation2 + $0x74] sm:$0x1]  ;;  %1010 = vst.msk [vmem:[#allocation3 + $0x50] sm:$0xf] %vm498_vm0, %v994_v28 }
  0xcf   : > { %2220 = vrot.lane.b32.xlu1 %v2109_v32, %s4226_s27  ;;  %v1369_v32 = vrot.slane %v1311_v10, 5  ;;  %v2202_v4 = vshll.u32 %v2013_v61, 16  ;;  %v1313_v10 = vld [vmem:[#allocation2 + $0x1c] sm:$0xf]  ;;  %v5069_v61 = vld [vmem:[#allocation2 + $0x6c] sm:$0xf] }
  0xd0   : > { %1905 = vrot.lane.b32.xlu0 %v1861_v20, %s4226_s27  ;;  %v2196_v20 = vshrl.u32 %v2012_v34, 16  ;;  %v5035_v34 = vrot.slane %v2192_v39, 5  ;;  %v1373_v43 = vrot.slane %v1313_v10, 5  ;;  %v5055_v39 = vrot.slane %v1888_v26, 4  ;;  %v1317_v38 = vld [vmem:[#allocation2 + $0x2c] sm:$0x1] }
  0xd1   : > { %v1370_v44 = vsel %vm4642_vm13, %v1368_v55, %v1369_v32  ;;  %v5057_v32 = vrot.slane %v2165_v5, 4  ;;  %v5061_v50 = vrot.slane %v2202_v4, 5  ;;  %v2123_v5 = vsel %vm4571_vm10, %v4955_v15, %v4865_v51 }
  0xd2   : > { %1432 = vst.msk [vmem:[#allocation3 + $0x40] sm:$0xf] %vm498_vm0, %v1370_v44  ;;  %v1585_v44 = vshll.u32 %v1543_v60, 16  ;;  %v2181_v53 = vsel %vm4571_vm10, %v5023_v42, %v5009_v31  ;;  %v1001_v31 = vld [vmem:[#allocation2 + $0x40] sm:$0xf] }
  0xd3   : > { %1267 = vrot.lane.b32.xlu1 %v1216_v9, %s4226_s27  ;;  %v995_v9 = vld [vmem:[#allocation2 + $0x1c] sm:$0xf]  ;;  %1017 = vst.msk [vmem:[#allocation3 + $0xdc] sm:$0xf] %vm498_vm0, %v1001_v31  ;;  %v1554_v31 = vld [vmem:[#allocation2 + $0x40] sm:$0xf] }
  0xd4   : > { %2218 = vrot.lane.b32.xlu0 %v2099_v46, %s4226_s27  ;;  %v1309_v46 = vld [vmem:[#allocation2 + $0xc] sm:$0xe]  ;;  %1011 = vst.msk [vmem:[#allocation3 + $0x64] sm:$0xf] %vm498_vm0, %v995_v9 }
  0xd5   : > { %v3681_v25 = vrot.slane %v1309_v46, 9 }
  0xd7   : > { %1503 = vrot.lane.b32.xlu1 %v1458_v62, %s4226_s27  ;;  %v2198_v62 = vrot.slane %v2196_v20, 4  ;;  %v1367_v33 = vsel %vm4642_vm13, %v3681_v25, %v1366_v17  ;;  %v1868_v17 = vsel %vm4642_vm13, %v3692_v3, %v1867_v58  ;;  %v1542_v20 = vld [vmem:[#allocation2 + $0x10] sm:$0xf]  ;;  %v1312_v58 = vld [vmem:[#allocation2 + $0x18] sm:$0xe]  ;;  %v1240_v3 = vsel %vm4571_vm10, %v4938_v40, %v4919_v7 }
  0xd8   : > { %1265 = vrot.lane.b32.xlu0 %v1206_v52, %s4226_s27  ;;  %1431 = vst.msk [vmem:[#allocation3 + $0x2c] sm:$0xf] %vm498_vm0, %v1367_v33  ;;  %v1375_v52 = vrot.slane %v1373_v43, 4  ;;  %v1575_v13 = vshll.u32 %v1542_v20, 16  ;;  %v1579_v55 = vshrl.u32 %v1542_v20, 16  ;;  %v1587_v7 = vrot.slane %v1585_v44, 5 }
  0xd9   : > { %v2199_v27 = vor.u32 %v2198_v62, %v5035_v34  ;;  %v1460_v62 = vld [vmem:[#allocation2 + $0x64] sm:$0xf]  ;;  %v1959_v25 = vld [vmem:[#allocation2 + $0x1c] sm:$0xf]  ;;  %v1541_v33 = vld [vmem:[#allocation2 + $0xc] sm:$0xf] }
  0xda   : > { %v1577_v9 = vrot.slane %v1575_v13, 5  ;;  %v1581_v46 = vrot.slane %v1579_v55, 4  ;;  %1975 = vst.msk [vmem:[#allocation3 + $0x20] sm:$0xf] %vm498_vm0, %v1959_v25  ;;  %v1566_v51 = vshrl.u32 %v1541_v33, 16  ;;  %v1569_v15 = vshll.u32 %v1541_v33, 16 }
  0xdb   : > { %1911 = vrot.lane.b32.xlu1 %v1871_v35, %s4226_s27  ;;  %v3682_v35 = vrot.slane %v1312_v58, 9  ;;  %v5078_v4 = vrot.slane %v2199_v27, 4  ;;  %v1958_v27 = vld [vmem:[#allocation2 + $0x18] sm:$0xf]  ;;  %v1878_v13 = vsel %vm4642_vm13, %v4930_v30, %v1877_v18  ;;  %v1380_v55 = vrot.slane %v1316_v59, 5 }
  0xdc   : > { %1501 = vrot.lane.b32.xlu0 %v1457_v36, %s4226_s27  ;;  %v1377_v36 = vsel %vm4642_vm13, %v1375_v52, %v1376_v1  ;;  %v1582_v10 = vor.u32 %v1581_v46, %v1577_v9  ;;  %v1568_v28 = vrot.slane %v1566_v51, 4  ;;  %1974 = vst.msk [vmem:[#allocation3 + $0xc] sm:$0xf] %vm498_vm0, %v1958_v27  ;;  %v1459_v52 = vld [vmem:[#allocation2 + $0x60] sm:$0xf]  ;;  %v1383_v58 = vrot.slane %v1317_v38, 5 }
  0xdd   : > { %1434 = vst.msk [vmem:[#allocation3 + $0x68] sm:$0xf] %vm498_vm0, %v1377_v36  ;;  %v1374_v40 = vsel %vm4642_vm13, %v3682_v35, %v1373_v43  ;;  %v2183_v43 = vshrl.u32 %v5069_v61, 16  ;;  %v2186_v36 = vshll.u32 %v5069_v61, 16  ;;  %v1545_v46 = vld [vmem:[#allocation2 + $0x1c] sm:$0xf]  ;;  %v2157_v61 = vsel %vm4571_vm10, %v4987_v21, %v4979_v45 }
  0xde   : > { %1433 = vst.msk [vmem:[#allocation3 + $0x54] sm:$0xf] %vm498_vm0, %v1374_v40  ;;  %v1583_v1 = vrot.slane %v1582_v10, 4  ;;  %v1546_v18 = vld [vmem:[#allocation2 + $0x20] sm:$0x1]  ;;  %v1599_v30 = vshll.u32 %v1545_v46, 16 }
  0xdf   : > { %2224 = vrot.lane.b32.xlu1 %v2133_v0, %s4226_s27  ;;  %v997_v0 = vld [vmem:[#allocation2 + $0x28] sm:$0xf]  ;;  %v5105_v35 = vrot.slane %v2183_v43, 4  ;;  %v1609_v25 = vshll.u32 %v1546_v18, 16  ;;  %v1544_v21 = vld [vmem:[#allocation2 + $0x18] sm:$0xf] }
  0xe0   : > { %1909 = vrot.lane.b32.xlu0 %v1868_v17, %s4226_s27  ;;  %v1571_v17 = vrot.slane %v1569_v15, 5  ;;  %1013 = vst.msk [vmem:[#allocation3 + $0x8c] sm:$0xf] %vm498_vm0, %v997_v0  ;;  %v1588_v20 = vsel %vm4571_vm10, %v1583_v1, %v1587_v7  ;;  %v1315_v7 = vld [vmem:[#allocation2 + $0x24] sm:$0xe]  ;;  %v5125_v10 = vrot.slane %v1599_v30, 5 }
  0xe1   : > { %1774 = vst.msk [vmem:[#allocation3 + $0x1c] sm:$0xf] %vm498_vm0, %v1588_v20  ;;  %v3683_v33 = vrot.slane %v1315_v7, 9  ;;  %v1961_v45 = vld [vmem:[#allocation2 + $0x28] sm:$0xf]  ;;  %v1611_v15 = vrot.slane %v1609_v25, 5 }
  0xe2   : > { %v1572_v60 = vor.u32 %v1571_v17, %v1568_v28  ;;  %1977 = vst.msk [vmem:[#allocation3 + $0x48] sm:$0xf] %vm498_vm0, %v1961_v45  ;;  %v1590_v0 = vshrl.u32 %v1544_v21, 16  ;;  %v1593_v57 = vshll.u32 %v1544_v21, 16  ;;  %v999_v43 = vld [vmem:[#allocation2 + $0x34] sm:$0xf] }
  0xe3   : > { %1271 = vrot.lane.b32.xlu1 %v1240_v3, %s4226_s27  ;;  %v996_v3 = vld [vmem:[#allocation2 + $0x24] sm:$0xf]  ;;  %1015 = vst.msk [vmem:[#allocation3 + $0xb4] sm:$0xf] %vm498_vm0, %v999_v43  ;;  %v1319_v1 = vld [vmem:[#allocation2 + $0x34] sm:$0xf]  ;;  %v2171_v43 = vsel %vm4571_vm10, %v5057_v32, %v4989_v12 }
  0xe4   : > { %2222 = vrot.lane.b32.xlu0 %v2123_v5, %s4226_s27  ;;  %v1573_v44 = vrot.slane %v1572_v60, 4  ;;  %1012 = vst.msk [vmem:[#allocation3 + $0x78] sm:$0xf] %vm498_vm0, %v996_v3  ;;  %v1382_v5 = vrot.slane %v1380_v55, 4  ;;  %v1320_v28 = vld [vmem:[#allocation2 + $0x38] sm:$0x1] }
  0xe5   : > { %v1592_v27 = vrot.slane %v1590_v0, 4  ;;  %v1387_v23 = vrot.slane %v1319_v1, 5  ;;  %v1390_v20 = vrot.slane %v1320_v28, 5  ;;  %v998_v60 = vld [vmem:[#allocation2 + $0x30] sm:$0xf]  ;;  %v5152_v59 = vrot.slane %v2186_v36, 5 }
  0xe6   : > { %v1578_v37 = vsel %vm4571_vm10, %v1573_v44, %v1577_v9  ;;  %v1384_v40 = vsel %vm4642_vm13, %v1382_v5, %v1383_v58  ;;  %v1875_v9 = vsel %vm4642_vm13, %v3693_v14, %v1874_v22  ;;  %v1885_v22 = vsel %vm4642_vm13, %v5000_v19, %v1884_v29  ;;  %v1960_v14 = vld [vmem:[#allocation2 + $0x24] sm:$0xf]  ;;  %1014 = vst.msk [vmem:[#allocation3 + $0xa0] sm:$0xf] %vm498_vm0, %v998_v60  ;;  %v5155_v58 = vld [vmem:[#allocation2 + $0x60] sm:$0xe] }
  0xe7   : > { %1507 = vrot.lane.b32.xlu1 %v1460_v62, %s4226_s27  ;;  %v1603_v62 = vshrl.u32 %v1545_v46, 16  ;;  %1773 = vst.msk [vmem:[#allocation3 + $0x8] sm:$0xf] %vm498_vm0, %v1578_v37  ;;  %1436 = vst.msk [vmem:[#allocation3 + $0x90] sm:$0xf] %vm498_vm0, %v1384_v40  ;;  %v2147_v29 = vsel %vm4571_vm10, %v5007_v11, %v4940_v49  ;;  %v1882_v19 = vsel %vm4642_vm13, %v3694_v24, %v1881_v41  ;;  %v1389_v49 = vrot.slane %v1387_v23, 4 }
  0xe8   : > { %1269 = vrot.lane.b32.xlu0 %v1230_v16, %s4226_s27  ;;  %v1381_v16 = vsel %vm4642_vm13, %v3683_v33, %v1380_v55  ;;  %1976 = vst.msk [vmem:[#allocation3 + $0x34] sm:$0xf] %vm498_vm0, %v1960_v14  ;;  %v1549_v55 = vld [vmem:[#allocation2 + $0x2c] sm:$0x1]  ;;  %v1318_v5 = vld [vmem:[#allocation2 + $0x30] sm:$0xe] }
  0xe9   : > { %v1605_v51 = vrot.slane %v1603_v62, 4  ;;  %1435 = vst.msk [vmem:[#allocation3 + $0x7c] sm:$0xf] %vm498_vm0, %v1381_v16  ;;  %v1633_v2 = vshll.u32 %v1549_v55, 16  ;;  %v3684_v24 = vrot.slane %v1318_v5, 9  ;;  %v1391_v30 = vsel %vm4642_vm13, %v1389_v49, %v1390_v20 }
  0xea   : > { %v1963_v36 = vld [vmem:[#allocation2 + $0x34] sm:$0xf]  ;;  %v1547_v46 = vld [vmem:[#allocation2 + $0x24] sm:$0xf]  ;;  %1438 = vst.msk [vmem:[#allocation3 + $0xb8] sm:$0xf] %vm498_vm0, %v1391_v30 }
  0xeb   : > { %1915 = vrot.lane.b32.xlu1 %v1878_v13, %s4226_s27  ;;  %v1606_v48 = vor.u32 %v1605_v51, %v5125_v10  ;;  %v1548_v13 = vld [vmem:[#allocation2 + $0x28] sm:$0xf]  ;;  %1979 = vst.msk [vmem:[#allocation3 + $0x70] sm:$0xf] %vm498_vm0, %v1963_v36  ;;  %v1635_v42 = vrot.slane %v1633_v2, 5  ;;  %v1614_v40 = vshrl.u32 %v1547_v46, 16 }
  0xec   : > { %1505 = vrot.lane.b32.xlu0 %v1459_v52, %s4226_s27  ;;  %v1595_v52 = vrot.slane %v1593_v57, 5  ;;  %v1623_v11 = vshll.u32 %v1548_v13, 16  ;;  %v1627_v44 = vshrl.u32 %v1548_v13, 16  ;;  %v1617_v25 = vshll.u32 %v1547_v46, 16  ;;  %v1962_v33 = vld [vmem:[#allocation2 + $0x30] sm:$0xf] }
  0xed   : > { %v1607_v38 = vrot.slane %v1606_v48, 4  ;;  %1978 = vst.msk [vmem:[#allocation3 + $0x5c] sm:$0xf] %vm498_vm0, %v1962_v33  ;;  %v1322_v21 = vld [vmem:[#allocation2 + $0x40] sm:$0xf]  ;;  %v1616_v16 = vrot.slane %v1614_v40, 4 }
  0xee   : > { %v1596_v3 = vor.u32 %v1595_v52, %v1592_v27  ;;  %v5168_v62 = vrot.slane %v1623_v11, 5  ;;  %v1629_v7 = vrot.slane %v1627_v44, 4  ;;  %v1619_v0 = vrot.slane %v1617_v25, 5  ;;  %v1000_v14 = vld [vmem:[#allocation2 + $0x3c] sm:$0xf] }
  0xef   : > { %2228 = vrot.lane.b32.xlu1 %v2157_v61, %s4226_s27  ;;  %v1612_v41 = vsel %vm4571_vm10, %v1607_v38, %v1611_v15  ;;  %v1388_v61 = vsel %vm4642_vm13, %v3684_v24, %v1387_v23  ;;  %v3695_v15 = vrot.slane %v5155_v58, 9  ;;  %v1394_v57 = vrot.slane %v1322_v21, 5  ;;  %v1551_v1 = vld [vmem:[#allocation2 + $0x34] sm:$0xf]  ;;  %1016 = vst.msk [vmem:[#allocation3 + $0xc8] sm:$0xf] %vm498_vm0, %v1000_v14 }
  0xf0   : > { %1913 = vrot.lane.b32.xlu0 %v1875_v9, %s4226_s27  ;;  %v1478_v17 = vpop.permute.xlu1 %1477  ;;  %1776 = vst.msk [vmem:[#allocation3 + $0x44] sm:$0xf] %vm498_vm0, %v1612_v41  ;;  %v1597_v18 = vrot.slane %v1596_v3, 4  ;;  %v2189_v9 = vor.u32 %v5152_v59, %v5105_v35  ;;  %v1630_v45 = vor.u32 %v1629_v7, %v5168_v62  ;;  %1437 = vst.msk [vmem:[#allocation3 + $0xa4] sm:$0xf] %vm498_vm0, %v1388_v61  ;;  %v1647_v52 = vshll.u32 %v1551_v1, 16 }
  0xf1   : > { %1525 = vst.msk [vmem:[#allocation3 + $0x4] sm:$0xf] %vm1289_vm14, %v1478_v17  ;;  %v1323_v35 = vld [vmem:[#allocation2 + $0x44] sm:$0x1]  ;;  %v1620_v28 = vor.u32 %v1619_v0, %v1616_v16  ;;  %v1396_v17 = vrot.slane %v1394_v57, 4  ;;  %v1651_v8 = vshrl.u32 %v1551_v1, 16  ;;  %v1889_v11 = vsel %vm4642_vm13, %v3695_v15, %v1888_v26 }
  0xf2   : > { %v1602_v51 = vsel %vm4571_vm10, %v1597_v18, %v5125_v10  ;;  %v1892_v10 = vsel %vm4642_vm13, %v5055_v39, %v1891_v6  ;;  %v1397_v48 = vrot.slane %v1323_v35, 5  ;;  %v1552_v27 = vld [vmem:[#allocation2 + $0x38] sm:$0x1]  ;;  %v2205_v6 = vsel %vm4571_vm10, %v5078_v4, %v5061_v50  ;;  %v1321_v20 = vld [vmem:[#allocation2 + $0x3c] sm:$0xe] }
  0xf3   : > { %1919 = vrot.lane.b32.xlu1 %v1885_v22, %s4226_s27  ;;  %1775 = vst.msk [vmem:[#allocation3 + $0x30] sm:$0xf] %vm498_vm0, %v1602_v51  ;;  %v1631_v22 = vrot.slane %v1630_v45, 4  ;;  %v5202_v39 = vrot.slane %v2189_v9, 4  ;;  %v1657_v32 = vshll.u32 %v1552_v27, 16  ;;  %v5211_v59 = vrot.slane %v1647_v52, 5 }
  0xf4   : > { %2226 = vrot.lane.b32.xlu0 %v2147_v29, %s4226_s27  ;;  %v1480_v37 = vpop.permute.xlu1 %1479  ;;  %v1965_v60 = vld [vmem:[#allocation2 + $0x40] sm:$0xf]  ;;  %v1621_v29 = vrot.slane %v1620_v28, 4  ;;  %v1653_v50 = vrot.slane %v1651_v8, 4  ;;  %v1550_v4 = vld [vmem:[#allocation2 + $0x30] sm:$0xf] }
  0xf5   : > { %1526 = vst.msk [vmem:[#allocation3 + $0x18] sm:$0xf] %vm1289_vm14, %v1480_v37  ;;  %v1636_v12 = vsel %vm4571_vm10, %v1631_v22, %v1635_v42  ;;  %v1659_v38 = vrot.slane %v1657_v32, 5  ;;  %v3685_v13 = vrot.slane %v1321_v20, 9  ;;  %v1638_v55 = vshrl.u32 %v1550_v4, 16  ;;  %v5261_v27 = vld [vmem:[%s5656_s3 + $0x110] sm:$0xff]  }
  0xf6   : > { %1778 = vst.msk [vmem:[#allocation3 + $0x6c] sm:$0xf] %vm498_vm0, %v1636_v12  ;;  %1981 = vst.msk [vmem:[#allocation3 + $0x98] sm:$0xf] %vm498_vm0, %v1965_v60  ;;  %v1641_v58 = vshll.u32 %v1550_v4, 16  ;;  %v1626_v44 = vsel %vm4571_vm10, %v1621_v29, %v5168_v62  ;;  %v1654_v5 = vor.u32 %v1653_v50, %v5211_v59  ;;  %v2195_v62 = vsel %vm4571_vm10, %v5202_v39, %v5035_v34 }
  0xf7   : > { %2232 = vrot.lane.b32.xlu1 %v2181_v53, %s4226_s27  ;;  %v1003_v3 = vld [vmem:[#allocation2 + $0x4c] sm:$0xf]  ;;  %v1964_v53 = vld [vmem:[#allocation2 + $0x3c] sm:$0xf]  ;;  %1777 = vst.msk [vmem:[#allocation3 + $0x58] sm:$0xf] %vm498_vm0, %v1626_v44  ;;  %v1395_v56 = vsel %vm4642_vm13, %v3685_v13, %v1394_v57 }
  0xf8   : > { %1917 = vrot.lane.b32.xlu0 %v1882_v19, %s4226_s27  ;;  %v1398_v19 = vsel %vm4642_vm13, %v1396_v17, %v1397_v48  ;;  %1019 = vst.msk [vmem:[#allocation3 + $0x104] sm:$0xf] %vm498_vm0, %v1003_v3  ;;  %v1640_v2 = vrot.slane %v1638_v55, 4  ;;  %v1643_v24 = vrot.slane %v1641_v58, 5  ;;  %1980 = vst.msk [vmem:[#allocation3 + $0x84] sm:$0xf] %vm498_vm0, %v1964_v53 }
  0xf9   : > { %1440 = vst.msk [vmem:[#allocation3 + $0xe0] sm:$0xf] %vm498_vm0, %v1398_v19  ;;  %v1325_v26 = vld [vmem:[#allocation2 + $0x4c] sm:$0xf]  ;;  %v1326_v36 = vld [vmem:[#allocation2 + $0x50] sm:$0x1] }
  0xfa   : > { %v1242_v23 = vpop.permute.xlu0 %1241  ;;  %v1655_v46 = vrot.slane %v1654_v5, 4  ;;  %1439 = vst.msk [vmem:[#allocation3 + $0xcc] sm:$0xf] %vm498_vm0, %v1395_v56  ;;  %v1401_v37 = vrot.slane %v1325_v26, 5  ;;  %v1404_v18 = vrot.slane %v1326_v36, 5  ;;  %v1644_v7 = vor.u32 %v1643_v24, %v1640_v2 }
  0xfb   : > { %1290 = vst.msk [vmem:[#allocation3] sm:$0xf] %vm1289_vm14, %v1242_v23  ;;  %1923 = vrot.lane.b32.xlu1 %v1892_v10, %s4226_s27  ;;  %v1002_v30 = vld [vmem:[#allocation2 + $0x48] sm:$0xf]  ;;  %v1555_v42 = vld [vmem:[#allocation2 + $0x44] sm:$0x1] }
  0xfc   : > { %2230 = vrot.lane.b32.xlu0 %v2171_v43, %s4226_s27  ;;  %1018 = vst.msk [vmem:[#allocation3 + $0xf0] sm:$0xf] %vm498_vm0, %v1002_v30  ;;  %v1324_v61 = vld [vmem:[#allocation2 + $0x48] sm:$0xe]  ;;  %v1660_v25 = vsel %vm4571_vm10, %v1655_v46, %v1659_v38  ;;  %v1403_v33 = vrot.slane %v1401_v37, 4  ;;  %v1671_v9 = vshll.u32 %v1554_v31, 16 }
  0xfd   : > { %v1248_v49 = vpop.permute.xlu1 %1247  ;;  %v1675_v51 = vshrl.u32 %v1554_v31, 16  ;;  %v1967_v45 = vld [vmem:[#allocation2 + $0x4c] sm:$0xf]  ;;  %1780 = vst.msk [vmem:[#allocation3 + $0x94] sm:$0xf] %vm498_vm0, %v1660_v25  ;;  %v1645_v34 = vrot.slane %v1644_v7, 4 }
  0xfe   : > { %1293 = vst.msk [vmem:[#allocation3 + $0x3c] sm:$0xf] %vm1289_vm14, %v1248_v49  ;;  %v1244_v41 = vpop.permute.xlu0 %1243  ;;  %v1681_v15 = vshll.u32 %v1555_v42, 16  ;;  %v3686_v16 = vrot.slane %v1324_v61, 9  ;;  %v1553_v0 = vld [vmem:[#allocation2 + $0x3c] sm:$0xf]  ;;  %v1405_v35 = vsel %vm4642_vm13, %v1403_v33, %v1404_v18 }
  0xff   : > { %1291 = vst.msk [vmem:[#allocation3 + $0x14] sm:$0xf] %vm1289_vm14, %v1244_v41  ;;  %2236 = vrot.lane.b32.xlu1 %v2205_v6, %s4226_s27  ;;  %v5247_v57 = vrot.slane %v1671_v9, 5  ;;  %v1677_v10 = vrot.slane %v1675_v51, 4  ;;  %v1662_v43 = vshrl.u32 %v1553_v0, 16  ;;  %v1650_v48 = vsel %vm4571_vm10, %v1645_v34, %v5211_v59  ;;  %v5277_v41 = vld [vmem:[%s5656_s3 + $0x108] sm:$0xff]  }
 0x100   : > { %1921 = vrot.lane.b32.xlu0 %v1889_v11, %s4226_s27  ;;  %1983 = vst.msk [vmem:[#allocation3 + $0xc0] sm:$0xf] %vm498_vm0, %v1967_v45  ;;  %v1005_v22 = vld [vmem:[#allocation2 + $0x58] sm:$0xf]  ;;  %1442 = vst.msk [vmem:[#allocation3 + $0x108] sm:$0xf] %vm498_vm0, %v1405_v35  ;;  %v1402_v14 = vsel %vm4642_vm13, %v3686_v16, %v1401_v37 }
 0x101   : > { %v1484_v40 = vpop.permute.xlu1 %1483  ;;  %v1665_v1 = vshll.u32 %v1553_v0, 16  ;;  %1021 = vst.msk [vmem:[#allocation3 + $0x12c] sm:$0xf] %vm498_vm0, %v1005_v22  ;;  %v1966_v28 = vld [vmem:[#allocation2 + $0x48] sm:$0xf]  ;;  %v1678_v52 = vor.u32 %v1677_v10, %v5247_v57  ;;  %v1683_v8 = vrot.slane %v1681_v15, 5 }
 0x102   : > { %1528 = vst.msk [vmem:[#allocation3 + $0x40] sm:$0xf] %vm1289_vm14, %v1484_v40  ;;  %v1246_v21 = vpop.permute.xlu0 %1245  ;;  %v1664_v23 = vrot.slane %v1662_v43, 4  ;;  %v1328_v6 = vld [vmem:[#allocation2 + $0x58] sm:$0xf]  ;;  %v5305_v43 = vld [vmem:[%s5656_s3 + $0x100] sm:$0xff]  }
 0x103   : > { %1292 = vst.msk [vmem:[#allocation3 + $0x28] sm:$0xf] %vm1289_vm14, %v1246_v21  ;;  %v4127_v32 = vld [vmem:[#allocation3 + $0x4] ss:$20 sps:$4 sm:$0xff]   ;;  %v1667_v20 = vrot.slane %v1665_v1, 5  ;;  %v1679_v60 = vrot.slane %v1678_v52, 4 }
 0x104   : > { %2234 = vrot.lane.b32.xlu0 %v2195_v62, %s4226_s27  ;;  %1779 = vst.msk [vmem:[#allocation3 + $0x80] sm:$0xf] %vm498_vm0, %v1650_v48  ;;  %1441 = vst.msk [vmem:[#allocation3 + $0xf4] sm:$0xf] %vm498_vm0, %v1402_v14  ;;  %v1329_v29 = vld [vmem:[#allocation2 + $0x5c] sm:$0x1]  ;;  %2999 = vmatprep.mubr.bf16.mxu0 %v4127_v32 }
 0x105   : > { %v1252_v17 = vpop.permute.xlu1 %1251  ;;  %1982 = vst.msk [vmem:[#allocation3 + $0xac] sm:$0xf] %vm498_vm0, %v1966_v28  ;;  %v1408_v19 = vrot.slane %v1328_v6, 5  ;;  %v1004_v59 = vld [vmem:[#allocation2 + $0x54] sm:$0xf]  ;;  %v1668_v50 = vor.u32 %v1667_v20, %v1664_v23  ;;  %v1411_v4 = vrot.slane %v1329_v29, 5  ;;  %v1684_v58 = vsel %vm4571_vm10, %v1679_v60, %v1683_v8 }
 0x106   : > { %1295 = vst.msk [vmem:[#allocation3 + $0x64] sm:$0xf] %vm1289_vm14, %v1252_v17  ;;  %v1482_v39 = vpop.permute.xlu0 %1481  ;;  %v4125_v12 = vld [vmem:[#allocation3] ss:$20 sps:$4 sm:$0xff]   ;;  %v1558_v13 = vld [vmem:[#allocation2 + $0x50] sm:$0x1] }
 0x107   : > { %1527 = vst.msk [vmem:[#allocation3 + $0x2c] sm:$0xf] %vm1289_vm14, %v1482_v39  ;;  %v1557_v38 = vld [vmem:[#allocation2 + $0x4c] sm:$0xf]  ;;  %3000 = vmatmul.mubr.bf16.vlgmr.msra.gmra.mxu0 %v4125_v12  ;;  %v1410_v3 = vrot.slane %v1408_v19, 4  ;;  %v1669_v53 = vrot.slane %v1668_v50, 4 }
 0x108   : > { %1020 = vst.msk [vmem:[#allocation3 + $0x118] sm:$0xf] %vm498_vm0, %v1004_v59  ;;  %v1695_v49 = vshll.u32 %v1557_v38, 16  ;;  %v1699_v11 = vshrl.u32 %v1557_v38, 16  ;;  %v1327_v44 = vld [vmem:[#allocation2 + $0x54] sm:$0xe]  ;;  %4032 = vmatpush3.bf16.msra.mxu0 %v4889_v54 }
 0x109   : > { %v1488_v55 = vpop.permute.xlu1 %1487  ;;  %1782 = vst.msk [vmem:[#allocation3 + $0xbc] sm:$0xf] %vm498_vm0, %v1684_v58  ;;  %v1705_v56 = vshll.u32 %v1558_v13, 16  ;;  %v3687_v2 = vrot.slane %v1327_v44, 9  ;;  %v1969_v24 = vld [vmem:[#allocation2 + $0x58] sm:$0xf]  ;;  %4033 = vmatprep.subr.bf16.mxu0 %v5261_v27  ;;  %v1412_v26 = vsel %vm4642_vm13, %v1410_v3, %v1411_v4  ;;  %v1674_v18 = vsel %vm4571_vm10, %v1669_v53, %v5247_v57 }
 0x10a   : > { %1530 = vst.msk [vmem:[#allocation3 + $0x68] sm:$0xf] %vm1289_vm14, %v1488_v55  ;;  %v1250_v5 = vpop.permute.xlu0 %1249  ;;  %v5283_v36 = vrot.slane %v1695_v49, 5  ;;  %v1701_v54 = vrot.slane %v1699_v11, 4  ;;  %v1556_v46 = vld [vmem:[#allocation2 + $0x48] sm:$0xf] }
 0x10b   : > { %1294 = vst.msk [vmem:[#allocation3 + $0x50] sm:$0xf] %vm1289_vm14, %v1250_v5  ;;  %v1560_v37 = vld [vmem:[#allocation2 + $0x58] sm:$0xf]  ;;  %v1707_v30 = vrot.slane %v1705_v56, 5  ;;  %v1409_v62 = vsel %vm4642_vm13, %v3687_v2, %v1408_v19  ;;  %v1686_v7 = vshrl.u32 %v1556_v46, 16 }
 0x10c   : > { %1985 = vst.msk [vmem:[#allocation3 + $0xe8] sm:$0xf] %vm498_vm0, %v1969_v24  ;;  %1444 = vst.msk [vmem:[#allocation3 + $0x130] sm:$0xf] %vm498_vm0, %v1412_v26  ;;  %v1561_v31 = vld [vmem:[#allocation2 + $0x5c] sm:$0x1]  ;;  %v1702_v40 = vor.u32 %v1701_v54, %v5283_v36  ;;  %4034 = vmatpush3.bf16.msra.mxu0 %v5261_v27 }
 0x10d   : > { %v1968_v42 = vld [vmem:[#allocation2 + $0x54] sm:$0xf]  ;;  %v1896_v61 = vpop.permute.xlu1 %1895  ;;  %1781 = vst.msk [vmem:[#allocation3 + $0xa8] sm:$0xf] %vm498_vm0, %v1674_v18  ;;  %1443 = vst.msk [vmem:[#allocation3 + $0x11c] sm:$0xf] %vm498_vm0, %v1409_v62  ;;  %4035 = vmatprep.subr.bf16.mxu0 %v5277_v41 }
 0x10e   : > { %v1689_v25 = vshll.u32 %v1556_v46, 16  ;;  %v1719_v33 = vshll.u32 %v1560_v37, 16  ;;  %v1723_v9 = vshrl.u32 %v1560_v37, 16  ;;  %1984 = vst.msk [vmem:[#allocation3 + $0xd4] sm:$0xf] %vm498_vm0, %v1968_v42  ;;  %v1486_v51 = vpop.permute.xlu0 %1485  ;;  %v2412_v45 = vld [vmem:[#allocation3 + $0x28] sm:$0xff] }
 0x10f   : > { %1942 = vst.msk [vmem:[#allocation3 + $0x1c] sm:$0xf] %vm1289_vm14, %v1896_v61  ;;  %v2415_v21 = vld [vmem:[#allocation3 + $0x3c] sm:$0xff]  ;;  %v1688_v15 = vrot.slane %v1686_v7, 4  ;;  %v1729_v16 = vshll.u32 %v1561_v31, 16  ;;  %v1703_v35 = vrot.slane %v1702_v40, 4 }
 0x110   : > { %v4132_v34 = vld [vmem:[#allocation3 + $0x2c] ss:$20 sps:$4 sm:$0xff]   ;;  %1529 = vst.msk [vmem:[#allocation3 + $0x54] sm:$0xf] %vm1289_vm14, %v1486_v51  ;;  %v3709_v0 = vcombine.low %v2412_v45, %v2415_v21  ;;  %v1691_v57 = vrot.slane %v1689_v25, 5  ;;  %v5300_v10 = vrot.slane %v1719_v33, 5  ;;  %4036 = vmatpush3.bf16.msra.mxu0 %v5277_v41 }
 0x111   : > { %3007 = vmatprep.mubr.bf16.mxu0 %v4132_v34  ;;  %v1725_v22 = vrot.slane %v1723_v9, 4  ;;  %v1731_v48 = vrot.slane %v1729_v16, 5  ;;  %v1971_v14 = vld [vmem:[#allocation2 + $0x64] sm:$0xf]  ;;  %v1559_v1 = vld [vmem:[#allocation2 + $0x54] sm:$0xf]  ;;  %v2209_v28 = vpop.permute.xlu1 %2208  ;;  %v1708_v17 = vsel %vm4571_vm10, %v1703_v35, %v1707_v30  ;;  %4037 = vmatprep.subr.bf16.mxu0 %v5305_v43 }
 0x112   : > { %3008 = vmatmul.mubr.bf16.gmra.mxu0 %v3709_v0  ;;  %v1692_v52 = vor.u32 %v1691_v57, %v1688_v15  ;;  %1987 = vst.msk [vmem:[#allocation3 + $0x110] sm:$0xf] %vm498_vm0, %v1971_v14  ;;  %v1710_v8 = vshrl.u32 %v1559_v1, 16  ;;  %v1713_v23 = vshll.u32 %v1559_v1, 16  ;;  %v1563_v6 = vld [vmem:[#allocation2 + $0x64] sm:$0xf]  ;;  %v1894_v39 = vpop.permute.xlu0 %1893 }
 0x113   : > { %2255 = vst.msk [vmem:[#allocation3 + $0x20] sm:$0xf] %vm1289_vm14, %v2209_v28  ;;  %v1726_v12 = vor.u32 %v1725_v22, %v5300_v10  ;;  %v1564_v32 = vld [vmem:[#allocation2 + $0x68] sm:$0x1]  ;;  %v1743_v20 = vshll.u32 %v1563_v6, 16  ;;  %v1747_v60 = vshrl.u32 %v1563_v6, 16 }
 0x114   : > { %1784 = vst.msk [vmem:[#allocation3 + $0xe4] sm:$0xf] %vm498_vm0, %v1708_v17  ;;  %v1970_v29 = vld [vmem:[#allocation2 + $0x60] sm:$0xf]  ;;  %v1693_v19 = vrot.slane %v1692_v52, 4  ;;  %v1712_v59 = vrot.slane %v1710_v8, 4  ;;  %4038 = vmatpush3.bf16.msra.mxu0 %v5305_v43 }
 0x115   : > { %1941 = vst.msk [vmem:[#allocation3 + $0x8] sm:$0xf] %vm1289_vm14, %v1894_v39  ;;  %v1715_v50 = vrot.slane %v1713_v23, 5  ;;  %v1753_v4 = vshll.u32 %v1564_v32, 16  ;;  %v2270_v38 = vld [vmem:[#allocation2 + $0x18] sm:$0xe]  ;;  %v1256_v44 = vpop.permute.xlu1 %1255 }
 0x116   : > { %1986 = vst.msk [vmem:[#allocation3 + $0xfc] sm:$0xf] %vm498_vm0, %v1970_v29  ;;  %v2421_v13 = vld [vmem:[#allocation3 + $0x64] sm:$0xff]  ;;  %v1727_v55 = vrot.slane %v1726_v12, 4  ;;  %v5317_v58 = vrot.slane %v1743_v20, 5  ;;  %v1749_v3 = vrot.slane %v1747_v60, 4  ;;  %v1698_v5 = vsel %vm4571_vm10, %v1693_v19, %v5283_v36  ;;  %v2207_v54 = vpop.permute.xlu0 %2206 }
 0x117   : > { %v2271_v49 = vld [vmem:[#allocation2 + $0x1c] sm:$0xf]  ;;  %v3696_v11 = vrot.slane %v2270_v38, 9  ;;  %v1716_v53 = vor.u32 %v1715_v50, %v1712_v59  ;;  %v1755_v56 = vrot.slane %v1753_v4, 5  ;;  %v2272_v2 = vld [vmem:[#allocation2 + $0x20] sm:$0x1] }
 0x118   : > { %v2320_v24 = vrot.slane %v2271_v49, 5  ;;  %v1973_v26 = vld [vmem:[#allocation2 + $0x70] sm:$0xf]  ;;  %1297 = vst.msk [vmem:[#allocation3 + $0x8c] sm:$0xf] %vm1289_vm14, %v1256_v44  ;;  %v2418_v46 = vld [vmem:[#allocation3 + $0x50] sm:$0xff]  ;;  %v1732_v18 = vsel %vm4571_vm10, %v1727_v55, %v1731_v48  ;;  %v1750_v30 = vor.u32 %v1749_v3, %v5317_v58 }
 0x119   : > { %v4138_v37 = vld [vmem:[#allocation3 + $0x54] ss:$20 sps:$4 sm:$0xff]   ;;  %1783 = vst.msk [vmem:[#allocation3 + $0xd0] sm:$0xf] %vm498_vm0, %v1698_v5  ;;  %v2323_v36 = vrot.slane %v2272_v2, 5  ;;  %v3714_v7 = vcombine.low %v2418_v46, %v2421_v13  ;;  %v1717_v31 = vrot.slane %v1716_v53, 4  ;;  %v1492_v34 = vpop.permute.xlu1 %1491 }
 0x11a   : > { %1989 = vst.msk [vmem:[#allocation3 + $0x138] sm:$0xf] %vm498_vm0, %v1973_v26  ;;  %v1562_v62 = vld [vmem:[#allocation2 + $0x60] sm:$0xf]  ;;  %1786 = vst.msk [vmem:[#allocation3 + $0x10c] sm:$0xf] %vm498_vm0, %v1732_v18  ;;  %v2321_v42 = vsel %vm4642_vm13, %v3696_v11, %v2320_v24  ;;  %3015 = vmatprep.mubr.bf16.mxu0 %v4138_v37  ;;  %v1254_v22 = vpop.permute.xlu0 %1253 }
 0x11b   : > { %2254 = vst.msk [vmem:[#allocation3 + $0xc] sm:$0xf] %vm1289_vm14, %v2207_v54  ;;  %v2322_v61 = vrot.slane %v2320_v24, 4  ;;  %v2273_v40 = vld [vmem:[#allocation2 + $0x24] sm:$0xe]  ;;  %v1751_v33 = vrot.slane %v1750_v30, 4  ;;  %3016 = vmatmul.mubr.bf16.gmra.mxu0 %v3714_v7  ;;  %v1722_v15 = vsel %vm4571_vm10, %v1717_v31, %v5300_v10 }
 0x11c   : > { %v2274_v25 = vld [vmem:[#allocation2 + $0x28] sm:$0xf]  ;;  %2390 = vst.msk [vmem:[#allocation3 + $0x10] sm:$0xf] %vm498_vm0, %v2321_v42  ;;  %v1734_v9 = vshrl.u32 %v1562_v62, 16  ;;  %v1737_v51 = vshll.u32 %v1562_v62, 16 }
 0x11d   : > { %v2275_v45 = vld [vmem:[#allocation2 + $0x2c] sm:$0x1]  ;;  %v3697_v21 = vrot.slane %v2273_v40, 9  ;;  %v2324_v16 = vsel %vm4642_vm13, %v2322_v61, %v2323_v36  ;;  %v2327_v0 = vrot.slane %v2274_v25, 5  ;;  %1532 = vst.msk [vmem:[#allocation3 + $0x90] sm:$0xf] %vm1289_vm14, %v1492_v34  ;;  %v1756_v48 = vsel %vm4571_vm10, %v1751_v33, %v1755_v56  ;;  %v1900_v60 = vpop.permute.xlu1 %1899 }
 0x11e   : > { %v2330_v35 = vrot.slane %v2275_v45, 5  ;;  %v1972_v57 = vld [vmem:[#allocation2 + $0x6c] sm:$0xf]  ;;  %1785 = vst.msk [vmem:[#allocation3 + $0xf8] sm:$0xf] %vm498_vm0, %v1722_v15  ;;  %v1736_v14 = vrot.slane %v1734_v9, 4  ;;  %v1490_v13 = vpop.permute.xlu0 %1489 }
 0x11f   : > { %2391 = vst.msk [vmem:[#allocation3 + $0x24] sm:$0xf] %vm498_vm0, %v2324_v16  ;;  %v1739_v1 = vrot.slane %v1737_v51, 5  ;;  %1988 = vst.msk [vmem:[#allocation3 + $0x124] sm:$0xf] %vm498_vm0, %v1972_v57  ;;  %v2328_v17 = vsel %vm4642_vm13, %v3697_v21, %v2327_v0  ;;  %v2329_v52 = vrot.slane %v2327_v0, 4 }
 0x120   : > { %v2276_v10 = vld [vmem:[#allocation2 + $0x30] sm:$0xe]  ;;  %v2277_v28 = vld [vmem:[#allocation2 + $0x34] sm:$0xf]  ;;  %1296 = vst.msk [vmem:[#allocation3 + $0x78] sm:$0xf] %vm1289_vm14, %v1254_v22 }
 0x121   : > { %1788 = vst.msk [vmem:[#allocation3 + $0x134] sm:$0xf] %vm498_vm0, %v1756_v48  ;;  %v2278_v8 = vld [vmem:[#allocation2 + $0x38] sm:$0x1]  ;;  %v3698_v23 = vrot.slane %v2276_v10, 9  ;;  %v2334_v6 = vrot.slane %v2277_v28, 5  ;;  %v1740_v39 = vor.u32 %v1739_v1, %v1736_v14  ;;  %v2331_v29 = vsel %vm4642_vm13, %v2329_v52, %v2330_v35  ;;  %v2213_v46 = vpop.permute.xlu1 %2212 }
 0x122   : > { %2392 = vst.msk [vmem:[#allocation3 + $0x38] sm:$0xf] %vm498_vm0, %v2328_v17  ;;  %v2337_v12 = vrot.slane %v2278_v8, 5  ;;  %v2279_v32 = vld [vmem:[#allocation2 + $0x3c] sm:$0xe]  ;;  %v1898_v30 = vpop.permute.xlu0 %1897 }
 0x123   : > { %v2280_v20 = vld [vmem:[#allocation2 + $0x40] sm:$0xf]  ;;  %v2335_v19 = vsel %vm4642_vm13, %v3698_v23, %v2334_v6  ;;  %v2336_v59 = vrot.slane %v2334_v6, 4  ;;  %v2281_v50 = vld [vmem:[#allocation2 + $0x44] sm:$0x1]  ;;  %v3699_v4 = vrot.slane %v2279_v32, 9 }
 0x124   : > { %v2282_v38 = vld [vmem:[#allocation2 + $0x48] sm:$0xe]  ;;  %1944 = vst.msk [vmem:[#allocation3 + $0x44] sm:$0xf] %vm1289_vm14, %v1900_v60  ;;  %v4144_v55 = vld [vmem:[#allocation3 + $0x8] ss:$20 sps:$4 sm:$0xff]  }
 0x125   : > { %v4146_v3 = vld [vmem:[#allocation3 + $0xc] ss:$20 sps:$4 sm:$0xff]   ;;  %v1741_v49 = vrot.slane %v1740_v39, 4  ;;  %2393 = vst.msk [vmem:[#allocation3 + $0x4c] sm:$0xf] %vm498_vm0, %v2331_v29  ;;  %v2338_v11 = vsel %vm4642_vm13, %v2336_v59, %v2337_v12  ;;  %v2341_v44 = vrot.slane %v2280_v20, 5  ;;  %v1260_v21 = vpop.permute.xlu1 %1259 }
 0x126   : > { %2394 = vst.msk [vmem:[#allocation3 + $0x60] sm:$0xf] %vm498_vm0, %v2335_v19  ;;  %v2344_v5 = vrot.slane %v2281_v50, 5  ;;  %v2283_v53 = vld [vmem:[#allocation2 + $0x4c] sm:$0xf]  ;;  %3096 = vmatprep.mubr.bf16.mxu1 %v4146_v3  ;;  %v3700_v24 = vrot.slane %v2282_v38, 9  ;;  %v2211_v16 = vpop.permute.xlu0 %2210 }
 0x127   : > { %1531 = vst.msk [vmem:[#allocation3 + $0x7c] sm:$0xf] %vm1289_vm14, %v1490_v13  ;;  %v1746_v56 = vsel %vm4571_vm10, %v1741_v49, %v5317_v58  ;;  %v2284_v2 = vld [vmem:[#allocation2 + $0x50] sm:$0x1]  ;;  %v2348_v26 = vrot.slane %v2283_v53, 5  ;;  %3097 = vmatmul.mubr.bf16.vlgmr.msra.gmra.mxu1 %v4144_v55  ;;  %v2342_v37 = vsel %vm4642_vm13, %v3699_v4, %v2341_v44  ;;  %v2343_v18 = vrot.slane %v2341_v44, 4 }
 0x128   : > { %2395 = vst.msk [vmem:[#allocation3 + $0x74] sm:$0xf] %vm498_vm0, %v2338_v11  ;;  %v2285_v54 = vld [vmem:[#allocation2 + $0x54] sm:$0xe]  ;;  %1787 = vst.msk [vmem:[#allocation3 + $0x120] sm:$0xf] %vm498_vm0, %v1746_v56  ;;  %4059 = vmatpush3.bf16.msra.mxu1 %v4184_v47 }
 0x129   : > { %2257 = vst.msk [vmem:[#allocation3 + $0x48] sm:$0xf] %vm1289_vm14, %v2213_v46  ;;  %v2349_v58 = vsel %vm4642_vm13, %v3700_v24, %v2348_v26  ;;  %v2350_v36 = vrot.slane %v2348_v26, 4  ;;  %v2351_v62 = vrot.slane %v2284_v2, 5  ;;  %v2286_v7 = vld [vmem:[#allocation2 + $0x58] sm:$0xf]  ;;  %4056 = vmatprep.subr.bf16.mxu1 %v5261_v27  ;;  %v2345_v42 = vsel %vm4642_vm13, %v2343_v18, %v2344_v5  ;;  %v1496_v8 = vpop.permute.xlu1 %1495 }
 0x12a   : > { %2396 = vst.msk [vmem:[#allocation3 + $0x88] sm:$0xf] %vm498_vm0, %v2342_v37  ;;  %v2287_v31 = vld [vmem:[#allocation2 + $0x5c] sm:$0x1]  ;;  %2398 = vst.msk [vmem:[#allocation3 + $0xb0] sm:$0xf] %vm498_vm0, %v2349_v58  ;;  %v1258_v39 = vpop.permute.xlu0 %1257 }
 0x12b   : > { %1943 = vst.msk [vmem:[#allocation3 + $0x30] sm:$0xf] %vm1289_vm14, %v1898_v30  ;;  %v3701_v61 = vrot.slane %v2285_v54, 9  ;;  %v2355_v40 = vrot.slane %v2286_v7, 5  ;;  %v2358_v25 = vrot.slane %v2287_v31, 5  ;;  %v2352_v33 = vsel %vm4642_vm13, %v2350_v36, %v2351_v62  ;;  %v2427_v34 = vld [vmem:[#allocation3 + $0x8c] sm:$0xff] }
 0x12c   : > { %2397 = vst.msk [vmem:[#allocation3 + $0x9c] sm:$0xf] %vm498_vm0, %v2345_v42  ;;  %v2288_v9 = vld [vmem:[#allocation2 + $0x60] sm:$0xe]  ;;  %v2289_v51 = vld [vmem:[#allocation2 + $0x64] sm:$0xf]  ;;  %4060 = vmatpush3.bf16.msra.mxu1 %v5261_v27 }
 0x12d   : > { %v2290_v45 = vld [vmem:[#allocation2 + $0x68] sm:$0x1]  ;;  %2399 = vst.msk [vmem:[#allocation3 + $0xc4] sm:$0xf] %vm498_vm0, %v2352_v33  ;;  %v2356_v15 = vsel %vm4642_vm13, %v3701_v61, %v2355_v40  ;;  %v2357_v57 = vrot.slane %v2355_v40, 4  ;;  %v3702_v22 = vrot.slane %v2288_v9, 9  ;;  %4057 = vmatprep.subr.bf16.mxu1 %v5277_v41  ;;  %v1904_v19 = vpop.permute.xlu1 %1903 }
 0x12e   : > { %1299 = vst.msk [vmem:[#allocation3 + $0xb4] sm:$0xf] %vm1289_vm14, %v1260_v21  ;;  %v2424_v0 = vld [vmem:[#allocation3 + $0x78] sm:$0xff]  ;;  %v2362_v48 = vrot.slane %v2289_v51, 5  ;;  %2256 = vst.msk [vmem:[#allocation3 + $0x34] sm:$0xf] %vm1289_vm14, %v2211_v16 }
 0x12f   : > { %v4147_v35 = vld [vmem:[#allocation3 + $0x7c] ss:$20 sps:$4 sm:$0xff]   ;;  %2400 = vst.msk [vmem:[#allocation3 + $0xd8] sm:$0xf] %vm498_vm0, %v2356_v15  ;;  %v3719_v14 = vcombine.low %v2424_v0, %v2427_v34  ;;  %v2365_v1 = vrot.slane %v2290_v45, 5  ;;  %v2359_v10 = vsel %vm4642_vm13, %v2357_v57, %v2358_v25 }
 0x130   : > { %3023 = vmatprep.mubr.bf16.mxu0 %v4147_v35  ;;  %v2363_v28 = vsel %vm4642_vm13, %v3702_v22, %v2362_v48  ;;  %v2364_v17 = vrot.slane %v2362_v48, 4  ;;  %v2291_v27 = vld [vmem:[#allocation2 + $0x6c] sm:$0xe]  ;;  %v2292_v52 = vld [vmem:[#allocation2 + $0x70] sm:$0xf]  ;;  %4061 = vmatpush3.bf16.msra.mxu1 %v5277_v41  ;;  %v1494_v41 = vpop.permute.xlu0 %1493  ;;  %v2416_v50 = vld [vmem:[#allocation3 + $0x44] sm:$0xff] }
 0x131   : > { %3024 = vmatmul.mubr.bf16.gmra.mxu0 %v3719_v14  ;;  %2401 = vst.msk [vmem:[#allocation3 + $0xec] sm:$0xf] %vm498_vm0, %v2359_v10  ;;  %2402 = vst.msk [vmem:[#allocation3 + $0x100] sm:$0xf] %vm498_vm0, %v2363_v28  ;;  %v2293_v23 = vld [vmem:[#allocation2 + $0x74] sm:$0x1]  ;;  %4058 = vmatprep.subr.bf16.mxu1 %v5305_v43  ;;  %v2217_v55 = vpop.permute.xlu1 %2216 }
 0x132   : > { %v3703_v6 = vrot.slane %v2291_v27, 9  ;;  %1534 = vst.msk [vmem:[#allocation3 + $0xb8] sm:$0xf] %vm1289_vm14, %v1496_v8  ;;  %v2366_v12 = vsel %vm4642_vm13, %v2364_v17, %v2365_v1  ;;  %v2369_v32 = vrot.slane %v2292_v52, 5  ;;  %v2372_v20 = vrot.slane %v2293_v23, 5 }
 0x133   : > { %1298 = vst.msk [vmem:[#allocation3 + $0xa0] sm:$0xf] %vm1289_vm14, %v1258_v39  ;;  %1946 = vst.msk [vmem:[#allocation3 + $0x6c] sm:$0xf] %vm1289_vm14, %v1904_v19  ;;  %v4171_v39 = vld [vmem:[#allocation3 + $0x10] ss:$20 sps:$4 sm:$0xff]  }
 0x134   : > { %2403 = vst.msk [vmem:[#allocation3 + $0x114] sm:$0xf] %vm498_vm0, %v2366_v12  ;;  %v2370_v60 = vsel %vm4642_vm13, %v3703_v6, %v2369_v32  ;;  %v2371_v29 = vrot.slane %v2369_v32, 4  ;;  %4062 = vmatpush3.bf16.msra.mxu1 %v5305_v43  ;;  %v1902_v3 = vpop.permute.xlu0 %1901 }
 0x135   : > { %2404 = vst.msk [vmem:[#allocation3 + $0x128] sm:$0xf] %vm498_vm0, %v2370_v60  ;;  %v2413_v59 = vld [vmem:[#allocation3 + $0x30] sm:$0xff]  ;;  %v1264_v49 = vpop.permute.xlu1 %1263 }
 0x136   : > { %v4149_v4 = vld [vmem:[#allocation3 + $0x34] ss:$20 sps:$4 sm:$0xff]   ;;  %v2373_v38 = vsel %vm4642_vm13, %v2371_v29, %v2372_v20  ;;  %1533 = vst.msk [vmem:[#allocation3 + $0xa4] sm:$0xf] %vm1289_vm14, %v1494_v41  ;;  %v3711_v13 = vcombine.low %v2413_v59, %v2416_v50  ;;  %2259 = vst.msk [vmem:[#allocation3 + $0x70] sm:$0xf] %vm1289_vm14, %v2217_v55 }
 0x137   : > { %2405 = vst.msk [vmem:[#allocation3 + $0x13c] sm:$0xf] %vm498_vm0, %v2373_v38  ;;  %3104 = vmatprep.mubr.bf16.mxu1 %v4149_v4  ;;  %v4172_v50 = vld [vmem:[#allocation3 + $0x38] ss:$20 sps:$4 sm:$0xff]   ;;  %v4175_v4 = vld [vmem:[#allocation3 + $0x60] ss:$20 sps:$4 sm:$0xff]  }
 0x138   : > { %3105 = vmatmul.mubr.bf16.gmra.mxu1 %v3711_v13  ;;  %1945 = vst.msk [vmem:[#allocation3 + $0x58] sm:$0xf] %vm1289_vm14, %v1902_v3  ;;  %1301 = vst.msk [vmem:[#allocation3 + $0xdc] sm:$0xf] %vm1289_vm14, %v1264_v49  ;;  %v2215_v43 = vpop.permute.xlu0 %2214 }
 0x139   : > { %v2433_v11 = vld [vmem:[#allocation3 + $0xb4] sm:$0xff]  ;;  %2258 = vst.msk [vmem:[#allocation3 + $0x5c] sm:$0xf] %vm1289_vm14, %v2215_v43  ;;  %v1500_v53 = vpop.permute.xlu1 %1499 }
 0x13a   : > { %1536 = vst.msk [vmem:[#allocation3 + $0xe0] sm:$0xf] %vm1289_vm14, %v1500_v53 }
 0x13c   : > { %v1262_v56 = vpop.permute.xlu0 %1261 }
 0x13d   : > { %v2430_v63 = vld [vmem:[#allocation3 + $0xa0] sm:$0xff]  ;;  %1300 = vst.msk [vmem:[#allocation3 + $0xc8] sm:$0xf] %vm1289_vm14, %v1262_v56  ;;  %v1908_v2 = vpop.permute.xlu1 %1907  ;;  %v2422_v54 = vld [vmem:[#allocation3 + $0x6c] sm:$0xff] }
 0x13e   : > { %v4151_v44 = vld [vmem:[#allocation3 + $0xa4] ss:$20 sps:$4 sm:$0xff]   ;;  %v3724_v5 = vcombine.low %v2430_v63, %v2433_v11  ;;  %1948 = vst.msk [vmem:[#allocation3 + $0x94] sm:$0xf] %vm1289_vm14, %v1908_v2  ;;  %v4176_v63 = vld [vmem:[#allocation3 + $0x88] ss:$20 sps:$4 sm:$0xff]  }
 0x13f   : > { %3031 = vmatprep.mubr.bf16.mxu0 %v4151_v44 }
 0x140   : > { %3032 = vmatmul.mubr.bf16.gmra.mxu0 %v3724_v5  ;;  %v1498_v24 = vpop.permute.xlu0 %1497  ;;  %v2419_v26 = vld [vmem:[#allocation3 + $0x58] sm:$0xff] }
 0x141   : > { %v4154_v46 = vld [vmem:[#allocation3 + $0x5c] ss:$20 sps:$4 sm:$0xff]   ;;  %1535 = vst.msk [vmem:[#allocation3 + $0xcc] sm:$0xf] %vm1289_vm14, %v1498_v24  ;;  %v3716_v37 = vcombine.low %v2419_v26, %v2422_v54  ;;  %v2221_v18 = vpop.permute.xlu1 %2220 }
 0x142   : > { %3112 = vmatprep.mubr.bf16.mxu1 %v4154_v46  ;;  %2261 = vst.msk [vmem:[#allocation3 + $0x98] sm:$0xf] %vm1289_vm14, %v2221_v18  ;;  %v2439_v62 = vld [vmem:[#allocation3 + $0xdc] sm:$0xff]  ;;  %v4180_v24 = vld [vmem:[#allocation3 + $0xb0] ss:$20 sps:$4 sm:$0xff]  }
 0x143   : > { %3113 = vmatmul.mubr.bf16.gmra.mxu1 %v3716_v37  ;;  %v4181_v46 = vld [vmem:[#allocation3 + $0xd8] ss:$20 sps:$4 sm:$0xff]   ;;  %v4182_v37 = vld [vmem:[#allocation3 + $0x100] ss:$20 sps:$4 sm:$0xff]   ;;  %v4183_v18 = vld [vmem:[#allocation3 + $0x128] ss:$20 sps:$4 sm:$0xff]  }
 0x144   : > { %v1906_v30 = vpop.permute.xlu0 %1905 }
 0x145   : > { %1947 = vst.msk [vmem:[#allocation3 + $0x80] sm:$0xf] %vm1289_vm14, %v1906_v30  ;;  %v1268_v47 = vpop.permute.xlu1 %1267 }
 0x146   : > { %1303 = vst.msk [vmem:[#allocation3 + $0x104] sm:$0xf] %vm1289_vm14, %v1268_v47 }
 0x148   : > { %v2219_v58 = vpop.permute.xlu0 %2218  ;;  %v2436_v36 = vld [vmem:[#allocation3 + $0xc8] sm:$0xff] }
 0x149   : > { %v4156_v7 = vld [vmem:[#allocation3 + $0xcc] ss:$20 sps:$4 sm:$0xff]   ;;  %2260 = vst.msk [vmem:[#allocation3 + $0x84] sm:$0xf] %vm1289_vm14, %v2219_v58  ;;  %v3729_v31 = vcombine.low %v2436_v36, %v2439_v62  ;;  %v1504_v42 = vpop.permute.xlu1 %1503  ;;  %v2428_v9 = vld [vmem:[#allocation3 + $0x94] sm:$0xff] }
 0x14a   : > { %3039 = vmatprep.mubr.bf16.mxu0 %v4156_v7  ;;  %1538 = vst.msk [vmem:[#allocation3 + $0x108] sm:$0xf] %vm1289_vm14, %v1504_v42 }
 0x14b   : > { %3040 = vmatmul.mubr.bf16.gmra.mxu0 %v3729_v31 }
 0x14c   : > { %v1266_v61 = vpop.permute.xlu0 %1265 }
 0x14d   : > { %1302 = vst.msk [vmem:[#allocation3 + $0xf0] sm:$0xf] %vm1289_vm14, %v1266_v61  ;;  %v1912_v40 = vpop.permute.xlu1 %1911 }
 0x14e   : > { %1950 = vst.msk [vmem:[#allocation3 + $0xbc] sm:$0xf] %vm1289_vm14, %v1912_v40 }
 0x150   : > { %v1502_v25 = vpop.permute.xlu0 %1501  ;;  %v2425_v33 = vld [vmem:[#allocation3 + $0x80] sm:$0xff] }
 0x151   : > { %v4159_v51 = vld [vmem:[#allocation3 + $0x84] ss:$20 sps:$4 sm:$0xff]   ;;  %1537 = vst.msk [vmem:[#allocation3 + $0xf4] sm:$0xf] %vm1289_vm14, %v1502_v25  ;;  %v3721_v45 = vcombine.low %v2425_v33, %v2428_v9  ;;  %v2225_v21 = vpop.permute.xlu1 %2224 }
 0x152   : > { %3120 = vmatprep.mubr.bf16.mxu1 %v4159_v51  ;;  %2263 = vst.msk [vmem:[#allocation3 + $0xc0] sm:$0xf] %vm1289_vm14, %v2225_v21  ;;  %v2445_v35 = vld [vmem:[#allocation3 + $0x104] sm:$0xff] }
 0x153   : > { %3121 = vmatmul.mubr.bf16.gmra.mxu1 %v3721_v45 }
 0x154   : > { %v1910_v34 = vpop.permute.xlu0 %1909 }
 0x155   : > { %1949 = vst.msk [vmem:[#allocation3 + $0xa8] sm:$0xf] %vm1289_vm14, %v1910_v34  ;;  %v1272_v15 = vpop.permute.xlu1 %1271 }
 0x156   : > { %1305 = vst.msk [vmem:[#allocation3 + $0x12c] sm:$0xf] %vm1289_vm14, %v1272_v15 }
 0x158   : > { %v2223_v16 = vpop.permute.xlu0 %2222  ;;  %v2442_v0 = vld [vmem:[#allocation3 + $0xf0] sm:$0xff] }
 0x159   : > { %v4161_v57 = vld [vmem:[#allocation3 + $0xf4] ss:$20 sps:$4 sm:$0xff]   ;;  %2262 = vst.msk [vmem:[#allocation3 + $0xac] sm:$0xf] %vm1289_vm14, %v2223_v16  ;;  %v3734_v22 = vcombine.low %v2442_v0, %v2445_v35  ;;  %v1508_v48 = vpop.permute.xlu1 %1507  ;;  %v2434_v17 = vld [vmem:[#allocation3 + $0xbc] sm:$0xff] }
 0x15a   : > { %3047 = vmatprep.mubr.bf16.mxu0 %v4161_v57  ;;  %1540 = vst.msk [vmem:[#allocation3 + $0x130] sm:$0xf] %vm1289_vm14, %v1508_v48 }
 0x15b   : > { %3048 = vmatmul.mubr.bf16.gmra.mxu0 %v3734_v22 }
 0x15c   : > { %v1270_v14 = vpop.permute.xlu0 %1269 }
 0x15d   : > { %1304 = vst.msk [vmem:[#allocation3 + $0x118] sm:$0xf] %vm1289_vm14, %v1270_v14  ;;  %v1916_v1 = vpop.permute.xlu1 %1915 }
 0x15e   : > { %1952 = vst.msk [vmem:[#allocation3 + $0xe4] sm:$0xf] %vm1289_vm14, %v1916_v1 }
 0x160   : > { %v1506_v10 = vpop.permute.xlu0 %1505  ;;  %v2431_v28 = vld [vmem:[#allocation3 + $0xa8] sm:$0xff] }
 0x161   : > { %v4164_v27 = vld [vmem:[#allocation3 + $0xac] ss:$20 sps:$4 sm:$0xff]   ;;  %1539 = vst.msk [vmem:[#allocation3 + $0x11c] sm:$0xf] %vm1289_vm14, %v1506_v10  ;;  %v3726_v52 = vcombine.low %v2431_v28, %v2434_v17  ;;  %v2229_v8 = vpop.permute.xlu1 %2228 }
 0x162   : > { %3128 = vmatprep.mubr.bf16.mxu1 %v4164_v27  ;;  %2265 = vst.msk [vmem:[#allocation3 + $0xe8] sm:$0xf] %vm1289_vm14, %v2229_v8  ;;  %v2451_v20 = vld [vmem:[#allocation3 + $0x12c] sm:$0xff] }
 0x163   : > { %3129 = vmatmul.mubr.bf16.gmra.mxu1 %v3726_v52 }
 0x164   : > { %v1914_v23 = vpop.permute.xlu0 %1913 }
 0x165   : > { %1951 = vst.msk [vmem:[#allocation3 + $0xd0] sm:$0xf] %vm1289_vm14, %v1914_v23  ;;  %v1920_v6 = vpop.permute.xlu1 %1919 }
 0x166   : > { %1954 = vst.msk [vmem:[#allocation3 + $0x10c] sm:$0xf] %vm1289_vm14, %v1920_v6 }
 0x168   : > { %v2227_v12 = vpop.permute.xlu0 %2226  ;;  %v2448_v32 = vld [vmem:[#allocation3 + $0x118] sm:$0xff] }
 0x169   : > { %v4166_v60 = vld [vmem:[#allocation3 + $0x11c] ss:$20 sps:$4 sm:$0xff]   ;;  %2264 = vst.msk [vmem:[#allocation3 + $0xd4] sm:$0xf] %vm1289_vm14, %v2227_v12  ;;  %v3739_v29 = vcombine.low %v2448_v32, %v2451_v20  ;;  %v2233_v19 = vpop.permute.xlu1 %2232  ;;  %v2440_v55 = vld [vmem:[#allocation3 + $0xe4] sm:$0xff] }
 0x16a   : > { %3055 = vmatprep.mubr.bf16.mxu0 %v4166_v60  ;;  %2267 = vst.msk [vmem:[#allocation3 + $0x110] sm:$0xf] %vm1289_vm14, %v2233_v19 }
 0x16b   : > { %3056 = vmatmul.mubr.bf16.gmra.mxu0 %v3739_v29 }
 0x16c   : > { %v1918_v41 = vpop.permute.xlu0 %1917  ;;  %4039 = vmatprep.mubr.msk.bf16.mxu0 %vm2942_vm15, %v4171_v39 }
 0x16d   : > { %1953 = vst.msk [vmem:[#allocation3 + $0xf8] sm:$0xf] %vm1289_vm14, %v1918_v41  ;;  %v1924_v59 = vpop.permute.xlu1 %1923 }
 0x16e   : > { %1956 = vst.msk [vmem:[#allocation3 + $0x134] sm:$0xf] %vm1289_vm14, %v1924_v59 }
 0x170   : > { %v2231_v38 = vpop.permute.xlu0 %2230  ;;  %v2437_v13 = vld [vmem:[#allocation3 + $0xd0] sm:$0xff] }
 0x171   : > { %v4169_v3 = vld [vmem:[#allocation3 + $0xd4] ss:$20 sps:$4 sm:$0xff]   ;;  %2266 = vst.msk [vmem:[#allocation3 + $0xfc] sm:$0xf] %vm1289_vm14, %v2231_v38  ;;  %v3731_v49 = vcombine.low %v2437_v13, %v2440_v55  ;;  %v2237_v11 = vpop.permute.xlu1 %2236  ;;  %v2446_v53 = vld [vmem:[#allocation3 + $0x10c] sm:$0xff] }
 0x172   : > { %3136 = vmatprep.mubr.bf16.mxu1 %v4169_v3  ;;  %2269 = vst.msk [vmem:[#allocation3 + $0x138] sm:$0xf] %vm1289_vm14, %v2237_v11 }
 0x173   : > { %3137 = vmatmul.mubr.bf16.gmra.mxu1 %v3731_v49  ;;  %4040 = vmatmul.mubr.msk.bf16.vlgmr.msra.gmra.mxu0 %vm2942_vm15, %v4172_v50 }
 0x174   : > { %v1922_v43 = vpop.permute.xlu0 %1921  ;;  %4043 = vmatprep.mubr.msk.bf16.mxu0 %vm2942_vm15, %v4175_v4 }
 0x175   : > { %1955 = vst.msk [vmem:[#allocation3 + $0x120] sm:$0xf] %vm1289_vm14, %v1922_v43 }
 0x178   : > { %v2235_v44 = vpop.permute.xlu0 %2234  ;;  %v2443_v5 = vld [vmem:[#allocation3 + $0xf8] sm:$0xff] }
 0x179   : > { %v4173_v56 = vld [vmem:[#allocation3 + $0xfc] ss:$20 sps:$4 sm:$0xff]   ;;  %2268 = vst.msk [vmem:[#allocation3 + $0x124] sm:$0xf] %vm1289_vm14, %v2235_v44  ;;  %v3736_v2 = vcombine.low %v2443_v5, %v2446_v53 }
 0x17a   : > { %3144 = vmatprep.mubr.bf16.mxu1 %v4173_v56 }
 0x17b   : > { %3145 = vmatmul.mubr.bf16.gmra.mxu1 %v3736_v2  ;;  %4044 = vmatmul.mubr.msk.bf16.gmra.mxu0 %vm2942_vm15, %v4176_v63 }
 0x17c   : > { %v4179_v54 = vld [vmem:[#allocation3 + $0x120] ss:$20 sps:$4 sm:$0xff]  }
 0x180   : > { %v4177_v26 = vld [vmem:[#allocation3 + $0x124] ss:$20 sps:$4 sm:$0xff]  }
 0x181   : > { %3152 = vmatprep.mubr.bf16.mxu1 %v4177_v26 }
 0x183   : > { %3153 = vmatmul.mubr.bf16.gmra.mxu1 %v4179_v54 }
 0x184   : > { %4047 = vmatprep.mubr.msk.bf16.mxu1 %vm2942_vm15, %v4180_v24 }
 0x18b   : > { %4048 = vmatmul.mubr.msk.bf16.vlgmr.msra.gmra.mxu1 %vm2942_vm15, %v4181_v46 }
 0x18c   : > { %4051 = vmatprep.mubr.msk.bf16.mxu1 %vm2942_vm15, %v4182_v37 }
 0x193   : > { %4052 = vmatmul.mubr.msk.bf16.gmra.mxu1 %vm2942_vm15, %v4183_v18 }
 0x1c7   : > { %v3907_v30 = vpop.f32.mrf.mxu0 }
 0x1c9   : > { %v3908_v47 = vpop.f32.mrf.mxu0 }
 0x1ca   : > { %v3909_v2 = vadd.f32 %v3908_v47, %v3907_v30 }
 0x1cb   : > { %v5455_v58 = vpop.f32.mrf.mxu0 }
 0x1cd   : > { %v5457_v36 = vpop.f32.mrf.mxu0 }
 0x1d2   : > { %v3913_v62 = vpop.f32.mrf.mxu0 }
 0x1d4   : > { %v3914_v7 = vpop.f32.mrf.mxu0 }
 0x1d5   : > { %v3915_v43 = vadd.f32 %v3914_v7, %v3913_v62 }
 0x1d6   : > { %v3916_v31 = vpop.f32.mrf.mxu0 }
 0x1d8   : > { %v3917_v42 = vpop.f32.mrf.mxu0 }
 0x1d9   : > { %v3918_v54 = vadd.f32 %v3917_v42, %v3916_v31 }
 0x1db   : > { %v5459_v61 = vpop.f32.mrf.mxu0 }
 0x1dd   : > { %v5461_v40 = vpop.f32.mrf.mxu0 }
 0x1df   : > { %v5463_v25 = vpop.f32.mrf.mxu0 }
 0x1e1   : > { %v5465_v9 = vpop.f32.mrf.mxu0 }
 0x1e7   : > { %v3971_v33 = vpop.f32.mrf.mxu1 }
 0x1e9   : > { %v3972_v51 = vpop.f32.mrf.mxu1 }
 0x1ea   : > { %v3973_v63 = vadd.f32 %v3972_v51, %v3971_v33  ;;  %v3912_v51 = vadd.f32 %v5457_v36, %v5455_v58 }
 0x1eb   : > { %v3974_v21 = vpop.f32.mrf.mxu1 }
 0x1ed   : > { %v3975_v15 = vpop.f32.mrf.mxu1 }
 0x1ee   : > { %v3976_v37 = vadd.f32 %v3975_v15, %v3974_v21 }
 0x1f0   : > { %v3102_v15 = vadd.f32 %v3976_v37, %v3912_v51 }
 0x1f1   : > { %v3925_v45 = vpop.f32.mrf.mxu0 }
 0x1f3   : > { %v3926_v34 = vpop.f32.mrf.mxu0 }
 0x1f4   : > { %v3927_v47 = vadd.f32 %v3926_v34, %v3925_v45 }
 0x1f5   : > { %v5467_v16 = vpop.f32.mrf.mxu0 }
 0x1f7   : > { %v5469_v35 = vpop.f32.mrf.mxu0 }
 0x1f8   : > { %v3977_v0 = vpop.f32.mrf.mxu1  ;;  %v3930_v45 = vadd.f32 %v5469_v35, %v5467_v16 }
 0x1fa   : > { %v3978_v57 = vpop.f32.mrf.mxu1 }
 0x1fb   : > { %v3979_v49 = vadd.f32 %v3978_v57, %v3977_v0  ;;  %v3099_v0 = vadd.f32 %v3973_v63, %v3909_v2  ;;  %v3924_v63 = vadd.f32 %v5465_v9, %v5463_v25 }
 0x1fc   : > { %v3980_v48 = vpop.f32.mrf.mxu1 }
 0x1fd   : > { %v3107_v56 = vadd.f32 %v3979_v49, %v3915_v43 }
 0x1fe   : > { %v3981_v1 = vpop.f32.mrf.mxu1 }
 0x1ff   : > { %v3982_v53 = vadd.f32 %v3981_v1, %v3980_v48 }
 0x200   : > { %v5471_v22 = vpop.f32.mrf.mxu0 }
 0x201   : > { %v3110_v33 = vadd.f32 %v3982_v53, %v3918_v54 }
 0x202   : > { %v5473_v14 = vpop.f32.mrf.mxu0 }
 0x203   : > { %v3983_v28 = vpop.f32.mrf.mxu1 }
 0x204   : > { %v5475_v10 = vpop.f32.mrf.mxu0 }
 0x205   : > { %v3984_v27 = vpop.f32.mrf.mxu1 }
 0x206   : > { %v5477_v17 = vpop.f32.mrf.mxu0  ;;  %v3985_v49 = vadd.f32 %v3984_v27, %v3983_v28 }
 0x207   : > { %v3986_v8 = vpop.f32.mrf.mxu1 }
 0x209   : > { %v3987_v6 = vpop.f32.mrf.mxu1 }
 0x20b   : > { %v5479_v52 = vpop.f32.mrf.mxu0 }
 0x20d   : > { %v5481_v23 = vpop.f32.mrf.mxu0 }
 0x20f   : > { %v5483_v39 = vpop.f32.mrf.mxu0 }
 0x211   : > { %v5485_v32 = vpop.f32.mrf.mxu0 }
 0x213   : > { %v3989_v12 = vpop.f32.mrf.mxu1 }
 0x215   : > { %v3990_v20 = vpop.f32.mrf.mxu1 }
 0x216   : > { %v3991_v62 = vadd.f32 %v3990_v20, %v3989_v12  ;;  %v3921_v20 = vadd.f32 %v5461_v40, %v5459_v61 }
 0x217   : > { %v3992_v29 = vpop.f32.mrf.mxu1 }
 0x218   : > { %v3123_v43 = vadd.f32 %v3991_v62, %v3927_v47  ;;  %v3115_v40 = vadd.f32 %v3985_v49, %v3921_v20 }
 0x219   : > { %v3993_v41 = vpop.f32.mrf.mxu1 }
 0x21a   : > { %v3994_v58 = vadd.f32 %v3993_v41, %v3992_v29 }
 0x21b   : > { %v5487_v60 = vpop.f32.mrf.mxu0 }
 0x21c   : > { %v3126_v54 = vadd.f32 %v3994_v58, %v3930_v45 }
 0x21d   : > { %v5489_v19 = vpop.f32.mrf.mxu0 }
 0x21f   : > { %v5491_v59 = vpop.f32.mrf.mxu0 }
 0x221   : > { %v5495_v4 = vpop.f32.mrf.mxu0 }
 0x223   : > { %v5493_v50 = vpop.f32.mrf.mxu1 }
 0x225   : > { %v5497_v38 = vpop.f32.mrf.mxu1 }
 0x227   : > { %v5501_v55 = vpop.f32.mrf.mxu1 }
 0x229   : > { %v5507_v44 = vpop.f32.mrf.mxu1 }
 0x22b   : > { %v5499_v13 = vpop.f32.mrf.mxu0 }
 0x22d   : > { %v5503_v3 = vpop.f32.mrf.mxu0 }
 0x22f   : > { %v5505_v11 = vpop.f32.mrf.mxu0 }
 0x231   : > { %v5509_v5 = vpop.f32.mrf.mxu0 }
 0x233   : > { %v5511_v24 = vpop.f32.mrf.mxu1  ;;  %v4041_v26 = vpop.f32.mrf.mxu0 }
 0x234   : > { %v3204_v46 = vadd.f32 %v4041_v26, %v3107_v56  ;;  %v3988_v56 = vadd.f32 %v3987_v6, %v3986_v8 }
 0x235   : > { %v5513_v18 = vpop.f32.mrf.mxu1  ;;  %v3195_v57 = vpop.f32.mrf.mxu0 }
 0x236   : > { %v3830_v7 = vpack.c.bf16 %v3204_v46, %v3204_v46  ;;  %v3196_v48 = vadd.f32 %v3195_v57, %v3099_v0  ;;  %v3298_v2 = vmul.f32 %v3204_v46, %v3204_v46  ;;  %v3261_v26 = vsel %vm2942_vm15, %v3204_v46, 0.0 }
 0x237   : > { %v5517_v1 = vpop.f32.mrf.mxu1  ;;  %v4042_v30 = vpop.f32.mrf.mxu0 }
 0x238   : > { %3416 = vst.msk [vmem:[%s4365_s25 + $0x8] sm:$0xf] %vm498_vm0, %v3830_v7  ;;  %v3207_v31 = vadd.f32 %v4042_v30, %v3110_v33  ;;  %v3828_v42 = vpack.c.bf16 %v3196_v48, %v3196_v48  ;;  %v3296_v34 = vmul.f32 %v3196_v48, %v3196_v48  ;;  %v3258_v25 = vsel %vm2942_vm15, %v3196_v48, 0.0 }
 0x239   : > { %v5521_v21 = vpop.f32.mrf.mxu1  ;;  %v3198_v12 = vpop.f32.mrf.mxu0  ;;  %v3315_v30 = vsel %vm2942_vm15, %v3298_v2, 0.0 }
 0x23a   : > { %v3831_v36 = vpack.c.bf16 %v3207_v31, %v3207_v31  ;;  %3414 = vst.msk [vmem:[%s4365_s25] sm:$0xf] %vm498_vm0, %v3828_v42  ;;  %v3199_v28 = vadd.f32 %v3198_v12, %v3102_v15  ;;  %v3312_v37 = vsel %vm2942_vm15, %v3296_v34, 0.0  ;;  %v3299_v0 = vmul.f32 %v3207_v31, %v3207_v31 }
 0x23b   : > { %v5531_v27 = vpop.f32.mrf.mxu1  ;;  %v4045_v53 = vpop.f32.mrf.mxu0  ;;  %v3263_v47 = vsel %vm2942_vm15, %v3207_v31, 0.0  ;;  %v3118_v15 = vadd.f32 %v3988_v56, %v3924_v63 }
 0x23c   : > { %3417 = vst.msk [vmem:[%s4365_s25 + $0xc] sm:$0xf] %vm498_vm0, %v3831_v36  ;;  %v5535_v61 = vadd.f32 %v4045_v53, %v3123_v43  ;;  %v3259_v9 = vsel %vm2942_vm15, %v3199_v28, 0.0  ;;  %v3297_v16 = vmul.f32 %v3199_v28, %v3199_v28  ;;  %v3829_v35 = vpack.c.bf16 %v3199_v28, %v3199_v28 }
 0x23d   : > { %v5539_v29 = vpop.f32.mrf.mxu1  ;;  %v3211_v41 = vpop.f32.mrf.mxu0  ;;  %v3260_v8 = vadd.f32 %v3259_v9, %v3258_v25  ;;  %v3317_v43 = vsel %vm2942_vm15, %v3299_v0, 0.0  ;;  %v4003_v25 = vadd.f32 %v5513_v18, %v5511_v24  ;;  %v3933_v0 = vadd.f32 %v5473_v14, %v5471_v22 }
 0x23e   : > { %v3834_v6 = vpack.c.bf16 %v5535_v61, %v5535_v61  ;;  %v3313_v57 = vsel %vm2942_vm15, %v3297_v16, 0.0  ;;  %3415 = vst.msk [vmem:[%s4365_s25 + $0x4] sm:$0xf] %vm498_vm0, %v3829_v35  ;;  %v3212_v62 = vadd.f32 %v3211_v41, %v3115_v40  ;;  %v3302_v24 = vmul.f32 %v5535_v61, %v5535_v61 }
 0x23f   : > { %v5548_v7 = vpop.f32.mrf.mxu1  ;;  %v4046_v33 = vpop.f32.mrf.mxu0  ;;  %v3262_v51 = vadd.f32 %v3261_v26, %v3260_v8  ;;  %v3314_v48 = vadd.f32 %v3313_v57, %v3312_v37  ;;  %v3939_v26 = vadd.f32 %v5481_v23, %v5479_v52  ;;  %v3997_v8 = vadd.f32 %v5497_v38, %v5493_v50 }
 0x240   : > { %3420 = vst.msk [vmem:[%s4365_s25 + $0x18] sm:$0xf] %vm498_vm0, %v3834_v6  ;;  %v3223_v46 = vadd.f32 %v4046_v33, %v3126_v54  ;;  %v3832_v49 = vpack.c.bf16 %v3212_v62, %v3212_v62  ;;  %v3300_v36 = vmul.f32 %v3212_v62, %v3212_v62  ;;  %v3265_v53 = vsel %vm2942_vm15, %v3212_v62, 0.0 }
 0x241   : > { %v5554_v42 = vpop.f32.mrf.mxu1  ;;  %v3214_v12 = vpop.f32.mrf.mxu0  ;;  %v3316_v20 = vadd.f32 %v3315_v30, %v3314_v48  ;;  %v3264_v58 = vadd.f32 %v3263_v47, %v3262_v51  ;;  %v4000_v54 = vadd.f32 %v5507_v44, %v5501_v55  ;;  %v3139_v57 = vadd.f32 %v4003_v25, %v3939_v26 }
 0x242   : > { %3418 = vst.msk [vmem:[%s4365_s25 + $0x10] sm:$0xf] %vm498_vm0, %v3832_v49  ;;  %v3835_v45 = vpack.c.bf16 %v3223_v46, %v3223_v46  ;;  %v3215_v34 = vadd.f32 %v3214_v12, %v3118_v15  ;;  %v3319_v9 = vsel %vm2942_vm15, %v3300_v36, 0.0  ;;  %v3936_v52 = vadd.f32 %v5477_v17, %v5475_v10 }
 0x243   : > { %v4013_v28 = vpop.f32.mrf.mxu1  ;;  %v3318_v31 = vadd.f32 %v3317_v43, %v3316_v20  ;;  %v3266_v2 = vadd.f32 %v3265_v53, %v3264_v58  ;;  %v3942_v23 = vadd.f32 %v5485_v32, %v5483_v39  ;;  %v4006_v50 = vadd.f32 %v5521_v21, %v5517_v1 }
 0x244   : > { %3421 = vst.msk [vmem:[%s4365_s25 + $0x1c] sm:$0xf] %vm498_vm0, %v3835_v45  ;;  %v3301_v40 = vmul.f32 %v3215_v34, %v3215_v34  ;;  %v3833_v63 = vpack.c.bf16 %v3215_v34, %v3215_v34  ;;  %v3267_v16 = vsel %vm2942_vm15, %v3215_v34, 0.0  ;;  %v3945_v44 = vadd.f32 %v5489_v19, %v5487_v60 }
 0x245   : > { %v4014_v56 = vpop.f32.mrf.mxu1  ;;  %v3320_v35 = vadd.f32 %v3319_v9, %v3318_v31  ;;  %v3268_v18 = vadd.f32 %v3267_v16, %v3266_v2  ;;  %v3269_v62 = vsel %vm2942_vm15, %v5535_v61, 0.0  ;;  %v3131_v22 = vadd.f32 %v3997_v8, %v3933_v0 }
 0x246   : > { %3419 = vst.msk [vmem:[%s4365_s25 + $0x14] sm:$0xf] %vm498_vm0, %v3833_v63  ;;  %v3321_v6 = vsel %vm2942_vm15, %v3301_v40, 0.0  ;;  %v3323_v14 = vsel %vm2942_vm15, %v3302_v24, 0.0  ;;  %v4009_v10 = vadd.f32 %v5539_v29, %v5531_v27  ;;  %v3134_v32 = vadd.f32 %v4000_v54, %v3936_v52 }
 0x247   : > { %v4016_v41 = vpop.f32.mrf.mxu1  ;;  %v3322_v38 = vadd.f32 %v3321_v6, %v3320_v35  ;;  %v3270_v17 = vadd.f32 %v3269_v62, %v3268_v18  ;;  %v3303_v1 = vmul.f32 %v3223_v46, %v3223_v46  ;;  %v4015_v21 = vadd.f32 %v4014_v56, %v4013_v28 }
 0x248   : > { %v3951_v60 = vadd.f32 %v5503_v3, %v5499_v13  ;;  %v3954_v19 = vadd.f32 %v5509_v5, %v5505_v11  ;;  %v3142_v30 = vadd.f32 %v4006_v50, %v3942_v23  ;;  %v3271_v49 = vsel %vm2942_vm15, %v3223_v46, 0.0 }
 0x249   : > { %v4017_v37 = vpop.f32.mrf.mxu1  ;;  %v3324_v61 = vadd.f32 %v3323_v14, %v3322_v38  ;;  %v3272_v20 = vadd.f32 %v3271_v49, %v3270_v17  ;;  %v3147_v13 = vadd.f32 %v4009_v10, %v3945_v44  ;;  %v3325_v3 = vsel %vm2942_vm15, %v3303_v1, 0.0 }
 0x24a   : > { %v4018_v12 = vadd.f32 %v4017_v37, %v4016_v41  ;;  %v3155_v46 = vadd.f32 %v4015_v21, %v3951_v60  ;;  %v4012_v56 = vadd.f32 %v5554_v42, %v5548_v7  ;;  %v3948_v54 = vadd.f32 %v5495_v4, %v5491_v59 }
 0x24b   : > { %v4049_v55 = vpop.f32.mrf.mxu1  ;;  %v3326_v34 = vadd.f32 %v3325_v3, %v3324_v61 }
 0x24c   : > { %v3236_v33 = vadd.f32 %v4049_v55, %v3139_v57  ;;  %v3158_v35 = vadd.f32 %v4018_v12, %v3954_v19  ;;  %v3150_v38 = vadd.f32 %v4012_v56, %v3948_v54 }
 0x24d   : > { %v3227_v39 = vpop.f32.mrf.mxu1 }
 0x24e   : > { %v3838_v51 = vpack.c.bf16 %v3236_v33, %v3236_v33  ;;  %v3228_v48 = vadd.f32 %v3227_v39, %v3131_v22  ;;  %v3306_v43 = vmul.f32 %v3236_v33, %v3236_v33  ;;  %v3277_v41 = vsel %vm2942_vm15, %v3236_v33, 0.0 }
 0x24f   : > { %v4050_v47 = vpop.f32.mrf.mxu1 }
 0x250   : > { %3424 = vst.msk [vmem:[%s4365_s25 + $0x28] sm:$0xf] %vm498_vm0, %v3838_v51  ;;  %v3273_v27 = vsel %vm2942_vm15, %v3228_v48, 0.0  ;;  %v3304_v29 = vmul.f32 %v3228_v48, %v3228_v48  ;;  %v3836_v15 = vpack.c.bf16 %v3228_v48, %v3228_v48  ;;  %v3239_v58 = vadd.f32 %v4050_v47, %v3142_v30 }
 0x251   : > { %v3230_v36 = vpop.f32.mrf.mxu1  ;;  %v3274_v45 = vadd.f32 %v3273_v27, %v3272_v20  ;;  %v3331_v37 = vsel %vm2942_vm15, %v3306_v43, 0.0 }
 0x252   : > { %v3327_v11 = vsel %vm2942_vm15, %v3304_v29, 0.0  ;;  %3422 = vst.msk [vmem:[%s4365_s25 + $0x20] sm:$0xf] %vm498_vm0, %v3836_v15  ;;  %v3231_v5 = vadd.f32 %v3230_v36, %v3134_v32  ;;  %v3839_v28 = vpack.c.bf16 %v3239_v58, %v3239_v58  ;;  %v3307_v26 = vmul.f32 %v3239_v58, %v3239_v58 }
 0x253   : > { %v4053_v53 = vpop.f32.mrf.mxu1  ;;  %v3328_v25 = vadd.f32 %v3327_v11, %v3326_v34  ;;  %v3279_v0 = vsel %vm2942_vm15, %v3239_v58, 0.0 }
 0x254   : > { %v3275_v31 = vsel %vm2942_vm15, %v3231_v5, 0.0  ;;  %v3305_v2 = vmul.f32 %v3231_v5, %v3231_v5  ;;  %v3837_v40 = vpack.c.bf16 %v3231_v5, %v3231_v5  ;;  %v3252_v63 = vadd.f32 %v4053_v53, %v3155_v46  ;;  %3425 = vst.msk [vmem:[%s4365_s25 + $0x2c] sm:$0xf] %vm498_vm0, %v3839_v28 }
 0x255   : > { %v3276_v9 = vadd.f32 %v3275_v31, %v3274_v45  ;;  %v3243_v16 = vpop.f32.mrf.mxu1  ;;  %v3333_v59 = vsel %vm2942_vm15, %v3307_v26, 0.0 }
 0x256   : > { %v3329_v8 = vsel %vm2942_vm15, %v3305_v2, 0.0  ;;  %3423 = vst.msk [vmem:[%s4365_s25 + $0x24] sm:$0xf] %vm498_vm0, %v3837_v40  ;;  %v3842_v6 = vpack.c.bf16 %v3252_v63, %v3252_v63  ;;  %v3244_v42 = vadd.f32 %v3243_v16, %v3147_v13  ;;  %v3310_v10 = vmul.f32 %v3252_v63, %v3252_v63 }
 0x257   : > { %v3278_v24 = vadd.f32 %v3277_v41, %v3276_v9  ;;  %v3330_v7 = vadd.f32 %v3329_v8, %v3328_v25  ;;  %v4054_v18 = vpop.f32.mrf.mxu1  ;;  %v3285_v48 = vsel %vm2942_vm15, %v3252_v63, 0.0 }
 0x258   : > { %3428 = vst.msk [vmem:[%s4365_s25 + $0x38] sm:$0xf] %vm498_vm0, %v3842_v6  ;;  %v3255_v57 = vadd.f32 %v4054_v18, %v3158_v35  ;;  %v3308_v50 = vmul.f32 %v3244_v42, %v3244_v42  ;;  %v3281_v4 = vsel %vm2942_vm15, %v3244_v42, 0.0  ;;  %v3840_v44 = vpack.c.bf16 %v3244_v42, %v3244_v42 }
 0x259   : > { %v3332_v52 = vadd.f32 %v3331_v37, %v3330_v7  ;;  %v3280_v23 = vadd.f32 %v3279_v0, %v3278_v24  ;;  %v3246_v55 = vpop.f32.mrf.mxu1  ;;  %v3339_v47 = vsel %vm2942_vm15, %v3310_v10, 0.0 }
 0x25a   : > { %v3843_v62 = vpack.c.bf16 %v3255_v57, %v3255_v57  ;;  %v3247_v14 = vadd.f32 %v3246_v55, %v3150_v38  ;;  %v3335_v17 = vsel %vm2942_vm15, %v3308_v50, 0.0  ;;  %3426 = vst.msk [vmem:[%s4365_s25 + $0x30] sm:$0xf] %vm498_vm0, %v3840_v44  ;;  %v3311_v60 = vmul.f32 %v3255_v57, %v3255_v57 }
 0x25b   : > { %v3282_v33 = vadd.f32 %v3281_v4, %v3280_v23  ;;  %v3334_v22 = vadd.f32 %v3333_v59, %v3332_v52  ;;  %v3287_v49 = vsel %vm2942_vm15, %v3255_v57, 0.0 }
 0x25c   : > { %3429 = vst.msk [vmem:[%s4365_s25 + $0x3c] sm:$0xf] %vm498_vm0, %v3843_v62  ;;  %v3283_v32 = vsel %vm2942_vm15, %v3247_v14, 0.0  ;;  %v3309_v1 = vmul.f32 %v3247_v14, %v3247_v14  ;;  %v3841_v21 = vpack.c.bf16 %v3247_v14, %v3247_v14  ;;  %v3341_v15 = vsel %vm2942_vm15, %v3311_v60, 0.0 }
 0x25d   : > { %v3336_v39 = vadd.f32 %v3335_v17, %v3334_v22  ;;  %v3284_v51 = vadd.f32 %v3283_v32, %v3282_v33 }
 0x25e   : > { %v3337_v19 = vsel %vm2942_vm15, %v3309_v1, 0.0  ;;  %3427 = vst.msk [vmem:[%s4365_s25 + $0x34] sm:$0xf] %vm498_vm0, %v3841_v21 }
 0x25f   : > { %v3286_v61 = vadd.f32 %v3285_v48, %v3284_v51  ;;  %v3338_v30 = vadd.f32 %v3337_v19, %v3336_v39 }
 0x261   : > { %v3288_v27 = vadd.f32 %v3287_v49, %v3286_v61  ;;  %v3340_v29 = vadd.f32 %v3339_v47, %v3338_v30 }
 0x263   : > { %v3289_v12 = vrot.slane %v3288_v27, 4  ;;  %v3342_v20 = vadd.f32 %v3341_v15, %v3340_v29 }
 0x265   : > { %v3290_v58 = vadd.f32 %v3289_v12, %v3288_v27  ;;  %v3343_v36 = vrot.slane %v3342_v20, 4 }
 0x267   : > { %v3291_v13 = vrot.slane %v3290_v58, 2  ;;  %v3344_v3 = vadd.f32 %v3343_v36, %v3342_v20 }
 0x269   : > { %v3292_v11 = vadd.f32 %v3291_v13, %v3290_v58  ;;  %v3345_v5 = vrot.slane %v3344_v3, 2 }
 0x26b   : > { %v3293_v46 = vrot.slane %v3292_v11, 1  ;;  %v3346_v43 = vadd.f32 %v3345_v5, %v3344_v3 }
 0x26d   : > { %v3294_v45 = vadd.f32 %v3293_v46, %v3292_v11  ;;  %v3347_v34 = vrot.slane %v3346_v43, 1 }
 0x26f   : > { %3295 = vst.msk [vmem:[%s4435_s20] sm:$0x1] %vm501_vm1, %v3294_v45  ;;  %v3348_v28 = vadd.f32 %v3347_v34, %v3346_v43 }
 0x271   : > { %3349 = vst.msk [vmem:[%s4435_s20 + $0x1] sm:$0x1] %vm501_vm1, %v3348_v28 }
 0x272 PF: > { %s19_s9 = sadd.s32 1, %s4223_s9   ;;  %s5673_s27 = smov %s4215_s29 }
 0x273   : > { %p16_p13 = scmp.ge.s32.totalorder %s19_s9, 6   ;;  %s5674_s28 = smov %s4219_s30 }
 0x274   : > { %s5675_s29 = smov %s5678_s6  ;;  %s5676_s30 = smov %s5682_s10 }
 0x275   :  { %18 = sbr.rel (!%p16_p13) target bundleno = 3 (0x3), region = 107 }

// kernel: dncnn_forward.43
= control target key start
LH: loop header
LB: loop body
LE: loop exit
PB: predicated region body
PF: predicated region fallthrough
CT: control target
= control target key end

     0   :  { %s5602_s0 = inlined_call_operand.vmem [shape: bf16[2,16,16,64], index: 0, kind: input, shape index: {}, may-alias: {0,1,2}]   ;;  %s5603_s1 = inlined_call_operand.vmem [shape: bf16[2,16,16,64], index: 1, kind: input, shape index: {}, may-alias: {0,1,2}]   ;;  %s5604_s2 = inlined_call_operand.vmem [shape: bf16[2,16,16,64], index: 2, kind: input, shape index: {}, may-alias: {0,1,2}]   ;;  %s5605_s3 = inlined_call_operand.vmem [shape: bf16[576,128], index: 3, kind: input, shape index: {}]   ;;  %s5606_s4 = inlined_call_operand.vmem [shape: f32[1,64], index: 4, kind: input, shape index: {}]   ;;  %s5607_s5 = inlined_call_operand.vmem [shape: f32[1,64], index: 5, kind: input, shape index: {}]   ;;  %s5608_s6 = inlined_call_operand.vmem [shape: f32[1,128], index: 6, kind: input, shape index: {}]   ;;  %s5609_s7 = inlined_call_operand.vmem [shape: f32[2,16,16,128], index: 7, kind: output, shape index: {0}]   ;;  %s5610_s8 = inlined_call_operand.hbm [shape: f32[2,2,2,128], index: 8, kind: output, shape index: {1}]  }
   0x1   :  { %5615 = sst [smem:[#allocation10_spill]] %s5602_s0 }
   0x2   :  { %5616 = sst [smem:[#allocation11_spill]] %s5606_s4 }
   0x3   :  { %14 = vsyncpa [#allocation5], 0 }
   0x4   :  { %16 = vsyncpa [#allocation5 + $0x1], 0  ;;  %s4231_s27 = smov 0   ;;  %s4233_s28 = smov 0  }
   0x5   :  { %s4235_s29 = smov 0   ;;  %s4237_s30 = smov 0  }
   0x6   :  { %s4239_s9 = smov 0   ;;  %s4241_s10 = smov 0  }
   0x7   :  { %s4243_s6 = smov 0   ;;  %s4245_s11 = smov 0  }
   0x8 LB: > { %5617 = sst [smem:[#allocation7_spill]] %s4177_s6  ;;  %s3521_s12 = sadd.s32 4294967295, %s4181_s11   ;;  %s4181_s11 = sphi %s4245_s11, %s22_s11   ;;  %s4177_s6 = sphi %s4243_s6, %s5638_s6   ;;  %s4173_s10 = sphi %s4241_s10, %s5643_s10   ;;  %s4169_s9 = sphi %s4239_s9, %s5636_s9   ;;  %s4165_s30 = sphi %s4237_s30, %s5642_s30   ;;  %s4161_s29 = sphi %s4235_s29, %s5641_s29   ;;  %s4157_s28 = sphi %s4233_s28, %s5640_s28   ;;  %s4153_s27 = sphi %s4231_s27, %s5639_s27  }
   0x9   : > { %s3522_s13 = sadd.s32 4294967294, %s4181_s11   ;;  %s31_s14 = sadd.s32 1, %s4173_s10 }
   0xa   : > { %p32_p0 = scmp.ge.s32.totalorder %s31_s14, 2  ;;  %s34_s15 = sadd.s32 1, %s4177_s6 }
   0xb   : > { %p265_p1 = scmp.ne.s32.totalorder %s4161_s29, %s4157_s28  ;;  %p266_p2 = scmp.eq.s32.totalorder %s3521_s12, 3 }
   0xc   : > { %s5645_s14 = smov (%p32_p0, %s31_s14), 0  ;;  %s5647_s15 = smov (!%p32_p0, %s34_s15), %s4177_s6 }
   0xd   : > { %5618 = sst [smem:[#allocation8_spill]] %s5645_s14  ;;  %s251_s16 = ssub.s32 %s4173_s10, %s5645_s14 }
   0xe   : > { %p4282_p3 = por %p266_p2, %p265_p1  ;;  %p36_p4 = scmp.ge.s32.totalorder %s5647_s15, 2 }
   0xf   : > { %p271_p5 = scmp.ne.s32.totalorder %s4157_s28, %s4153_s27  ;;  %p272_p6 = scmp.eq.s32.totalorder %s3522_s13, 3 }
  0x10   : > { %p3531_p7 = scmp.ge.s32.totalorder %s4181_s11, 1  ;;  %s5649_s15 = smov (%p36_p4, %s5647_s15), 0 }
  0x11   : > { %5620 = sst [smem:[#allocation9_spill]] %s5649_s15  ;;  %p4291_p8 = por %p272_p6, %p271_p5 }
  0x12   : > { %p356_p9 = scmp.lt.s32.totalorder %s4181_s11, 5  ;;  %s250_s19 = ssub.s32 %s4177_s6, %s5649_s15 }
  0x13   : > { %s255_s20 = sadd.s32 1, %s4161_s29  ;;  %s252_s21 = sor.u32 %s251_s16, %s250_s19 }
  0x14   : > { %p357_p10 = pnand %p3531_p7, %p356_p9  ;;  %p253_p11 = scmp.eq.s32.totalorder %s252_s21, 0 }
  0x15   : > { %s5614_s23 = sand.u32 (!%p357_p10), 1, %s4157_s28   ;;  %s4304_s24 = sshll.u32 (!%p357_p10), %s4165_s30, 3 }
  0x16   : > { %s4300_s22 = scalar_select %p253_p11, %s4161_s29, %s255_s20  }
  0x17   : > { %360 = sbr.rel (%p357_p10) target bundleno = 650 (0x28a), region = 48  ;;  %s4338_s25 = sshll.u32 (!%p357_p10), %s5614_s23, 1 }
  0x18   : > { %p432_p12 = scmp.lt.s32.totalorder (!%p357_p10), %s4169_s9, 1  ;;  %p434_p13 = scmp.lt.s32.totalorder (!%p357_p10), %s4304_s24, 15 }
  0x19   : > { %s3538_s16 = sadd.s32 (!%p357_p10), 4294967295, %s4304_s24  ;;  %s460_s15 = sadd.s32 (!%p357_p10), 8, %s4304_s24 }
  0x1a   : > { %p444_p0 = scmp.gt.s32.totalorder (!%p357_p10), %s3538_s16, 0  ;;  %p3539_p1 = scmp.lt.s32.totalorder (!%p357_p10), %s3538_s16, 15 }
  0x1b   : > { %s5622_s0 = sld [smem:[#allocation10_spill]] (!%p357_p10)  ;;  %p4357_p2 = scmp.lt.s32.totalorder (!%p357_p10), %s460_s15, 15 }
  0x1c   : > { %vm490_vm0 = vcmask 519168   ;;  %vm493_vm1 = vcmask 516096   ;;  %v4183_v0 = vmov 0   ;;  %s433_s26 = scalar_select %p432_p12, %s4169_s9, 1  ;;  %vm827_vm2 = vsmask.f32 7938 }
  0x1d   : > { %495 = vst.msk [vmem:[#allocation2 + $0xc] sm:$0xf] %vm490_vm0, %v4183_v0  ;;  %491 = vst.msk [vmem:[#allocation2] sm:$0xf] %vm490_vm0, %v4183_v0  ;;  %s435_s12 = scalar_select %p434_p13, %s4304_s24, 15 }
  0x1e   : > { %492 = vst.msk [vmem:[#allocation2 + $0x4] sm:$0xf] %vm490_vm0, %v4183_v0  ;;  %496 = vst.msk [vmem:[#allocation2 + $0x10] sm:$0xf] %vm490_vm0, %v4183_v0  ;;  %s4344_s13 = sshll.u32 %s433_s26, 5  ;;  %s5624_s4 = sld [smem:[#allocation11_spill]] }
  0x1f   : > { %498 = vst.msk [vmem:[#allocation2 + $0x18] sm:$0xf] %vm490_vm0, %v4183_v0  ;;  %499 = vst.msk [vmem:[#allocation2 + $0x1c] sm:$0xf] %vm490_vm0, %v4183_v0  ;;  %s3534_s19 = sshll.u32 %s435_s12, 1  ;;  %s5651_s15 = smov (!%p4357_p2, %s460_s15), 15 }
  0x20   : > { %501 = vst.msk [vmem:[#allocation2 + $0x24] sm:$0xf] %vm490_vm0, %v4183_v0  ;;  %502 = vst.msk [vmem:[#allocation2 + $0x28] sm:$0xf] %vm490_vm0, %v4183_v0  ;;  %s4348_s20 = sadd.s32 %s4344_s13, %s3534_s19  ;;  %v4376_v10 = vld [vmem:[%s5607_s5] ss:$0 sm:$0xff] }
  0x21   : > { %504 = vst.msk [vmem:[#allocation2 + $0x30] sm:$0xf] %vm490_vm0, %v4183_v0  ;;  %505 = vst.msk [vmem:[#allocation2 + $0x34] sm:$0xf] %vm490_vm0, %v4183_v0  ;;  %s3536_s21 = sshll.u32 %s4348_s20, 2  ;;  %s5655_s15 = smov (!%p4357_p2, %s5651_s15), 15 }
  0x22   : > { %507 = vst.msk [vmem:[#allocation2 + $0x3c] sm:$0xf] %vm490_vm0, %v4183_v0  ;;  %508 = vst.msk [vmem:[#allocation2 + $0x40] sm:$0xf] %vm490_vm0, %v4183_v0  ;;  %s4355_s23 = scalar_lea.vmem %s5622_s0, %s3536_s21  ;;  %vm662_vm3 = vsmask.f32 256 }
  0x23   : > { %510 = vst.msk [vmem:[#allocation2 + $0x48] sm:$0xf] %vm490_vm0, %v4183_v0  ;;  %511 = vst.msk [vmem:[#allocation2 + $0x4c] sm:$0xf] %vm490_vm0, %v4183_v0  ;;  %s445_s24 = scalar_select %p444_p0, %s3538_s16, 0  ;;  %v3718_v2 = vld [vmem:[%s4355_s23] sm:$0xff]  }
  0x24   : > { %513 = vst.msk [vmem:[#allocation2 + $0x54] sm:$0xf] %vm490_vm0, %v4183_v0  ;;  %514 = vst.msk [vmem:[#allocation2 + $0x58] sm:$0xf] %vm490_vm0, %v4183_v0  ;;  %v4364_v1 = vld [vmem:[%s5624_s4] ss:$0 sm:$0xff]  ;;  %v3719_v5 = vunpack.c.l.bf16 %v3718_v2  ;;  %v3720_v6 = vunpack.c.h.bf16 %v3718_v2 }
  0x25   : > { %516 = vst.msk [vmem:[#allocation2 + $0x60] sm:$0xf] %vm490_vm0, %v4183_v0  ;;  %517 = vst.msk [vmem:[#allocation2 + $0x64] sm:$0xf] %vm490_vm0, %v4183_v0  ;;  %v3757_v3 = vld [vmem:[%s4355_s23 + $0x8] sm:$0xff]   ;;  %v3758_v4 = vld [vmem:[%s4355_s23 + $0x10] sm:$0xff]  }
  0x26   : > { %519 = vst.msk [vmem:[#allocation2 + $0x6c] sm:$0xf] %vm490_vm0, %v4183_v0  ;;  %520 = vst.msk [vmem:[#allocation2 + $0x70] sm:$0xf] %vm490_vm0, %v4183_v0  ;;  %v3723_v7 = vunpack.c.l.bf16 %v3757_v3  ;;  %v3724_v8 = vunpack.c.h.bf16 %v3757_v3  ;;  %v3759_v9 = vld [vmem:[%s4355_s23 + $0x18] sm:$0xff]   ;;  %s5653_s24 = smov (!%p3539_p1, %s445_s24), 15  ;;  %v3727_v11 = vunpack.c.l.bf16 %v3758_v4  ;;  %v3728_v12 = vunpack.c.h.bf16 %v3758_v4 }
  0x27   : > { %497 = vst.msk [vmem:[#allocation2 + $0x14] sm:$0x1] %vm493_vm1, %v4183_v0  ;;  %494 = vst.msk [vmem:[#allocation2 + $0x8] sm:$0x1] %vm493_vm1, %v4183_v0  ;;  %vm663_vm4 = vsmask.f32 4368  ;;  %v3731_v13 = vunpack.c.l.bf16 %v3759_v9  ;;  %v3732_v14 = vunpack.c.h.bf16 %v3759_v9  ;;  %v560_v15 = vmul.f32 %v3719_v5, %v4364_v1 }
  0x28   : > { %500 = vst.msk [vmem:[#allocation2 + $0x20] sm:$0x1] %vm493_vm1, %v4183_v0  ;;  %503 = vst.msk [vmem:[#allocation2 + $0x2c] sm:$0x1] %vm493_vm1, %v4183_v0  ;;  %v561_v16 = vmul.f32 %v3720_v6, %v4364_v1  ;;  %v562_v17 = vmul.f32 %v3723_v7, %v4364_v1  ;;  %v563_v18 = vmul.f32 %v3724_v8, %v4364_v1  ;;  %s3544_s16 = sshll.u32 %s5653_s24, 1  ;;  %s3557_s21 = sshll.u32 %s4348_s20, 3 }
  0x29   : > { %506 = vst.msk [vmem:[#allocation2 + $0x38] sm:$0x1] %vm493_vm1, %v4183_v0  ;;  %509 = vst.msk [vmem:[#allocation2 + $0x44] sm:$0x1] %vm493_vm1, %v4183_v0  ;;  %v564_v19 = vmul.f32 %v3727_v11, %v4364_v1  ;;  %v565_v20 = vmul.f32 %v3728_v12, %v4364_v1  ;;  %v566_v21 = vmul.f32 %v3731_v13, %v4364_v1  ;;  %s452_s26 = sadd.s32 %s3544_s16, %s4344_s13  ;;  %s3551_s12 = sshll.u32 %s5655_s15, 1 }
  0x2a   : > { %512 = vst.msk [vmem:[#allocation2 + $0x50] sm:$0x1] %vm493_vm1, %v4183_v0  ;;  %515 = vst.msk [vmem:[#allocation2 + $0x5c] sm:$0x1] %vm493_vm1, %v4183_v0  ;;  %v567_v22 = vmul.f32 %v3732_v14, %v4364_v1  ;;  %v582_v23 = vadd.f32 %v4376_v10, %v560_v15  ;;  %v583_v24 = vadd.f32 %v4376_v10, %v561_v16  ;;  %s3546_s19 = sshll.u32 %s452_s26, 2  ;;  %s469_s20 = sadd.s32 %s3551_s12, %s4344_s13 }
  0x2b   : > { %518 = vst.msk [vmem:[#allocation2 + $0x68] sm:$0x1] %vm493_vm1, %v4183_v0  ;;  %521 = vst.msk [vmem:[#allocation2 + $0x74] sm:$0x1] %vm493_vm1, %v4183_v0  ;;  %v584_v25 = vadd.f32 %v4376_v10, %v562_v17  ;;  %v585_v26 = vadd.f32 %v4376_v10, %v563_v18  ;;  %v586_v27 = vadd.f32 %v4376_v10, %v564_v19  ;;  %s4402_s6 = scalar_lea.vmem %s5603_s1, %s3546_s19  ;;  %s4404_s14 = sshll.u32 %s469_s20, 2 }
  0x2c   : > { %v587_v28 = vadd.f32 %v4376_v10, %v565_v20  ;;  %v588_v29 = vadd.f32 %v4376_v10, %v566_v21  ;;  %v589_v30 = vadd.f32 %v4376_v10, %v567_v22  ;;  %v598_v31 = vmax.f32 %v582_v23, 0.0  ;;  %s471_s26 = scalar_lea.vmem %s5604_s2, %s4404_s14  ;;  %s4413_s4 = scalar_lea.vmem %s5609_s7, %s3557_s21  ;;  %vm4421_vm5 = vmand %vm490_vm0, %vm827_vm2  ;;  %v829_v57 = vld [vmem:[#allocation2 + $0xc] sm:$0xf]  ;;  %v838_v9 = vld [vmem:[#allocation2 + $0x18] sm:$0xf] }
  0x2d   : > { %v599_v32 = vmax.f32 %v583_v24, 0.0  ;;  %v600_v33 = vmax.f32 %v584_v25, 0.0  ;;  %v601_v34 = vmax.f32 %v585_v26, 0.0  ;;  %v602_v35 = vmax.f32 %v586_v27, 0.0  ;;  %vm4427_vm6 = vmor %vm662_vm3, %vm663_vm4  ;;  %v845_v23 = vld [vmem:[#allocation2 + $0x24] sm:$0xf] }
  0x2e   : > { %v603_v36 = vmax.f32 %v587_v28, 0.0  ;;  %v604_v37 = vmax.f32 %v588_v29, 0.0  ;;  %v605_v38 = vmax.f32 %v589_v30, 0.0  ;;  %v3697_v39 = vpack.c.bf16 %v598_v31, %v598_v31  ;;  %vm4433_vm7 = vmand %vm493_vm1, %vm662_vm3  ;;  %v835_v63 = vld [vmem:[#allocation2 + $0x14] sm:$0x1]  ;;  %v3760_v25 = vld [vmem:[%s4355_s23 + $0x20] sm:$0xff]  }
  0x2f   : > { %v3698_v40 = vpack.c.bf16 %v599_v32, %v599_v32  ;;  %v3699_v41 = vpack.c.bf16 %v600_v33, %v600_v33  ;;  %v3700_v42 = vpack.c.bf16 %v601_v34, %v601_v34  ;;  %v3701_v43 = vpack.c.bf16 %v602_v35, %v602_v35  ;;  %v842_v11 = vld [vmem:[#allocation2 + $0x20] sm:$0x1]  ;;  %v849_v28 = vld [vmem:[#allocation2 + $0x2c] sm:$0x1]  ;;  %s4518_s0 = scalar_lea.vmem [#allocation4], %s4338_s25  ;;  %p3576_p4 = scmp.le.s32.totalorder %s4165_s30, 0 }
  0x30   : > { %v3702_v44 = vpack.c.bf16 %v603_v36, %v603_v36  ;;  %v4415_v45 = vpack.c.bf16 %v604_v37, %v604_v37  ;;  %v4417_v46 = vpack.c.bf16 %v605_v38, %v605_v38  ;;  %v666_v47 = vshrl.u32 %v3697_v39, 16  ;;  %v3761_v31 = vld [vmem:[%s4355_s23 + $0x28] sm:$0xff]  }
  0x31   : > { %v669_v48 = vshll.u32 %v3697_v39, 16  ;;  %v674_v49 = vshrl.u32 %v3698_v40, 16  ;;  %v677_v50 = vshll.u32 %v3698_v40, 16  ;;  %v683_v52 = vshrl.u32 %v3699_v41, 16 }
  0x32   : > { %v686_v53 = vshll.u32 %v3699_v41, 16  ;;  %v691_v54 = vshrl.u32 %v3700_v42, 16  ;;  %v694_v55 = vshll.u32 %v3700_v42, 16  ;;  %v668_v56 = vrot.slane %v666_v47, 7  ;;  %v852_v42 = vld [vmem:[#allocation2 + $0x30] sm:$0xf] }
  0x33   : > { %v676_v59 = vrot.slane %v674_v49, 7  ;;  %v700_v60 = vshrl.u32 %v3701_v43, 16  ;;  %v703_v61 = vshll.u32 %v3701_v43, 16  ;;  %v685_v0 = vrot.slane %v683_v52, 7 }
  0x34   : > { %v693_v2 = vrot.slane %v691_v54, 7  ;;  %v708_v3 = vshrl.u32 %v3702_v44, 16  ;;  %v711_v4 = vshll.u32 %v3702_v44, 16  ;;  %v671_v5 = vor.u32 %v669_v48, %v668_v56  ;;  %v856_v48 = vld [vmem:[#allocation2 + $0x38] sm:$0x1] }
  0x35   : > { %v672_v6 = vrot.slane %v668_v56, 4  ;;  %v679_v7 = vor.u32 %v677_v50, %v676_v59  ;;  %v681_v8 = vrot.slane %v676_v59, 4  ;;  %v688_v12 = vor.u32 %v686_v53, %v685_v0 }
  0x36   : > { %v689_v13 = vrot.slane %v685_v0, 4  ;;  %v696_v14 = vor.u32 %v694_v55, %v693_v2  ;;  %v698_v15 = vrot.slane %v693_v2, 4  ;;  %v830_v16 = vsel %vm4421_vm5, %v671_v5, %v829_v57 }
  0x37   : > { %v680_v17 = vsel %vm4427_vm6, %v672_v6, %v679_v7  ;;  %v836_v18 = vsel %vm4433_vm7, %v681_v8, %v835_v63  ;;  %v702_v19 = vrot.slane %v700_v60, 7  ;;  %831 = vst [vmem:[#allocation2 + $0xc] sm:$0xf] %v830_v16  ;;  %v839_v20 = vsel %vm4421_vm5, %v688_v12, %v838_v9 }
  0x38   : > { %832 = vst.msk [vmem:[#allocation2 + $0x10] sm:$0xf] %vm490_vm0, %v680_v17  ;;  %837 = vst [vmem:[#allocation2 + $0x14] sm:$0x1] %v836_v18  ;;  %v697_v21 = vsel %vm4427_vm6, %v689_v13, %v696_v14  ;;  %v843_v22 = vsel %vm4433_vm7, %v698_v15, %v842_v11  ;;  %v710_v24 = vrot.slane %v708_v3, 7  ;;  %v717_v29 = vshrl.u32 %v4415_v45, 16 }
  0x39   : > { %840 = vst [vmem:[#allocation2 + $0x18] sm:$0xf] %v839_v20  ;;  %841 = vst.msk [vmem:[#allocation2 + $0x1c] sm:$0xf] %vm490_vm0, %v697_v21  ;;  %v705_v26 = vor.u32 %v703_v61, %v702_v19  ;;  %v706_v27 = vrot.slane %v702_v19, 4  ;;  %v720_v30 = vshll.u32 %v4415_v45, 16  ;;  %v3735_v38 = vunpack.c.l.bf16 %v3760_v25 }
  0x3a   : > { %844 = vst [vmem:[#allocation2 + $0x20] sm:$0x1] %v843_v22  ;;  %v713_v32 = vor.u32 %v711_v4, %v710_v24  ;;  %v715_v33 = vrot.slane %v710_v24, 4  ;;  %v725_v34 = vshrl.u32 %v4417_v46, 16  ;;  %v728_v35 = vshll.u32 %v4417_v46, 16  ;;  %v3762_v45 = vld [vmem:[%s4355_s23 + $0x30] sm:$0xff]  }
  0x3b   : > { %v846_v36 = vsel %vm4421_vm5, %v705_v26, %v845_v23  ;;  %v719_v37 = vrot.slane %v717_v29, 7  ;;  %v3736_v39 = vunpack.c.h.bf16 %v3760_v25  ;;  %v3739_v44 = vunpack.c.l.bf16 %v3761_v31  ;;  %v3763_v61 = vld [vmem:[%s4355_s23 + $0x38] sm:$0xff]  }
  0x3c   : > { %847 = vst [vmem:[#allocation2 + $0x24] sm:$0xf] %v846_v36  ;;  %v714_v40 = vsel %vm4427_vm6, %v706_v27, %v713_v32  ;;  %v850_v41 = vsel %vm4433_vm7, %v715_v33, %v849_v28  ;;  %v727_v43 = vrot.slane %v725_v34, 7  ;;  %v568_v49 = vmul.f32 %v3735_v38, %v4364_v1  ;;  %v863_v34 = vld [vmem:[#allocation2 + $0x44] sm:$0x1] }
  0x3d   : > { %848 = vst.msk [vmem:[#allocation2 + $0x28] sm:$0xf] %vm490_vm0, %v714_v40  ;;  %851 = vst [vmem:[#allocation2 + $0x2c] sm:$0x1] %v850_v41  ;;  %v722_v46 = vor.u32 %v720_v30, %v719_v37  ;;  %v723_v47 = vrot.slane %v719_v37, 4  ;;  %v569_v50 = vmul.f32 %v3736_v39, %v4364_v1  ;;  %v570_v54 = vmul.f32 %v3739_v44, %v4364_v1 }
  0x3e   : > { %v730_v52 = vor.u32 %v728_v35, %v727_v43  ;;  %v732_v53 = vrot.slane %v727_v43, 4  ;;  %v3740_v55 = vunpack.c.h.bf16 %v3761_v31  ;;  %v590_v57 = vadd.f32 %v4376_v10, %v568_v49  ;;  %v859_v30 = vld [vmem:[#allocation2 + $0x3c] sm:$0xf]  ;;  %v866_v43 = vld [vmem:[#allocation2 + $0x48] sm:$0xf] }
  0x3f   : > { %v853_v56 = vsel %vm4421_vm5, %v722_v46, %v852_v42  ;;  %v591_v59 = vadd.f32 %v4376_v10, %v569_v50  ;;  %v3743_v60 = vunpack.c.l.bf16 %v3762_v45  ;;  %v592_v2 = vadd.f32 %v4376_v10, %v570_v54 }
  0x40   : > { %854 = vst [vmem:[#allocation2 + $0x30] sm:$0xf] %v853_v56  ;;  %v731_v63 = vsel %vm4427_vm6, %v723_v47, %v730_v52  ;;  %v857_v0 = vsel %vm4433_vm7, %v732_v53, %v856_v48  ;;  %v571_v3 = vmul.f32 %v3740_v55, %v4364_v1  ;;  %v606_v4 = vmax.f32 %v590_v57, 0.0  ;;  %v870_v52 = vld [vmem:[#allocation2 + $0x50] sm:$0x1] }
  0x41   : > { %855 = vst.msk [vmem:[#allocation2 + $0x34] sm:$0xf] %vm490_vm0, %v731_v63  ;;  %858 = vst [vmem:[#allocation2 + $0x38] sm:$0x1] %v857_v0  ;;  %v607_v5 = vmax.f32 %v591_v59, 0.0  ;;  %v572_v6 = vmul.f32 %v3743_v60, %v4364_v1  ;;  %v3744_v7 = vunpack.c.h.bf16 %v3762_v45  ;;  %v608_v8 = vmax.f32 %v592_v2, 0.0 }
  0x42   : > { %v593_v9 = vadd.f32 %v4376_v10, %v571_v3  ;;  %v3747_v11 = vunpack.c.l.bf16 %v3763_v61  ;;  %v3748_v12 = vunpack.c.h.bf16 %v3763_v61  ;;  %v3705_v13 = vpack.c.bf16 %v606_v4, %v606_v4  ;;  %v873_v59 = vld [vmem:[#allocation2 + $0x54] sm:$0xf] }
  0x43   : > { %v3706_v14 = vpack.c.bf16 %v607_v5, %v607_v5  ;;  %v594_v15 = vadd.f32 %v4376_v10, %v572_v6  ;;  %v573_v16 = vmul.f32 %v3744_v7, %v4364_v1  ;;  %v3707_v17 = vpack.c.bf16 %v608_v8, %v608_v8 }
  0x44   : > { %v609_v18 = vmax.f32 %v593_v9, 0.0  ;;  %v574_v19 = vmul.f32 %v3747_v11, %v4364_v1  ;;  %v575_v20 = vmul.f32 %v3748_v12, %v4364_v1  ;;  %v734_v21 = vshrl.u32 %v3705_v13, 16 }
  0x45   : > { %v737_v22 = vshll.u32 %v3705_v13, 16  ;;  %v742_v23 = vshrl.u32 %v3706_v14, 16  ;;  %v745_v24 = vshll.u32 %v3706_v14, 16  ;;  %v751_v25 = vshrl.u32 %v3707_v17, 16 }
  0x46   : > { %v754_v26 = vshll.u32 %v3707_v17, 16  ;;  %v3708_v27 = vpack.c.bf16 %v609_v18, %v609_v18  ;;  %v610_v28 = vmax.f32 %v594_v15, 0.0  ;;  %v736_v29 = vrot.slane %v734_v21, 7  ;;  %v877_v17 = vld [vmem:[#allocation2 + $0x5c] sm:$0x1] }
  0x47   : > { %v744_v31 = vrot.slane %v742_v23, 7  ;;  %v595_v32 = vadd.f32 %v4376_v10, %v573_v16  ;;  %v596_v33 = vadd.f32 %v4376_v10, %v574_v19  ;;  %v753_v35 = vrot.slane %v751_v25, 7  ;;  %v880_v18 = vld [vmem:[#allocation2 + $0x60] sm:$0xf] }
  0x48   : > { %v759_v36 = vshrl.u32 %v3708_v27, 16  ;;  %v762_v37 = vshll.u32 %v3708_v27, 16  ;;  %v3709_v38 = vpack.c.bf16 %v610_v28, %v610_v28  ;;  %v739_v39 = vor.u32 %v737_v22, %v736_v29 }
  0x49   : > { %v740_v40 = vrot.slane %v736_v29, 4  ;;  %v747_v41 = vor.u32 %v745_v24, %v744_v31  ;;  %v749_v42 = vrot.slane %v744_v31, 4  ;;  %v756_v44 = vor.u32 %v754_v26, %v753_v35  ;;  %v884_v29 = vld [vmem:[#allocation2 + $0x68] sm:$0x1] }
  0x4a   : > { %v757_v45 = vrot.slane %v753_v35, 4  ;;  %v761_v46 = vrot.slane %v759_v36, 7  ;;  %v768_v47 = vshrl.u32 %v3709_v38, 16  ;;  %v860_v48 = vsel %vm4421_vm5, %v739_v39, %v859_v30 }
  0x4b   : > { %v748_v49 = vsel %vm4427_vm6, %v740_v40, %v747_v41  ;;  %v864_v50 = vsel %vm4433_vm7, %v749_v42, %v863_v34  ;;  %v771_v53 = vshll.u32 %v3709_v38, 16  ;;  %861 = vst [vmem:[#allocation2 + $0x3c] sm:$0xf] %v860_v48  ;;  %v867_v54 = vsel %vm4421_vm5, %v756_v44, %v866_v43 }
  0x4c   : > { %862 = vst.msk [vmem:[#allocation2 + $0x40] sm:$0xf] %vm490_vm0, %v748_v49  ;;  %865 = vst [vmem:[#allocation2 + $0x44] sm:$0x1] %v864_v50  ;;  %v764_v55 = vor.u32 %v762_v37, %v761_v46  ;;  %v766_v56 = vrot.slane %v761_v46, 4  ;;  %v770_v57 = vrot.slane %v768_v47, 7  ;;  %v597_v63 = vadd.f32 %v4376_v10, %v575_v20 }
  0x4d   : > { %868 = vst [vmem:[#allocation2 + $0x48] sm:$0xf] %v867_v54  ;;  %v611_v60 = vmax.f32 %v595_v32, 0.0  ;;  %v612_v61 = vmax.f32 %v596_v33, 0.0 }
  0x4e   : > { %v765_v0 = vsel %vm4427_vm6, %v757_v45, %v764_v55  ;;  %v871_v2 = vsel %vm4433_vm7, %v766_v56, %v870_v52  ;;  %v773_v3 = vor.u32 %v771_v53, %v770_v57  ;;  %v613_v6 = vmax.f32 %v597_v63, 0.0 }
  0x4f   : > { %869 = vst.msk [vmem:[#allocation2 + $0x4c] sm:$0xf] %vm490_vm0, %v765_v0  ;;  %872 = vst [vmem:[#allocation2 + $0x50] sm:$0x1] %v871_v2  ;;  %v3710_v4 = vpack.c.bf16 %v611_v60, %v611_v60  ;;  %v3711_v5 = vpack.c.bf16 %v612_v61, %v612_v61  ;;  %v774_v14 = vrot.slane %v770_v57, 4 }
  0x50   : > { %v874_v7 = vsel %vm4421_vm5, %v773_v3, %v873_v59  ;;  %v3712_v13 = vpack.c.bf16 %v613_v6, %v613_v6 }
  0x51   : > { %875 = vst [vmem:[#allocation2 + $0x54] sm:$0xf] %v874_v7  ;;  %v776_v8 = vshrl.u32 %v3710_v4, 16  ;;  %v779_v9 = vshll.u32 %v3710_v4, 16  ;;  %v785_v11 = vshrl.u32 %v3711_v5, 16  ;;  %v788_v12 = vshll.u32 %v3711_v5, 16 }
  0x52   : > { %v793_v19 = vshrl.u32 %v3712_v13, 16  ;;  %v796_v20 = vshll.u32 %v3712_v13, 16 }
  0x53   : > { %v778_v15 = vrot.slane %v776_v8, 7  ;;  %v787_v16 = vrot.slane %v785_v11, 7 }
  0x54   : > { %v795_v25 = vrot.slane %v793_v19, 7 }
  0x55   : > { %v781_v21 = vor.u32 %v779_v9, %v778_v15  ;;  %v783_v22 = vrot.slane %v778_v15, 4  ;;  %v790_v23 = vor.u32 %v788_v12, %v787_v16  ;;  %v791_v24 = vrot.slane %v787_v16, 4 }
  0x56   : > { %v798_v30 = vor.u32 %v796_v20, %v795_v25  ;;  %v800_v31 = vrot.slane %v795_v25, 4  ;;  %890 = sbr.rel (%p3576_p4) target bundleno = 111 (0x6f), region = 52 }
  0x57   : > { %v782_v26 = vsel %vm4427_vm6, %v774_v14, %v781_v21  ;;  %v878_v27 = vsel %vm4433_vm7, %v783_v22, %v877_v17  ;;  %v881_v28 = vsel %vm4421_vm5, %v790_v23, %v880_v18 }
  0x58   : > { %876 = vst.msk [vmem:[#allocation2 + $0x58] sm:$0xf] %vm490_vm0, %v782_v26  ;;  %879 = vst [vmem:[#allocation2 + $0x5c] sm:$0x1] %v878_v27  ;;  %v799_v32 = vsel %vm4427_vm6, %v791_v24, %v798_v30  ;;  %v885_v33 = vsel %vm4433_vm7, %v800_v31, %v884_v29 }
  0x59   : > { %882 = vst [vmem:[#allocation2 + $0x60] sm:$0xf] %v881_v28  ;;  %883 = vst.msk [vmem:[#allocation2 + $0x64] sm:$0xf] %vm490_vm0, %v799_v32 }
  0x5a   : > { %886 = vst [vmem:[#allocation2 + $0x68] sm:$0x1] %v885_v33 }
  0x5b   : > { %v3750_v34 = vld [vmem:[%s4402_s6] sm:$0xff]   ;;  %v931_v53 = vld [vmem:[#allocation2 + $0x8] sm:$0x1] }
  0x5c   : > { %v3751_v35 = vunpack.c.l.bf16 %v3750_v34  ;;  %v3752_v36 = vunpack.c.h.bf16 %v3750_v34  ;;  %v927_v52 = vld [vmem:[#allocation2] sm:$0xf] }
  0x5e   : > { %v895_v37 = vmul.f32 %v3751_v35, %v4364_v1  ;;  %v896_v38 = vmul.f32 %v3752_v36, %v4364_v1 }
  0x60   : > { %v897_v39 = vadd.f32 %v4376_v10, %v895_v37  ;;  %v898_v40 = vadd.f32 %v4376_v10, %v896_v38 }
  0x62   : > { %v899_v41 = vmax.f32 %v897_v39, 0.0  ;;  %v900_v42 = vmax.f32 %v898_v40, 0.0 }
  0x64   : > { %v3713_v43 = vpack.c.bf16 %v899_v41, %v899_v41  ;;  %v3714_v44 = vpack.c.bf16 %v900_v42, %v900_v42 }
  0x66   : > { %v908_v45 = vshrl.u32 %v3713_v43, 16  ;;  %v911_v46 = vshll.u32 %v3713_v43, 16  ;;  %v916_v47 = vshrl.u32 %v3714_v44, 16  ;;  %v919_v48 = vshll.u32 %v3714_v44, 16 }
  0x68   : > { %v910_v49 = vrot.slane %v908_v45, 7  ;;  %v918_v50 = vrot.slane %v916_v47, 7 }
  0x6a   : > { %v913_v54 = vor.u32 %v911_v46, %v910_v49  ;;  %v914_v55 = vrot.slane %v910_v49, 4  ;;  %v921_v56 = vor.u32 %v919_v48, %v918_v50  ;;  %v923_v57 = vrot.slane %v918_v50, 4 }
  0x6c   : > { %v928_v59 = vsel %vm4421_vm5, %v913_v54, %v927_v52  ;;  %v922_v60 = vsel %vm4427_vm6, %v914_v55, %v921_v56  ;;  %v932_v61 = vsel %vm4433_vm7, %v923_v57, %v931_v53 }
  0x6d   : > { %929 = vst [vmem:[#allocation2] sm:$0xf] %v928_v59  ;;  %930 = vst.msk [vmem:[#allocation2 + $0x4] sm:$0xf] %vm490_vm0, %v922_v60 }
  0x6e   : > { %933 = vst [vmem:[#allocation2 + $0x8] sm:$0x1] %v932_v61 }
  0x6f PF: > { %p3579_p5 = scmp.ge.s32.totalorder %s4165_s30, 1 }
  0x71   : > { %937 = sbr.rel (%p3579_p5) target bundleno = 138 (0x8a), region = 56 }
  0x76   : > { %v3754_v63 = vld [vmem:[%s471_s26] sm:$0xff]   ;;  %v975_v18 = vld [vmem:[#allocation2 + $0x6c] sm:$0xf]  ;;  %v979_v19 = vld [vmem:[#allocation2 + $0x74] sm:$0x1] }
  0x77   : > { %v3755_v0 = vunpack.c.l.bf16 %v3754_v63  ;;  %v3756_v2 = vunpack.c.h.bf16 %v3754_v63 }
  0x79   : > { %v942_v3 = vmul.f32 %v3755_v0, %v4364_v1  ;;  %v943_v4 = vmul.f32 %v3756_v2, %v4364_v1 }
  0x7b   : > { %v944_v5 = vadd.f32 %v4376_v10, %v942_v3  ;;  %v945_v6 = vadd.f32 %v4376_v10, %v943_v4 }
  0x7d   : > { %v946_v7 = vmax.f32 %v944_v5, 0.0  ;;  %v947_v8 = vmax.f32 %v945_v6, 0.0 }
  0x7f   : > { %v3715_v9 = vpack.c.bf16 %v946_v7, %v946_v7  ;;  %v3716_v11 = vpack.c.bf16 %v947_v8, %v947_v8 }
  0x81   : > { %v955_v12 = vshrl.u32 %v3715_v9, 16  ;;  %v958_v13 = vshll.u32 %v3715_v9, 16  ;;  %v963_v14 = vshrl.u32 %v3716_v11, 16  ;;  %v966_v15 = vshll.u32 %v3716_v11, 16 }
  0x83   : > { %v957_v16 = vrot.slane %v955_v12, 7  ;;  %v965_v17 = vrot.slane %v963_v14, 7 }
  0x85   : > { %v960_v20 = vor.u32 %v958_v13, %v957_v16  ;;  %v961_v21 = vrot.slane %v957_v16, 4  ;;  %v968_v22 = vor.u32 %v966_v15, %v965_v17  ;;  %v970_v1 = vrot.slane %v965_v17, 4 }
  0x87   : > { %v976_v23 = vsel %vm4421_vm5, %v960_v20, %v975_v18  ;;  %v969_v10 = vsel %vm4427_vm6, %v961_v21, %v968_v22  ;;  %v980_v24 = vsel %vm4433_vm7, %v970_v1, %v979_v19 }
  0x88   : > { %977 = vst [vmem:[#allocation2 + $0x6c] sm:$0xf] %v976_v23  ;;  %978 = vst.msk [vmem:[#allocation2 + $0x70] sm:$0xf] %vm490_vm0, %v969_v10 }
  0x89   : > { %981 = vst [vmem:[#allocation2 + $0x74] sm:$0x1] %v980_v24 }
  0x8a PF: > { %v1437_v25 = vld [vmem:[#allocation2 + $0xc] sm:$0xf]  ;;  %v1438_v26 = vld [vmem:[#allocation2 + $0x10] sm:$0xf]  ;;  %s4184_s21 = smov 64   ;;  %v4009_v62 = vld [vmem:[%s5605_s3 + $0x78] sm:$0xff]  }
  0x8b   : > { %1469 = vrot.lane.b32.xlu1 %v1437_v25, %s4184_s21  ;;  %v1014_v27 = vld [vmem:[#allocation2] sm:$0xf]  ;;  %v1015_v28 = vld [vmem:[#allocation2 + $0x4] sm:$0xf]  ;;  %vm1038_vm8 = vsmask.f32 3328  ;;  %3764 = vmatprep.subr.bf16.mxu0 %v4009_v62 }
  0x8c   : > { %vm1039_vm9 = vsmask.f32 7440  ;;  %v1042_v51 = vshrl.u32 %v1014_v27, 16  ;;  %v1045_v58 = vshll.u32 %v1014_v27, 16  ;;  %v1051_v29 = vshll.u32 %v1015_v28, 16  ;;  %v4010_v46 = vld [vmem:[%s5605_s3 + $0x38] sm:$0xff]  }
  0x8d   : > { %v1055_v30 = vshrl.u32 %v1015_v28, 16  ;;  %v1018_v31 = vld [vmem:[#allocation2 + $0x10] sm:$0xf]  ;;  %v1019_v32 = vld [vmem:[#allocation2 + $0x14] sm:$0x1]  ;;  %vm4562_vm10 = vmor %vm1038_vm8, %vm1039_vm9  ;;  %3765 = vmatpush3.bf16.msra.mxu0 %v4010_v46  ;;  %vm1346_vm11 = vcmask 1042432  }
  0x8e   : > { %v1044_v33 = vrot.slane %v1042_v51, 4  ;;  %v1047_v34 = vrot.slane %v1045_v58, 5  ;;  %v1053_v35 = vrot.slane %v1051_v29, 5  ;;  %v1075_v36 = vshll.u32 %v1018_v31, 16  ;;  %v1016_v37 = vld [vmem:[#allocation2 + $0x8] sm:$0x1] }
  0x8f   : > { %1471 = vrot.lane.b32.xlu1 %v1438_v26, %s4184_s21  ;;  %v1057_v38 = vrot.slane %v1055_v30, 4  ;;  %v1079_v39 = vshrl.u32 %v1018_v31, 16  ;;  %v1085_v40 = vshll.u32 %v1019_v32, 16  ;;  %v1061_v41 = vshll.u32 %v1016_v37, 16  ;;  %v1017_v44 = vld [vmem:[#allocation2 + $0xc] sm:$0xf] }
  0x90   : > { %v1048_v42 = vor.u32 %v1047_v34, %v1044_v33  ;;  %v4555_v43 = vrot.slane %v1075_v36, 5  ;;  %v1021_v45 = vld [vmem:[#allocation2 + $0x1c] sm:$0xf]  ;;  %v4011_v52 = vld [vmem:[%s5605_s3 + $0x70] sm:$0xff]   ;;  %v1066_v54 = vshrl.u32 %v1017_v44, 16  ;;  %v1069_v55 = vshll.u32 %v1017_v44, 16 }
  0x91   : > { %v1081_v48 = vrot.slane %v1079_v39, 4  ;;  %v1058_v49 = vor.u32 %v1057_v38, %v1053_v35  ;;  %v1063_v50 = vrot.slane %v1061_v41, 5  ;;  %v1022_v56 = vld [vmem:[#allocation2 + $0x20] sm:$0x1]  ;;  %v1099_v57 = vshll.u32 %v1021_v45, 16  ;;  %3766 = vmatprep.subr.bf16.mxu0 %v4011_v52  ;;  %v4012_v0 = vld [vmem:[%s5605_s3 + $0x30] sm:$0xff]  }
  0x92   : > { %v1049_v53 = vrot.slane %v1048_v42, 4  ;;  %v1087_v60 = vrot.slane %v1085_v40, 5  ;;  %v1103_v63 = vshrl.u32 %v1021_v45, 16  ;;  %v1068_v3 = vrot.slane %v1066_v54, 4  ;;  %v1020_v6 = vld [vmem:[#allocation2 + $0x18] sm:$0xf]  ;;  %3767 = vmatpush3.bf16.msra.mxu0 %v4012_v0 }
  0x93   : > { %v1082_v59 = vor.u32 %v1081_v48, %v4555_v43  ;;  %v1059_v61 = vrot.slane %v1058_v49, 4  ;;  %v1071_v4 = vrot.slane %v1069_v55, 5  ;;  %v4575_v5 = vrot.slane %v1099_v57, 5  ;;  %v4013_v7 = vld [vmem:[%s5605_s3 + $0x68] sm:$0xff]   ;;  %v1983_v19 = vld [vmem:[#allocation2 + $0x1c] sm:$0xf] }
  0x94   : > { %v1054_v2 = vsel %vm4562_vm10, %v1049_v53, %v1053_v35  ;;  %v1105_v9 = vrot.slane %v1103_v63, 4  ;;  %v1109_v11 = vshll.u32 %v1022_v56, 16  ;;  %v1090_v14 = vshrl.u32 %v1020_v6, 16  ;;  %v4014_v16 = vld [vmem:[%s5605_s3 + $0x28] sm:$0xff]   ;;  %3768 = vmatprep.subr.bf16.mxu0 %v4013_v7  ;;  %v4015_v20 = vld [vmem:[%s5605_s3 + $0x60] sm:$0xff]   ;;  %v4017_v30 = vld [vmem:[%s5605_s3 + $0x58] sm:$0xff]  }
  0x95   : > { %1233 = vrot.lane.b32.xlu0 %v1054_v2, %s4184_s21  ;;  %v1083_v8 = vrot.slane %v1082_v59, 4  ;;  %v1064_v12 = vsel %vm4562_vm10, %v1059_v61, %v1063_v50  ;;  %v1072_v13 = vor.u32 %v1071_v4, %v1068_v3  ;;  %v1093_v15 = vshll.u32 %v1020_v6, 16  ;;  %v1440_v23 = vld [vmem:[#allocation2 + $0x1c] sm:$0xf]  ;;  %v4597_v51 = vld [vmem:[#allocation2 + $0x10] sm:$0xf] }
  0x96   : > { %v1106_v18 = vor.u32 %v1105_v9, %v4575_v5  ;;  %v1092_v22 = vrot.slane %v1090_v14, 4  ;;  %v1111_v24 = vrot.slane %v1109_v11, 5  ;;  %v2016_v25 = vshll.u32 %v1983_v19, 16  ;;  %v1024_v58 = vld [vmem:[#allocation2 + $0x28] sm:$0xf]  ;;  %3769 = vmatpush3.bf16.msra.mxu0 %v4014_v16  ;;  %v4016_v29 = vld [vmem:[%s5605_s3 + $0x20] sm:$0xff]  }
  0x97   : > { %v1088_v17 = vsel %vm4562_vm10, %v1083_v8, %v1087_v60  ;;  %v1073_v21 = vrot.slane %v1072_v13, 4  ;;  %v1095_v1 = vrot.slane %v1093_v15, 5  ;;  %v2020_v26 = vshrl.u32 %v1983_v19, 16  ;;  %v1982_v62 = vld [vmem:[#allocation2 + $0x18] sm:$0xf]  ;;  %3770 = vmatprep.subr.bf16.mxu0 %v4015_v20  ;;  %v4019_v48 = vld [vmem:[%s5605_s3 + $0x50] sm:$0xff]  }
  0x98   : > { %1239 = vrot.lane.b32.xlu1 %v1088_v17, %s4184_s21  ;;  %v1107_v10 = vrot.slane %v1106_v18, 4  ;;  %v1439_v31 = vld [vmem:[#allocation2 + $0x18] sm:$0xf]  ;;  %v1783_v32 = vld [vmem:[#allocation2 + $0x14] sm:$0x1]  ;;  %v1123_v33 = vshll.u32 %v1024_v58, 16 }
  0x99   : > { %1235 = vrot.lane.b32.xlu0 %v1064_v12, %s4184_s21  ;;  %v1078_v27 = vsel %vm4562_vm10, %v1073_v21, %v4555_v43  ;;  %v1096_v28 = vor.u32 %v1095_v1, %v1092_v22  ;;  %v1127_v34 = vshrl.u32 %v1024_v58, 16  ;;  %v1831_v36 = vrot.slane %v4597_v51, 5  ;;  %v1023_v39 = vld [vmem:[#allocation2 + $0x24] sm:$0xf]  ;;  %v1984_v41 = vld [vmem:[#allocation2 + $0x20] sm:$0x1] }
  0x9a   : > { %v1112_v35 = vsel %vm4562_vm10, %v1107_v10, %v1111_v24  ;;  %v4610_v37 = vrot.slane %v2016_v25, 5  ;;  %v2022_v38 = vrot.slane %v2020_v26, 4  ;;  %v2007_v42 = vshrl.u32 %v1982_v62, 16  ;;  %3771 = vmatpush3.bf16.msra.mxu0 %v4016_v29  ;;  %v4018_v44 = vld [vmem:[%s5605_s3 + $0x18] sm:$0xff]   ;;  %v1442_v45 = vld [vmem:[#allocation2 + $0x28] sm:$0xf] }
  0x9b   : > { %v1097_v40 = vrot.slane %v1096_v28, 4  ;;  %v2010_v43 = vshll.u32 %v1982_v62, 16  ;;  %vm1347_vm12 = vcmask 1046532   ;;  %v1114_v46 = vshrl.u32 %v1023_v39, 16  ;;  %3772 = vmatprep.subr.bf16.mxu0 %v4017_v30  ;;  %v1025_v49 = vld [vmem:[#allocation2 + $0x2c] sm:$0x1] }
  0x9c   : > { %1475 = vrot.lane.b32.xlu1 %v1440_v23, %s4184_s21  ;;  %v4619_v50 = vrot.slane %v1123_v33, 5  ;;  %v1129_v52 = vrot.slane %v1127_v34, 4  ;;  %v1117_v53 = vshll.u32 %v1023_v39, 16  ;;  %v1833_v54 = vrot.slane %v1831_v36, 4  ;;  %v1986_v59 = vld [vmem:[#allocation2 + $0x28] sm:$0xf]  ;;  %vm4633_vm13 = vmor %vm1346_vm11, %vm1347_vm12 }
  0x9d   : > { %1237 = vrot.lane.b32.xlu0 %v1078_v27, %s4184_s21  ;;  %v1834_v55 = vrot.slane %v1783_v32, 5  ;;  %v2023_v56 = vor.u32 %v2022_v38, %v4610_v37  ;;  %v2026_v57 = vshll.u32 %v1984_v41, 16  ;;  %v4022_v60 = vld [vmem:[%s5605_s3 + $0xf8] sm:$0xff]   ;;  %v1102_v61 = vsel %vm4562_vm10, %v1097_v40, %v4575_v5  ;;  %v4020_v3 = vld [vmem:[%s5605_s3 + $0x10] sm:$0xff]   ;;  %v1781_v4 = vld [vmem:[#allocation2 + $0xc] sm:$0xe] }
  0x9e   : > { %v2009_v0 = vrot.slane %v2007_v42, 4  ;;  %v2012_v2 = vrot.slane %v2010_v43, 5  ;;  %3773 = vmatpush3.bf16.msra.mxu0 %v4018_v44  ;;  %v1133_v6 = vshll.u32 %v1025_v49, 16  ;;  %v1116_v7 = vrot.slane %v1114_v46, 4  ;;  %v4021_v5 = vld [vmem:[%s5605_s3 + $0x48] sm:$0xff]   ;;  %3828 = vmatprep.subr.bf16.mxu1 %v4022_v60  ;;  %v4024_v28 = vld [vmem:[%s5605_s3 + $0xb8] sm:$0xff]  }
  0x9f   : > { %v1119_v8 = vrot.slane %v1117_v53, 5  ;;  %3774 = vmatprep.subr.bf16.mxu0 %v4019_v48  ;;  %v1130_v9 = vor.u32 %v1129_v52, %v4619_v50  ;;  %v2040_v11 = vshll.u32 %v1986_v59, 16  ;;  %v2044_v12 = vshrl.u32 %v1986_v59, 16  ;;  %v1027_v13 = vld [vmem:[#allocation2 + $0x34] sm:$0xf]  ;;  %v4023_v23 = vld [vmem:[%s5605_s3 + $0x8] sm:$0xff]   ;;  %3829 = vmatpush3.bf16.msra.mxu1 %v4024_v28 }
  0xa0   : > { %1243 = vrot.lane.b32.xlu1 %v1112_v35, %s4184_s21  ;;  %v1835_v14 = vsel %vm4633_vm13, %v1833_v54, %v1834_v55  ;;  %v1441_v15 = vld [vmem:[#allocation2 + $0x24] sm:$0xf]  ;;  %v2024_v16 = vrot.slane %v2023_v56, 4  ;;  %v2028_v17 = vrot.slane %v2026_v57, 5  ;;  %v4648_v18 = vld [vmem:[#allocation2 + $0x1c] sm:$0xf]  ;;  %v2013_v20 = vor.u32 %v2012_v2, %v2009_v0 }
  0xa1   : > { %1473 = vrot.lane.b32.xlu0 %v1439_v31, %s4184_s21  ;;  %v3590_v19 = vrot.slane %v1781_v4, 9  ;;  %v4650_v21 = vld [vmem:[#allocation2 + $0x20] sm:$0x1]  ;;  %v1987_v22 = vld [vmem:[#allocation2 + $0x2c] sm:$0x1]  ;;  %v1135_v10 = vrot.slane %v1133_v6, 5  ;;  %v1120_v24 = vor.u32 %v1119_v8, %v1116_v7 }
  0xa2   : > { %v1985_v1 = vld [vmem:[#allocation2 + $0x24] sm:$0xf]  ;;  %3775 = vmatpush3.bf16.msra.mxu0 %v4020_v3  ;;  %v1028_v25 = vld [vmem:[#allocation2 + $0x38] sm:$0x1]  ;;  %v1147_v26 = vshll.u32 %v1027_v13, 16  ;;  %v1151_v27 = vshrl.u32 %v1027_v13, 16  ;;  %v2029_v32 = vsel %vm4562_vm10, %v2024_v16, %v2028_v17 }
  0xa3   : > { %3776 = vmatprep.subr.bf16.mxu0 %v4021_v5  ;;  %v1131_v58 = vrot.slane %v1130_v9, 4  ;;  %v1838_v29 = vrot.slane %v4648_v18, 5  ;;  %v4660_v62 = vrot.slane %v2040_v11, 5  ;;  %v2046_v30 = vrot.slane %v2044_v12, 4  ;;  %v4025_v31 = vld [vmem:[%s5605_s3 + $0x40] sm:$0xff]   ;;  %v4026_v43 = vld [vmem:[%s5605_s3 + $0xf0] sm:$0xff]  }
  0xa4   : > { %1479 = vrot.lane.b32.xlu1 %v1442_v45, %s4184_s21  ;;  %v4668_v33 = vld [vmem:[#allocation2 + $0x18] sm:$0xe]  ;;  %v2031_v34 = vshrl.u32 %v1985_v1, 16  ;;  %v2034_v35 = vshll.u32 %v1985_v1, 16  ;;  %v1026_v38 = vld [vmem:[#allocation2 + $0x30] sm:$0xf]  ;;  %v1832_v39 = vsel %vm4633_vm13, %v3590_v19, %v1831_v36  ;;  %3830 = vmatprep.subr.bf16.mxu1 %v4026_v43 }
  0xa5   : > { %1241 = vrot.lane.b32.xlu0 %v1102_v61, %s4184_s21  ;;  %v2014_v40 = vrot.slane %v2013_v20, 4  ;;  %v2050_v41 = vshll.u32 %v1987_v22, 16  ;;  %v1157_v42 = vshll.u32 %v1028_v25, 16  ;;  %v1121_v44 = vrot.slane %v1120_v24, 4  ;;  %v4685_v53 = vld [vmem:[#allocation2 + $0x28] sm:$0xf] }
  0xa6   : > { %3777 = vmatpush3.bf16.msra.mxu0 %v4023_v23  ;;  %v1841_v45 = vrot.slane %v4650_v21, 5  ;;  %v4678_v46 = vrot.slane %v1147_v26, 5  ;;  %v1153_v48 = vrot.slane %v1151_v27, 4  ;;  %v1840_v51 = vrot.slane %v1838_v29, 4  ;;  %v4690_v57 = vld [vmem:[#allocation2 + $0x2c] sm:$0x1] }
  0xa7   : > { %3778 = vmatprep.subr.bf16.mxu0 %v4025_v31  ;;  %v2047_v36 = vor.u32 %v2046_v30, %v4660_v62  ;;  %v3591_v49 = vrot.slane %v4668_v33, 9  ;;  %v1138_v52 = vshrl.u32 %v1026_v38, 16  ;;  %v1136_v54 = vsel %vm4562_vm10, %v1131_v58, %v1135_v10  ;;  %v1989_v59 = vld [vmem:[#allocation2 + $0x34] sm:$0xf]  ;;  %v1030_v3 = vld [vmem:[#allocation2 + $0x40] sm:$0xf] }
  0xa8   : > { %1887 = vrot.lane.b32.xlu1 %v1835_v14, %s4184_s21  ;;  %v2033_v55 = vrot.slane %v2031_v34, 4  ;;  %v2036_v56 = vrot.slane %v2034_v35, 5  ;;  %v2019_v60 = vsel %vm4562_vm10, %v2014_v40, %v4610_v37  ;;  %v4695_v61 = vrot.slane %v2050_v41, 5  ;;  %v4027_v4 = vld [vmem:[%s5605_s3] sm:$0xff]   ;;  %v1988_v5 = vld [vmem:[#allocation2 + $0x30] sm:$0xf] }
  0xa9   : > { %1477 = vrot.lane.b32.xlu0 %v1441_v15, %s4184_s21  ;;  %v4697_v0 = vrot.slane %v1157_v42, 5  ;;  %v1141_v2 = vshll.u32 %v1026_v38, 16  ;;  %v1126_v6 = vsel %vm4562_vm10, %v1121_v44, %v4619_v50  ;;  %v1154_v7 = vor.u32 %v1153_v48, %v4678_v46  ;;  %v1029_v37 = vld [vmem:[#allocation2 + $0x3c] sm:$0xf]  ;;  %v4028_v9 = vld [vmem:[%s5605_s3 + $0xb0] sm:$0xff]   ;;  %v4032_v24 = vld [vmem:[%s5605_s3 + $0xe8] sm:$0xff]  }
  0xaa   : > { %v1845_v8 = vrot.slane %v4685_v53, 5  ;;  %v1444_v11 = vld [vmem:[#allocation2 + $0x34] sm:$0xf]  ;;  %v4711_v12 = vrot.slane %v2047_v36, 4  ;;  %v4713_v13 = vrot.slane %v1138_v52, 4  ;;  %v2064_v14 = vshll.u32 %v1989_v59, 16  ;;  %3779 = vmatpush3.bf16.msra.mxu0 %v4027_v4  ;;  %3831 = vmatpush3.bf16.msra.mxu1 %v4028_v9 }
  0xab   : > { %v2068_v15 = vshrl.u32 %v1989_v59, 16  ;;  %v2037_v50 = vor.u32 %v2036_v56, %v2033_v55  ;;  %v1848_v16 = vrot.slane %v4690_v57, 5  ;;  %v1990_v17 = vld [vmem:[#allocation2 + $0x38] sm:$0x1]  ;;  %v1171_v19 = vshll.u32 %v1030_v3, 16  ;;  %v4033_v58 = vld [vmem:[%s5605_s3 + $0xa8] sm:$0xff]   ;;  %3832 = vmatprep.subr.bf16.mxu1 %v4032_v24 }
  0xac   : > { %2200 = vrot.lane.b32.xlu1 %v2029_v32, %s4184_s21  ;;  %v1175_v20 = vshrl.u32 %v1030_v3, 16  ;;  %v1143_v22 = vrot.slane %v1141_v2, 5  ;;  %v2055_v1 = vshrl.u32 %v1988_v5, 16  ;;  %v2058_v23 = vshll.u32 %v1988_v5, 16  ;;  %v4726_v27 = vld [vmem:[#allocation2 + $0x24] sm:$0xe] }
  0xad   : > { %1885 = vrot.lane.b32.xlu0 %v1832_v39, %s4184_s21  ;;  %v1162_v10 = vshrl.u32 %v1029_v37, 16  ;;  %v4720_v25 = vrot.slane %v1154_v7, 4  ;;  %v4724_v26 = vrot.slane %v1845_v8, 4  ;;  %v1165_v28 = vshll.u32 %v1029_v37, 16  ;;  %v1443_v30 = vld [vmem:[#allocation2 + $0x30] sm:$0xf] }
  0xae   : > { %v4732_v31 = vrot.slane %v2064_v14, 5  ;;  %v2070_v32 = vrot.slane %v2068_v15, 4  ;;  %v2074_v34 = vshll.u32 %v1990_v17, 16  ;;  %v1992_v35 = vld [vmem:[#allocation2 + $0x40] sm:$0xf]  ;;  %v1842_v39 = vsel %vm4633_vm13, %v1840_v51, %v1841_v45  ;;  %3833 = vmatpush3.bf16.msra.mxu1 %v4033_v58  ;;  %v4039_v9 = vld [vmem:[%s5605_s3 + $0x98] sm:$0xff]  }
  0xaf   : > { %v4034_v38 = vld [vmem:[%s5605_s3 + $0xe0] sm:$0xff]   ;;  %v4742_v40 = vrot.slane %v2037_v50, 4  ;;  %v4744_v42 = vrot.slane %v1171_v19, 5  ;;  %v1177_v43 = vrot.slane %v1175_v20, 4  ;;  %v1144_v48 = vor.u32 %v1143_v22, %v4713_v13  ;;  %v4750_v21 = vld [vmem:[#allocation2 + $0x34] sm:$0xf] }
  0xb0   : > { %1247 = vrot.lane.b32.xlu1 %v1136_v54, %s4184_s21  ;;  %v1031_v41 = vld [vmem:[#allocation2 + $0x44] sm:$0x1]  ;;  %v2057_v36 = vrot.slane %v2055_v1, 4  ;;  %v2060_v52 = vrot.slane %v2058_v23, 5  ;;  %v1164_v54 = vrot.slane %v1162_v10, 4  ;;  %3834 = vmatprep.subr.bf16.mxu1 %v4034_v38  ;;  %v1839_v45 = vsel %vm4633_vm13, %v3591_v49, %v1838_v29  ;;  %v4040_v19 = vld [vmem:[%s5605_s3 + $0xd0] sm:$0xff]  }
  0xb1   : > { %2198 = vrot.lane.b32.xlu0 %v2019_v60, %s4184_s21  ;;  %v4035_v44 = vld [vmem:[%s5605_s3 + $0xa0] sm:$0xff]   ;;  %v1167_v51 = vrot.slane %v1165_v28, 5  ;;  %v2088_v55 = vshll.u32 %v1992_v35, 16  ;;  %v2092_v56 = vshrl.u32 %v1992_v35, 16  ;;  %v1033_v59 = vld [vmem:[#allocation2 + $0x4c] sm:$0xf]  ;;  %v2071_v2 = vor.u32 %v2070_v32, %v4732_v31 }
  0xb2   : > { %v4038_v60 = vld [vmem:[%s5605_s3 + $0xd8] sm:$0xff]   ;;  %v4763_v3 = vrot.slane %v2074_v34, 5  ;;  %v3592_v18 = vrot.slane %v4726_v27, 9  ;;  %v1181_v33 = vshll.u32 %v1031_v41, 16  ;;  %v1993_v4 = vld [vmem:[#allocation2 + $0x44] sm:$0x1]  ;;  %v2053_v29 = vsel %vm4562_vm10, %v4711_v12, %v4695_v61  ;;  %3835 = vmatpush3.bf16.msra.mxu1 %v4035_v44 }
  0xb3   : > { %v1160_v49 = vsel %vm4562_vm10, %v4720_v25, %v4697_v0  ;;  %v4776_v7 = vld [vmem:[#allocation2 + $0x38] sm:$0x1]  ;;  %v1852_v5 = vrot.slane %v4750_v21, 5  ;;  %v1991_v37 = vld [vmem:[#allocation2 + $0x3c] sm:$0xf]  ;;  %v2061_v61 = vor.u32 %v2060_v52, %v2057_v36  ;;  %v1195_v13 = vshll.u32 %v1033_v59, 16  ;;  %3836 = vmatprep.subr.bf16.mxu1 %v4038_v60 }
  0xb4   : > { %1483 = vrot.lane.b32.xlu1 %v1444_v11, %s4184_s21  ;;  %v4782_v11 = vrot.slane %v1144_v48, 4  ;;  %v4784_v12 = vld [vmem:[#allocation2 + $0x30] sm:$0xe]  ;;  %v1199_v14 = vshrl.u32 %v1033_v59, 16  ;;  %v1168_v0 = vor.u32 %v1167_v51, %v1164_v54  ;;  %v4786_v15 = vrot.slane %v2088_v55, 5  ;;  %v4044_v55 = vld [vmem:[%s5605_s3 + $0xc8] sm:$0xff]  }
  0xb5   : > { %1245 = vrot.lane.b32.xlu0 %v1126_v6, %s4184_s21  ;;  %v1178_v6 = vor.u32 %v1177_v43, %v4744_v42  ;;  %v2094_v50 = vrot.slane %v2092_v56, 4  ;;  %v2098_v17 = vshll.u32 %v1993_v4, 16  ;;  %v4792_v20 = vrot.slane %v2071_v2, 4  ;;  %v1034_v1 = vld [vmem:[#allocation2 + $0x50] sm:$0x1]  ;;  %v4088_v47 = vld [vmem:[%s5605_s3 + $0x118] sm:$0xff]  }
  0xb6   : > { %v4794_v22 = vrot.slane %v1181_v33, 5  ;;  %v2079_v23 = vshrl.u32 %v1991_v37, 16  ;;  %v2082_v10 = vshll.u32 %v1991_v37, 16  ;;  %v4801_v25 = vrot.slane %v1852_v5, 4  ;;  %3837 = vmatpush3.bf16.msra.mxu1 %v4039_v9  ;;  %v4041_v41 = vld [vmem:[%s5605_s3 + $0x90] sm:$0xff]   ;;  %v4045_v37 = vld [vmem:[%s5605_s3 + $0x88] sm:$0xff]  }
  0xb7   : > { %v4797_v24 = vrot.slane %v1178_v6, 4  ;;  %v1855_v28 = vrot.slane %v4776_v7, 5  ;;  %v3593_v58 = vrot.slane %v4784_v12, 9  ;;  %v2043_v32 = vsel %vm4562_vm10, %v4742_v40, %v4660_v62  ;;  %3838 = vmatprep.subr.bf16.mxu1 %v4040_v19  ;;  %v1446_v43 = vld [vmem:[#allocation2 + $0x40] sm:$0xf]  ;;  %s3691_s20 = sshll.u32 %s4169_s9, 1 }
  0xb8   : > { %1891 = vrot.lane.b32.xlu1 %v1842_v39, %s4184_s21  ;;  %v4809_v34 = vrot.slane %v2061_v61, 4  ;;  %v4811_v35 = vrot.slane %v1195_v13, 5  ;;  %v1201_v38 = vrot.slane %v1199_v14, 4  ;;  %v1995_v39 = vld [vmem:[#allocation2 + $0x4c] sm:$0xf]  ;;  %v4816_v44 = vrot.slane %v1168_v0, 4 }
  0xb9   : > { %1481 = vrot.lane.b32.xlu0 %v1443_v30, %s4184_s21  ;;  %v1032_v30 = vld [vmem:[#allocation2 + $0x48] sm:$0xf]  ;;  %v2095_v48 = vor.u32 %v2094_v50, %v4786_v15  ;;  %v4819_v36 = vrot.slane %v2098_v17, 5  ;;  %v1205_v52 = vshll.u32 %v1034_v1, 16  ;;  %v4821_v62 = vld [vmem:[#allocation2 + $0x40] sm:$0xf]  ;;  %v1150_v60 = vsel %vm4562_vm10, %v4782_v11, %v4678_v46 }
  0xba   : > { %v2081_v40 = vrot.slane %v2079_v23, 4  ;;  %v2084_v54 = vrot.slane %v2082_v10, 5  ;;  %v1189_v51 = vshll.u32 %v1032_v30, 16  ;;  %v2112_v56 = vshll.u32 %v1995_v39, 16  ;;  %3839 = vmatpush3.bf16.msra.mxu1 %v4041_v41  ;;  %v4833_v33 = vld [vmem:[#allocation2 + $0x44] sm:$0x1] }
  0xbb   : > { %v2116_v59 = vshrl.u32 %v1995_v39, 16  ;;  %v1202_v2 = vor.u32 %v1201_v38, %v4811_v35  ;;  %3840 = vmatprep.subr.bf16.mxu1 %v4044_v55  ;;  %v1849_v4 = vsel %vm4633_vm13, %v4724_v26, %v1848_v16  ;;  %v1036_v6 = vld [vmem:[#allocation2 + $0x58] sm:$0xf]  ;;  %v1445_v46 = vld [vmem:[#allocation2 + $0x3c] sm:$0xf]  ;;  %v1859_v57 = vrot.slane %v4821_v62, 5 }
  0xbc   : > { %2204 = vrot.lane.b32.xlu1 %v2053_v29, %s4184_s21  ;;  %v4840_v29 = vrot.slane %v2095_v48, 4  ;;  %v2085_v9 = vor.u32 %v2084_v54, %v2081_v40  ;;  %v1191_v61 = vrot.slane %v1189_v51, 5  ;;  %v4847_v13 = vld [vmem:[#allocation2 + $0x3c] sm:$0xe]  ;;  %v1037_v14 = vld [vmem:[#allocation2 + $0x5c] sm:$0x1]  ;;  %v1184_v53 = vsel %vm4562_vm10, %v4797_v24, %v4794_v22 }
  0xbd   : > { %1889 = vrot.lane.b32.xlu0 %v1839_v45, %s4184_s21  ;;  %v1186_v45 = vshrl.u32 %v1032_v30, 16  ;;  %v4046_v16 = vld [vmem:[%s5605_s3 + $0xc0] sm:$0xff]   ;;  %v4853_v26 = vrot.slane %v1205_v52, 5  ;;  %v1862_v0 = vrot.slane %v4833_v33, 5  ;;  %v4856_v50 = vrot.slane %v2112_v56, 5  ;;  %v4880_v54 = vld [vmem:[%s5605_s3 + $0x118] sm:$0xff]  }
  0xbe   : > { %v2118_v17 = vrot.slane %v2116_v59, 4  ;;  %v1994_v19 = vld [vmem:[#allocation2 + $0x48] sm:$0xf]  ;;  %3841 = vmatpush3.bf16.msra.mxu1 %v4045_v37  ;;  %v4858_v1 = vrot.slane %v1202_v2, 4  ;;  %v1219_v23 = vshll.u32 %v1036_v6, 16  ;;  %v2077_v30 = vsel %vm4562_vm10, %v4792_v20, %v4763_v3  ;;  %v4047_v38 = vld [vmem:[%s5605_s3 + $0x80] sm:$0xff]   ;;  %3904 = vmatprep.subr.bf16.mxu0 %v4880_v54 }
  0xbf   : > { %v1188_v11 = vrot.slane %v1186_v45, 4  ;;  %v1035_v10 = vld [vmem:[#allocation2 + $0x54] sm:$0xf]  ;;  %3842 = vmatprep.subr.bf16.mxu1 %v4046_v16  ;;  %v4868_v39 = vrot.slane %v2085_v9, 4  ;;  %v3594_v3 = vrot.slane %v4847_v13, 9  ;;  %v1229_v20 = vshll.u32 %v1037_v14, 16 }
  0xc0   : > { %1251 = vrot.lane.b32.xlu1 %v1160_v49, %s4184_s21  ;;  %v1996_v49 = vld [vmem:[#allocation2 + $0x50] sm:$0x1]  ;;  %v2119_v52 = vor.u32 %v2118_v17, %v4856_v50  ;;  %v2103_v40 = vshrl.u32 %v1994_v19, 16  ;;  %v1846_v45 = vsel %vm4633_vm13, %v3592_v18, %v1845_v8  ;;  %v2106_v51 = vshll.u32 %v1994_v19, 16  ;;  %v4888_v56 = vld [vmem:[#allocation2 + $0x4c] sm:$0xf] }
  0xc1   : > { %2202 = vrot.lane.b32.xlu0 %v2043_v32, %s4184_s21  ;;  %v1223_v32 = vshrl.u32 %v1036_v6, 16  ;;  %v1192_v41 = vor.u32 %v1191_v61, %v1188_v11  ;;  %v2122_v48 = vshll.u32 %v1996_v49, 16  ;;  %v1210_v55 = vshrl.u32 %v1035_v10, 16  ;;  %v1998_v2 = vld [vmem:[#allocation2 + $0x58] sm:$0xf]  ;;  %s3356_s15 = sshll.u32 %s4518_s0, 4  ;;  %s3357_s15 = int_to_ptr.vmem [resolvable:$true] %s3356_s15 }
  0xc2   : > { %3843 = vmatpush3.bf16.msra.mxu1 %v4047_v38  ;;  %v4890_v59 = vrot.slane %v1219_v23, 5  ;;  %v2067_v8 = vsel %vm4562_vm10, %v4809_v34, %v4732_v31  ;;  %v1213_v18 = vshll.u32 %v1035_v10, 16  ;;  %v4908_v49 = vrot.slane %v2119_v52, 4  ;;  %v4912_v37 = vld [vmem:[#allocation2 + $0x50] sm:$0x1]  ;;  %s5635_s13 = sand.u32 1, %s4157_s28  }
  0xc3   : > { %3928 = vmatprep.subr.bf16.mxu1 %v4880_v54  ;;  %v4903_v27 = vrot.slane %v2122_v48, 5  ;;  %v4910_v6 = vrot.slane %v1229_v20, 5  ;;  %v1866_v22 = vrot.slane %v4888_v56, 5  ;;  %v2105_v24 = vrot.slane %v2103_v40, 4  ;;  %v1448_v31 = vld [vmem:[#allocation2 + $0x4c] sm:$0xf] }
  0xc4   : > { %1487 = vrot.lane.b32.xlu1 %v1446_v43, %s4184_s21  ;;  %v4872_v43 = vrot.slane %v1859_v57, 4  ;;  %v1212_v9 = vrot.slane %v1210_v55, 4  ;;  %v2136_v11 = vshll.u32 %v1998_v2, 16  ;;  %v1997_v61 = vld [vmem:[#allocation2 + $0x54] sm:$0xf]  ;;  %v1215_v16 = vrot.slane %v1213_v18, 5 }
  0xc5   : > { %1249 = vrot.lane.b32.xlu0 %v1150_v60, %s4184_s21  ;;  %v1225_v60 = vrot.slane %v1223_v32, 4  ;;  %v1298_v14 = vld [vmem:[#allocation2] sm:$0xe]  ;;  %v1869_v17 = vrot.slane %v4912_v37, 5  ;;  %v2140_v19 = vshrl.u32 %v1998_v2, 16  ;;  %v1174_v38 = vsel %vm4562_vm10, %v4816_v44, %v4744_v42  ;;  %s3337_s16 = scalar_lea.sflag [#allocation5], %s5635_s13 }
  0xc6   : > { %v1299_v23 = vld [vmem:[#allocation2 + $0x4] sm:$0xf]  ;;  %v3582_v10 = vrot.slane %v1298_v14, 9  ;;  %v4927_v48 = vld [vmem:[#allocation2 + $0x48] sm:$0xe]  ;;  %v2127_v52 = vshrl.u32 %v1997_v61, 16  ;;  %v1216_v18 = vor.u32 %v1215_v16, %v1212_v9 }
  0xc7   : > { %v1226_v34 = vor.u32 %v1225_v60, %v4890_v59  ;;  %v1351_v32 = vrot.slane %v1299_v23, 5  ;;  %v2130_v20 = vshll.u32 %v1997_v61, 16  ;;  %v1447_v60 = vld [vmem:[#allocation2 + $0x48] sm:$0xf]  ;;  %v2142_v2 = vrot.slane %v2140_v19, 4 }
  0xc8   : > { %1895 = vrot.lane.b32.xlu1 %v1849_v4, %s4184_s21  ;;  %v4906_v4 = vrot.slane %v1192_v41, 4  ;;  %v1999_v41 = vld [vmem:[#allocation2 + $0x5c] sm:$0x1]  ;;  %v1300_v42 = vld [vmem:[#allocation2 + $0x8] sm:$0x1]  ;;  %v3595_v19 = vrot.slane %v4927_v48, 9 }
  0xc9   : > { %1485 = vrot.lane.b32.xlu0 %v1445_v46, %s4184_s21  ;;  %v2108_v46 = vrot.slane %v2106_v51, 5  ;;  %v4929_v40 = vrot.slane %v1226_v34, 4  ;;  %v4931_v51 = vrot.slane %v2136_v11, 5  ;;  %v1352_v55 = vsel %vm4633_vm13, %v3582_v10, %v1351_v32  ;;  %v4949_v23 = vld [vmem:[#allocation2 + $0x5c] sm:$0x1] }
  0xca   : > { %1421 = vst.msk [vmem:[#allocation3 + $0x4] sm:$0xf] %vm490_vm0, %v1352_v55  ;;  %v1353_v44 = vrot.slane %v1351_v32, 4  ;;  %v1354_v11 = vrot.slane %v1300_v42, 5  ;;  %v2129_v34 = vrot.slane %v2127_v52, 4  ;;  %v2132_v61 = vrot.slane %v2130_v20, 5 }
  0xcb   : > { %v2002_v7 = vld [vmem:[#allocation2 + $0x68] sm:$0x1]  ;;  %v2000_v16 = vld [vmem:[#allocation2 + $0x60] sm:$0xf]  ;;  %v2101_v32 = vsel %vm4562_vm10, %v4840_v29, %v4819_v36  ;;  %v985_v52 = vld [vmem:[#allocation2 + $0x10] sm:$0xf]  ;;  %v1853_v20 = vsel %vm4633_vm13, %v3593_v58, %v1852_v5 }
  0xcc   : > { %2208 = vrot.lane.b32.xlu1 %v2077_v30, %s4184_s21  ;;  %v4921_v30 = vrot.slane %v1866_v22, 4  ;;  %v1355_v10 = vsel %vm4633_vm13, %v1353_v44, %v1354_v11  ;;  %v2133_v55 = vor.u32 %v2132_v61, %v2129_v34  ;;  %1001 = vst.msk [vmem:[#allocation3 + $0x3c] sm:$0xf] %vm490_vm0, %v985_v52  ;;  %v983_v36 = vld [vmem:[#allocation2 + $0x4] sm:$0xf]  ;;  %v1876_v29 = vrot.slane %v4949_v23, 5 }
  0xcd   : > { %1893 = vrot.lane.b32.xlu0 %v1846_v45, %s4184_s21  ;;  %v2109_v45 = vor.u32 %v2108_v46, %v2105_v24  ;;  %v2146_v24 = vshll.u32 %v1999_v41, 16  ;;  %v2001_v46 = vld [vmem:[#allocation2 + $0x64] sm:$0xf]  ;;  %1422 = vst.msk [vmem:[#allocation3 + $0x18] sm:$0xf] %vm490_vm0, %v1355_v10  ;;  %v2151_v42 = vshrl.u32 %v2000_v16, 16  ;;  %v1198_v52 = vsel %vm4562_vm10, %v4906_v4, %v4811_v35 }
  0xce   : > { %v2164_v9 = vshrl.u32 %v2001_v46, 16  ;;  %999 = vst.msk [vmem:[#allocation3 + $0x14] sm:$0xf] %vm490_vm0, %v983_v36  ;;  %v4982_v58 = vld [vmem:[#allocation2 + $0x64] sm:$0xf]  ;;  %v2154_v44 = vshll.u32 %v2000_v16, 16  ;;  %v1863_v35 = vsel %vm4633_vm13, %v4872_v43, %v1862_v0  ;;  %v2125_v0 = vsel %vm4562_vm10, %v4908_v49, %v4903_v27 }
  0xcf   : > { %v4946_v14 = vrot.slane %v2109_v45, 4  ;;  %v4970_v45 = vrot.slane %v2146_v24, 5  ;;  %v4998_v11 = vrot.slane %v2133_v55, 4  ;;  %v2004_v34 = vld [vmem:[#allocation2 + $0x70] sm:$0xf]  ;;  %vm1281_vm14 = vcmask 1043968  }
  0xd0   : > { %1255 = vrot.lane.b32.xlu1 %v1184_v53, %s4184_s21  ;;  %v4936_v53 = vld [vmem:[#allocation2 + $0x58] sm:$0xf]  ;;  %v2166_v5 = vrot.slane %v2164_v9, 4  ;;  %v1302_v10 = vld [vmem:[#allocation2 + $0x10] sm:$0xf]  ;;  %vm2934_vm15 = vcmask 523264  }
  0xd1   : > { %2206 = vrot.lane.b32.xlu0 %v2067_v8, %s4184_s21  ;;  %v1856_v8 = vsel %vm4633_vm13, %v4801_v25, %v1855_v28  ;;  %v2143_v25 = vor.u32 %v2142_v2, %v4931_v51  ;;  %v2160_v28 = vshll.u32 %v2001_v46, 16  ;;  %v1873_v41 = vrot.slane %v4936_v53, 5  ;;  %v4972_v2 = vld [vmem:[#allocation2 + $0x54] sm:$0xe]  ;;  %v1450_v61 = vld [vmem:[#allocation2 + $0x58] sm:$0xf] }
  0xd2   : > { %v3596_v24 = vrot.slane %v4972_v2, 9  ;;  %v2091_v46 = vsel %vm4562_vm10, %v4868_v39, %v4786_v15  ;;  %v1303_v9 = vld [vmem:[#allocation2 + $0x14] sm:$0x1]  ;;  %v1358_v16 = vrot.slane %v1302_v10, 5  ;;  %v984_v15 = vld [vmem:[#allocation2 + $0xc] sm:$0xf] }
  0xd3   : > { %v4978_v21 = vrot.slane %v2143_v25, 4  ;;  %v4980_v12 = vrot.slane %v2160_v28, 5  ;;  %v2156_v28 = vrot.slane %v2154_v44, 5  ;;  %v2184_v39 = vshll.u32 %v2004_v34, 16  ;;  %1000 = vst.msk [vmem:[#allocation3 + $0x28] sm:$0xf] %vm490_vm0, %v984_v15 }
  0xd4   : > { %1491 = vrot.lane.b32.xlu1 %v1448_v31, %s4184_s21  ;;  %v982_v31 = vld [vmem:[#allocation2] sm:$0xf]  ;;  %v1360_v55 = vrot.slane %v1358_v16, 4  ;;  %v1449_v36 = vld [vmem:[#allocation2 + $0x54] sm:$0xf] }
  0xd5   : > { %1253 = vrot.lane.b32.xlu0 %v1174_v38, %s4184_s21  ;;  %998 = vst.msk [vmem:[#allocation3] sm:$0xf] %vm490_vm0, %v982_v31  ;;  %v4961_v38 = vrot.slane %v1216_v18, 4  ;;  %v4991_v18 = vrot.slane %v1873_v41, 4  ;;  %v2167_v25 = vor.u32 %v2166_v5, %v4980_v12  ;;  %v1306_v15 = vld [vmem:[#allocation2 + $0x20] sm:$0x1] }
  0xd6   : > { %v1535_v62 = vld [vmem:[#allocation2 + $0x14] sm:$0x1] }
  0xd8   : > { %1899 = vrot.lane.b32.xlu1 %v1856_v8, %s4184_s21  ;;  %v1208_v8 = vsel %vm4562_vm10, %v4858_v1, %v4853_v26  ;;  %v1880_v26 = vrot.slane %v4982_v58, 5  ;;  %v2153_v1 = vrot.slane %v2151_v42, 4  ;;  %v5014_v42 = vrot.slane %v2167_v25, 4 }
  0xd9   : > { %1489 = vrot.lane.b32.xlu0 %v1447_v60, %s4184_s21  ;;  %v2170_v60 = vshll.u32 %v2002_v7, 16  ;;  %v5002_v7 = vld [vmem:[#allocation2 + $0x68] sm:$0x1] }
  0xda   : > { %v1883_v5 = vrot.slane %v5002_v7, 5  ;;  %v2157_v4 = vor.u32 %v2156_v28, %v2153_v1  ;;  %v1368_v1 = vrot.slane %v1306_v15, 5  ;;  %v986_v28 = vld [vmem:[#allocation2 + $0x18] sm:$0xf]  ;;  %v1222_v15 = vsel %vm4562_vm10, %v4961_v38, %v4890_v59  ;;  %v1308_v59 = vld [vmem:[#allocation2 + $0x28] sm:$0xf] }
  0xdb   : > { %v5000_v31 = vrot.slane %v2170_v60, 5  ;;  %v2005_v60 = vld [vmem:[#allocation2 + $0x74] sm:$0x1]  ;;  %1002 = vst.msk [vmem:[#allocation3 + $0x50] sm:$0xf] %vm490_vm0, %v986_v28 }
  0xdc   : > { %2212 = vrot.lane.b32.xlu1 %v2101_v32, %s4184_s21  ;;  %v1361_v32 = vrot.slane %v1303_v9, 5  ;;  %v2194_v10 = vshll.u32 %v2005_v60, 16  ;;  %v1305_v9 = vld [vmem:[#allocation2 + $0x1c] sm:$0xf]  ;;  %v5060_v60 = vld [vmem:[#allocation2 + $0x6c] sm:$0xf] }
  0xdd   : > { %1897 = vrot.lane.b32.xlu0 %v1853_v20, %s4184_s21  ;;  %v2188_v20 = vshrl.u32 %v2004_v34, 16  ;;  %v5026_v34 = vrot.slane %v2184_v39, 5  ;;  %v1365_v43 = vrot.slane %v1305_v9, 5  ;;  %v5046_v39 = vrot.slane %v1880_v26, 4  ;;  %v1309_v38 = vld [vmem:[#allocation2 + $0x2c] sm:$0x1] }
  0xde   : > { %v1362_v44 = vsel %vm4633_vm13, %v1360_v55, %v1361_v32  ;;  %v5048_v32 = vrot.slane %v2157_v4, 4  ;;  %v5052_v49 = vrot.slane %v2194_v10, 5  ;;  %v2115_v4 = vsel %vm4562_vm10, %v4946_v14, %v4856_v50 }
  0xdf   : > { %1424 = vst.msk [vmem:[#allocation3 + $0x40] sm:$0xf] %vm490_vm0, %v1362_v44  ;;  %v1577_v44 = vshll.u32 %v1535_v62, 16  ;;  %v2173_v53 = vsel %vm4562_vm10, %v5014_v42, %v5000_v31  ;;  %v993_v31 = vld [vmem:[#allocation2 + $0x40] sm:$0xf] }
  0xe0   : > { %1259 = vrot.lane.b32.xlu1 %v1208_v8, %s4184_s21  ;;  %v987_v8 = vld [vmem:[#allocation2 + $0x1c] sm:$0xf]  ;;  %1009 = vst.msk [vmem:[#allocation3 + $0xdc] sm:$0xf] %vm490_vm0, %v993_v31  ;;  %v1546_v31 = vld [vmem:[#allocation2 + $0x40] sm:$0xf] }
  0xe1   : > { %2210 = vrot.lane.b32.xlu0 %v2091_v46, %s4184_s21  ;;  %v1301_v46 = vld [vmem:[#allocation2 + $0xc] sm:$0xe]  ;;  %1003 = vst.msk [vmem:[#allocation3 + $0x64] sm:$0xf] %vm490_vm0, %v987_v8 }
  0xe2   : > { %v3583_v25 = vrot.slane %v1301_v46, 9 }
  0xe4   : > { %1495 = vrot.lane.b32.xlu1 %v1450_v61, %s4184_s21  ;;  %v2190_v61 = vrot.slane %v2188_v20, 4  ;;  %v1359_v33 = vsel %vm4633_vm13, %v3583_v25, %v1358_v16  ;;  %v1860_v16 = vsel %vm4633_vm13, %v3594_v3, %v1859_v57  ;;  %v1534_v20 = vld [vmem:[#allocation2 + $0x10] sm:$0xf]  ;;  %v1304_v57 = vld [vmem:[#allocation2 + $0x18] sm:$0xe]  ;;  %v1232_v3 = vsel %vm4562_vm10, %v4929_v40, %v4910_v6 }
  0xe5   : > { %1257 = vrot.lane.b32.xlu0 %v1198_v52, %s4184_s21  ;;  %1423 = vst.msk [vmem:[#allocation3 + $0x2c] sm:$0xf] %vm490_vm0, %v1359_v33  ;;  %v1367_v52 = vrot.slane %v1365_v43, 4  ;;  %v1567_v13 = vshll.u32 %v1534_v20, 16  ;;  %v1571_v55 = vshrl.u32 %v1534_v20, 16  ;;  %v1579_v6 = vrot.slane %v1577_v44, 5 }
  0xe6   : > { %v2191_v27 = vor.u32 %v2190_v61, %v5026_v34  ;;  %v1452_v61 = vld [vmem:[#allocation2 + $0x64] sm:$0xf]  ;;  %v1951_v25 = vld [vmem:[#allocation2 + $0x1c] sm:$0xf]  ;;  %v1533_v33 = vld [vmem:[#allocation2 + $0xc] sm:$0xf] }
  0xe7   : > { %v1569_v8 = vrot.slane %v1567_v13, 5  ;;  %v1573_v46 = vrot.slane %v1571_v55, 4  ;;  %1967 = vst.msk [vmem:[#allocation3 + $0x20] sm:$0xf] %vm490_vm0, %v1951_v25  ;;  %v1558_v50 = vshrl.u32 %v1533_v33, 16  ;;  %v1561_v14 = vshll.u32 %v1533_v33, 16 }
  0xe8   : > { %1903 = vrot.lane.b32.xlu1 %v1863_v35, %s4184_s21  ;;  %v3584_v35 = vrot.slane %v1304_v57, 9  ;;  %v5069_v10 = vrot.slane %v2191_v27, 4  ;;  %v1950_v27 = vld [vmem:[#allocation2 + $0x18] sm:$0xf]  ;;  %v1870_v13 = vsel %vm4633_vm13, %v4921_v30, %v1869_v17  ;;  %v1372_v55 = vrot.slane %v1308_v59, 5 }
  0xe9   : > { %1493 = vrot.lane.b32.xlu0 %v1449_v36, %s4184_s21  ;;  %v1369_v36 = vsel %vm4633_vm13, %v1367_v52, %v1368_v1  ;;  %v1574_v9 = vor.u32 %v1573_v46, %v1569_v8  ;;  %v1560_v28 = vrot.slane %v1558_v50, 4  ;;  %1966 = vst.msk [vmem:[#allocation3 + $0xc] sm:$0xf] %vm490_vm0, %v1950_v27  ;;  %v1451_v52 = vld [vmem:[#allocation2 + $0x60] sm:$0xf]  ;;  %v1375_v57 = vrot.slane %v1309_v38, 5 }
  0xea   : > { %1426 = vst.msk [vmem:[#allocation3 + $0x68] sm:$0xf] %vm490_vm0, %v1369_v36  ;;  %v1366_v40 = vsel %vm4633_vm13, %v3584_v35, %v1365_v43  ;;  %v2175_v43 = vshrl.u32 %v5060_v60, 16  ;;  %v2178_v36 = vshll.u32 %v5060_v60, 16  ;;  %v1537_v46 = vld [vmem:[#allocation2 + $0x1c] sm:$0xf]  ;;  %v2149_v60 = vsel %vm4562_vm10, %v4978_v21, %v4970_v45 }
  0xeb   : > { %1425 = vst.msk [vmem:[#allocation3 + $0x54] sm:$0xf] %vm490_vm0, %v1366_v40  ;;  %v1575_v1 = vrot.slane %v1574_v9, 4  ;;  %v1538_v17 = vld [vmem:[#allocation2 + $0x20] sm:$0x1]  ;;  %v1591_v30 = vshll.u32 %v1537_v46, 16 }
  0xec   : > { %2216 = vrot.lane.b32.xlu1 %v2125_v0, %s4184_s21  ;;  %v989_v0 = vld [vmem:[#allocation2 + $0x28] sm:$0xf]  ;;  %v5096_v35 = vrot.slane %v2175_v43, 4  ;;  %v1601_v25 = vshll.u32 %v1538_v17, 16  ;;  %v1536_v21 = vld [vmem:[#allocation2 + $0x18] sm:$0xf] }
  0xed   : > { %1901 = vrot.lane.b32.xlu0 %v1860_v16, %s4184_s21  ;;  %v1563_v16 = vrot.slane %v1561_v14, 5  ;;  %1005 = vst.msk [vmem:[#allocation3 + $0x8c] sm:$0xf] %vm490_vm0, %v989_v0  ;;  %v1580_v20 = vsel %vm4562_vm10, %v1575_v1, %v1579_v6  ;;  %v1307_v6 = vld [vmem:[#allocation2 + $0x24] sm:$0xe]  ;;  %v5116_v9 = vrot.slane %v1591_v30, 5 }
  0xee   : > { %1766 = vst.msk [vmem:[#allocation3 + $0x1c] sm:$0xf] %vm490_vm0, %v1580_v20  ;;  %v3585_v33 = vrot.slane %v1307_v6, 9  ;;  %v1953_v45 = vld [vmem:[#allocation2 + $0x28] sm:$0xf]  ;;  %v1603_v14 = vrot.slane %v1601_v25, 5 }
  0xef   : > { %v1564_v62 = vor.u32 %v1563_v16, %v1560_v28  ;;  %1969 = vst.msk [vmem:[#allocation3 + $0x48] sm:$0xf] %vm490_vm0, %v1953_v45  ;;  %v1582_v0 = vshrl.u32 %v1536_v21, 16  ;;  %v1585_v56 = vshll.u32 %v1536_v21, 16  ;;  %v991_v43 = vld [vmem:[#allocation2 + $0x34] sm:$0xf] }
  0xf0   : > { %1263 = vrot.lane.b32.xlu1 %v1232_v3, %s4184_s21  ;;  %v988_v3 = vld [vmem:[#allocation2 + $0x24] sm:$0xf]  ;;  %1007 = vst.msk [vmem:[#allocation3 + $0xb4] sm:$0xf] %vm490_vm0, %v991_v43  ;;  %v1311_v1 = vld [vmem:[#allocation2 + $0x34] sm:$0xf]  ;;  %v2163_v43 = vsel %vm4562_vm10, %v5048_v32, %v4980_v12 }
  0xf1   : > { %2214 = vrot.lane.b32.xlu0 %v2115_v4, %s4184_s21  ;;  %v1565_v44 = vrot.slane %v1564_v62, 4  ;;  %1004 = vst.msk [vmem:[#allocation3 + $0x78] sm:$0xf] %vm490_vm0, %v988_v3  ;;  %v1374_v4 = vrot.slane %v1372_v55, 4  ;;  %v1312_v28 = vld [vmem:[#allocation2 + $0x38] sm:$0x1] }
  0xf2   : > { %v1584_v27 = vrot.slane %v1582_v0, 4  ;;  %v1379_v23 = vrot.slane %v1311_v1, 5  ;;  %v1382_v20 = vrot.slane %v1312_v28, 5  ;;  %v990_v62 = vld [vmem:[#allocation2 + $0x30] sm:$0xf]  ;;  %v5143_v59 = vrot.slane %v2178_v36, 5 }
  0xf3   : > { %v1570_v37 = vsel %vm4562_vm10, %v1565_v44, %v1569_v8  ;;  %v1376_v40 = vsel %vm4633_vm13, %v1374_v4, %v1375_v57  ;;  %v1867_v8 = vsel %vm4633_vm13, %v3595_v19, %v1866_v22  ;;  %v1877_v22 = vsel %vm4633_vm13, %v4991_v18, %v1876_v29  ;;  %v1952_v19 = vld [vmem:[#allocation2 + $0x24] sm:$0xf]  ;;  %1006 = vst.msk [vmem:[#allocation3 + $0xa0] sm:$0xf] %vm490_vm0, %v990_v62  ;;  %v5146_v57 = vld [vmem:[#allocation2 + $0x60] sm:$0xe] }
  0xf4   : > { %1499 = vrot.lane.b32.xlu1 %v1452_v61, %s4184_s21  ;;  %v1595_v61 = vshrl.u32 %v1537_v46, 16  ;;  %1765 = vst.msk [vmem:[#allocation3 + $0x8] sm:$0xf] %vm490_vm0, %v1570_v37  ;;  %1428 = vst.msk [vmem:[#allocation3 + $0x90] sm:$0xf] %vm490_vm0, %v1376_v40  ;;  %v2139_v29 = vsel %vm4562_vm10, %v4998_v11, %v4931_v51  ;;  %v1874_v18 = vsel %vm4633_vm13, %v3596_v24, %v1873_v41  ;;  %v1381_v51 = vrot.slane %v1379_v23, 4 }
  0xf5   : > { %1261 = vrot.lane.b32.xlu0 %v1222_v15, %s4184_s21  ;;  %v1373_v15 = vsel %vm4633_vm13, %v3585_v33, %v1372_v55  ;;  %1968 = vst.msk [vmem:[#allocation3 + $0x34] sm:$0xf] %vm490_vm0, %v1952_v19  ;;  %v1541_v55 = vld [vmem:[#allocation2 + $0x2c] sm:$0x1]  ;;  %v1310_v4 = vld [vmem:[#allocation2 + $0x30] sm:$0xe] }
  0xf6   : > { %v1597_v50 = vrot.slane %v1595_v61, 4  ;;  %1427 = vst.msk [vmem:[#allocation3 + $0x7c] sm:$0xf] %vm490_vm0, %v1373_v15  ;;  %v1625_v2 = vshll.u32 %v1541_v55, 16  ;;  %v3586_v24 = vrot.slane %v1310_v4, 9  ;;  %v1383_v30 = vsel %vm4633_vm13, %v1381_v51, %v1382_v20 }
  0xf7   : > { %v1955_v36 = vld [vmem:[#allocation2 + $0x34] sm:$0xf]  ;;  %v1539_v46 = vld [vmem:[#allocation2 + $0x24] sm:$0xf]  ;;  %1430 = vst.msk [vmem:[#allocation3 + $0xb8] sm:$0xf] %vm490_vm0, %v1383_v30 }
  0xf8   : > { %1907 = vrot.lane.b32.xlu1 %v1870_v13, %s4184_s21  ;;  %v1598_v48 = vor.u32 %v1597_v50, %v5116_v9  ;;  %v1540_v13 = vld [vmem:[#allocation2 + $0x28] sm:$0xf]  ;;  %1971 = vst.msk [vmem:[#allocation3 + $0x70] sm:$0xf] %vm490_vm0, %v1955_v36  ;;  %v1627_v42 = vrot.slane %v1625_v2, 5  ;;  %v1606_v40 = vshrl.u32 %v1539_v46, 16 }
  0xf9   : > { %1497 = vrot.lane.b32.xlu0 %v1451_v52, %s4184_s21  ;;  %v1587_v52 = vrot.slane %v1585_v56, 5  ;;  %v1615_v11 = vshll.u32 %v1540_v13, 16  ;;  %v1619_v44 = vshrl.u32 %v1540_v13, 16  ;;  %v1609_v25 = vshll.u32 %v1539_v46, 16  ;;  %v1954_v33 = vld [vmem:[#allocation2 + $0x30] sm:$0xf] }
  0xfa   : > { %v1599_v38 = vrot.slane %v1598_v48, 4  ;;  %1970 = vst.msk [vmem:[#allocation3 + $0x5c] sm:$0xf] %vm490_vm0, %v1954_v33  ;;  %v1314_v21 = vld [vmem:[#allocation2 + $0x40] sm:$0xf]  ;;  %v1608_v15 = vrot.slane %v1606_v40, 4 }
  0xfb   : > { %v1588_v3 = vor.u32 %v1587_v52, %v1584_v27  ;;  %v5159_v61 = vrot.slane %v1615_v11, 5  ;;  %v1621_v6 = vrot.slane %v1619_v44, 4  ;;  %v1611_v0 = vrot.slane %v1609_v25, 5  ;;  %v992_v19 = vld [vmem:[#allocation2 + $0x3c] sm:$0xf] }
  0xfc   : > { %2220 = vrot.lane.b32.xlu1 %v2149_v60, %s4184_s21  ;;  %v1604_v41 = vsel %vm4562_vm10, %v1599_v38, %v1603_v14  ;;  %v1380_v60 = vsel %vm4633_vm13, %v3586_v24, %v1379_v23  ;;  %v3597_v14 = vrot.slane %v5146_v57, 9  ;;  %v1386_v56 = vrot.slane %v1314_v21, 5  ;;  %v1543_v1 = vld [vmem:[#allocation2 + $0x34] sm:$0xf]  ;;  %1008 = vst.msk [vmem:[#allocation3 + $0xc8] sm:$0xf] %vm490_vm0, %v992_v19 }
  0xfd   : > { %1905 = vrot.lane.b32.xlu0 %v1867_v8, %s4184_s21  ;;  %v1470_v16 = vpop.permute.xlu1 %1469  ;;  %1768 = vst.msk [vmem:[#allocation3 + $0x44] sm:$0xf] %vm490_vm0, %v1604_v41  ;;  %v1589_v17 = vrot.slane %v1588_v3, 4  ;;  %v2181_v8 = vor.u32 %v5143_v59, %v5096_v35  ;;  %v1622_v45 = vor.u32 %v1621_v6, %v5159_v61  ;;  %1429 = vst.msk [vmem:[#allocation3 + $0xa4] sm:$0xf] %vm490_vm0, %v1380_v60  ;;  %v1639_v52 = vshll.u32 %v1543_v1, 16 }
  0xfe   : > { %1517 = vst.msk [vmem:[#allocation3 + $0x4] sm:$0xf] %vm1281_vm14, %v1470_v16  ;;  %v1315_v35 = vld [vmem:[#allocation2 + $0x44] sm:$0x1]  ;;  %v1612_v28 = vor.u32 %v1611_v0, %v1608_v15  ;;  %v1388_v16 = vrot.slane %v1386_v56, 4  ;;  %v1643_v7 = vshrl.u32 %v1543_v1, 16  ;;  %v1881_v11 = vsel %vm4633_vm13, %v3597_v14, %v1880_v26 }
  0xff   : > { %v1594_v50 = vsel %vm4562_vm10, %v1589_v17, %v5116_v9  ;;  %v1884_v9 = vsel %vm4633_vm13, %v5046_v39, %v1883_v5  ;;  %v1389_v48 = vrot.slane %v1315_v35, 5  ;;  %v1544_v27 = vld [vmem:[#allocation2 + $0x38] sm:$0x1]  ;;  %v2197_v5 = vsel %vm4562_vm10, %v5069_v10, %v5052_v49  ;;  %v1313_v20 = vld [vmem:[#allocation2 + $0x3c] sm:$0xe] }
 0x100   : > { %1911 = vrot.lane.b32.xlu1 %v1877_v22, %s4184_s21  ;;  %1767 = vst.msk [vmem:[#allocation3 + $0x30] sm:$0xf] %vm490_vm0, %v1594_v50  ;;  %v1623_v22 = vrot.slane %v1622_v45, 4  ;;  %v5193_v39 = vrot.slane %v2181_v8, 4  ;;  %v1649_v32 = vshll.u32 %v1544_v27, 16  ;;  %v5202_v59 = vrot.slane %v1639_v52, 5 }
 0x101   : > { %2218 = vrot.lane.b32.xlu0 %v2139_v29, %s4184_s21  ;;  %v1472_v37 = vpop.permute.xlu1 %1471  ;;  %v1957_v62 = vld [vmem:[#allocation2 + $0x40] sm:$0xf]  ;;  %v1613_v29 = vrot.slane %v1612_v28, 4  ;;  %v1645_v49 = vrot.slane %v1643_v7, 4  ;;  %v1542_v10 = vld [vmem:[#allocation2 + $0x30] sm:$0xf] }
 0x102   : > { %1518 = vst.msk [vmem:[#allocation3 + $0x18] sm:$0xf] %vm1281_vm14, %v1472_v37  ;;  %v1628_v12 = vsel %vm4562_vm10, %v1623_v22, %v1627_v42  ;;  %v1651_v38 = vrot.slane %v1649_v32, 5  ;;  %v3587_v13 = vrot.slane %v1313_v20, 9  ;;  %v1630_v55 = vshrl.u32 %v1542_v10, 16  ;;  %v5252_v27 = vld [vmem:[%s5605_s3 + $0x110] sm:$0xff]  }
 0x103   : > { %1770 = vst.msk [vmem:[#allocation3 + $0x6c] sm:$0xf] %vm490_vm0, %v1628_v12  ;;  %1973 = vst.msk [vmem:[#allocation3 + $0x98] sm:$0xf] %vm490_vm0, %v1957_v62  ;;  %v1633_v57 = vshll.u32 %v1542_v10, 16  ;;  %v1618_v44 = vsel %vm4562_vm10, %v1613_v29, %v5159_v61  ;;  %v1646_v4 = vor.u32 %v1645_v49, %v5202_v59  ;;  %v2187_v61 = vsel %vm4562_vm10, %v5193_v39, %v5026_v34 }
 0x104   : > { %2224 = vrot.lane.b32.xlu1 %v2173_v53, %s4184_s21  ;;  %v995_v3 = vld [vmem:[#allocation2 + $0x4c] sm:$0xf]  ;;  %v1956_v53 = vld [vmem:[#allocation2 + $0x3c] sm:$0xf]  ;;  %1769 = vst.msk [vmem:[#allocation3 + $0x58] sm:$0xf] %vm490_vm0, %v1618_v44  ;;  %v1387_v58 = vsel %vm4633_vm13, %v3587_v13, %v1386_v56 }
 0x105   : > { %1909 = vrot.lane.b32.xlu0 %v1874_v18, %s4184_s21  ;;  %v1390_v18 = vsel %vm4633_vm13, %v1388_v16, %v1389_v48  ;;  %1011 = vst.msk [vmem:[#allocation3 + $0x104] sm:$0xf] %vm490_vm0, %v995_v3  ;;  %v1632_v2 = vrot.slane %v1630_v55, 4  ;;  %v1635_v24 = vrot.slane %v1633_v57, 5  ;;  %1972 = vst.msk [vmem:[#allocation3 + $0x84] sm:$0xf] %vm490_vm0, %v1956_v53 }
 0x106   : > { %1432 = vst.msk [vmem:[#allocation3 + $0xe0] sm:$0xf] %vm490_vm0, %v1390_v18  ;;  %v1317_v26 = vld [vmem:[#allocation2 + $0x4c] sm:$0xf]  ;;  %v1318_v36 = vld [vmem:[#allocation2 + $0x50] sm:$0x1] }
 0x107   : > { %v1234_v23 = vpop.permute.xlu0 %1233  ;;  %v1647_v46 = vrot.slane %v1646_v4, 4  ;;  %1431 = vst.msk [vmem:[#allocation3 + $0xcc] sm:$0xf] %vm490_vm0, %v1387_v58  ;;  %v1393_v37 = vrot.slane %v1317_v26, 5  ;;  %v1396_v17 = vrot.slane %v1318_v36, 5  ;;  %v1636_v6 = vor.u32 %v1635_v24, %v1632_v2 }
 0x108   : > { %1282 = vst.msk [vmem:[#allocation3] sm:$0xf] %vm1281_vm14, %v1234_v23  ;;  %1915 = vrot.lane.b32.xlu1 %v1884_v9, %s4184_s21  ;;  %v994_v30 = vld [vmem:[#allocation2 + $0x48] sm:$0xf]  ;;  %v1547_v42 = vld [vmem:[#allocation2 + $0x44] sm:$0x1] }
 0x109   : > { %2222 = vrot.lane.b32.xlu0 %v2163_v43, %s4184_s21  ;;  %1010 = vst.msk [vmem:[#allocation3 + $0xf0] sm:$0xf] %vm490_vm0, %v994_v30  ;;  %v1316_v60 = vld [vmem:[#allocation2 + $0x48] sm:$0xe]  ;;  %v1652_v25 = vsel %vm4562_vm10, %v1647_v46, %v1651_v38  ;;  %v1395_v33 = vrot.slane %v1393_v37, 4  ;;  %v1663_v8 = vshll.u32 %v1546_v31, 16 }
 0x10a   : > { %v1240_v51 = vpop.permute.xlu1 %1239  ;;  %v1667_v50 = vshrl.u32 %v1546_v31, 16  ;;  %v1959_v45 = vld [vmem:[#allocation2 + $0x4c] sm:$0xf]  ;;  %1772 = vst.msk [vmem:[#allocation3 + $0x94] sm:$0xf] %vm490_vm0, %v1652_v25  ;;  %v1637_v34 = vrot.slane %v1636_v6, 4 }
 0x10b   : > { %1285 = vst.msk [vmem:[#allocation3 + $0x3c] sm:$0xf] %vm1281_vm14, %v1240_v51  ;;  %v1236_v41 = vpop.permute.xlu0 %1235  ;;  %v1673_v14 = vshll.u32 %v1547_v42, 16  ;;  %v3588_v15 = vrot.slane %v1316_v60, 9  ;;  %v1545_v0 = vld [vmem:[#allocation2 + $0x3c] sm:$0xf]  ;;  %v1397_v35 = vsel %vm4633_vm13, %v1395_v33, %v1396_v17 }
 0x10c   : > { %1283 = vst.msk [vmem:[#allocation3 + $0x14] sm:$0xf] %vm1281_vm14, %v1236_v41  ;;  %2228 = vrot.lane.b32.xlu1 %v2197_v5, %s4184_s21  ;;  %v5238_v56 = vrot.slane %v1663_v8, 5  ;;  %v1669_v9 = vrot.slane %v1667_v50, 4  ;;  %v1654_v43 = vshrl.u32 %v1545_v0, 16  ;;  %v1642_v48 = vsel %vm4562_vm10, %v1637_v34, %v5202_v59  ;;  %v5268_v41 = vld [vmem:[%s5605_s3 + $0x108] sm:$0xff]  }
 0x10d   : > { %1913 = vrot.lane.b32.xlu0 %v1881_v11, %s4184_s21  ;;  %1975 = vst.msk [vmem:[#allocation3 + $0xc0] sm:$0xf] %vm490_vm0, %v1959_v45  ;;  %v997_v22 = vld [vmem:[#allocation2 + $0x58] sm:$0xf]  ;;  %1434 = vst.msk [vmem:[#allocation3 + $0x108] sm:$0xf] %vm490_vm0, %v1397_v35  ;;  %v1394_v19 = vsel %vm4633_vm13, %v3588_v15, %v1393_v37 }
 0x10e   : > { %v1476_v40 = vpop.permute.xlu1 %1475  ;;  %v1657_v1 = vshll.u32 %v1545_v0, 16  ;;  %1013 = vst.msk [vmem:[#allocation3 + $0x12c] sm:$0xf] %vm490_vm0, %v997_v22  ;;  %v1958_v28 = vld [vmem:[#allocation2 + $0x48] sm:$0xf]  ;;  %v1670_v52 = vor.u32 %v1669_v9, %v5238_v56  ;;  %v1675_v7 = vrot.slane %v1673_v14, 5 }
 0x10f   : > { %1520 = vst.msk [vmem:[#allocation3 + $0x40] sm:$0xf] %vm1281_vm14, %v1476_v40  ;;  %v1238_v21 = vpop.permute.xlu0 %1237  ;;  %v1656_v23 = vrot.slane %v1654_v43, 4  ;;  %v1320_v5 = vld [vmem:[#allocation2 + $0x58] sm:$0xf]  ;;  %v5296_v43 = vld [vmem:[%s5605_s3 + $0x100] sm:$0xff]  }
 0x110   : > { %1284 = vst.msk [vmem:[#allocation3 + $0x28] sm:$0xf] %vm1281_vm14, %v1238_v21  ;;  %v4031_v32 = vld [vmem:[#allocation3 + $0x4] ss:$20 sps:$4 sm:$0xff]   ;;  %v1659_v20 = vrot.slane %v1657_v1, 5  ;;  %v1671_v62 = vrot.slane %v1670_v52, 4 }
 0x111   : > { %2226 = vrot.lane.b32.xlu0 %v2187_v61, %s4184_s21  ;;  %1771 = vst.msk [vmem:[#allocation3 + $0x80] sm:$0xf] %vm490_vm0, %v1642_v48  ;;  %1433 = vst.msk [vmem:[#allocation3 + $0xf4] sm:$0xf] %vm490_vm0, %v1394_v19  ;;  %v1321_v29 = vld [vmem:[#allocation2 + $0x5c] sm:$0x1]  ;;  %2991 = vmatprep.mubr.bf16.mxu0 %v4031_v32 }
 0x112   : > { %v1244_v16 = vpop.permute.xlu1 %1243  ;;  %1974 = vst.msk [vmem:[#allocation3 + $0xac] sm:$0xf] %vm490_vm0, %v1958_v28  ;;  %v1400_v18 = vrot.slane %v1320_v5, 5  ;;  %v996_v59 = vld [vmem:[#allocation2 + $0x54] sm:$0xf]  ;;  %v1660_v49 = vor.u32 %v1659_v20, %v1656_v23  ;;  %v1403_v10 = vrot.slane %v1321_v29, 5  ;;  %v1676_v57 = vsel %vm4562_vm10, %v1671_v62, %v1675_v7 }
 0x113   : > { %1287 = vst.msk [vmem:[#allocation3 + $0x64] sm:$0xf] %vm1281_vm14, %v1244_v16  ;;  %v1474_v39 = vpop.permute.xlu0 %1473  ;;  %v4029_v12 = vld [vmem:[#allocation3] ss:$20 sps:$4 sm:$0xff]   ;;  %v1550_v13 = vld [vmem:[#allocation2 + $0x50] sm:$0x1] }
 0x114   : > { %1519 = vst.msk [vmem:[#allocation3 + $0x2c] sm:$0xf] %vm1281_vm14, %v1474_v39  ;;  %v1549_v38 = vld [vmem:[#allocation2 + $0x4c] sm:$0xf]  ;;  %2992 = vmatmul.mubr.bf16.vlgmr.msra.gmra.mxu0 %v4029_v12  ;;  %v1402_v3 = vrot.slane %v1400_v18, 4  ;;  %v1661_v53 = vrot.slane %v1660_v49, 4 }
 0x115   : > { %1012 = vst.msk [vmem:[#allocation3 + $0x118] sm:$0xf] %vm490_vm0, %v996_v59  ;;  %v1687_v51 = vshll.u32 %v1549_v38, 16  ;;  %v1691_v11 = vshrl.u32 %v1549_v38, 16  ;;  %v1319_v44 = vld [vmem:[#allocation2 + $0x54] sm:$0xe]  ;;  %3905 = vmatpush3.bf16.msra.mxu0 %v4880_v54 }
 0x116   : > { %v1480_v55 = vpop.permute.xlu1 %1479  ;;  %1774 = vst.msk [vmem:[#allocation3 + $0xbc] sm:$0xf] %vm490_vm0, %v1676_v57  ;;  %v1697_v58 = vshll.u32 %v1550_v13, 16  ;;  %v3589_v2 = vrot.slane %v1319_v44, 9  ;;  %v1961_v24 = vld [vmem:[#allocation2 + $0x58] sm:$0xf]  ;;  %3906 = vmatprep.subr.bf16.mxu0 %v5252_v27  ;;  %v1404_v26 = vsel %vm4633_vm13, %v1402_v3, %v1403_v10  ;;  %v1666_v17 = vsel %vm4562_vm10, %v1661_v53, %v5238_v56 }
 0x117   : > { %1522 = vst.msk [vmem:[#allocation3 + $0x68] sm:$0xf] %vm1281_vm14, %v1480_v55  ;;  %v1242_v4 = vpop.permute.xlu0 %1241  ;;  %v5274_v36 = vrot.slane %v1687_v51, 5  ;;  %v1693_v54 = vrot.slane %v1691_v11, 4  ;;  %v1548_v46 = vld [vmem:[#allocation2 + $0x48] sm:$0xf] }
 0x118   : > { %1286 = vst.msk [vmem:[#allocation3 + $0x50] sm:$0xf] %vm1281_vm14, %v1242_v4  ;;  %v1552_v37 = vld [vmem:[#allocation2 + $0x58] sm:$0xf]  ;;  %v1699_v30 = vrot.slane %v1697_v58, 5  ;;  %v1401_v61 = vsel %vm4633_vm13, %v3589_v2, %v1400_v18  ;;  %v1678_v6 = vshrl.u32 %v1548_v46, 16 }
 0x119   : > { %1977 = vst.msk [vmem:[#allocation3 + $0xe8] sm:$0xf] %vm490_vm0, %v1961_v24  ;;  %1436 = vst.msk [vmem:[#allocation3 + $0x130] sm:$0xf] %vm490_vm0, %v1404_v26  ;;  %v1553_v31 = vld [vmem:[#allocation2 + $0x5c] sm:$0x1]  ;;  %v1694_v40 = vor.u32 %v1693_v54, %v5274_v36  ;;  %3907 = vmatpush3.bf16.msra.mxu0 %v5252_v27 }
 0x11a   : > { %v1960_v42 = vld [vmem:[#allocation2 + $0x54] sm:$0xf]  ;;  %v1888_v60 = vpop.permute.xlu1 %1887  ;;  %1773 = vst.msk [vmem:[#allocation3 + $0xa8] sm:$0xf] %vm490_vm0, %v1666_v17  ;;  %1435 = vst.msk [vmem:[#allocation3 + $0x11c] sm:$0xf] %vm490_vm0, %v1401_v61  ;;  %3908 = vmatprep.subr.bf16.mxu0 %v5268_v41 }
 0x11b   : > { %v1681_v25 = vshll.u32 %v1548_v46, 16  ;;  %v1711_v33 = vshll.u32 %v1552_v37, 16  ;;  %v1715_v8 = vshrl.u32 %v1552_v37, 16  ;;  %1976 = vst.msk [vmem:[#allocation3 + $0xd4] sm:$0xf] %vm490_vm0, %v1960_v42  ;;  %v1478_v50 = vpop.permute.xlu0 %1477  ;;  %v2404_v45 = vld [vmem:[#allocation3 + $0x28] sm:$0xff] }
 0x11c   : > { %1934 = vst.msk [vmem:[#allocation3 + $0x1c] sm:$0xf] %vm1281_vm14, %v1888_v60  ;;  %v2407_v21 = vld [vmem:[#allocation3 + $0x3c] sm:$0xff]  ;;  %v1680_v14 = vrot.slane %v1678_v6, 4  ;;  %v1721_v15 = vshll.u32 %v1553_v31, 16  ;;  %v1695_v35 = vrot.slane %v1694_v40, 4 }
 0x11d   : > { %v4036_v34 = vld [vmem:[#allocation3 + $0x2c] ss:$20 sps:$4 sm:$0xff]   ;;  %1521 = vst.msk [vmem:[#allocation3 + $0x54] sm:$0xf] %vm1281_vm14, %v1478_v50  ;;  %v3611_v0 = vcombine.low %v2404_v45, %v2407_v21  ;;  %v1683_v56 = vrot.slane %v1681_v25, 5  ;;  %v5291_v9 = vrot.slane %v1711_v33, 5  ;;  %3909 = vmatpush3.bf16.msra.mxu0 %v5268_v41 }
 0x11e   : > { %2999 = vmatprep.mubr.bf16.mxu0 %v4036_v34  ;;  %v1717_v22 = vrot.slane %v1715_v8, 4  ;;  %v1723_v48 = vrot.slane %v1721_v15, 5  ;;  %v1963_v19 = vld [vmem:[#allocation2 + $0x64] sm:$0xf]  ;;  %v1551_v1 = vld [vmem:[#allocation2 + $0x54] sm:$0xf]  ;;  %v2201_v28 = vpop.permute.xlu1 %2200  ;;  %v1700_v16 = vsel %vm4562_vm10, %v1695_v35, %v1699_v30  ;;  %3910 = vmatprep.subr.bf16.mxu0 %v5296_v43 }
 0x11f   : > { %3000 = vmatmul.mubr.bf16.gmra.mxu0 %v3611_v0  ;;  %v1684_v52 = vor.u32 %v1683_v56, %v1680_v14  ;;  %1979 = vst.msk [vmem:[#allocation3 + $0x110] sm:$0xf] %vm490_vm0, %v1963_v19  ;;  %v1702_v7 = vshrl.u32 %v1551_v1, 16  ;;  %v1705_v23 = vshll.u32 %v1551_v1, 16  ;;  %v1555_v5 = vld [vmem:[#allocation2 + $0x64] sm:$0xf]  ;;  %v1886_v39 = vpop.permute.xlu0 %1885 }
 0x120   : > { %2247 = vst.msk [vmem:[#allocation3 + $0x20] sm:$0xf] %vm1281_vm14, %v2201_v28  ;;  %v1718_v12 = vor.u32 %v1717_v22, %v5291_v9  ;;  %v1556_v32 = vld [vmem:[#allocation2 + $0x68] sm:$0x1]  ;;  %v1735_v20 = vshll.u32 %v1555_v5, 16  ;;  %v1739_v62 = vshrl.u32 %v1555_v5, 16 }
 0x121   : > { %1776 = vst.msk [vmem:[#allocation3 + $0xe4] sm:$0xf] %vm490_vm0, %v1700_v16  ;;  %v1962_v29 = vld [vmem:[#allocation2 + $0x60] sm:$0xf]  ;;  %v1685_v18 = vrot.slane %v1684_v52, 4  ;;  %v1704_v59 = vrot.slane %v1702_v7, 4  ;;  %3911 = vmatpush3.bf16.msra.mxu0 %v5296_v43 }
 0x122   : > { %1933 = vst.msk [vmem:[#allocation3 + $0x8] sm:$0xf] %vm1281_vm14, %v1886_v39  ;;  %v1707_v49 = vrot.slane %v1705_v23, 5  ;;  %v1745_v10 = vshll.u32 %v1556_v32, 16  ;;  %v2262_v38 = vld [vmem:[#allocation2 + $0x18] sm:$0xe]  ;;  %v1248_v44 = vpop.permute.xlu1 %1247 }
 0x123   : > { %1978 = vst.msk [vmem:[#allocation3 + $0xfc] sm:$0xf] %vm490_vm0, %v1962_v29  ;;  %v2413_v13 = vld [vmem:[#allocation3 + $0x64] sm:$0xff]  ;;  %v1719_v55 = vrot.slane %v1718_v12, 4  ;;  %v5308_v57 = vrot.slane %v1735_v20, 5  ;;  %v1741_v3 = vrot.slane %v1739_v62, 4  ;;  %v1690_v4 = vsel %vm4562_vm10, %v1685_v18, %v5274_v36  ;;  %v2199_v54 = vpop.permute.xlu0 %2198 }
 0x124   : > { %v2263_v51 = vld [vmem:[#allocation2 + $0x1c] sm:$0xf]  ;;  %v3598_v11 = vrot.slane %v2262_v38, 9  ;;  %v1708_v53 = vor.u32 %v1707_v49, %v1704_v59  ;;  %v1747_v58 = vrot.slane %v1745_v10, 5  ;;  %v2264_v2 = vld [vmem:[#allocation2 + $0x20] sm:$0x1] }
 0x125   : > { %v2312_v24 = vrot.slane %v2263_v51, 5  ;;  %v1965_v26 = vld [vmem:[#allocation2 + $0x70] sm:$0xf]  ;;  %1289 = vst.msk [vmem:[#allocation3 + $0x8c] sm:$0xf] %vm1281_vm14, %v1248_v44  ;;  %v2410_v46 = vld [vmem:[#allocation3 + $0x50] sm:$0xff]  ;;  %v1724_v17 = vsel %vm4562_vm10, %v1719_v55, %v1723_v48  ;;  %v1742_v30 = vor.u32 %v1741_v3, %v5308_v57 }
 0x126   : > { %v4042_v37 = vld [vmem:[#allocation3 + $0x54] ss:$20 sps:$4 sm:$0xff]   ;;  %1775 = vst.msk [vmem:[#allocation3 + $0xd0] sm:$0xf] %vm490_vm0, %v1690_v4  ;;  %v2315_v36 = vrot.slane %v2264_v2, 5  ;;  %v3616_v6 = vcombine.low %v2410_v46, %v2413_v13  ;;  %v1709_v31 = vrot.slane %v1708_v53, 4  ;;  %v1484_v34 = vpop.permute.xlu1 %1483 }
 0x127   : > { %1981 = vst.msk [vmem:[#allocation3 + $0x138] sm:$0xf] %vm490_vm0, %v1965_v26  ;;  %v1554_v61 = vld [vmem:[#allocation2 + $0x60] sm:$0xf]  ;;  %1778 = vst.msk [vmem:[#allocation3 + $0x10c] sm:$0xf] %vm490_vm0, %v1724_v17  ;;  %v2313_v42 = vsel %vm4633_vm13, %v3598_v11, %v2312_v24  ;;  %3007 = vmatprep.mubr.bf16.mxu0 %v4042_v37  ;;  %v1246_v22 = vpop.permute.xlu0 %1245 }
 0x128   : > { %2246 = vst.msk [vmem:[#allocation3 + $0xc] sm:$0xf] %vm1281_vm14, %v2199_v54  ;;  %v2314_v60 = vrot.slane %v2312_v24, 4  ;;  %v2265_v40 = vld [vmem:[#allocation2 + $0x24] sm:$0xe]  ;;  %v1743_v33 = vrot.slane %v1742_v30, 4  ;;  %3008 = vmatmul.mubr.bf16.gmra.mxu0 %v3616_v6  ;;  %v1714_v14 = vsel %vm4562_vm10, %v1709_v31, %v5291_v9 }
 0x129   : > { %v2266_v25 = vld [vmem:[#allocation2 + $0x28] sm:$0xf]  ;;  %2382 = vst.msk [vmem:[#allocation3 + $0x10] sm:$0xf] %vm490_vm0, %v2313_v42  ;;  %v1726_v8 = vshrl.u32 %v1554_v61, 16  ;;  %v1729_v50 = vshll.u32 %v1554_v61, 16 }
 0x12a   : > { %v2267_v45 = vld [vmem:[#allocation2 + $0x2c] sm:$0x1]  ;;  %v3599_v21 = vrot.slane %v2265_v40, 9  ;;  %v2316_v15 = vsel %vm4633_vm13, %v2314_v60, %v2315_v36  ;;  %v2319_v0 = vrot.slane %v2266_v25, 5  ;;  %1524 = vst.msk [vmem:[#allocation3 + $0x90] sm:$0xf] %vm1281_vm14, %v1484_v34  ;;  %v1748_v48 = vsel %vm4562_vm10, %v1743_v33, %v1747_v58  ;;  %v1892_v62 = vpop.permute.xlu1 %1891 }
 0x12b   : > { %v2322_v35 = vrot.slane %v2267_v45, 5  ;;  %v1964_v56 = vld [vmem:[#allocation2 + $0x6c] sm:$0xf]  ;;  %1777 = vst.msk [vmem:[#allocation3 + $0xf8] sm:$0xf] %vm490_vm0, %v1714_v14  ;;  %v1728_v19 = vrot.slane %v1726_v8, 4  ;;  %v1482_v13 = vpop.permute.xlu0 %1481 }
 0x12c   : > { %2383 = vst.msk [vmem:[#allocation3 + $0x24] sm:$0xf] %vm490_vm0, %v2316_v15  ;;  %v1731_v1 = vrot.slane %v1729_v50, 5  ;;  %1980 = vst.msk [vmem:[#allocation3 + $0x124] sm:$0xf] %vm490_vm0, %v1964_v56  ;;  %v2320_v16 = vsel %vm4633_vm13, %v3599_v21, %v2319_v0  ;;  %v2321_v52 = vrot.slane %v2319_v0, 4 }
 0x12d   : > { %v2268_v9 = vld [vmem:[#allocation2 + $0x30] sm:$0xe]  ;;  %v2269_v28 = vld [vmem:[#allocation2 + $0x34] sm:$0xf]  ;;  %1288 = vst.msk [vmem:[#allocation3 + $0x78] sm:$0xf] %vm1281_vm14, %v1246_v22 }
 0x12e   : > { %1780 = vst.msk [vmem:[#allocation3 + $0x134] sm:$0xf] %vm490_vm0, %v1748_v48  ;;  %v2270_v7 = vld [vmem:[#allocation2 + $0x38] sm:$0x1]  ;;  %v3600_v23 = vrot.slane %v2268_v9, 9  ;;  %v2326_v5 = vrot.slane %v2269_v28, 5  ;;  %v1732_v39 = vor.u32 %v1731_v1, %v1728_v19  ;;  %v2323_v29 = vsel %vm4633_vm13, %v2321_v52, %v2322_v35  ;;  %v2205_v46 = vpop.permute.xlu1 %2204 }
 0x12f   : > { %2384 = vst.msk [vmem:[#allocation3 + $0x38] sm:$0xf] %vm490_vm0, %v2320_v16  ;;  %v2329_v12 = vrot.slane %v2270_v7, 5  ;;  %v2271_v32 = vld [vmem:[#allocation2 + $0x3c] sm:$0xe]  ;;  %v1890_v30 = vpop.permute.xlu0 %1889  ;;  %s4089_s21 = scalar_lea.vmem %s3357_s15, 32 }
 0x130   : > { %v2272_v20 = vld [vmem:[#allocation2 + $0x40] sm:$0xf]  ;;  %v2327_v18 = vsel %vm4633_vm13, %v3600_v23, %v2326_v5  ;;  %v2328_v59 = vrot.slane %v2326_v5, 4  ;;  %v2273_v49 = vld [vmem:[#allocation2 + $0x44] sm:$0x1]  ;;  %v3601_v10 = vrot.slane %v2271_v32, 9  ;;  %p4090_p6 = scmp.ne.s32.totalorder %s3357_s15, %s4089_s21 }
 0x131   : > { %v2274_v38 = vld [vmem:[#allocation2 + $0x48] sm:$0xe]  ;;  %1936 = vst.msk [vmem:[#allocation3 + $0x44] sm:$0xf] %vm1281_vm14, %v1892_v62  ;;  %v4048_v55 = vld [vmem:[#allocation3 + $0x8] ss:$20 sps:$4 sm:$0xff]  }
 0x132   : > { %v4050_v3 = vld [vmem:[#allocation3 + $0xc] ss:$20 sps:$4 sm:$0xff]   ;;  %v1733_v51 = vrot.slane %v1732_v39, 4  ;;  %2385 = vst.msk [vmem:[#allocation3 + $0x4c] sm:$0xf] %vm490_vm0, %v2323_v29  ;;  %v2330_v11 = vsel %vm4633_vm13, %v2328_v59, %v2329_v12  ;;  %v2333_v44 = vrot.slane %v2272_v20, 5  ;;  %v1252_v21 = vpop.permute.xlu1 %1251  ;;  %p4091_p7 = pnand %p4090_p6, %p4282_p3 }
 0x133   : > { %2386 = vst.msk [vmem:[#allocation3 + $0x60] sm:$0xf] %vm490_vm0, %v2327_v18  ;;  %v2336_v4 = vrot.slane %v2273_v49, 5  ;;  %v2275_v53 = vld [vmem:[#allocation2 + $0x4c] sm:$0xf]  ;;  %3088 = vmatprep.mubr.bf16.mxu1 %v4050_v3  ;;  %v3602_v24 = vrot.slane %v2274_v38, 9  ;;  %v2203_v15 = vpop.permute.xlu0 %2202 }
 0x134   : > { %1523 = vst.msk [vmem:[#allocation3 + $0x7c] sm:$0xf] %vm1281_vm14, %v1482_v13  ;;  %v1738_v58 = vsel %vm4562_vm10, %v1733_v51, %v5308_v57  ;;  %v2276_v2 = vld [vmem:[#allocation2 + $0x50] sm:$0x1]  ;;  %v2340_v26 = vrot.slane %v2275_v53, 5  ;;  %3089 = vmatmul.mubr.bf16.vlgmr.msra.gmra.mxu1 %v4048_v55  ;;  %v2334_v37 = vsel %vm4633_vm13, %v3601_v10, %v2333_v44  ;;  %v2335_v17 = vrot.slane %v2333_v44, 4  ;;  %p4092_p9 = pneg %p4091_p7 }
 0x135   : > { %2387 = vst.msk [vmem:[#allocation3 + $0x74] sm:$0xf] %vm490_vm0, %v2330_v11  ;;  %v2277_v54 = vld [vmem:[#allocation2 + $0x54] sm:$0xe]  ;;  %1779 = vst.msk [vmem:[#allocation3 + $0x120] sm:$0xf] %vm490_vm0, %v1738_v58  ;;  %3932 = vmatpush3.bf16.msra.mxu1 %v4088_v47 }
 0x136   : > { %2249 = vst.msk [vmem:[#allocation3 + $0x48] sm:$0xf] %vm1281_vm14, %v2205_v46  ;;  %v2341_v57 = vsel %vm4633_vm13, %v3602_v24, %v2340_v26  ;;  %v2342_v36 = vrot.slane %v2340_v26, 4  ;;  %v2343_v61 = vrot.slane %v2276_v2, 5  ;;  %v2278_v6 = vld [vmem:[#allocation2 + $0x58] sm:$0xf]  ;;  %3929 = vmatprep.subr.bf16.mxu1 %v5252_v27  ;;  %v2337_v42 = vsel %vm4633_vm13, %v2335_v17, %v2336_v4  ;;  %v1488_v7 = vpop.permute.xlu1 %1487 }
 0x137   : > { %2388 = vst.msk [vmem:[#allocation3 + $0x88] sm:$0xf] %vm490_vm0, %v2334_v37  ;;  %v2279_v31 = vld [vmem:[#allocation2 + $0x5c] sm:$0x1]  ;;  %2390 = vst.msk [vmem:[#allocation3 + $0xb0] sm:$0xf] %vm490_vm0, %v2341_v57  ;;  %v1250_v39 = vpop.permute.xlu0 %1249 }
 0x138   : > { %1935 = vst.msk [vmem:[#allocation3 + $0x30] sm:$0xf] %vm1281_vm14, %v1890_v30  ;;  %v3603_v60 = vrot.slane %v2277_v54, 9  ;;  %v2347_v40 = vrot.slane %v2278_v6, 5  ;;  %v2350_v25 = vrot.slane %v2279_v31, 5  ;;  %v2344_v33 = vsel %vm4633_vm13, %v2342_v36, %v2343_v61  ;;  %v2419_v34 = vld [vmem:[#allocation3 + $0x8c] sm:$0xff] }
 0x139   : > { %2389 = vst.msk [vmem:[#allocation3 + $0x9c] sm:$0xf] %vm490_vm0, %v2337_v42  ;;  %v2280_v8 = vld [vmem:[#allocation2 + $0x60] sm:$0xe]  ;;  %v2281_v50 = vld [vmem:[#allocation2 + $0x64] sm:$0xf]  ;;  %3933 = vmatpush3.bf16.msra.mxu1 %v5252_v27 }
 0x13a   : > { %v2282_v45 = vld [vmem:[#allocation2 + $0x68] sm:$0x1]  ;;  %2391 = vst.msk [vmem:[#allocation3 + $0xc4] sm:$0xf] %vm490_vm0, %v2344_v33  ;;  %v2348_v14 = vsel %vm4633_vm13, %v3603_v60, %v2347_v40  ;;  %v2349_v56 = vrot.slane %v2347_v40, 4  ;;  %v3604_v22 = vrot.slane %v2280_v8, 9  ;;  %3930 = vmatprep.subr.bf16.mxu1 %v5268_v41  ;;  %v1896_v18 = vpop.permute.xlu1 %1895 }
 0x13b   : > { %1291 = vst.msk [vmem:[#allocation3 + $0xb4] sm:$0xf] %vm1281_vm14, %v1252_v21  ;;  %v2416_v0 = vld [vmem:[#allocation3 + $0x78] sm:$0xff]  ;;  %v2354_v48 = vrot.slane %v2281_v50, 5  ;;  %2248 = vst.msk [vmem:[#allocation3 + $0x34] sm:$0xf] %vm1281_vm14, %v2203_v15 }
 0x13c   : > { %v4051_v35 = vld [vmem:[#allocation3 + $0x7c] ss:$20 sps:$4 sm:$0xff]   ;;  %2392 = vst.msk [vmem:[#allocation3 + $0xd8] sm:$0xf] %vm490_vm0, %v2348_v14  ;;  %v3621_v19 = vcombine.low %v2416_v0, %v2419_v34  ;;  %v2357_v1 = vrot.slane %v2282_v45, 5  ;;  %v2351_v9 = vsel %vm4633_vm13, %v2349_v56, %v2350_v25 }
 0x13d   : > { %3015 = vmatprep.mubr.bf16.mxu0 %v4051_v35  ;;  %v2355_v28 = vsel %vm4633_vm13, %v3604_v22, %v2354_v48  ;;  %v2356_v16 = vrot.slane %v2354_v48, 4  ;;  %v2283_v27 = vld [vmem:[#allocation2 + $0x6c] sm:$0xe]  ;;  %v2284_v52 = vld [vmem:[#allocation2 + $0x70] sm:$0xf]  ;;  %3934 = vmatpush3.bf16.msra.mxu1 %v5268_v41  ;;  %v1486_v41 = vpop.permute.xlu0 %1485  ;;  %v2408_v49 = vld [vmem:[#allocation3 + $0x44] sm:$0xff] }
 0x13e   : > { %3016 = vmatmul.mubr.bf16.gmra.mxu0 %v3621_v19  ;;  %2393 = vst.msk [vmem:[#allocation3 + $0xec] sm:$0xf] %vm490_vm0, %v2351_v9  ;;  %2394 = vst.msk [vmem:[#allocation3 + $0x100] sm:$0xf] %vm490_vm0, %v2355_v28  ;;  %v2285_v23 = vld [vmem:[#allocation2 + $0x74] sm:$0x1]  ;;  %3931 = vmatprep.subr.bf16.mxu1 %v5296_v43  ;;  %v2209_v55 = vpop.permute.xlu1 %2208 }
 0x13f   : > { %v3605_v5 = vrot.slane %v2283_v27, 9  ;;  %1526 = vst.msk [vmem:[#allocation3 + $0xb8] sm:$0xf] %vm1281_vm14, %v1488_v7  ;;  %v2358_v12 = vsel %vm4633_vm13, %v2356_v16, %v2357_v1  ;;  %v2361_v32 = vrot.slane %v2284_v52, 5  ;;  %v2364_v20 = vrot.slane %v2285_v23, 5 }
 0x140   : > { %1290 = vst.msk [vmem:[#allocation3 + $0xa0] sm:$0xf] %vm1281_vm14, %v1250_v39  ;;  %1938 = vst.msk [vmem:[#allocation3 + $0x6c] sm:$0xf] %vm1281_vm14, %v1896_v18  ;;  %v4075_v39 = vld [vmem:[#allocation3 + $0x10] ss:$20 sps:$4 sm:$0xff]  }
 0x141   : > { %2395 = vst.msk [vmem:[#allocation3 + $0x114] sm:$0xf] %vm490_vm0, %v2358_v12  ;;  %v2362_v62 = vsel %vm4633_vm13, %v3605_v5, %v2361_v32  ;;  %v2363_v29 = vrot.slane %v2361_v32, 4  ;;  %3935 = vmatpush3.bf16.msra.mxu1 %v5296_v43  ;;  %v1894_v3 = vpop.permute.xlu0 %1893 }
 0x142   : > { %2396 = vst.msk [vmem:[#allocation3 + $0x128] sm:$0xf] %vm490_vm0, %v2362_v62  ;;  %v2405_v59 = vld [vmem:[#allocation3 + $0x30] sm:$0xff]  ;;  %v1256_v51 = vpop.permute.xlu1 %1255 }
 0x143   : > { %v4053_v10 = vld [vmem:[#allocation3 + $0x34] ss:$20 sps:$4 sm:$0xff]   ;;  %v2365_v38 = vsel %vm4633_vm13, %v2363_v29, %v2364_v20  ;;  %1525 = vst.msk [vmem:[#allocation3 + $0xa4] sm:$0xf] %vm1281_vm14, %v1486_v41  ;;  %v3613_v13 = vcombine.low %v2405_v59, %v2408_v49  ;;  %2251 = vst.msk [vmem:[#allocation3 + $0x70] sm:$0xf] %vm1281_vm14, %v2209_v55 }
 0x144   : > { %2397 = vst.msk [vmem:[#allocation3 + $0x13c] sm:$0xf] %vm490_vm0, %v2365_v38  ;;  %3096 = vmatprep.mubr.bf16.mxu1 %v4053_v10  ;;  %v4076_v49 = vld [vmem:[#allocation3 + $0x38] ss:$20 sps:$4 sm:$0xff]   ;;  %v4079_v10 = vld [vmem:[#allocation3 + $0x60] ss:$20 sps:$4 sm:$0xff]  }
 0x145   : > { %3097 = vmatmul.mubr.bf16.gmra.mxu1 %v3613_v13  ;;  %1937 = vst.msk [vmem:[#allocation3 + $0x58] sm:$0xf] %vm1281_vm14, %v1894_v3  ;;  %1293 = vst.msk [vmem:[#allocation3 + $0xdc] sm:$0xf] %vm1281_vm14, %v1256_v51  ;;  %v2207_v43 = vpop.permute.xlu0 %2206 }
 0x146   : > { %v2425_v11 = vld [vmem:[#allocation3 + $0xb4] sm:$0xff]  ;;  %2250 = vst.msk [vmem:[#allocation3 + $0x5c] sm:$0xf] %vm1281_vm14, %v2207_v43  ;;  %v1492_v53 = vpop.permute.xlu1 %1491 }
 0x147   : > { %1528 = vst.msk [vmem:[#allocation3 + $0xe0] sm:$0xf] %vm1281_vm14, %v1492_v53 }
 0x149   : > { %v1254_v58 = vpop.permute.xlu0 %1253 }
 0x14a   : > { %v2422_v63 = vld [vmem:[#allocation3 + $0xa0] sm:$0xff]  ;;  %1292 = vst.msk [vmem:[#allocation3 + $0xc8] sm:$0xf] %vm1281_vm14, %v1254_v58  ;;  %v1900_v2 = vpop.permute.xlu1 %1899  ;;  %v2414_v54 = vld [vmem:[#allocation3 + $0x6c] sm:$0xff] }
 0x14b   : > { %v4055_v44 = vld [vmem:[#allocation3 + $0xa4] ss:$20 sps:$4 sm:$0xff]   ;;  %v3626_v4 = vcombine.low %v2422_v63, %v2425_v11  ;;  %1940 = vst.msk [vmem:[#allocation3 + $0x94] sm:$0xf] %vm1281_vm14, %v1900_v2  ;;  %v4080_v63 = vld [vmem:[#allocation3 + $0x88] ss:$20 sps:$4 sm:$0xff]  }
 0x14c   : > { %3023 = vmatprep.mubr.bf16.mxu0 %v4055_v44 }
 0x14d   : > { %3024 = vmatmul.mubr.bf16.gmra.mxu0 %v3626_v4  ;;  %v1490_v24 = vpop.permute.xlu0 %1489  ;;  %v2411_v26 = vld [vmem:[#allocation3 + $0x58] sm:$0xff] }
 0x14e   : > { %v4058_v46 = vld [vmem:[#allocation3 + $0x5c] ss:$20 sps:$4 sm:$0xff]   ;;  %1527 = vst.msk [vmem:[#allocation3 + $0xcc] sm:$0xf] %vm1281_vm14, %v1490_v24  ;;  %v3618_v37 = vcombine.low %v2411_v26, %v2414_v54  ;;  %v2213_v17 = vpop.permute.xlu1 %2212 }
 0x14f   : > { %3104 = vmatprep.mubr.bf16.mxu1 %v4058_v46  ;;  %2253 = vst.msk [vmem:[#allocation3 + $0x98] sm:$0xf] %vm1281_vm14, %v2213_v17  ;;  %v2431_v61 = vld [vmem:[#allocation3 + $0xdc] sm:$0xff]  ;;  %v4084_v24 = vld [vmem:[#allocation3 + $0xb0] ss:$20 sps:$4 sm:$0xff]  }
 0x150   : > { %3105 = vmatmul.mubr.bf16.gmra.mxu1 %v3618_v37  ;;  %v4085_v46 = vld [vmem:[#allocation3 + $0xd8] ss:$20 sps:$4 sm:$0xff]   ;;  %v4086_v37 = vld [vmem:[#allocation3 + $0x100] ss:$20 sps:$4 sm:$0xff]   ;;  %v4087_v17 = vld [vmem:[#allocation3 + $0x128] ss:$20 sps:$4 sm:$0xff]  }
 0x151   : > { %v1898_v30 = vpop.permute.xlu0 %1897 }
 0x152   : > { %1939 = vst.msk [vmem:[#allocation3 + $0x80] sm:$0xf] %vm1281_vm14, %v1898_v30  ;;  %v1260_v47 = vpop.permute.xlu1 %1259 }
 0x153   : > { %1295 = vst.msk [vmem:[#allocation3 + $0x104] sm:$0xf] %vm1281_vm14, %v1260_v47 }
 0x155   : > { %v2211_v57 = vpop.permute.xlu0 %2210  ;;  %v2428_v36 = vld [vmem:[#allocation3 + $0xc8] sm:$0xff] }
 0x156   : > { %v4060_v6 = vld [vmem:[#allocation3 + $0xcc] ss:$20 sps:$4 sm:$0xff]   ;;  %2252 = vst.msk [vmem:[#allocation3 + $0x84] sm:$0xf] %vm1281_vm14, %v2211_v57  ;;  %v3631_v31 = vcombine.low %v2428_v36, %v2431_v61  ;;  %v1496_v42 = vpop.permute.xlu1 %1495  ;;  %v2420_v8 = vld [vmem:[#allocation3 + $0x94] sm:$0xff] }
 0x157   : > { %3031 = vmatprep.mubr.bf16.mxu0 %v4060_v6  ;;  %1530 = vst.msk [vmem:[#allocation3 + $0x108] sm:$0xf] %vm1281_vm14, %v1496_v42 }
 0x158   : > { %3032 = vmatmul.mubr.bf16.gmra.mxu0 %v3631_v31 }
 0x159   : > { %v1258_v60 = vpop.permute.xlu0 %1257 }
 0x15a   : > { %1294 = vst.msk [vmem:[#allocation3 + $0xf0] sm:$0xf] %vm1281_vm14, %v1258_v60  ;;  %v1904_v40 = vpop.permute.xlu1 %1903 }
 0x15b   : > { %1942 = vst.msk [vmem:[#allocation3 + $0xbc] sm:$0xf] %vm1281_vm14, %v1904_v40 }
 0x15d   : > { %v1494_v25 = vpop.permute.xlu0 %1493  ;;  %v2417_v33 = vld [vmem:[#allocation3 + $0x80] sm:$0xff] }
 0x15e   : > { %v4063_v50 = vld [vmem:[#allocation3 + $0x84] ss:$20 sps:$4 sm:$0xff]   ;;  %1529 = vst.msk [vmem:[#allocation3 + $0xf4] sm:$0xf] %vm1281_vm14, %v1494_v25  ;;  %v3623_v45 = vcombine.low %v2417_v33, %v2420_v8  ;;  %v2217_v21 = vpop.permute.xlu1 %2216 }
 0x15f   : > { %3112 = vmatprep.mubr.bf16.mxu1 %v4063_v50  ;;  %2255 = vst.msk [vmem:[#allocation3 + $0xc0] sm:$0xf] %vm1281_vm14, %v2217_v21  ;;  %v2437_v35 = vld [vmem:[#allocation3 + $0x104] sm:$0xff] }
 0x160   : > { %3113 = vmatmul.mubr.bf16.gmra.mxu1 %v3623_v45 }
 0x161   : > { %v1902_v34 = vpop.permute.xlu0 %1901 }
 0x162   : > { %1941 = vst.msk [vmem:[#allocation3 + $0xa8] sm:$0xf] %vm1281_vm14, %v1902_v34  ;;  %v1264_v14 = vpop.permute.xlu1 %1263 }
 0x163   : > { %1297 = vst.msk [vmem:[#allocation3 + $0x12c] sm:$0xf] %vm1281_vm14, %v1264_v14 }
 0x165   : > { %v2215_v15 = vpop.permute.xlu0 %2214  ;;  %v2434_v0 = vld [vmem:[#allocation3 + $0xf0] sm:$0xff] }
 0x166   : > { %v4065_v56 = vld [vmem:[#allocation3 + $0xf4] ss:$20 sps:$4 sm:$0xff]   ;;  %2254 = vst.msk [vmem:[#allocation3 + $0xac] sm:$0xf] %vm1281_vm14, %v2215_v15  ;;  %v3636_v22 = vcombine.low %v2434_v0, %v2437_v35  ;;  %v1500_v48 = vpop.permute.xlu1 %1499  ;;  %v2426_v16 = vld [vmem:[#allocation3 + $0xbc] sm:$0xff] }
 0x167   : > { %3039 = vmatprep.mubr.bf16.mxu0 %v4065_v56  ;;  %1532 = vst.msk [vmem:[#allocation3 + $0x130] sm:$0xf] %vm1281_vm14, %v1500_v48 }
 0x168   : > { %3040 = vmatmul.mubr.bf16.gmra.mxu0 %v3636_v22 }
 0x169   : > { %v1262_v19 = vpop.permute.xlu0 %1261 }
 0x16a   : > { %1296 = vst.msk [vmem:[#allocation3 + $0x118] sm:$0xf] %vm1281_vm14, %v1262_v19  ;;  %v1908_v1 = vpop.permute.xlu1 %1907 }
 0x16b   : > { %1944 = vst.msk [vmem:[#allocation3 + $0xe4] sm:$0xf] %vm1281_vm14, %v1908_v1 }
 0x16d   : > { %v1498_v9 = vpop.permute.xlu0 %1497  ;;  %v2423_v28 = vld [vmem:[#allocation3 + $0xa8] sm:$0xff] }
 0x16e   : > { %v4068_v27 = vld [vmem:[#allocation3 + $0xac] ss:$20 sps:$4 sm:$0xff]   ;;  %1531 = vst.msk [vmem:[#allocation3 + $0x11c] sm:$0xf] %vm1281_vm14, %v1498_v9  ;;  %v3628_v52 = vcombine.low %v2423_v28, %v2426_v16  ;;  %v2221_v7 = vpop.permute.xlu1 %2220 }
 0x16f   : > { %3120 = vmatprep.mubr.bf16.mxu1 %v4068_v27  ;;  %2257 = vst.msk [vmem:[#allocation3 + $0xe8] sm:$0xf] %vm1281_vm14, %v2221_v7  ;;  %v2443_v20 = vld [vmem:[#allocation3 + $0x12c] sm:$0xff] }
 0x170   : > { %3121 = vmatmul.mubr.bf16.gmra.mxu1 %v3628_v52 }
 0x171   : > { %v1906_v23 = vpop.permute.xlu0 %1905 }
 0x172   : > { %1943 = vst.msk [vmem:[#allocation3 + $0xd0] sm:$0xf] %vm1281_vm14, %v1906_v23  ;;  %v1912_v5 = vpop.permute.xlu1 %1911 }
 0x173   : > { %1946 = vst.msk [vmem:[#allocation3 + $0x10c] sm:$0xf] %vm1281_vm14, %v1912_v5 }
 0x175   : > { %v2219_v12 = vpop.permute.xlu0 %2218  ;;  %v2440_v32 = vld [vmem:[#allocation3 + $0x118] sm:$0xff] }
 0x176   : > { %v4070_v62 = vld [vmem:[#allocation3 + $0x11c] ss:$20 sps:$4 sm:$0xff]   ;;  %2256 = vst.msk [vmem:[#allocation3 + $0xd4] sm:$0xf] %vm1281_vm14, %v2219_v12  ;;  %v3641_v29 = vcombine.low %v2440_v32, %v2443_v20  ;;  %v2225_v18 = vpop.permute.xlu1 %2224  ;;  %v2432_v55 = vld [vmem:[#allocation3 + $0xe4] sm:$0xff] }
 0x177   : > { %3047 = vmatprep.mubr.bf16.mxu0 %v4070_v62  ;;  %2259 = vst.msk [vmem:[#allocation3 + $0x110] sm:$0xf] %vm1281_vm14, %v2225_v18 }
 0x178   : > { %3048 = vmatmul.mubr.bf16.gmra.mxu0 %v3641_v29 }
 0x179   : > { %v1910_v41 = vpop.permute.xlu0 %1909  ;;  %3912 = vmatprep.mubr.msk.bf16.mxu0 %vm2934_vm15, %v4075_v39 }
 0x17a   : > { %1945 = vst.msk [vmem:[#allocation3 + $0xf8] sm:$0xf] %vm1281_vm14, %v1910_v41  ;;  %v1916_v59 = vpop.permute.xlu1 %1915 }
 0x17b   : > { %1948 = vst.msk [vmem:[#allocation3 + $0x134] sm:$0xf] %vm1281_vm14, %v1916_v59 }
 0x17d   : > { %v2223_v38 = vpop.permute.xlu0 %2222  ;;  %v2429_v13 = vld [vmem:[#allocation3 + $0xd0] sm:$0xff] }
 0x17e   : > { %v4073_v3 = vld [vmem:[#allocation3 + $0xd4] ss:$20 sps:$4 sm:$0xff]   ;;  %2258 = vst.msk [vmem:[#allocation3 + $0xfc] sm:$0xf] %vm1281_vm14, %v2223_v38  ;;  %v3633_v51 = vcombine.low %v2429_v13, %v2432_v55  ;;  %v2229_v11 = vpop.permute.xlu1 %2228  ;;  %v2438_v53 = vld [vmem:[#allocation3 + $0x10c] sm:$0xff] }
 0x17f   : > { %3128 = vmatprep.mubr.bf16.mxu1 %v4073_v3  ;;  %2261 = vst.msk [vmem:[#allocation3 + $0x138] sm:$0xf] %vm1281_vm14, %v2229_v11 }
 0x180   : > { %3129 = vmatmul.mubr.bf16.gmra.mxu1 %v3633_v51  ;;  %3913 = vmatmul.mubr.msk.bf16.vlgmr.msra.gmra.mxu0 %vm2934_vm15, %v4076_v49 }
 0x181   : > { %v1914_v43 = vpop.permute.xlu0 %1913  ;;  %3916 = vmatprep.mubr.msk.bf16.mxu0 %vm2934_vm15, %v4079_v10 }
 0x182   : > { %1947 = vst.msk [vmem:[#allocation3 + $0x120] sm:$0xf] %vm1281_vm14, %v1914_v43 }
 0x185   : > { %v2227_v44 = vpop.permute.xlu0 %2226  ;;  %v2435_v4 = vld [vmem:[#allocation3 + $0xf8] sm:$0xff] }
 0x186   : > { %v4077_v58 = vld [vmem:[#allocation3 + $0xfc] ss:$20 sps:$4 sm:$0xff]   ;;  %2260 = vst.msk [vmem:[#allocation3 + $0x124] sm:$0xf] %vm1281_vm14, %v2227_v44  ;;  %v3638_v2 = vcombine.low %v2435_v4, %v2438_v53 }
 0x187   : > { %3136 = vmatprep.mubr.bf16.mxu1 %v4077_v58 }
 0x188   : > { %3137 = vmatmul.mubr.bf16.gmra.mxu1 %v3638_v2  ;;  %3917 = vmatmul.mubr.msk.bf16.gmra.mxu0 %vm2934_vm15, %v4080_v63 }
 0x189   : > { %v4083_v54 = vld [vmem:[#allocation3 + $0x120] ss:$20 sps:$4 sm:$0xff]  }
 0x18d   : > { %v4081_v26 = vld [vmem:[#allocation3 + $0x124] ss:$20 sps:$4 sm:$0xff]  }
 0x18e   : > { %3144 = vmatprep.mubr.bf16.mxu1 %v4081_v26 }
 0x190   : > { %3145 = vmatmul.mubr.bf16.gmra.mxu1 %v4083_v54 }
 0x191   : > { %3920 = vmatprep.mubr.msk.bf16.mxu1 %vm2934_vm15, %v4084_v24 }
 0x198   : > { %3921 = vmatmul.mubr.msk.bf16.vlgmr.msra.gmra.mxu1 %vm2934_vm15, %v4085_v46 }
 0x199   : > { %3924 = vmatprep.mubr.msk.bf16.mxu1 %vm2934_vm15, %v4086_v37 }
 0x1a0   : > { %3925 = vmatmul.mubr.msk.bf16.gmra.mxu1 %vm2934_vm15, %v4087_v17 }
 0x1d4   : > { %v3780_v30 = vpop.f32.mrf.mxu0 }
 0x1d6   : > { %v3781_v47 = vpop.f32.mrf.mxu0 }
 0x1d7   : > { %v3782_v53 = vadd.f32 %v3781_v47, %v3780_v30 }
 0x1d8   : > { %v5446_v57 = vpop.f32.mrf.mxu0 }
 0x1da   : > { %v5448_v36 = vpop.f32.mrf.mxu0 }
 0x1df   : > { %v3786_v61 = vpop.f32.mrf.mxu0 }
 0x1e1   : > { %v3787_v6 = vpop.f32.mrf.mxu0 }
 0x1e2   : > { %v3788_v43 = vadd.f32 %v3787_v6, %v3786_v61  ;;  %v3785_v61 = vadd.f32 %v5448_v36, %v5446_v57 }
 0x1e3   : > { %v3789_v31 = vpop.f32.mrf.mxu0 }
 0x1e5   : > { %v3790_v42 = vpop.f32.mrf.mxu0 }
 0x1e6   : > { %v3791_v54 = vadd.f32 %v3790_v42, %v3789_v31 }
 0x1e8   : > { %v5450_v60 = vpop.f32.mrf.mxu0 }
 0x1ea   : > { %v5452_v40 = vpop.f32.mrf.mxu0 }
 0x1eb   : > { %v3794_v57 = vadd.f32 %v5452_v40, %v5450_v60 }
 0x1ec   : > { %v5454_v25 = vpop.f32.mrf.mxu0 }
 0x1ee   : > { %v5456_v8 = vpop.f32.mrf.mxu0 }
 0x1f4   : > { %v3844_v33 = vpop.f32.mrf.mxu1 }
 0x1f6   : > { %v3845_v50 = vpop.f32.mrf.mxu1 }
 0x1f7   : > { %v3846_v63 = vadd.f32 %v3845_v50, %v3844_v33 }
 0x1f8   : > { %v3847_v21 = vpop.f32.mrf.mxu1 }
 0x1f9   : > { %v3091_v17 = vadd.f32 %v3846_v63, %v3782_v53 }
 0x1fa   : > { %v3848_v14 = vpop.f32.mrf.mxu1 }
 0x1fb   : > { %v3849_v46 = vadd.f32 %v3848_v14, %v3847_v21 }
 0x1fd   : > { %v3094_v31 = vadd.f32 %v3849_v46, %v3785_v61 }
 0x1fe   : > { %v3798_v45 = vpop.f32.mrf.mxu0 }
 0x200   : > { %v3799_v34 = vpop.f32.mrf.mxu0 }
 0x202   : > { %v5458_v15 = vpop.f32.mrf.mxu0 }
 0x204   : > { %v5460_v35 = vpop.f32.mrf.mxu0 }
 0x205   : > { %v3850_v0 = vpop.f32.mrf.mxu1  ;;  %v3803_v36 = vadd.f32 %v5460_v35, %v5458_v15  ;;  %v3797_v15 = vadd.f32 %v5456_v8, %v5454_v25 }
 0x207   : > { %v3851_v56 = vpop.f32.mrf.mxu1 }
 0x208   : > { %v3852_v51 = vadd.f32 %v3851_v56, %v3850_v0 }
 0x209   : > { %v3853_v48 = vpop.f32.mrf.mxu1 }
 0x20a   : > { %v3099_v2 = vadd.f32 %v3852_v51, %v3788_v43 }
 0x20b   : > { %v3854_v1 = vpop.f32.mrf.mxu1 }
 0x20c   : > { %v3855_v58 = vadd.f32 %v3854_v1, %v3853_v48  ;;  %v3800_v48 = vadd.f32 %v3799_v34, %v3798_v45 }
 0x20d   : > { %v5462_v22 = vpop.f32.mrf.mxu0 }
 0x20e   : > { %v3102_v30 = vadd.f32 %v3855_v58, %v3791_v54 }
 0x20f   : > { %v5464_v19 = vpop.f32.mrf.mxu0 }
 0x210   : > { %v3856_v28 = vpop.f32.mrf.mxu1 }
 0x211   : > { %v5466_v9 = vpop.f32.mrf.mxu0 }
 0x212   : > { %v3857_v27 = vpop.f32.mrf.mxu1 }
 0x213   : > { %v5468_v16 = vpop.f32.mrf.mxu0  ;;  %v3858_v42 = vadd.f32 %v3857_v27, %v3856_v28 }
 0x214   : > { %v3859_v7 = vpop.f32.mrf.mxu1 }
 0x216   : > { %v3860_v5 = vpop.f32.mrf.mxu1 }
 0x217   : > { %v3861_v27 = vadd.f32 %v3860_v5, %v3859_v7 }
 0x218   : > { %v5470_v52 = vpop.f32.mrf.mxu0 }
 0x21a   : > { %v5472_v23 = vpop.f32.mrf.mxu0 }
 0x21c   : > { %v5474_v39 = vpop.f32.mrf.mxu0 }
 0x21e   : > { %v5476_v32 = vpop.f32.mrf.mxu0 }
 0x220   : > { %v3862_v12 = vpop.f32.mrf.mxu1 }
 0x222   : > { %v3863_v20 = vpop.f32.mrf.mxu1 }
 0x223   : > { %v3864_v6 = vadd.f32 %v3863_v20, %v3862_v12 }
 0x224   : > { %v3865_v29 = vpop.f32.mrf.mxu1 }
 0x225   : > { %v3115_v63 = vadd.f32 %v3864_v6, %v3800_v48  ;;  %v3110_v6 = vadd.f32 %v3861_v27, %v3797_v15 }
 0x226   : > { %v3866_v41 = vpop.f32.mrf.mxu1 }
 0x227   : > { %v3867_v51 = vadd.f32 %v3866_v41, %v3865_v29  ;;  %v3107_v41 = vadd.f32 %v3858_v42, %v3794_v57 }
 0x228   : > { %v5478_v62 = vpop.f32.mrf.mxu0 }
 0x229   : > { %v3118_v40 = vadd.f32 %v3867_v51, %v3803_v36  ;;  %v3806_v36 = vadd.f32 %v5464_v19, %v5462_v22 }
 0x22a   : > { %v5480_v18 = vpop.f32.mrf.mxu0 }
 0x22c   : > { %v5482_v59 = vpop.f32.mrf.mxu0 }
 0x22e   : > { %v5486_v10 = vpop.f32.mrf.mxu0 }
 0x230   : > { %v5484_v49 = vpop.f32.mrf.mxu1 }
 0x232   : > { %v5488_v38 = vpop.f32.mrf.mxu1 }
 0x234   : > { %v5492_v55 = vpop.f32.mrf.mxu1 }
 0x236   : > { %v5498_v44 = vpop.f32.mrf.mxu1 }
 0x238   : > { %v5490_v13 = vpop.f32.mrf.mxu0 }
 0x23a   : > { %v5494_v3 = vpop.f32.mrf.mxu0 }
 0x23c   : > { %v5496_v11 = vpop.f32.mrf.mxu0 }
 0x23e   : > { %v5500_v4 = vpop.f32.mrf.mxu0 }
 0x240   : > { %v5502_v24 = vpop.f32.mrf.mxu1  ;;  %v3914_v26 = vpop.f32.mrf.mxu0 }
 0x241   : > { %v3196_v37 = vadd.f32 %v3914_v26, %v3099_v2 }
 0x242   : > { %v3875_v0 = vpop.f32.mrf.mxu1  ;;  %v3187_v56 = vpop.f32.mrf.mxu0 }
 0x243   : > { %3312 = vst [vmem:[%s4413_s4 + $0x10] sm:$0xff] %v3196_v37  ;;  %v3188_v33 = vadd.f32 %v3187_v56, %v3091_v17  ;;  %v3274_v2 = vmul.f32 %v3196_v37, %v3196_v37  ;;  %v3876_v8 = vadd.f32 %v3875_v0, %v5502_v24  ;;  %v3815_v24 = vadd.f32 %v5476_v32, %v5474_v39 }
 0x244   : > { %v3877_v47 = vpop.f32.mrf.mxu1  ;;  %v3915_v50 = vpop.f32.mrf.mxu0  ;;  %v3873_v0 = vadd.f32 %v5498_v44, %v5492_v55  ;;  %v3824_v39 = vadd.f32 %v5494_v3, %v5490_v13  ;;  %v3827_v3 = vadd.f32 %v5500_v4, %v5496_v11 }
 0x245   : > { %3310 = vst [vmem:[%s4413_s4] sm:$0xff] %v3188_v33  ;;  %v3199_v1 = vadd.f32 %v3915_v50, %v3102_v30  ;;  %v3272_v34 = vmul.f32 %v3188_v33, %v3188_v33 }
 0x246   : > { %v3878_v21 = vpop.f32.mrf.mxu1  ;;  %v3190_v14 = vpop.f32.mrf.mxu0 }
 0x247   : > { %3313 = vst [vmem:[%s4413_s4 + $0x18] sm:$0xff] %v3199_v1  ;;  %v3191_v43 = vadd.f32 %v3190_v14, %v3094_v31  ;;  %v3275_v17 = vmul.f32 %v3199_v1, %v3199_v1 }
 0x248   : > { %v5513_v12 = vpop.f32.mrf.mxu1  ;;  %v3918_v45 = vpop.f32.mrf.mxu0 }
 0x249   : > { %v3250_v20 = vadd.f32 %v3191_v43, %v3188_v33  ;;  %v3273_v53 = vmul.f32 %v3191_v43, %v3191_v43  ;;  %3311 = vst [vmem:[%s4413_s4 + $0x8] sm:$0xff] %v3191_v43  ;;  %v3212_v28 = vadd.f32 %v3918_v45, %v3115_v63  ;;  %v3870_v43 = vadd.f32 %v5488_v38, %v5484_v49 }
 0x24a   : > { %v3881_v29 = vpop.f32.mrf.mxu1  ;;  %v3203_v58 = vpop.f32.mrf.mxu0  ;;  %v3879_v45 = vadd.f32 %v3878_v21, %v3877_v47  ;;  %v3809_v38 = vadd.f32 %v5468_v16, %v5466_v9  ;;  %v3818_v9 = vadd.f32 %v5480_v18, %v5478_v62  ;;  %v3821_v18 = vadd.f32 %v5486_v10, %v5482_v59 }
 0x24b   : > { %v3251_v26 = vadd.f32 %v3250_v20, %v3196_v37  ;;  %v3288_v60 = vadd.f32 %v3273_v53, %v3272_v34  ;;  %3316 = vst [vmem:[%s4413_s4 + $0x30] sm:$0xff] %v3212_v28  ;;  %v3204_v35 = vadd.f32 %v3203_v58, %v3107_v41  ;;  %v3123_v49 = vadd.f32 %v3870_v43, %v3806_v36 }
 0x24c   : > { %v3883_v54 = vpop.f32.mrf.mxu1  ;;  %v3919_v46 = vpop.f32.mrf.mxu0  ;;  %v3134_v21 = vadd.f32 %v3879_v45, %v3815_v24  ;;  %v3882_v32 = vadd.f32 %v3881_v29, %v5513_v12  ;;  %v3126_v44 = vadd.f32 %v3873_v0, %v3809_v38 }
 0x24d   : > { %v3289_v56 = vadd.f32 %v3288_v60, %v3274_v2  ;;  %v3252_v7 = vadd.f32 %v3251_v26, %v3199_v1  ;;  %v3215_v5 = vadd.f32 %v3919_v46, %v3118_v40  ;;  %3314 = vst [vmem:[%s4413_s4 + $0x20] sm:$0xff] %v3204_v35  ;;  %v3276_v31 = vmul.f32 %v3204_v35, %v3204_v35 }
 0x24e   : > { %v3884_v61 = vpop.f32.mrf.mxu1  ;;  %v3206_v33 = vpop.f32.mrf.mxu0  ;;  %v3812_v1 = vadd.f32 %v5472_v23, %v5470_v52  ;;  %v3278_v52 = vmul.f32 %v3212_v28, %v3212_v28  ;;  %v3139_v46 = vadd.f32 %v3882_v32, %v3818_v9 }
 0x24f   : > { %v3290_v37 = vadd.f32 %v3289_v56, %v3275_v17  ;;  %3317 = vst [vmem:[%s4413_s4 + $0x38] sm:$0xff] %v3215_v5  ;;  %v3207_v30 = vadd.f32 %v3206_v33, %v3110_v6  ;;  %v3253_v48 = vadd.f32 %v3252_v7, %v3204_v35  ;;  %v3885_v12 = vadd.f32 %v3884_v61, %v3883_v54 }
 0x250   : > { %v3886_v50 = vpop.f32.mrf.mxu1  ;;  %v3131_v20 = vadd.f32 %v3876_v8, %v3812_v1 }
 0x251   : > { %3315 = vst [vmem:[%s4413_s4 + $0x28] sm:$0xff] %v3207_v30  ;;  %v3291_v42 = vadd.f32 %v3290_v37, %v3276_v31  ;;  %v3277_v14 = vmul.f32 %v3207_v30, %v3207_v30  ;;  %v3254_v63 = vadd.f32 %v3253_v48, %v3207_v30  ;;  %v3142_v54 = vadd.f32 %v3885_v12, %v3821_v18 }
 0x252   : > { %v3887_v25 = vpop.f32.mrf.mxu1 }
 0x253   : > { %v3292_v34 = vadd.f32 %v3291_v42, %v3277_v14  ;;  %v3255_v23 = vadd.f32 %v3254_v63, %v3212_v28  ;;  %v3888_v19 = vadd.f32 %v3887_v25, %v3886_v50  ;;  %v3279_v28 = vmul.f32 %v3215_v5, %v3215_v5 }
 0x254   : > { %v3889_v51 = vpop.f32.mrf.mxu1 }
 0x255   : > { %v3293_v22 = vadd.f32 %v3292_v34, %v3278_v52  ;;  %v3256_v58 = vadd.f32 %v3255_v23, %v3215_v5  ;;  %v3147_v13 = vadd.f32 %v3888_v19, %v3824_v39 }
 0x256   : > { %v3890_v57 = vpop.f32.mrf.mxu1 }
 0x257   : > { %v3891_v16 = vadd.f32 %v3890_v57, %v3889_v51  ;;  %v3294_v15 = vadd.f32 %v3293_v22, %v3279_v28 }
 0x258   : > { %v3922_v53 = vpop.f32.mrf.mxu1 }
 0x259   : > { %v3228_v27 = vadd.f32 %v3922_v53, %v3131_v20  ;;  %v3150_v6 = vadd.f32 %v3891_v16, %v3827_v3 }
 0x25a   : > { %v3219_v41 = vpop.f32.mrf.mxu1 }
 0x25b   : > { %3320 = vst [vmem:[%s4413_s4 + $0x50] sm:$0xff] %v3228_v27  ;;  %v3220_v47 = vadd.f32 %v3219_v41, %v3123_v49  ;;  %v3282_v33 = vmul.f32 %v3228_v27, %v3228_v27 }
 0x25c   : > { %v3923_v55 = vpop.f32.mrf.mxu1 }
 0x25d   : > { %v3280_v2 = vmul.f32 %v3220_v47, %v3220_v47  ;;  %3318 = vst [vmem:[%s4413_s4 + $0x40] sm:$0xff] %v3220_v47  ;;  %v3231_v26 = vadd.f32 %v3923_v55, %v3134_v21  ;;  %v3257_v40 = vadd.f32 %v3256_v58, %v3220_v47 }
 0x25e   : > { %v3222_v60 = vpop.f32.mrf.mxu1 }
 0x25f   : > { %3321 = vst [vmem:[%s4413_s4 + $0x58] sm:$0xff] %v3231_v26  ;;  %v3223_v35 = vadd.f32 %v3222_v60, %v3126_v44  ;;  %v3295_v17 = vadd.f32 %v3294_v15, %v3280_v2  ;;  %v3283_v61 = vmul.f32 %v3231_v26, %v3231_v26 }
 0x260   : > { %v3926_v29 = vpop.f32.mrf.mxu1 }
 0x261   : > { %v3258_v56 = vadd.f32 %v3257_v40, %v3223_v35  ;;  %v3281_v7 = vmul.f32 %v3223_v35, %v3223_v35  ;;  %3319 = vst [vmem:[%s4413_s4 + $0x48] sm:$0xff] %v3223_v35  ;;  %v3244_v62 = vadd.f32 %v3926_v29, %v3147_v13 }
 0x262   : > { %v3235_v5 = vpop.f32.mrf.mxu1 }
 0x263   : > { %v3259_v37 = vadd.f32 %v3258_v56, %v3228_v27  ;;  %v3296_v30 = vadd.f32 %v3295_v17, %v3281_v7  ;;  %3324 = vst [vmem:[%s4413_s4 + $0x70] sm:$0xff] %v3244_v62  ;;  %v3236_v11 = vadd.f32 %v3235_v5, %v3139_v46  ;;  %v3286_v43 = vmul.f32 %v3244_v62, %v3244_v62 }
 0x264   : > { %v3927_v4 = vpop.f32.mrf.mxu1 }
 0x265   : > { %v3297_v50 = vadd.f32 %v3296_v30, %v3282_v33  ;;  %v3260_v48 = vadd.f32 %v3259_v37, %v3231_v26  ;;  %3322 = vst [vmem:[%s4413_s4 + $0x60] sm:$0xff] %v3236_v11  ;;  %v3247_v31 = vadd.f32 %v3927_v4, %v3150_v6  ;;  %v3284_v42 = vmul.f32 %v3236_v11, %v3236_v11 }
 0x266   : > { %v3238_v25 = vpop.f32.mrf.mxu1 }
 0x267   : > { %v3261_v8 = vadd.f32 %v3260_v48, %v3236_v11  ;;  %v3298_v59 = vadd.f32 %v3297_v50, %v3283_v61  ;;  %3325 = vst [vmem:[%s4413_s4 + $0x78] sm:$0xff] %v3247_v31  ;;  %v3239_v10 = vadd.f32 %v3238_v25, %v3142_v54  ;;  %v3287_v36 = vmul.f32 %v3247_v31, %v3247_v31 }
 0x269   : > { %v3299_v14 = vadd.f32 %v3298_v59, %v3284_v42  ;;  %v3262_v51 = vadd.f32 %v3261_v8, %v3239_v10  ;;  %v3285_v1 = vmul.f32 %v3239_v10, %v3239_v10  ;;  %3323 = vst [vmem:[%s4413_s4 + $0x68] sm:$0xff] %v3239_v10  ;;  %s3352_s4 = sadd.s32 %s4165_s30, %s3691_s20  ;;  %s4185_s30 = smov [#allocation4]  }
 0x26a   : > { %s3692_s24 = sshll.u32 %s3352_s4, 5  ;;  %s4093_s26 = sshll.u32 %s4185_s30, 4  ;;  %s4094_s26 = int_to_ptr.vmem [resolvable:$false] %s4093_s26 }
 0x26b   : > { %v3263_v63 = vadd.f32 %v3262_v51, %v3244_v62  ;;  %v3300_v57 = vadd.f32 %v3299_v14, %v3285_v1  ;;  %s3354_s9 = scalar_lea.hbm %s5610_s8, %s3692_s24  ;;  %s4095_s12 = scalar_lea.vmem %s4094_s26, 64 }
 0x26c   : > { %p4096_p10 = scmp.lt.s32.totalorder %s3357_s15, %s4094_s26  ;;  %p4097_p11 = scmp.lt.s32.totalorder %s4095_s12, %s4089_s21 }
 0x26d   : > { %v3264_v45 = vadd.f32 %v3263_v63, %v3247_v31  ;;  %v3301_v34 = vadd.f32 %v3300_v57, %v3286_v43 }
 0x26e   : > { %p4098_p12 = por %p4097_p11, %p4096_p10 }
 0x26f   : > { %v3265_v20 = vrot.slane %v3264_v45, 4  ;;  %v3302_v24 = vadd.f32 %v3301_v34, %v3287_v36 }
 0x270   : > { %p4099_p13 = pnand %p4098_p12, %p4092_p9 }
 0x271   : > { %v3266_v0 = vadd.f32 %v3265_v20, %v3264_v45  ;;  %v3303_v53 = vrot.slane %v3302_v24, 4 }
 0x273   : > { %v3267_v52 = vrot.slane %v3266_v0, 2  ;;  %v3304_v23 = vadd.f32 %v3303_v53, %v3302_v24 }
 0x275   : > { %v3268_v27 = vadd.f32 %v3267_v52, %v3266_v0  ;;  %v3305_v49 = vrot.slane %v3304_v23, 2 }
 0x277   : > { %v3269_v38 = vrot.slane %v3268_v27, 1  ;;  %v3306_v41 = vadd.f32 %v3305_v49, %v3304_v23 }
 0x279   : > { %v3270_v22 = vadd.f32 %v3269_v38, %v3268_v27  ;;  %v3307_v19 = vrot.slane %v3306_v41, 1 }
 0x27b   : > { %3271 = vst [vmem:[%s4518_s0] sm:$0x1] %v3270_v22  ;;  %v3308_v47 = vadd.f32 %v3307_v19, %v3306_v41 }
 0x27d   : > { %3309 = vst [vmem:[%s4518_s0 + $0x1] sm:$0x1] %v3308_v47 }
 0x27e   : > { %4102 = shalt.err (!%p4099_p13)
}
 0x27f   : > { %s4103_s23 = scalar_lea.hbm %s3354_s9, 32  ;;  %s4107_s19 = scalar_lea.hbm %s5610_s8, 128 }
 0x280   : > { %p4104_p0 = scmp.ne.s32.totalorder %s3354_s9, %s4103_s23  ;;  %p4108_p4 = scmp.lt.s32.totalorder %s3354_s9, %s5610_s8 }
 0x281   : > { %p4109_p5 = scmp.lt.s32.totalorder %s4107_s19, %s4103_s23 }
 0x282   : > { %p4105_p1 = pnand %p4104_p0, %p4282_p3 }
 0x283   : > { %p4110_p6 = por %p4109_p5, %p4108_p4 }
 0x284   : > { %p4106_p2 = pneg %p4105_p1 }
 0x286   : > { %p4111_p7 = pnand %p4110_p6, %p4106_p2 }
 0x288   : > { %4114 = shalt.err (!%p4111_p7)
}
 0x289   : > { %3936 = dma.vmem_to_hbm [thread:$0]  (%p4282_p3), %s3357_s15, 32, %s3354_s9, %s3337_s16  }
 0x28a PF: > { %p3942_p9 = scmp.ge.s32.totalorder %s4181_s11, 2  ;;  %s3381_s24 = sand.u32 1, %s4153_s27  }
 0x28b   : > { %s3382_s6 = scalar_lea.sflag [#allocation5], %s3381_s24 }
 0x28c   : > { %p3939_p10 = pnand %p3942_p9, %p4291_p8 }
 0x28e   : > { %p3940_p11 = pneg %p3939_p10 }
 0x290   : > { %4148 = dma.done.wait (%p3940_p11), %s3382_s6, 32  }
 0x291   : > { %4150 = vsyncadd (%p3940_p11), %s3382_s6, 4294967264  ;;  %s22_s11 = sadd.s32 1, %s4181_s11   ;;  %s5636_s9 = sld [smem:[#allocation7_spill]] }
 0x292   : > { %p19_p12 = scmp.ge.s32.totalorder %s22_s11, 6   ;;  %s5637_s17 = sld [smem:[#allocation8_spill]] }
 0x293   : > { %s5638_s6 = sld [smem:[#allocation9_spill]]  ;;  %s5639_s27 = smov %s4157_s28 }
 0x294   : > { %s5640_s28 = smov %s4161_s29  ;;  %s5641_s29 = smov %s4300_s22 }
 0x295   : > { %s5642_s30 = smov %s4173_s10  ;;  %21 = sbr.rel (!%p19_p12) target bundleno = 8 (0x8), region = 112 }
 0x298   : > { %s5643_s10 = smov %s5637_s17 }
 0x29a   :  { %3387 = vsyncpa [#allocation5], 1 }
 0x29b   :  { %3389 = vsyncpa [#allocation5 + $0x1], 1 }

</bundles_post_ra>
